<compile_context>
chip_gen: v5e
topology: v5e:2x2
jax: 0.10.0
libtpu: 0.0.40
codegen_flags: <defaults>
</compile_context>

<pallas_src>
import functools

import jax
import jax.numpy as jnp
from jax.experimental import pallas as pl
from jax.experimental.pallas import tpu as pltpu

LEAKY_SLOPE = 0.01  # PyTorch default for nn.LeakyReLU / F.leaky_relu
BN_EPS = 1e-5


def _round_up(v, m):
    return (v + m - 1) // m * m


# ---------------------------------------------------------------------------
# Fused kernel: conv3x3+BN1+LeakyReLU -> conv3x3+BN2 -> (+shortcut) -> LeakyReLU
#
# Geometry: the padded input / canvas is a flattened (L, C) matrix with
# L = (H+2)*Wp, Wp = round_up(W+2, 8) (so f32 reshapes stay tile aligned and
# the right padding columns provide zero taps).  A 3x3 tap (dy, dx) is a
# constant sublane shift of that matrix; rolling the *input* per tap lets all
# 9 taps be concatenated along K (lanes, 128-aligned chunks) into one im2col
# LHS, so each conv is a single MXU matmul with in-MXU f32 accumulation.
# Roll wraparound only ever lands in masked border rows / padding columns or
# in output rows that are never stored (asserted by construction: Wp >= W+2).
# ---------------------------------------------------------------------------
def _basic_block_kernel(x_ref, m_ref, w1_ref, s1_ref, b1_ref,
                        w2_ref, s2_ref, b2_ref, *rest,
                        H, W, Wp, slope, has_sc):
    if has_sc:
        wsc_ref, ssc_ref, bsc_ref, o_ref, lhs_ref = rest
    else:
        o_ref, lhs_ref = rest

    Hc = H + 2
    L = Hc * Wp
    cin_p = x_ref.shape[-1]
    cmid_p = w1_ref.shape[-1]
    cout_p = w2_ref.shape[-1]
    k1 = 9 * cin_p
    k2 = 9 * cmid_p

    # ----- conv1: build K-stacked im2col LHS from rolled inputs -------------
    xf = x_ref[...].astype(jnp.float32)                      # (L, cin_p)
    for dy in range(3):
        for dx in range(3):
            t = dy * 3 + dx
            shift = ((1 - dy) * Wp + (1 - dx)) % L
            tap = xf if shift == 0 else pltpu.roll(xf, shift, 0)
            lhs_ref[:, t * cin_p:(t + 1) * cin_p] = tap.astype(jnp.bfloat16)

    acc1 = jnp.dot(lhs_ref[:, :k1], w1_ref[...],
                   preferred_element_type=jnp.float32)        # (L, cmid_p)
    y = acc1 * s1_ref[...] + b1_ref[...]                      # folded BN1 (f32)
    y = jnp.where(y >= 0, y, slope * y)                       # LeakyReLU
    # Zero the canvas border + width padding (= conv2's zero padding) and any
    # roll-wraparound garbage.  Multiplicative 0/1 mask, exact.
    canvas = y * m_ref[...]                                   # (L, cmid_p) f32

    # ----- conv2: same K-stacking on the canvas ------------------------------
    for dy in range(3):
        for dx in range(3):
            t = dy * 3 + dx
            shift = (-(dy * Wp + dx)) % L
            tap = canvas if shift == 0 else pltpu.roll(canvas, shift, 0)
            lhs_ref[:, t * cmid_p:(t + 1) * cmid_p] = tap.astype(jnp.bfloat16)

    out = jnp.dot(lhs_ref[:, :k2], w2_ref[...],
                  preferred_element_type=jnp.float32)          # (L, cout_p)
    out = out * s2_ref[...] + b2_ref[...]                      # folded BN2

    # ----- shortcut + residual add + final LeakyReLU -------------------------
    xs = pltpu.roll(xf, (-(Wp + 1)) % L, 0)                    # x at output coords
    if has_sc:
        sc = jnp.dot(xs.astype(jnp.bfloat16), wsc_ref[...],
                     preferred_element_type=jnp.float32)
        sc = sc * ssc_ref[...] + bsc_ref[...]                  # folded shortcut BN
    else:
        sc = xs                                                # identity
    out = out + sc
    out = jnp.where(out >= 0, out, slope * out)

    # f32 reshape/slice (Wp % 8 == 0 -> tile aligned); unpadded lane-masked store.
    out3 = out.reshape(Hc, Wp, cout_p)[:H, :W, :o_ref.shape[-1]]
    o_ref[...] = out3.astype(o_ref.dtype)


# ---------------------------------------------------------------------------
# Parameter init / BN folding (eval mode)
# ---------------------------------------------------------------------------
def fold_bn(gamma, beta, mean, var, eps=BN_EPS):
    scale = gamma / jnp.sqrt(var + eps)
    bias = beta - mean * scale
    return scale.astype(jnp.float32), bias.astype(jnp.float32)


def init_params(key, in_channels, out_channels, stride=1):
    assert stride == 1, "TODO(synk): stride != 1 not implemented"
    ks = jax.random.split(key, 8)

    def bn_params(k, c):
        k1, k2, k3, k4 = jax.random.split(k, 4)
        gamma = 1.0 + 0.1 * jax.random.normal(k1, (c,), jnp.float32)
        beta = 0.1 * jax.random.normal(k2, (c,), jnp.float32)
        mean = 0.1 * jax.random.normal(k3, (c,), jnp.float32)
        var = 0.5 + jnp.abs(jax.random.normal(k4, (c,), jnp.float32)) * 0.5
        return gamma, beta, mean, var

    p = {"stride": stride}
    p["w1"] = 0.1 * jax.random.normal(ks[0], (3, 3, in_channels, out_channels),
                                      jnp.float32)
    p["s1"], p["b1"] = fold_bn(*bn_params(ks[1], out_channels))
    p["w2"] = 0.1 * jax.random.normal(ks[2], (3, 3, out_channels, out_channels),
                                      jnp.float32)
    p["s2"], p["b2"] = fold_bn(*bn_params(ks[3], out_channels))
    p["has_shortcut_conv"] = (stride != 1) or (in_channels != out_channels)
    if p["has_shortcut_conv"]:
        p["wsc"] = 0.1 * jax.random.normal(ks[4], (in_channels, out_channels),
                                           jnp.float32)
        p["ssc"], p["bsc"] = fold_bn(*bn_params(ks[5], out_channels))
    return p


def _stack_w3x3(w, cin_p, cout_p):
    """(3,3,Cin,Cout) f32 -> K-stacked (9*cin_p, cout_p) bf16, tap-major order."""
    kh, kw, ci, co = w.shape
    wpad = jnp.pad(w, ((0, 0), (0, 0), (0, cin_p - ci), (0, cout_p - co)))
    return wpad.reshape(kh * kw * cin_p, cout_p).astype(jnp.bfloat16)


def _pad_vec(v, c_p):
    return jnp.pad(v, (0, c_p - v.shape[0])).reshape(1, c_p).astype(jnp.float32)


# ---------------------------------------------------------------------------
# BasicBlock forward (wrapper / glue): one pallas_call, grid over batch.
# ---------------------------------------------------------------------------
def basic_block_forward(x_nchw, params):
    assert params["stride"] == 1, "TODO(synk): stride != 1 not implemented"
    N, Cin, H, W = x_nchw.shape
    Cout = params["w1"].shape[-1]
    has_sc = params["has_shortcut_conv"]
    if not has_sc:
        assert Cin == Cout

    Cin_p = _round_up(Cin, 128)      # lane-dense channels inside the kernel
    Cmid_p = _round_up(Cout, 128)
    Cout_p = Cmid_p
    Hc = H + 2
    Wp = _round_up(W + 2, 8)         # sublane-aligned padded width (>= W+2)
    L = Hc * Wp
    assert Wp >= W + 2 and Wp % 8 == 0  # roll wraparound stays in masked region

    # NCHW -> NHWC bf16, single pad (halo + width alignment + channel lanes),
    # flattened spatially so the kernel never reshapes packed bf16 data.
    x = jnp.transpose(x_nchw, (0, 2, 3, 1)).astype(jnp.bfloat16)
    xp = jnp.pad(x, ((0, 0), (1, 1), (1, Wp - W - 1), (0, Cin_p - Cin)))
    xflat = xp.reshape(N, L, Cin_p)

    # Canvas-interior mask (rows [1,H], cols [1,W]) as a tiny (L, 1) f32 input.
    rows = jnp.arange(Hc, dtype=jnp.int32)[:, None]
    cols = jnp.arange(Wp, dtype=jnp.int32)[None, :]
    interior = (rows >= 1) & (rows <= H) & (cols >= 1) & (cols <= W)
    mask = interior.astype(jnp.float32).reshape(L, 1)

    w1s = _stack_w3x3(params["w1"], Cin_p, Cmid_p)
    w2s = _stack_w3x3(params["w2"], Cmid_p, Cout_p)
    s1 = _pad_vec(params["s1"], Cmid_p)
    b1 = _pad_vec(params["b1"], Cmid_p)
    s2 = _pad_vec(params["s2"], Cout_p)
    b2 = _pad_vec(params["b2"], Cout_p)

    in_specs = [
        pl.BlockSpec((None, L, Cin_p), lambda n: (n, 0, 0)),
        pl.BlockSpec((L, 1), lambda n: (0, 0)),
        pl.BlockSpec((9 * Cin_p, Cmid_p), lambda n: (0, 0)),
        pl.BlockSpec((1, Cmid_p), lambda n: (0, 0)),
        pl.BlockSpec((1, Cmid_p), lambda n: (0, 0)),
        pl.BlockSpec((9 * Cmid_p, Cout_p), lambda n: (0, 0)),
        pl.BlockSpec((1, Cout_p), lambda n: (0, 0)),
        pl.BlockSpec((1, Cout_p), lambda n: (0, 0)),
    ]
    args = [xflat, mask, w1s, s1, b1, w2s, s2, b2]

    flops = N * (2 * L * 9 * Cin_p * Cmid_p + 2 * L * 9 * Cmid_p * Cout_p)
    bytes_accessed = (xflat.size * 2 + mask.size * 4
                      + (w1s.size + w2s.size) * 2
                      + (s1.size + b1.size + s2.size + b2.size) * 4
                      + N * H * W * Cout * 4)

    if has_sc:
        wsc = jnp.pad(params["wsc"], ((0, Cin_p - Cin),
                                      (0, Cout_p - Cout))).astype(jnp.bfloat16)
        ssc = _pad_vec(params["ssc"], Cout_p)
        bsc = _pad_vec(params["bsc"], Cout_p)
        in_specs += [
            pl.BlockSpec((Cin_p, Cout_p), lambda n: (0, 0)),
            pl.BlockSpec((1, Cout_p), lambda n: (0, 0)),
            pl.BlockSpec((1, Cout_p), lambda n: (0, 0)),
        ]
        args += [wsc, ssc, bsc]
        flops += N * 2 * L * Cin_p * Cout_p
        bytes_accessed += wsc.size * 2 + (ssc.size + bsc.size) * 4

    kernel = functools.partial(_basic_block_kernel, H=H, W=W, Wp=Wp,
                               slope=LEAKY_SLOPE, has_sc=has_sc)

    out_nhwc = pl.pallas_call(
        kernel,
        out_shape=jax.ShapeDtypeStruct((N, H, W, Cout), jnp.float32),
        grid=(N,),
        in_specs=in_specs,
        out_specs=pl.BlockSpec((None, H, W, Cout), lambda n: (n, 0, 0, 0)),
        scratch_shapes=[
            # shared K-stacked im2col staging buffer (reused by both convs)
            pltpu.VMEM((L, 9 * max(Cin_p, Cmid_p)), jnp.bfloat16),
        ],
        compiler_params=pltpu.CompilerParams(
            dimension_semantics=("parallel",)),
        cost_estimate=pl.CostEstimate(flops=int(flops), transcendentals=0,
                                      bytes_accessed=int(bytes_accessed)),
    )(*args)

    return jnp.transpose(out_nhwc, (0, 3, 1, 2))   # NHWC -> NCHW at block exit


# ---------------------------------------------------------------------------
# Pure-JAX reference.  match_bf16=True rounds matmul operands / the
# intermediate feature map to bf16 exactly like the kernel (f32 accumulation
# kept), isolating kernel bugs from the bf16 precision policy.
# ---------------------------------------------------------------------------
def ref_forward(x_nchw, params, *, match_bf16=False):
    def q(a):
        a = a.astype(jnp.float32)
        return a.astype(jnp.bfloat16).astype(jnp.float32) if match_bf16 else a

    dn = ("NHWC", "HWIO", "NHWC")
    hp = jax.lax.Precision.HIGHEST

    def lrelu(v):
        return jnp.where(v >= 0, v, LEAKY_SLOPE * v)

    x = jnp.transpose(x_nchw, (0, 2, 3, 1)).astype(jnp.float32)
    xq = q(x)
    o = jax.lax.conv_general_dilated(xq, q(params["w1"]), (1, 1),
                                     ((1, 1), (1, 1)), dimension_numbers=dn,
                                     precision=hp)
    o = lrelu(o * params["s1"] + params["b1"])
    o = q(o)  # kernel feeds the canvas to conv2 as bf16
    o = jax.lax.conv_general_dilated(o, q(params["w2"]), (1, 1),
                                     ((1, 1), (1, 1)), dimension_numbers=dn,
                                     precision=hp)
    o = o * params["s2"] + params["b2"]
    if params["has_shortcut_conv"]:
        sc = jax.lax.conv_general_dilated(xq, q(params["wsc"])[None, None],
                                          (1, 1), ((0, 0), (0, 0)),
                                          dimension_numbers=dn, precision=hp)
        sc = sc * params["ssc"] + params["bsc"]
    else:
        sc = xq
    o = lrelu(o + sc)
    return jnp.transpose(o, (0, 3, 1, 2))


if __name__ == "__main__":
    key = jax.random.PRNGKey(0)
    k_x, k_p, k_x2, k_p2 = jax.random.split(key, 4)

    # Case 1: Cin != Cout -> exercises the fused 1x1-conv shortcut path.
    N, Cin, H, W = 2, 4, 16, 16
    Cout = 8
    x = jax.random.normal(k_x, (N, Cin, H, W), jnp.float32)   # NCHW (PyTorch)
    params = init_params(k_p, Cin, Cout, stride=1)

    out = jax.block_until_ready(basic_block_forward(x, params))
    assert out.shape == (N, Cout, H, W), out.shape

    ref_match = ref_forward(x, params, match_bf16=True)
    ref_f32 = ref_forward(x, params, match_bf16=False)
    err_match = float(jnp.max(jnp.abs(out - ref_match)))
    err_f32 = float(jnp.max(jnp.abs(out - ref_f32)))
    assert jnp.allclose(out, ref_match, atol=2e-3, rtol=2e-3), err_match
    assert jnp.allclose(out, ref_f32, atol=1e-1, rtol=1e-1), err_f32

    # Case 2: Cin == Cout -> identity shortcut path.
    x2 = jax.random.normal(k_x2, (2, 8, 16, 16), jnp.float32)
    params2 = init_params(k_p2, 8, 8, stride=1)
    out2 = jax.block_until_ready(basic_block_forward(x2, params2))
    ref2 = ref_forward(x2, params2, match_bf16=True)
    assert out2.shape == (2, 8, 16, 16), out2.shape
    assert jnp.allclose(out2, ref2, atol=2e-3, rtol=2e-3), \
        float(jnp.max(jnp.abs(out2 - ref2)))

    print("KERNEL_OK")
</pallas_src>

<mosaic_0001>
module attributes {stable_mosaic.version = 11 : i64} {
  func.func @_basic_block_kernel(%arg0: i32, %arg1: memref<1x432x128xbf16, #tpu.memory_space<vmem>>, %arg2: memref<432x1xf32, #tpu.memory_space<vmem>>, %arg3: memref<1152x128xbf16, #tpu.memory_space<vmem>>, %arg4: memref<1x128xf32, #tpu.memory_space<vmem>>, %arg5: memref<1x128xf32, #tpu.memory_space<vmem>>, %arg6: memref<1152x128xbf16, #tpu.memory_space<vmem>>, %arg7: memref<1x128xf32, #tpu.memory_space<vmem>>, %arg8: memref<1x128xf32, #tpu.memory_space<vmem>>, %arg9: memref<128x128xbf16, #tpu.memory_space<vmem>>, %arg10: memref<1x128xf32, #tpu.memory_space<vmem>>, %arg11: memref<1x128xf32, #tpu.memory_space<vmem>>, %arg12: memref<1x16x16x8xf32, #tpu.memory_space<vmem>>, %arg13: memref<432x1152xbf16, #tpu.memory_space<vmem>>) attributes {dimension_semantics = [#tpu.dimension_semantics<parallel>], iteration_bounds = array<i64: 2>, scalar_prefetch = 0 : i64, scratch_operands = 1 : i64, tpu.core_type = #tpu.core_type<tc>, window_params = [{transform_indices = @transform_0, window_bounds = array<i64: 1, 432, 128>}, {pipeline_mode = #tpu.pipeline_mode<synchronous>, transform_indices = @transform_1, window_bounds = array<i64: 432, 1>}, {pipeline_mode = #tpu.pipeline_mode<synchronous>, transform_indices = @transform_2, window_bounds = array<i64: 1152, 128>}, {pipeline_mode = #tpu.pipeline_mode<synchronous>, transform_indices = @transform_3, window_bounds = array<i64: 1, 128>}, {pipeline_mode = #tpu.pipeline_mode<synchronous>, transform_indices = @transform_4, window_bounds = array<i64: 1, 128>}, {pipeline_mode = #tpu.pipeline_mode<synchronous>, transform_indices = @transform_5, window_bounds = array<i64: 1152, 128>}, {pipeline_mode = #tpu.pipeline_mode<synchronous>, transform_indices = @transform_6, window_bounds = array<i64: 1, 128>}, {pipeline_mode = #tpu.pipeline_mode<synchronous>, transform_indices = @transform_7, window_bounds = array<i64: 1, 128>}, {pipeline_mode = #tpu.pipeline_mode<synchronous>, transform_indices = @transform_8, window_bounds = array<i64: 128, 128>}, {pipeline_mode = #tpu.pipeline_mode<synchronous>, transform_indices = @transform_9, window_bounds = array<i64: 1, 128>}, {pipeline_mode = #tpu.pipeline_mode<synchronous>, transform_indices = @transform_10, window_bounds = array<i64: 1, 128>}, {transform_indices = @transform_11, window_bounds = array<i64: 1, 16, 16, 8>}]} {
    %c0 = arith.constant 0 : index
    %c0_0 = arith.constant 0 : index
    %c0_1 = arith.constant 0 : index
    %0 = vector.load %arg1[%c0, %c0_0, %c0_1] : memref<1x432x128xbf16, #tpu.memory_space<vmem>>, vector<1x432x128xbf16>
    %1 = vector.shape_cast %0 : vector<1x432x128xbf16> to vector<432x128xbf16>
    %2 = arith.extf %1 : vector<432x128xbf16> to vector<432x128xf32>
    %c25_i32 = arith.constant 25 : i32
    %3 = tpu.dynamic_rotate %2 by %c25_i32 dim 0 : vector<432x128xf32>, i32 -> vector<432x128xf32>
    %4 = arith.truncf %3 : vector<432x128xf32> to vector<432x128xbf16>
    %c0_2 = arith.constant 0 : index
    %c0_3 = arith.constant 0 : index
    %5 = vector.load %arg13[%c0_2, %c0_3] : memref<432x1152xbf16, #tpu.memory_space<vmem>>, vector<432x128xbf16>
    tpu.vector_store %arg13[%c0_2, %c0_3], %4 {strides = array<i32>} : memref<432x1152xbf16, #tpu.memory_space<vmem>>, vector<432x128xbf16>,
    %c24_i32 = arith.constant 24 : i32
    %6 = tpu.dynamic_rotate %2 by %c24_i32 dim 0 : vector<432x128xf32>, i32 -> vector<432x128xf32>
    %7 = arith.truncf %6 : vector<432x128xf32> to vector<432x128xbf16>
    %c0_4 = arith.constant 0 : index
    %c128 = arith.constant 128 : index
    %8 = vector.load %arg13[%c0_4, %c128] : memref<432x1152xbf16, #tpu.memory_space<vmem>>, vector<432x128xbf16>
    tpu.vector_store %arg13[%c0_4, %c128], %7 {strides = array<i32>} : memref<432x1152xbf16, #tpu.memory_space<vmem>>, vector<432x128xbf16>,
    %c23_i32 = arith.constant 23 : i32
    %9 = tpu.dynamic_rotate %2 by %c23_i32 dim 0 : vector<432x128xf32>, i32 -> vector<432x128xf32>
    %10 = arith.truncf %9 : vector<432x128xf32> to vector<432x128xbf16>
    %c0_5 = arith.constant 0 : index
    %c256 = arith.constant 256 : index
    %11 = vector.load %arg13[%c0_5, %c256] : memref<432x1152xbf16, #tpu.memory_space<vmem>>, vector<432x128xbf16>
    tpu.vector_store %arg13[%c0_5, %c256], %10 {strides = array<i32>} : memref<432x1152xbf16, #tpu.memory_space<vmem>>, vector<432x128xbf16>,
    %c1_i32 = arith.constant 1 : i32
    %12 = tpu.dynamic_rotate %2 by %c1_i32 dim 0 : vector<432x128xf32>, i32 -> vector<432x128xf32>
    %13 = arith.truncf %12 : vector<432x128xf32> to vector<432x128xbf16>
    %c0_6 = arith.constant 0 : index
    %c384 = arith.constant 384 : index
    %14 = vector.load %arg13[%c0_6, %c384] : memref<432x1152xbf16, #tpu.memory_space<vmem>>, vector<432x128xbf16>
    tpu.vector_store %arg13[%c0_6, %c384], %13 {strides = array<i32>} : memref<432x1152xbf16, #tpu.memory_space<vmem>>, vector<432x128xbf16>,
    %15 = arith.truncf %2 : vector<432x128xf32> to vector<432x128xbf16>
    %c0_7 = arith.constant 0 : index
    %c512 = arith.constant 512 : index
    %16 = vector.load %arg13[%c0_7, %c512] : memref<432x1152xbf16, #tpu.memory_space<vmem>>, vector<432x128xbf16>
    tpu.vector_store %arg13[%c0_7, %c512], %15 {strides = array<i32>} : memref<432x1152xbf16, #tpu.memory_space<vmem>>, vector<432x128xbf16>,
    %c431_i32 = arith.constant 431 : i32
    %17 = tpu.dynamic_rotate %2 by %c431_i32 dim 0 : vector<432x128xf32>, i32 -> vector<432x128xf32>
    %18 = arith.truncf %17 : vector<432x128xf32> to vector<432x128xbf16>
    %c0_8 = arith.constant 0 : index
    %c640 = arith.constant 640 : index
    %19 = vector.load %arg13[%c0_8, %c640] : memref<432x1152xbf16, #tpu.memory_space<vmem>>, vector<432x128xbf16>
    tpu.vector_store %arg13[%c0_8, %c640], %18 {strides = array<i32>} : memref<432x1152xbf16, #tpu.memory_space<vmem>>, vector<432x128xbf16>,
    %c409_i32 = arith.constant 409 : i32
    %20 = tpu.dynamic_rotate %2 by %c409_i32 dim 0 : vector<432x128xf32>, i32 -> vector<432x128xf32>
    %21 = arith.truncf %20 : vector<432x128xf32> to vector<432x128xbf16>
    %c0_9 = arith.constant 0 : index
    %c768 = arith.constant 768 : index
    %22 = vector.load %arg13[%c0_9, %c768] : memref<432x1152xbf16, #tpu.memory_space<vmem>>, vector<432x128xbf16>
    tpu.vector_store %arg13[%c0_9, %c768], %21 {strides = array<i32>} : memref<432x1152xbf16, #tpu.memory_space<vmem>>, vector<432x128xbf16>,
    %c408_i32 = arith.constant 408 : i32
    %23 = tpu.dynamic_rotate %2 by %c408_i32 dim 0 : vector<432x128xf32>, i32 -> vector<432x128xf32>
    %24 = arith.truncf %23 : vector<432x128xf32> to vector<432x128xbf16>
    %c0_10 = arith.constant 0 : index
    %c896 = arith.constant 896 : index
    %25 = vector.load %arg13[%c0_10, %c896] : memref<432x1152xbf16, #tpu.memory_space<vmem>>, vector<432x128xbf16>
    tpu.vector_store %arg13[%c0_10, %c896], %24 {strides = array<i32>} : memref<432x1152xbf16, #tpu.memory_space<vmem>>, vector<432x128xbf16>,
    %c407_i32 = arith.constant 407 : i32
    %26 = tpu.dynamic_rotate %2 by %c407_i32 dim 0 : vector<432x128xf32>, i32 -> vector<432x128xf32>
    %27 = arith.truncf %26 : vector<432x128xf32> to vector<432x128xbf16>
    %c0_11 = arith.constant 0 : index
    %c1024 = arith.constant 1024 : index
    %28 = vector.load %arg13[%c0_11, %c1024] : memref<432x1152xbf16, #tpu.memory_space<vmem>>, vector<432x128xbf16>
    tpu.vector_store %arg13[%c0_11, %c1024], %27 {strides = array<i32>} : memref<432x1152xbf16, #tpu.memory_space<vmem>>, vector<432x128xbf16>,
    %c0_12 = arith.constant 0 : index
    %c0_13 = arith.constant 0 : index
    %29 = vector.load %arg13[%c0_12, %c0_13] : memref<432x1152xbf16, #tpu.memory_space<vmem>>, vector<432x1152xbf16>
    %c0_14 = arith.constant 0 : index
    %c0_15 = arith.constant 0 : index
    %30 = vector.load %arg3[%c0_14, %c0_15] : memref<1152x128xbf16, #tpu.memory_space<vmem>>, vector<1152x128xbf16>
    %cst = arith.constant dense<0.000000e+00> : vector<432x128xf32>
    %31 = tpu.matmul %29, %30, %cst {dimension_numbers = #tpu.dot_dimension_numbers<[1], [0], [0], [1], [0, 0, 1, 1], [], []>} : vector<432x1152xbf16>, vector<1152x128xbf16>, vector<432x128xf32> -> vector<432x128xf32>
    %c0_16 = arith.constant 0 : index
    %c0_17 = arith.constant 0 : index
    %32 = vector.load %arg4[%c0_16, %c0_17] : memref<1x128xf32, #tpu.memory_space<vmem>>, vector<1x128xf32>
    %33 = vector.broadcast %32 : vector<1x128xf32> to vector<432x128xf32>
    %34 = arith.mulf %31, %33 : vector<432x128xf32>
    %c0_18 = arith.constant 0 : index
    %c0_19 = arith.constant 0 : index
    %35 = vector.load %arg5[%c0_18, %c0_19] : memref<1x128xf32, #tpu.memory_space<vmem>>, vector<1x128xf32>
    %36 = vector.broadcast %35 : vector<1x128xf32> to vector<432x128xf32>
    %37 = arith.addf %34, %36 : vector<432x128xf32>
    %cst_20 = arith.constant 0.000000e+00 : f32
    %38 = vector.broadcast %cst_20 : f32 to vector<432x128xf32>
    %39 = arith.cmpf oge, %37, %38 : vector<432x128xf32>
    %cst_21 = arith.constant 0.00999999977 : f32
    %40 = vector.broadcast %cst_21 : f32 to vector<432x128xf32>
    %41 = arith.mulf %40, %37 : vector<432x128xf32>
    %42 = arith.select %39, %37, %41 : vector<432x128xi1>, vector<432x128xf32>
    %c0_22 = arith.constant 0 : index
    %c0_23 = arith.constant 0 : index
    %43 = vector.load %arg2[%c0_22, %c0_23] : memref<432x1xf32, #tpu.memory_space<vmem>>, vector<432x1xf32>
    %44 = vector.broadcast %43 : vector<432x1xf32> to vector<432x128xf32>
    %45 = arith.mulf %42, %44 : vector<432x128xf32>
    %46 = arith.truncf %45 : vector<432x128xf32> to vector<432x128xbf16>
    %c0_24 = arith.constant 0 : index
    %c0_25 = arith.constant 0 : index
    %47 = vector.load %arg13[%c0_24, %c0_25] : memref<432x1152xbf16, #tpu.memory_space<vmem>>, vector<432x128xbf16>
    tpu.vector_store %arg13[%c0_24, %c0_25], %46 {strides = array<i32>} : memref<432x1152xbf16, #tpu.memory_space<vmem>>, vector<432x128xbf16>,
    %c431_i32_26 = arith.constant 431 : i32
    %48 = tpu.dynamic_rotate %45 by %c431_i32_26 dim 0 : vector<432x128xf32>, i32 -> vector<432x128xf32>
    %49 = arith.truncf %48 : vector<432x128xf32> to vector<432x128xbf16>
    %c0_27 = arith.constant 0 : index
    %c128_28 = arith.constant 128 : index
    %50 = vector.load %arg13[%c0_27, %c128_28] : memref<432x1152xbf16, #tpu.memory_space<vmem>>, vector<432x128xbf16>
    tpu.vector_store %arg13[%c0_27, %c128_28], %49 {strides = array<i32>} : memref<432x1152xbf16, #tpu.memory_space<vmem>>, vector<432x128xbf16>,
    %c430_i32 = arith.constant 430 : i32
    %51 = tpu.dynamic_rotate %45 by %c430_i32 dim 0 : vector<432x128xf32>, i32 -> vector<432x128xf32>
    %52 = arith.truncf %51 : vector<432x128xf32> to vector<432x128xbf16>
    %c0_29 = arith.constant 0 : index
    %c256_30 = arith.constant 256 : index
    %53 = vector.load %arg13[%c0_29, %c256_30] : memref<432x1152xbf16, #tpu.memory_space<vmem>>, vector<432x128xbf16>
    tpu.vector_store %arg13[%c0_29, %c256_30], %52 {strides = array<i32>} : memref<432x1152xbf16, #tpu.memory_space<vmem>>, vector<432x128xbf16>,
    %c408_i32_31 = arith.constant 408 : i32
    %54 = tpu.dynamic_rotate %45 by %c408_i32_31 dim 0 : vector<432x128xf32>, i32 -> vector<432x128xf32>
    %55 = arith.truncf %54 : vector<432x128xf32> to vector<432x128xbf16>
    %c0_32 = arith.constant 0 : index
    %c384_33 = arith.constant 384 : index
    %56 = vector.load %arg13[%c0_32, %c384_33] : memref<432x1152xbf16, #tpu.memory_space<vmem>>, vector<432x128xbf16>
    tpu.vector_store %arg13[%c0_32, %c384_33], %55 {strides = array<i32>} : memref<432x1152xbf16, #tpu.memory_space<vmem>>, vector<432x128xbf16>,
    %c407_i32_34 = arith.constant 407 : i32
    %57 = tpu.dynamic_rotate %45 by %c407_i32_34 dim 0 : vector<432x128xf32>, i32 -> vector<432x128xf32>
    %58 = arith.truncf %57 : vector<432x128xf32> to vector<432x128xbf16>
    %c0_35 = arith.constant 0 : index
    %c512_36 = arith.constant 512 : index
    %59 = vector.load %arg13[%c0_35, %c512_36] : memref<432x1152xbf16, #tpu.memory_space<vmem>>, vector<432x128xbf16>
    tpu.vector_store %arg13[%c0_35, %c512_36], %58 {strides = array<i32>} : memref<432x1152xbf16, #tpu.memory_space<vmem>>, vector<432x128xbf16>,
    %c406_i32 = arith.constant 406 : i32
    %60 = tpu.dynamic_rotate %45 by %c406_i32 dim 0 : vector<432x128xf32>, i32 -> vector<432x128xf32>
    %61 = arith.truncf %60 : vector<432x128xf32> to vector<432x128xbf16>
    %c0_37 = arith.constant 0 : index
    %c640_38 = arith.constant 640 : index
    %62 = vector.load %arg13[%c0_37, %c640_38] : memref<432x1152xbf16, #tpu.memory_space<vmem>>, vector<432x128xbf16>
    tpu.vector_store %arg13[%c0_37, %c640_38], %61 {strides = array<i32>} : memref<432x1152xbf16, #tpu.memory_space<vmem>>, vector<432x128xbf16>,
    %c384_i32 = arith.constant 384 : i32
    %63 = tpu.dynamic_rotate %45 by %c384_i32 dim 0 : vector<432x128xf32>, i32 -> vector<432x128xf32>
    %64 = arith.truncf %63 : vector<432x128xf32> to vector<432x128xbf16>
    %c0_39 = arith.constant 0 : index
    %c768_40 = arith.constant 768 : index
    %65 = vector.load %arg13[%c0_39, %c768_40] : memref<432x1152xbf16, #tpu.memory_space<vmem>>, vector<432x128xbf16>
    tpu.vector_store %arg13[%c0_39, %c768_40], %64 {strides = array<i32>} : memref<432x1152xbf16, #tpu.memory_space<vmem>>, vector<432x128xbf16>,
    %c383_i32 = arith.constant 383 : i32
    %66 = tpu.dynamic_rotate %45 by %c383_i32 dim 0 : vector<432x128xf32>, i32 -> vector<432x128xf32>
    %67 = arith.truncf %66 : vector<432x128xf32> to vector<432x128xbf16>
    %c0_41 = arith.constant 0 : index
    %c896_42 = arith.constant 896 : index
    %68 = vector.load %arg13[%c0_41, %c896_42] : memref<432x1152xbf16, #tpu.memory_space<vmem>>, vector<432x128xbf16>
    tpu.vector_store %arg13[%c0_41, %c896_42], %67 {strides = array<i32>} : memref<432x1152xbf16, #tpu.memory_space<vmem>>, vector<432x128xbf16>,
    %c382_i32 = arith.constant 382 : i32
    %69 = tpu.dynamic_rotate %45 by %c382_i32 dim 0 : vector<432x128xf32>, i32 -> vector<432x128xf32>
    %70 = arith.truncf %69 : vector<432x128xf32> to vector<432x128xbf16>
    %c0_43 = arith.constant 0 : index
    %c1024_44 = arith.constant 1024 : index
    %71 = vector.load %arg13[%c0_43, %c1024_44] : memref<432x1152xbf16, #tpu.memory_space<vmem>>, vector<432x128xbf16>
    tpu.vector_store %arg13[%c0_43, %c1024_44], %70 {strides = array<i32>} : memref<432x1152xbf16, #tpu.memory_space<vmem>>, vector<432x128xbf16>,
    %c0_45 = arith.constant 0 : index
    %c0_46 = arith.constant 0 : index
    %72 = vector.load %arg13[%c0_45, %c0_46] : memref<432x1152xbf16, #tpu.memory_space<vmem>>, vector<432x1152xbf16>
    %c0_47 = arith.constant 0 : index
    %c0_48 = arith.constant 0 : index
    %73 = vector.load %arg6[%c0_47, %c0_48] : memref<1152x128xbf16, #tpu.memory_space<vmem>>, vector<1152x128xbf16>
    %cst_49 = arith.constant dense<0.000000e+00> : vector<432x128xf32>
    %74 = tpu.matmul %72, %73, %cst_49 {dimension_numbers = #tpu.dot_dimension_numbers<[1], [0], [0], [1], [0, 0, 1, 1], [], []>} : vector<432x1152xbf16>, vector<1152x128xbf16>, vector<432x128xf32> -> vector<432x128xf32>
    %c0_50 = arith.constant 0 : index
    %c0_51 = arith.constant 0 : index
    %75 = vector.load %arg7[%c0_50, %c0_51] : memref<1x128xf32, #tpu.memory_space<vmem>>, vector<1x128xf32>
    %76 = vector.broadcast %75 : vector<1x128xf32> to vector<432x128xf32>
    %77 = arith.mulf %74, %76 : vector<432x128xf32>
    %c0_52 = arith.constant 0 : index
    %c0_53 = arith.constant 0 : index
    %78 = vector.load %arg8[%c0_52, %c0_53] : memref<1x128xf32, #tpu.memory_space<vmem>>, vector<1x128xf32>
    %79 = vector.broadcast %78 : vector<1x128xf32> to vector<432x128xf32>
    %80 = arith.addf %77, %79 : vector<432x128xf32>
    %c407_i32_54 = arith.constant 407 : i32
    %81 = tpu.dynamic_rotate %2 by %c407_i32_54 dim 0 : vector<432x128xf32>, i32 -> vector<432x128xf32>
    %82 = arith.truncf %81 : vector<432x128xf32> to vector<432x128xbf16>
    %c0_55 = arith.constant 0 : index
    %c0_56 = arith.constant 0 : index
    %83 = vector.load %arg9[%c0_55, %c0_56] : memref<128x128xbf16, #tpu.memory_space<vmem>>, vector<128x128xbf16>
    %cst_57 = arith.constant dense<0.000000e+00> : vector<432x128xf32>
    %84 = tpu.matmul %82, %83, %cst_57 {dimension_numbers = #tpu.dot_dimension_numbers<[1], [0], [0], [1], [0, 0, 1, 1], [], []>} : vector<432x128xbf16>, vector<128x128xbf16>, vector<432x128xf32> -> vector<432x128xf32>
    %c0_58 = arith.constant 0 : index
    %c0_59 = arith.constant 0 : index
    %85 = vector.load %arg10[%c0_58, %c0_59] : memref<1x128xf32, #tpu.memory_space<vmem>>, vector<1x128xf32>
    %86 = vector.broadcast %85 : vector<1x128xf32> to vector<432x128xf32>
    %87 = arith.mulf %84, %86 : vector<432x128xf32>
    %c0_60 = arith.constant 0 : index
    %c0_61 = arith.constant 0 : index
    %88 = vector.load %arg11[%c0_60, %c0_61] : memref<1x128xf32, #tpu.memory_space<vmem>>, vector<1x128xf32>
    %89 = vector.broadcast %88 : vector<1x128xf32> to vector<432x128xf32>
    %90 = arith.addf %87, %89 : vector<432x128xf32>
    %91 = arith.addf %80, %90 : vector<432x128xf32>
    %cst_62 = arith.constant 0.000000e+00 : f32
    %92 = vector.broadcast %cst_62 : f32 to vector<432x128xf32>
    %93 = arith.cmpf oge, %91, %92 : vector<432x128xf32>
    %cst_63 = arith.constant 0.00999999977 : f32
    %94 = vector.broadcast %cst_63 : f32 to vector<432x128xf32>
    %95 = arith.mulf %94, %91 : vector<432x128xf32>
    %96 = arith.select %93, %91, %95 : vector<432x128xi1>, vector<432x128xf32>
    %97 = vector.shape_cast %96 : vector<432x128xf32> to vector<18x24x128xf32>
    %98 = vector.extract_strided_slice %97 {offsets = [0, 0, 0], sizes = [16, 16, 8], strides = [1, 1, 1]} : vector<18x24x128xf32> to vector<16x16x8xf32>
    %c0_64 = arith.constant 0 : index
    %c0_65 = arith.constant 0 : index
    %c0_66 = arith.constant 0 : index
    %c0_67 = arith.constant 0 : index
    %99 = vector.load %arg12[%c0_64, %c0_65, %c0_66, %c0_67] : memref<1x16x16x8xf32, #tpu.memory_space<vmem>>, vector<1x16x16x8xf32>
    %100 = vector.shape_cast %99 : vector<1x16x16x8xf32> to vector<16x16x8xf32>
    %101 = vector.shape_cast %98 : vector<16x16x8xf32> to vector<1x16x16x8xf32>
    tpu.vector_store %arg12[%c0_64, %c0_65, %c0_66, %c0_67], %101 {strides = array<i32>} : memref<1x16x16x8xf32, #tpu.memory_space<vmem>>, vector<1x16x16x8xf32>,
    return
  }
  func.func @transform_0(%arg0: i32) -> (i32, i32, i32) {
    %c0_i32 = arith.constant 0 : i32
    %c0_i32_0 = arith.constant 0 : i32
    %c0_i32_1 = arith.constant 0 : i32
    return %arg0, %c0_i32, %c0_i32_0 : i32, i32, i32
  }
  func.func @transform_1(%arg0: i32) -> (i32, i32) {
    %c0_i32 = arith.constant 0 : i32
    %c0_i32_0 = arith.constant 0 : i32
    %c0_i32_1 = arith.constant 0 : i32
    return %c0_i32, %c0_i32_0 : i32, i32
  }
  func.func @transform_2(%arg0: i32) -> (i32, i32) {
    %c0_i32 = arith.constant 0 : i32
    %c0_i32_0 = arith.constant 0 : i32
    %c0_i32_1 = arith.constant 0 : i32
    return %c0_i32, %c0_i32_0 : i32, i32
  }
  func.func @transform_3(%arg0: i32) -> (i32, i32) {
    %c0_i32 = arith.constant 0 : i32
    %c0_i32_0 = arith.constant 0 : i32
    %c0_i32_1 = arith.constant 0 : i32
    return %c0_i32, %c0_i32_0 : i32, i32
  }
  func.func @transform_4(%arg0: i32) -> (i32, i32) {
    %c0_i32 = arith.constant 0 : i32
    %c0_i32_0 = arith.constant 0 : i32
    %c0_i32_1 = arith.constant 0 : i32
    return %c0_i32, %c0_i32_0 : i32, i32
  }
  func.func @transform_5(%arg0: i32) -> (i32, i32) {
    %c0_i32 = arith.constant 0 : i32
    %c0_i32_0 = arith.constant 0 : i32
    %c0_i32_1 = arith.constant 0 : i32
    return %c0_i32, %c0_i32_0 : i32, i32
  }
  func.func @transform_6(%arg0: i32) -> (i32, i32) {
    %c0_i32 = arith.constant 0 : i32
    %c0_i32_0 = arith.constant 0 : i32
    %c0_i32_1 = arith.constant 0 : i32
    return %c0_i32, %c0_i32_0 : i32, i32
  }
  func.func @transform_7(%arg0: i32) -> (i32, i32) {
    %c0_i32 = arith.constant 0 : i32
    %c0_i32_0 = arith.constant 0 : i32
    %c0_i32_1 = arith.constant 0 : i32
    return %c0_i32, %c0_i32_0 : i32, i32
  }
  func.func @transform_8(%arg0: i32) -> (i32, i32) {
    %c0_i32 = arith.constant 0 : i32
    %c0_i32_0 = arith.constant 0 : i32
    %c0_i32_1 = arith.constant 0 : i32
    return %c0_i32, %c0_i32_0 : i32, i32
  }
  func.func @transform_9(%arg0: i32) -> (i32, i32) {
    %c0_i32 = arith.constant 0 : i32
    %c0_i32_0 = arith.constant 0 : i32
    %c0_i32_1 = arith.constant 0 : i32
    return %c0_i32, %c0_i32_0 : i32, i32
  }
  func.func @transform_10(%arg0: i32) -> (i32, i32) {
    %c0_i32 = arith.constant 0 : i32
    %c0_i32_0 = arith.constant 0 : i32
    %c0_i32_1 = arith.constant 0 : i32
    return %c0_i32, %c0_i32_0 : i32, i32
  }
  func.func @transform_11(%arg0: i32) -> (i32, i32, i32, i32) {
    %c0_i32 = arith.constant 0 : i32
    %c0_i32_0 = arith.constant 0 : i32
    %c0_i32_1 = arith.constant 0 : i32
    %c0_i32_2 = arith.constant 0 : i32
    return %arg0, %c0_i32, %c0_i32_0, %c0_i32_1 : i32, i32, i32, i32
  }
}

</mosaic_0001>

<bundles_post_ra>
// kernel: tpu_custom_call.1
= control target key start
LH: loop header
LB: loop body
LE: loop exit
PB: predicated region body
PF: predicated region fallthrough
CT: control target
= control target key end

     0   :  { %16 = vsyncpa [#allocation4], 0  ;;  %s17581_s0 = inlined_call_operand.vmem [shape: bf16[2,432,128], index: 0, kind: input, shape index: {}]   ;;  %s17582_s1 = inlined_call_operand.vmem [shape: f32[432,1], index: 1, kind: input, shape index: {}]   ;;  %s17583_s2 = inlined_call_operand.hbm [shape: bf16[1152,128], index: 2, kind: input, shape index: {}]   ;;  %s17584_s3 = inlined_call_operand.vmem [shape: f32[1,128], index: 3, kind: input, shape index: {}]   ;;  %s17585_s4 = inlined_call_operand.vmem [shape: f32[1,128], index: 4, kind: input, shape index: {}]   ;;  %s17586_s5 = inlined_call_operand.hbm [shape: bf16[1152,128], index: 5, kind: input, shape index: {}]   ;;  %s17587_s6 = inlined_call_operand.vmem [shape: f32[1,128], index: 6, kind: input, shape index: {}]   ;;  %s17588_s7 = inlined_call_operand.vmem [shape: f32[1,128], index: 7, kind: input, shape index: {}]   ;;  %s17589_s8 = inlined_call_operand.hbm [shape: bf16[128,128], index: 8, kind: input, shape index: {}]   ;;  %s17590_s9 = inlined_call_operand.vmem [shape: f32[1,128], index: 9, kind: input, shape index: {}]   ;;  %s17591_s10 = inlined_call_operand.vmem [shape: f32[1,128], index: 10, kind: input, shape index: {}]   ;;  %s17592_s11 = inlined_call_operand.vmem [shape: f32[2,16,16,8], index: 11, kind: output, shape index: {}]  }
   0x1   :  { %17 = vsyncpa [#allocation6], 0  ;;  %s13708_s17 = smov 0  }
   0x2 LB: > { %s13714_s18 = sadd.s32 4294967295, %s13640_s17   ;;  %p10245_p0 = scmp.ge.s32.totalorder %s13640_s17, 1  ;;  %s13640_s17 = sphi %s13708_s17, %s23_s17  }
   0x3   : > { %p290_p1 = scmp.lt.s32.totalorder %s13640_s17, 3  ;;  %p13497_p2 = scmp.eq.s32.totalorder %s13714_s18, 0 }
   0x4   : > { %s324_s21 = sshll.u32 %s17586_s5, 4  ;;  %s304_s25 = sshll.u32 %s17583_s2, 4  ;;  %s325_s21 = int_to_ptr.hbm [resolvable:$true] %s324_s21  ;;  %s305_s25 = int_to_ptr.hbm [resolvable:$true] %s304_s25 }
   0x5   : > { %p13722_p3 = pnand %p10245_p0, %p290_p1  ;;  %s13642_s26 = smov [#allocation5]  }
   0x6   : > { %s326_s27 = sshll.u32 %s13642_s26, 4  ;;  %s13643_s28 = smov [#allocation3]   ;;  %s327_s27 = int_to_ptr.vmem [resolvable:$true] %s326_s27 }
   0x7   : > { %p13487_p4 = pneg %p13722_p3  ;;  %s306_s29 = sshll.u32 %s13643_s28, 4  ;;  %s307_s29 = int_to_ptr.vmem [resolvable:$true] %s306_s29 }
   0x8   : > { %s344_s13 = sshll.u32 %s17589_s8, 4  ;;  %s13644_s14 = smov 64   ;;  %s345_s13 = int_to_ptr.hbm [resolvable:$true] %s344_s13 }
   0x9   : > { %p13488_p5 = pnand %p13497_p2, %p13487_p4  ;;  %s13645_s15 = smov 4  }
   0xa   : > { %s13646_s16 = smov [#allocation7]   ;;  %376 = sbr.rel (%p13722_p3) target bundleno = 2688 (0xa80), region = 64 }
   0xb   : > { %13493 = dma.hbm_to_vmem [thread:$0]  (!%p13488_p5), %s325_s21, 9216, %s327_s27, [#allocation6], %s13644_s14, %s13644_s14, %s13645_s15  }
   0xc   : > { %13490 = dma.hbm_to_vmem [thread:$0]  (!%p13488_p5), %s305_s25, 9216, %s307_s29, [#allocation4], %s13644_s14, %s13644_s14, %s13645_s15  }
   0xd   : > { %s346_s19 = sshll.u32 %s13646_s16, 4  ;;  %s347_s19 = int_to_ptr.vmem [resolvable:$true] %s346_s19 }
   0xe   : > { %13496 = dma.hbm_to_vmem [thread:$0]  (!%p13488_p5), %s345_s13, 1024, %s347_s19, [#allocation6], %s13644_s14, %s13644_s14, %s13645_s15  }
   0xf   : > { %13631 = dma.done.wait (%p13497_p2), [#allocation4], 9216  }
  0x10   : > { %13633 = vsyncadd (%p13497_p2), [#allocation4], 4294958080 }
  0x11   : > { %13635 = dma.done.wait (%p13497_p2), [#allocation6], 10240  }
  0x12   : > { %13637 = vsyncadd (%p13497_p2), [#allocation6], 4294957056  ;;  %p427_p6 = scmp.lt.s32.totalorder %s13714_s18, 1  ;;  %v599_v0 = vlaneseq  ;;  %v13062_v1 = vld [vmem:[#allocation3 + $0x38] sm:$0xff]  ;;  %v13061_v4 = vld [vmem:[#allocation3 + $0x30] sm:$0xff] }
  0x13   : > { %v13750_v2 = vld [vmem:[#allocation3 + $0x78] sm:$0xff]  ;;  %3501 = vmatpush.bf16.msra.mxu0 %v13062_v1  ;;  %13450 = vmatpush.bf16.msra.mxu3 %v13062_v1  ;;  %v13757_v5 = vld [vmem:[#allocation3 + $0x70] sm:$0xff]  ;;  %v13060_v8 = vld [vmem:[#allocation3 + $0x28] sm:$0xff] }
  0x14   : > { %s18053_s18 = smov (!%p427_p6, %s13714_s18), 1  ;;  %v13752_v3 = vld [vmem:[#allocation3 + $0xb8] sm:$0xff]  ;;  %3645 = vmatpush.bf16.msra.mxu1 %v13750_v2  ;;  %v13759_v6 = vld [vmem:[#allocation3 + $0xb0] sm:$0xff]  ;;  %v13761_v7 = vshrl.u32 %v599_v0, 7  ;;  %v13770_v9 = vld [vmem:[#allocation3 + $0x68] sm:$0xff] }
  0x15   : > { %s13474_s20 = smul.u32 216, %s18053_s18  ;;  %3789 = vmatpush.bf16.msra.mxu2 %v13752_v3  ;;  %v13772_v10 = vld [vmem:[#allocation3 + $0xa8] sm:$0xff]  ;;  %v13059_v19 = vld [vmem:[#allocation3 + $0x20] sm:$0xff]  ;;  %v13058_v35 = vld [vmem:[#allocation3 + $0x18] sm:$0xff] }
  0x16   : > { %17688 = vst [vmem:[#allocation10_spill] sm:$0xff] %v13761_v7  ;;  %vm601_vm0 = vcmp.lt.s32.totalorder %v13761_v7, 1  ;;  %v13786_v20 = vld [vmem:[#allocation3 + $0x60] sm:$0xff]  ;;  %v13822_v39 = vld [vmem:[#allocation3 + $0x58] sm:$0xff]  ;;  %v13057_v44 = vld [vmem:[#allocation3 + $0x10] sm:$0xff]  ;;  %vm926_vm1 = vcmp.lt.s32.totalorder %v13761_v7, 7 }
  0x17   : > { %s13766_s23 = scalar_lea.vmem %s17581_s0, %s13474_s20  ;;  %3502 = vmatpush.bf16.msra.mxu0 %v13061_v4  ;;  %13451 = vmatpush.bf16.msra.mxu3 %v13061_v4  ;;  %v13795_v24 = vld [vmem:[#allocation3 + $0xa0] sm:$0xff]  ;;  %v13824_v40 = vld [vmem:[#allocation3 + $0x98] sm:$0xff]  ;;  %v13840_v46 = vld [vmem:[#allocation3 + $0x50] sm:$0xff]  ;;  %s12811_s20 = sshll.u32 %s18053_s18, 8 }
  0x18   : > { %3646 = vmatpush.bf16.msra.mxu1 %v13757_v5  ;;  %v487_v11 = vld [vmem:[%s13766_s23 + $0xc8] sm:$0xf]  ;;  %v488_v12 = vld [vmem:[%s13766_s23 + $0xcc] sm:$0xf]  ;;  %v489_v13 = vld [vmem:[%s13766_s23 + $0xd0] sm:$0xf] }
  0x19   : > { %3790 = vmatpush.bf16.msra.mxu2 %v13759_v6  ;;  %v13778_v14 = vunpack.c.l.bf16 %v487_v11  ;;  %v13780_v15 = vunpack.c.l.bf16 %v488_v12  ;;  %v13782_v16 = vunpack.c.l.bf16 %v489_v13  ;;  %1193 = vst [vmem:[#allocation2 + $0x718] sm:$0xf] %v487_v11  ;;  %v475_v17 = vld [vmem:[%s13766_s23 + $0x98] sm:$0xf]  ;;  %v476_v18 = vld [vmem:[%s13766_s23 + $0x9c] sm:$0xf] }
  0x1a   : > { %1194 = vst [vmem:[#allocation2 + $0x73c] sm:$0xf] %v488_v12  ;;  %v477_v21 = vld [vmem:[%s13766_s23 + $0xa0] sm:$0xf]  ;;  %v13789_v22 = vunpack.c.l.bf16 %v475_v17  ;;  %v13791_v23 = vunpack.c.l.bf16 %v476_v18  ;;  %v13818_v38 = vld [vmem:[%s13766_s23 + $0xd4] sm:$0xf] }
  0x1b   : > { %3503 = vmatpush.bf16.msra.mxu0 %v13060_v8  ;;  %13452 = vmatpush.bf16.msra.mxu3 %v13060_v8  ;;  %v595_v25 = vrot.slane %v13778_v14, 7  ;;  %v596_v26 = vrot.slane %v13780_v15, 7  ;;  %v597_v27 = vrot.slane %v13782_v16, 7  ;;  %1195 = vst [vmem:[#allocation2 + $0x760] sm:$0xf] %v489_v13  ;;  %v13800_v28 = vunpack.c.l.bf16 %v477_v21  ;;  %v13842_v47 = vld [vmem:[#allocation3 + $0x90] sm:$0xff] }
  0x1c   : > { %3647 = vmatpush.bf16.msra.mxu1 %v13770_v9  ;;  %v17593_v29 = vrot.slane %v13789_v22, 7  ;;  %v584_v30 = vrot.slane %v13791_v23, 7  ;;  %1181 = vst [vmem:[#allocation2 + $0x568] sm:$0xf] %v475_v17  ;;  %v13806_v31 = vpack.c.bf16 %v13780_v15, %v13780_v15  ;;  %v13836_v43 = vunpack.c.l.bf16 %v13818_v38  ;;  %v13849_v52 = vld [vmem:[%s13766_s23] sm:$0xf] }
  0x1d   : > { %3791 = vmatpush.bf16.msra.mxu2 %v13772_v10  ;;  %v603_v32 = vsel %vm601_vm0, %v596_v26, %v597_v27  ;;  %v604_v33 = vsel %vm601_vm0, %v595_v25, %v596_v26  ;;  %v585_v34 = vrot.slane %v13800_v28, 7  ;;  %1182 = vst [vmem:[#allocation2 + $0x58c] sm:$0xf] %v476_v18  ;;  %v17594_v49 = vrot.slane %v13780_v15, 1  ;;  %v13056_v53 = vld [vmem:[#allocation3 + $0x8] sm:$0xff]  ;;  %v13055_v59 = vld [vmem:[#allocation3] sm:$0xff] }
  0x1e   : > { %v656_v36 = vpack.c.bf16 %v604_v33, %v604_v33  ;;  %v657_v37 = vpack.c.bf16 %v603_v32, %v603_v32  ;;  %1183 = vst [vmem:[#allocation2 + $0x5b0] sm:$0xf] %v477_v21  ;;  %v616_v41 = vsel %vm601_vm0, %v17593_v29, %v584_v30  ;;  %v924_v50 = vrot.slane %v13782_v16, 1  ;;  %v13853_v54 = vld [vmem:[#allocation3 + $0x48] sm:$0xff]  ;;  %v13866_v60 = vld [vmem:[#allocation3 + $0x40] sm:$0xff]  ;;  %v13094_v12 = vld [vmem:[#allocation3 + $0x138] sm:$0xff] }
  0x1f   : > { %3504 = vmatpush.bf16.msra.mxu0 %v13059_v19  ;;  %13453 = vmatpush.bf16.msra.mxu3 %v13059_v19  ;;  %818 = vst [vmem:[#allocation2 + $0x4] sm:$0xf] %v13806_v31  ;;  %v615_v42 = vsel %vm601_vm0, %v584_v30, %v585_v34  ;;  %v698_v45 = vpack.c.bf16 %v616_v41, %v616_v41  ;;  %v925_v51 = vrot.slane %v13836_v43, 1  ;;  %v13855_v55 = vld [vmem:[#allocation3 + $0x88] sm:$0xff]  ;;  %v13864_v58 = vunpack.c.l.bf16 %v13849_v52  ;;  %v13874_v0 = vld [vmem:[#allocation3 + $0x80] sm:$0xff] }
  0x20   : > { %3648 = vmatpush.bf16.msra.mxu1 %v13786_v20  ;;  %710 = vst [vmem:[#allocation2] sm:$0xf] %v656_v36  ;;  %v699_v48 = vpack.c.bf16 %v615_v42, %v615_v42  ;;  %v765_v56 = vpack.c.bf16 %v13782_v16, %v13782_v16  ;;  %v928_v57 = vsel %vm926_vm1, %v17594_v49, %v924_v50  ;;  %v598_v4 = vrot.slane %v13836_v43, 7  ;;  %v13880_v8 = vld [vmem:[%s13766_s23 + $0xa4] sm:$0xf] }
  0x21   : > { %3792 = vmatpush.bf16.msra.mxu2 %v13795_v24  ;;  %711 = vst [vmem:[#allocation2 + $0x24] sm:$0xf] %v657_v37  ;;  %v927_v61 = vsel %vm926_vm1, %v924_v50, %v925_v51  ;;  %v13876_v1 = vpack.c.bf16 %v928_v57, %v928_v57  ;;  %v545_v13 = vrot.slane %v13864_v58, 7  ;;  %v13886_v17 = vld [vmem:[%s13766_s23 + $0xa8] sm:$0xf]  ;;  %v13890_v26 = vunpack.c.l.bf16 %v13880_v8 }
  0x22   : > { %1140 = vst [vmem:[#allocation2 + $0x738] sm:$0xf] %v656_v36  ;;  %v13882_v11 = vpack.c.bf16 %v927_v61, %v927_v61  ;;  %v602_v32 = vsel %vm601_vm0, %v597_v27, %v598_v4 }
  0x23   : > { %3505 = vmatpush.bf16.msra.mxu0 %v13058_v35  ;;  %13454 = vmatpush.bf16.msra.mxu3 %v13058_v35  ;;  %1141 = vst [vmem:[#allocation2 + $0x75c] sm:$0xf] %v657_v37  ;;  %v655_v33 = vsel %vm601_vm0, %v598_v4, %v545_v13  ;;  %v658_v16 = vpack.c.bf16 %v602_v32, %v602_v32  ;;  %v586_v27 = vrot.slane %v13890_v26, 7 }
  0x24   : > { %3649 = vmatpush.bf16.msra.mxu1 %v13822_v39  ;;  %1299 = vst [vmem:[#allocation2 + $0x6d8] sm:$0xf] %v656_v36 }
  0x25   : > { %3793 = vmatpush.bf16.msra.mxu2 %v13824_v40  ;;  %1300 = vst [vmem:[#allocation2 + $0x6fc] sm:$0xf] %v657_v37  ;;  %v659_v37 = vpack.c.bf16 %v655_v33, %v655_v33 }
  0x26   : > { %752 = vst [vmem:[#allocation2 + $0x5e8] sm:$0xf] %v698_v45  ;;  %v12812_v35 = vld [vmem:[#allocation2 + $0x4] sm:$0xf] }
  0x27   : > { %3506 = vmatpush.bf16.msra.mxu0 %v13057_v44  ;;  %13455 = vmatpush.bf16.msra.mxu3 %v13057_v44  ;;  %753 = vst [vmem:[#allocation2 + $0x60c] sm:$0xf] %v699_v48  ;;  %v10259_v62 = vld [vmem:[#allocation2] sm:$0xf] }
  0x28   : > { %3650 = vmatpush.bf16.msra.mxu1 %v13840_v46  ;;  %1128 = vst [vmem:[#allocation2 + $0x588] sm:$0xf] %v698_v45  ;;  %v12816_v63 = vld [vmem:[#allocation2 + $0x20] sm:$0xf0] }
  0x29   : > { %3794 = vmatpush.bf16.msra.mxu2 %v13842_v47  ;;  %1129 = vst [vmem:[#allocation2 + $0x5ac] sm:$0xf] %v699_v48  ;;  %v10260_v18 = vor.u32 %v12816_v63, %v10259_v62  ;;  %v13933_v62 = vld [vmem:[%s13766_s23 + $0x8] sm:$0xf] }
  0x2a   : > { %1287 = vst [vmem:[#allocation2 + $0x528] sm:$0xf] %v698_v45  ;;  %v13947_v4 = vunpack.c.l.bf16 %v13933_v62 }
  0x2b   : > { %3507 = vmatpush.bf16.msra.mxu0 %v13056_v53  ;;  %13456 = vmatpush.bf16.msra.mxu3 %v13056_v53  ;;  %1288 = vst [vmem:[#allocation2 + $0x54c] sm:$0xf] %v699_v48 }
  0x2c   : > { %3651 = vmatpush.bf16.msra.mxu1 %v13853_v54  ;;  %17689 = vst [vmem:[#allocation11_spill] sm:$0xff] %v13876_v1 }
  0x2d   : > { %3795 = vmatpush.bf16.msra.mxu2 %v13855_v55  ;;  %819 = vst [vmem:[#allocation2 + $0x28] sm:$0xf] %v765_v56  ;;  %v11015_v19 = vld [vmem:[#allocation2 + $0x5e8] sm:$0xf] }
  0x2e   : > { %17690 = vst [vmem:[#allocation12_spill] sm:$0xff] %v13882_v11  ;;  %v13005_v21 = vld [vmem:[#allocation2 + $0x608] sm:$0xf0] }
  0x2f   : > { %1353 = vst [vmem:[#allocation2 + $0x6dc] sm:$0xf] %v13806_v31  ;;  %3508 = vmatpush.bf16.msra.mxu0 %v13055_v59  ;;  %13457 = vmatpush.bf16.msra.mxu3 %v13055_v59  ;;  %v11016_v30 = vor.u32 %v13005_v21, %v11015_v19  ;;  %v13900_v31 = vunpack.c.l.bf16 %v13886_v17  ;;  %v872_v59 = vrot.slane %v13864_v58, 1  ;;  %v547_v21 = vrot.slane %v13947_v4, 7 }
  0x30   : > { %1354 = vst [vmem:[#allocation2 + $0x700] sm:$0xf] %v765_v56  ;;  %3652 = vmatpush.bf16.msra.mxu1 %v13866_v60 }
  0x31   : > { %3796 = vmatpush.bf16.msra.mxu2 %v13874_v0  ;;  %1035 = vst [vmem:[#allocation2 + $0x8] sm:$0xf] %v13876_v1  ;;  %v587_v41 = vrot.slane %v13900_v31, 7  ;;  %v980_v63 = vsel %vm926_vm1, %v925_v51, %v872_v59 }
  0x32   : > { %1036 = vst [vmem:[#allocation2 + $0x2c] sm:$0xf] %v13882_v11  ;;  %3509 = vmatmul.bf16.vlgmr.msra.gmra.mxu0 %v10260_v18  ;;  %3614 = vmatmul.bf16.vlgmr.msra.gmra.mxu3 %v11016_v30  ;;  %v481_v30 = vld [vmem:[%s13766_s23 + $0xb0] sm:$0xf] }
  0x33   : > { %4077 = vmatpush.bf16.msrb.mxu0 %v13094_v12  ;;  %13458 = vmatpush.bf16.msrb.mxu3 %v13750_v2  ;;  %1196 = vst [vmem:[#allocation2 + $0x784] sm:$0xf] %v13818_v38  ;;  %v614_v38 = vsel %vm601_vm0, %v585_v34, %v586_v27  ;;  %v613_v45 = vsel %vm601_vm0, %v586_v27, %v587_v41  ;;  %v13954_v12 = vld [vmem:[%s13766_s23 + $0xac] sm:$0xf]  ;;  %v13972_v33 = vunpack.c.l.bf16 %v481_v30 }
  0x34   : > { %1248 = vst [vmem:[#allocation2 + $0x740] sm:$0xf] %v13876_v1  ;;  %v10261_v36 = vld [vmem:[#allocation2 + $0x24] sm:$0xf0]  ;;  %v700_v50 = vpack.c.bf16 %v614_v38, %v614_v38  ;;  %v701_v53 = vpack.c.bf16 %v613_v45, %v613_v45  ;;  %v13965_v32 = vunpack.c.l.bf16 %v13954_v12 }
  0x35   : > { %1249 = vst [vmem:[#allocation2 + $0x764] sm:$0xf] %v13882_v11  ;;  %v10264_v42 = vor.u32 %v12812_v35, %v10261_v36 }
  0x36   : > { %1407 = vst [vmem:[#allocation2 + $0x6e0] sm:$0xf] %v13876_v1 }
  0x37   : > { %13459 = vmatpush.bf16.msrb.mxu3 %v13757_v5  ;;  %1408 = vst [vmem:[#allocation2 + $0x704] sm:$0xf] %v13882_v11  ;;  %3653 = vmatmul.bf16.vlgmr.msra.gmra.mxu1 %v10264_v42  ;;  %v438_v5 = vld [vmem:[%s13766_s23 + $0x4] sm:$0xf]  ;;  %v13093_v42 = vld [vmem:[#allocation3 + $0x130] sm:$0xff] }
  0x38   : > { %v10267_v2 = vld [vmem:[#allocation2 + $0x8] sm:$0xf]  ;;  %712 = vst [vmem:[#allocation2 + $0x48] sm:$0xf] %v658_v16  ;;  %v13927_v34 = vunpack.c.l.bf16 %v438_v5  ;;  %4078 = vmatpush.bf16.msrb.mxu0 %v13093_v42 }
  0x39   : > { %v12817_v44 = vld [vmem:[#allocation2 + $0x28] sm:$0xf0]  ;;  %713 = vst [vmem:[#allocation2 + $0x6c] sm:$0xf] %v659_v37 }
  0x3a   : > { %v10268_v48 = vor.u32 %v12817_v44, %v10267_v2  ;;  %1089 = vst [vmem:[#allocation2 + $0xc] sm:$0xf] %v659_v37  ;;  %v546_v51 = vrot.slane %v13927_v34, 7 }
  0x3b   : > { %1142 = vst [vmem:[#allocation2 + $0x780] sm:$0xf] %v658_v16  ;;  %13460 = vmatpush.bf16.msrb.mxu3 %v13770_v9  ;;  %v873_v9 = vrot.slane %v13927_v34, 1 }
  0x3c   : > { %3797 = vmatmul.bf16.vlgmr.msra.gmra.mxu2 %v10268_v48  ;;  %1143 = vst [vmem:[#allocation2 + $0x10] sm:$0xf] %v13849_v52  ;;  %v766_v52 = vpack.c.bf16 %v13836_v43, %v13836_v43  ;;  %v13956_v43 = vpack.c.bf16 %v980_v63, %v980_v63  ;;  %v653_v35 = vsel %vm601_vm0, %v546_v51, %v547_v21 }
  0x3d   : > { %1301 = vst [vmem:[#allocation2 + $0x720] sm:$0xf] %v658_v16 }
  0x3e   : > { %1302 = vst [vmem:[#allocation2 + $0x744] sm:$0xf] %v659_v37 }
  0x3f   : > { %v10295_v56 = vld [vmem:[#allocation2 + $0x48] sm:$0xf]  ;;  %754 = vst [vmem:[#allocation2 + $0x630] sm:$0xf] %v700_v50  ;;  %13461 = vmatpush.bf16.msrb.mxu3 %v13786_v20  ;;  %v767_v20 = vpack.c.bf16 %v13864_v58, %v13864_v58  ;;  %v588_v58 = vrot.slane %v13965_v32, 7 }
  0x40   : > { %v12825_v57 = vld [vmem:[#allocation2 + $0x68] sm:$0xf0]  ;;  %755 = vst [vmem:[#allocation2 + $0x654] sm:$0xf] %v701_v53 }
  0x41   : > { %v10296_v61 = vor.u32 %v12825_v57, %v10295_v56  ;;  %1130 = vst [vmem:[#allocation2 + $0x5d0] sm:$0xf] %v700_v50  ;;  %v612_v38 = vsel %vm601_vm0, %v587_v41, %v588_v58  ;;  %v874_v56 = vrot.slane %v13947_v4, 1 }
  0x42   : > { %1131 = vst [vmem:[#allocation2 + $0x5f4] sm:$0xf] %v701_v53  ;;  %v702_v48 = vpack.c.bf16 %v612_v38, %v612_v38 }
  0x43   : > { %3514 = vmatmul.bf16.gmra.mxu0 %v10296_v61  ;;  %1184 = vst [vmem:[#allocation2 + $0x5d4] sm:$0xf] %v13880_v8  ;;  %13462 = vmatpush.bf16.msrb.mxu3 %v13822_v39  ;;  %v979_v39 = vsel %vm926_vm1, %v872_v59, %v873_v9  ;;  %v441_v59 = vld [vmem:[%s13766_s23 + $0x10] sm:$0xf]  ;;  %v768_v61 = vpack.c.bf16 %v13927_v34, %v13927_v34 }
  0x44   : > { %1185 = vst [vmem:[#allocation2 + $0x5f8] sm:$0xf] %v13886_v17  ;;  %v13960_v19 = vpack.c.bf16 %v979_v39, %v979_v39 }
  0x45   : > { %1289 = vst [vmem:[#allocation2 + $0x570] sm:$0xf] %v700_v50 }
  0x46   : > { %v11051_v8 = vld [vmem:[#allocation2 + $0x630] sm:$0xf]  ;;  %1290 = vst [vmem:[#allocation2 + $0x594] sm:$0xf] %v701_v53 }
  0x47   : > { %v13014_v17 = vld [vmem:[#allocation2 + $0x650] sm:$0xf0]  ;;  %820 = vst [vmem:[#allocation2 + $0x4c] sm:$0xf] %v766_v52  ;;  %13463 = vmatpush.bf16.msrb.mxu3 %v13840_v46  ;;  %v654_v46 = vsel %vm601_vm0, %v545_v13, %v546_v51  ;;  %v661_v13 = vpack.c.bf16 %v653_v35, %v653_v35  ;;  %v483_v51 = vld [vmem:[%s13766_s23 + $0xb8] sm:$0xf] }
  0x48   : > { %17691 = vst [vmem:[#allocation13_spill] sm:$0xff] %v13956_v43  ;;  %v11052_v18 = vor.u32 %v13014_v17, %v11051_v8  ;;  %v660_v27 = vpack.c.bf16 %v654_v46, %v654_v46 }
  0x49   : > { %821 = vst [vmem:[#allocation2 + $0x70] sm:$0xf] %v767_v20 }
  0x4a   : > { %17692 = vst [vmem:[#allocation14_spill] sm:$0xff] %v13960_v19  ;;  %3619 = vmatmul.bf16.gmra.mxu3 %v11052_v18 }
  0x4b   : > { %1355 = vst [vmem:[#allocation2 + $0x724] sm:$0xf] %v766_v52  ;;  %13464 = vmatpush.bf16.msrb.mxu3 %v13853_v54  ;;  %v589_v54 = vrot.slane %v13972_v33, 7  ;;  %v14015_v52 = vunpack.c.l.bf16 %v441_v59 }
  0x4c   : > { %1356 = vst [vmem:[#allocation2 + $0x748] sm:$0xf] %v767_v20 }
  0x4d   : > { %1037 = vst [vmem:[#allocation2 + $0x50] sm:$0xf] %v13956_v43  ;;  %v549_v17 = vrot.slane %v14015_v52, 7 }
  0x4e   : > { %1038 = vst [vmem:[#allocation2 + $0x74] sm:$0xf] %v13960_v19  ;;  %v12821_v16 = vld [vmem:[#allocation2 + $0x4c] sm:$0xf] }
  0x4f   : > { %1144 = vst [vmem:[#allocation2 + $0x34] sm:$0xf] %v438_v5  ;;  %13465 = vmatpush.bf16.msrb.mxu3 %v13866_v60  ;;  %v611_v60 = vsel %vm601_vm0, %v588_v58, %v589_v54 }
  0x50   : > { %1197 = vst [vmem:[#allocation2 + $0x14] sm:$0xf] %v13960_v19  ;;  %v10297_v36 = vld [vmem:[#allocation2 + $0x6c] sm:$0xf0]  ;;  %v703_v41 = vpack.c.bf16 %v611_v60, %v611_v60 }
  0x51   : > { %1250 = vst [vmem:[#allocation2 + $0x788] sm:$0xf] %v13956_v43  ;;  %v10300_v37 = vor.u32 %v12821_v16, %v10297_v36 }
  0x52   : > { %1409 = vst [vmem:[#allocation2 + $0x728] sm:$0xf] %v13956_v43 }
  0x53   : > { %13466 = vmatpush.bf16.msra.mxu3 %v13752_v3  ;;  %1410 = vst [vmem:[#allocation2 + $0x74c] sm:$0xf] %v13960_v19  ;;  %3658 = vmatmul.bf16.gmra.mxu1 %v10300_v37  ;;  %v440_v3 = vld [vmem:[%s13766_s23 + $0xc] sm:$0xf] }
  0x54   : > { %v10303_v2 = vld [vmem:[#allocation2 + $0x50] sm:$0xf]  ;;  %714 = vst [vmem:[#allocation2 + $0x90] sm:$0xf] %v660_v27  ;;  %v13999_v5 = vunpack.c.l.bf16 %v440_v3 }
  0x55   : > { %v12826_v44 = vld [vmem:[#allocation2 + $0x70] sm:$0xf0]  ;;  %715 = vst [vmem:[#allocation2 + $0xb4] sm:$0xf] %v661_v13 }
  0x56   : > { %v10304_v45 = vor.u32 %v12826_v44, %v10303_v2  ;;  %1090 = vst [vmem:[#allocation2 + $0x30] sm:$0xf] %v660_v27  ;;  %v548_v34 = vrot.slane %v13999_v5, 7  ;;  %v442_v2 = vld [vmem:[%s13766_s23 + $0x14] sm:$0xf] }
  0x57   : > { %1091 = vst [vmem:[#allocation2 + $0x54] sm:$0xf] %v661_v13  ;;  %13467 = vmatpush.bf16.msra.mxu3 %v13759_v6  ;;  %v875_v6 = vrot.slane %v13999_v5, 1 }
  0x58   : > { %3802 = vmatmul.bf16.gmra.mxu2 %v10304_v45  ;;  %1145 = vst [vmem:[#allocation2 + $0x58] sm:$0xf] %v13933_v62  ;;  %v978_v62 = vsel %vm926_vm1, %v873_v9, %v874_v56  ;;  %v651_v46 = vsel %vm601_vm0, %v548_v34, %v549_v17 }
  0x59   : > { %1303 = vst [vmem:[#allocation2 + $0x768] sm:$0xf] %v660_v27  ;;  %v977_v20 = vsel %vm926_vm1, %v874_v56, %v875_v6  ;;  %v14024_v8 = vpack.c.bf16 %v978_v62, %v978_v62 }
  0x5a   : > { %1304 = vst [vmem:[#allocation2 + $0x78c] sm:$0xf] %v661_v13 }
  0x5b   : > { %v10331_v50 = vld [vmem:[#allocation2 + $0x90] sm:$0xf]  ;;  %756 = vst [vmem:[#allocation2 + $0x678] sm:$0xf] %v702_v48  ;;  %13468 = vmatpush.bf16.msra.mxu3 %v13772_v10  ;;  %v769_v10 = vpack.c.bf16 %v13947_v4, %v13947_v4 }
  0x5c   : > { %v12834_v53 = vld [vmem:[#allocation2 + $0xb0] sm:$0xf0]  ;;  %757 = vst [vmem:[#allocation2 + $0x69c] sm:$0xf] %v703_v41 }
  0x5d   : > { %v10332_v57 = vor.u32 %v12834_v53, %v10331_v50  ;;  %1132 = vst [vmem:[#allocation2 + $0x618] sm:$0xf] %v702_v48  ;;  %v770_v50 = vpack.c.bf16 %v13999_v5, %v13999_v5  ;;  %v771_v53 = vpack.c.bf16 %v14015_v52, %v14015_v52 }
  0x5e   : > { %1133 = vst [vmem:[#allocation2 + $0x63c] sm:$0xf] %v703_v41 }
  0x5f   : > { %3519 = vmatmul.bf16.gmra.mxu0 %v10332_v57  ;;  %1186 = vst [vmem:[#allocation2 + $0x61c] sm:$0xf] %v13954_v12  ;;  %13469 = vmatpush.bf16.msra.mxu3 %v13795_v24  ;;  %v14022_v24 = vld [vmem:[%s13766_s23 + $0xb4] sm:$0xf]  ;;  %v14028_v12 = vpack.c.bf16 %v977_v20, %v977_v20 }
  0x60   : > { %1187 = vst [vmem:[#allocation2 + $0x640] sm:$0xf] %v481_v30  ;;  %v14033_v18 = vunpack.c.l.bf16 %v14022_v24  ;;  %v14040_v30 = vunpack.c.l.bf16 %v483_v51 }
  0x61   : > { %1291 = vst [vmem:[#allocation2 + $0x5b8] sm:$0xf] %v702_v48 }
  0x62   : > { %v11087_v63 = vld [vmem:[#allocation2 + $0x678] sm:$0xf]  ;;  %1292 = vst [vmem:[#allocation2 + $0x5dc] sm:$0xf] %v703_v41  ;;  %v590_v4 = vrot.slane %v14033_v18, 7 }
  0x63   : > { %v13023_v39 = vld [vmem:[#allocation2 + $0x698] sm:$0xf0]  ;;  %822 = vst [vmem:[#allocation2 + $0x94] sm:$0xf] %v768_v61  ;;  %13470 = vmatpush.bf16.msra.mxu3 %v13824_v40  ;;  %v652_v40 = vsel %vm601_vm0, %v547_v21, %v548_v34  ;;  %v663_v21 = vpack.c.bf16 %v651_v46, %v651_v46  ;;  %v443_v41 = vld [vmem:[%s13766_s23 + $0x18] sm:$0xf] }
  0x64   : > { %17693 = vst [vmem:[#allocation15_spill] sm:$0xff] %v14024_v8  ;;  %v11088_v9 = vor.u32 %v13023_v39, %v11087_v63  ;;  %v662_v16 = vpack.c.bf16 %v652_v40, %v652_v40  ;;  %v610_v13 = vsel %vm601_vm0, %v589_v54, %v590_v4  ;;  %v14065_v54 = vunpack.c.l.bf16 %v442_v2  ;;  %v485_v39 = vld [vmem:[%s13766_s23 + $0xc0] sm:$0xf] }
  0x65   : > { %823 = vst [vmem:[#allocation2 + $0xb8] sm:$0xf] %v769_v10  ;;  %v704_v38 = vpack.c.bf16 %v610_v13, %v610_v13  ;;  %v14079_v57 = vunpack.c.l.bf16 %v443_v41 }
  0x66   : > { %17694 = vst [vmem:[#allocation16_spill] sm:$0xff] %v14028_v12  ;;  %3624 = vmatmul.bf16.gmra.mxu3 %v11088_v9  ;;  %v877_v48 = vrot.slane %v14065_v54, 1  ;;  %v550_v5 = vrot.slane %v14065_v54, 7 }
  0x67   : > { %1357 = vst [vmem:[#allocation2 + $0x76c] sm:$0xf] %v768_v61  ;;  %13471 = vmatpush.bf16.msra.mxu3 %v13842_v47  ;;  %v591_v47 = vrot.slane %v14040_v30, 7 }
  0x68   : > { %1358 = vst [vmem:[#allocation2 + $0x790] sm:$0xf] %v769_v10  ;;  %v484_v10 = vld [vmem:[%s13766_s23 + $0xbc] sm:$0xf]  ;;  %v650_v9 = vsel %vm601_vm0, %v549_v17, %v550_v5 }
  0x69   : > { %1039 = vst [vmem:[#allocation2 + $0x98] sm:$0xf] %v14024_v8  ;;  %v14093_v34 = vunpack.c.l.bf16 %v484_v10 }
  0x6a   : > { %1040 = vst [vmem:[#allocation2 + $0xbc] sm:$0xf] %v14028_v12  ;;  %v12830_v35 = vld [vmem:[#allocation2 + $0x94] sm:$0xf] }
  0x6b   : > { %1146 = vst [vmem:[#allocation2 + $0x7c] sm:$0xf] %v440_v3  ;;  %13472 = vmatpush.bf16.msra.mxu3 %v13855_v55  ;;  %v609_v55 = vsel %vm601_vm0, %v590_v4, %v591_v47  ;;  %v876_v3 = vrot.slane %v14015_v52, 1 }
  0x6c   : > { %1198 = vst [vmem:[#allocation2 + $0x38] sm:$0xf] %v14024_v8  ;;  %v10333_v27 = vld [vmem:[#allocation2 + $0xb4] sm:$0xf0]  ;;  %v705_v44 = vpack.c.bf16 %v609_v55, %v609_v55  ;;  %v444_v55 = vld [vmem:[%s13766_s23 + $0x1c] sm:$0xf] }
  0x6d   : > { %1199 = vst [vmem:[#allocation2 + $0x5c] sm:$0xf] %v14028_v12  ;;  %v10336_v58 = vor.u32 %v12830_v35, %v10333_v27  ;;  %v976_v56 = vsel %vm926_vm1, %v875_v6, %v876_v3  ;;  %v664_v35 = vpack.c.bf16 %v650_v9, %v650_v9 }
  0x6e   : > { %1411 = vst [vmem:[#allocation2 + $0x770] sm:$0xf] %v14024_v8  ;;  %v14086_v20 = vpack.c.bf16 %v976_v56, %v976_v56 }
  0x6f   : > { %1412 = vst [vmem:[#allocation2 + $0x794] sm:$0xf] %v14028_v12  ;;  %3663 = vmatmul.bf16.gmra.mxu1 %v10336_v58  ;;  %13473 = vmatpush.bf16.msra.mxu3 %v13874_v0 }
  0x70   : > { %v10339_v36 = vld [vmem:[#allocation2 + $0x98] sm:$0xf]  ;;  %716 = vst [vmem:[#allocation2 + $0xd8] sm:$0xf] %v662_v16 }
  0x71   : > { %v12835_v37 = vld [vmem:[#allocation2 + $0xb8] sm:$0xf0]  ;;  %717 = vst [vmem:[#allocation2 + $0xfc] sm:$0xf] %v663_v21 }
  0x72   : > { %v10340_v42 = vor.u32 %v12835_v37, %v10339_v36  ;;  %1092 = vst [vmem:[#allocation2 + $0x78] sm:$0xf] %v662_v16 }
  0x73   : > { %1093 = vst [vmem:[#allocation2 + $0x9c] sm:$0xf] %v663_v21 }
  0x74   : > { %3807 = vmatmul.bf16.gmra.mxu2 %v10340_v42  ;;  %1147 = vst [vmem:[#allocation2 + $0xa0] sm:$0xf] %v441_v59  ;;  %v975_v59 = vsel %vm926_vm1, %v876_v3, %v877_v48 }
  0x75   : > { %1251 = vst [vmem:[#allocation2 + $0x18] sm:$0xf] %v662_v16  ;;  %v14089_v6 = vpack.c.bf16 %v975_v59, %v975_v59  ;;  %v592_v16 = vrot.slane %v14093_v34, 7 }
  0x76   : > { %1252 = vst [vmem:[#allocation2 + $0x3c] sm:$0xf] %v663_v21 }
  0x77   : > { %v10367_v60 = vld [vmem:[#allocation2 + $0xd8] sm:$0xf]  ;;  %758 = vst [vmem:[#allocation2 + $0x6c0] sm:$0xf] %v704_v38  ;;  %v608_v58 = vsel %vm601_vm0, %v591_v47, %v592_v16 }
  0x78   : > { %v12843_v45 = vld [vmem:[#allocation2 + $0xf8] sm:$0xf0]  ;;  %759 = vst [vmem:[#allocation2 + $0x6e4] sm:$0xf] %v705_v44  ;;  %v706_v42 = vpack.c.bf16 %v608_v58, %v608_v58 }
  0x79   : > { %v10368_v0 = vor.u32 %v12843_v45, %v10367_v60  ;;  %1134 = vst [vmem:[#allocation2 + $0x660] sm:$0xf] %v704_v38  ;;  %v878_v60 = vrot.slane %v14079_v57, 1 }
  0x7a   : > { %1135 = vst [vmem:[#allocation2 + $0x684] sm:$0xf] %v705_v44 }
  0x7b   : > { %3524 = vmatmul.bf16.gmra.mxu0 %v10368_v0  ;;  %1188 = vst [vmem:[#allocation2 + $0x664] sm:$0xf] %v14022_v24  ;;  %v551_v24 = vrot.slane %v14079_v57, 7  ;;  %v445_v0 = vld [vmem:[%s13766_s23 + $0x20] sm:$0xf] }
  0x7c   : > { %1189 = vst [vmem:[#allocation2 + $0x688] sm:$0xf] %v483_v51  ;;  %v14100_v51 = vunpack.c.l.bf16 %v485_v39  ;;  %v14135_v56 = vunpack.c.l.bf16 %v445_v0 }
  0x7d   : > { %1293 = vst [vmem:[#allocation2 + $0x600] sm:$0xf] %v704_v38  ;;  %v649_v40 = vsel %vm601_vm0, %v550_v5, %v551_v24  ;;  %v14122_v38 = vunpack.c.l.bf16 %v444_v55 }
  0x7e   : > { %v11123_v61 = vld [vmem:[#allocation2 + $0x6c0] sm:$0xf]  ;;  %1294 = vst [vmem:[#allocation2 + $0x624] sm:$0xf] %v705_v44  ;;  %v665_v17 = vpack.c.bf16 %v649_v40, %v649_v40  ;;  %v593_v4 = vrot.slane %v14100_v51, 7 }
  0x7f   : > { %v13032_v62 = vld [vmem:[#allocation2 + $0x6e0] sm:$0xf0]  ;;  %824 = vst [vmem:[#allocation2 + $0xdc] sm:$0xf] %v770_v50  ;;  %v879_v3 = vrot.slane %v14122_v38, 1 }
  0x80   : > { %17695 = vst [vmem:[#allocation17_spill] sm:$0xff] %v14086_v20  ;;  %v11124_v63 = vor.u32 %v13032_v62, %v11123_v61  ;;  %v607_v13 = vsel %vm601_vm0, %v592_v16, %v593_v4 }
  0x81   : > { %825 = vst [vmem:[#allocation2 + $0x100] sm:$0xf] %v771_v53  ;;  %v973_v59 = vsel %vm926_vm1, %v878_v60, %v879_v3 }
  0x82   : > { %17696 = vst [vmem:[#allocation18_spill] sm:$0xff] %v14089_v6  ;;  %3629 = vmatmul.bf16.gmra.mxu3 %v11124_v63 }
  0x83   : > { %1305 = vst [vmem:[#allocation2 + $0x1c] sm:$0xf] %v770_v50  ;;  %v773_v50 = vpack.c.bf16 %v14079_v57, %v14079_v57 }
  0x84   : > { %1306 = vst [vmem:[#allocation2 + $0x40] sm:$0xf] %v771_v53  ;;  %v974_v53 = vsel %vm926_vm1, %v877_v48, %v878_v60  ;;  %v14145_v48 = vpack.c.bf16 %v973_v59, %v973_v59 }
  0x85   : > { %1041 = vst [vmem:[#allocation2 + $0xe0] sm:$0xf] %v14086_v20  ;;  %v14142_v5 = vpack.c.bf16 %v974_v53, %v974_v53 }
  0x86   : > { %1042 = vst [vmem:[#allocation2 + $0x104] sm:$0xf] %v14089_v6  ;;  %v12839_v46 = vld [vmem:[#allocation2 + $0xdc] sm:$0xf] }
  0x87   : > { %1148 = vst [vmem:[#allocation2 + $0xc4] sm:$0xf] %v442_v2  ;;  %v707_v2 = vpack.c.bf16 %v607_v13, %v607_v13 }
  0x88   : > { %1200 = vst [vmem:[#allocation2 + $0x80] sm:$0xf] %v14086_v20  ;;  %v10369_v52 = vld [vmem:[#allocation2 + $0xfc] sm:$0xf0] }
  0x89   : > { %1201 = vst [vmem:[#allocation2 + $0xa4] sm:$0xf] %v14089_v6  ;;  %v10372_v27 = vor.u32 %v12839_v46, %v10369_v52 }
  0x8a   : > { %1359 = vst [vmem:[#allocation2 + $0x20] sm:$0xf] %v14086_v20  ;;  %v13101_v20 = vld [vmem:[#allocation3 + $0x170] sm:$0xff] }
  0x8b   : > { %1360 = vst [vmem:[#allocation2 + $0x44] sm:$0xf] %v14089_v6  ;;  %3668 = vmatmul.bf16.gmra.mxu1 %v10372_v27 }
  0x8c   : > { %v10375_v21 = vld [vmem:[#allocation2 + $0xe0] sm:$0xf]  ;;  %718 = vst [vmem:[#allocation2 + $0x120] sm:$0xf] %v664_v35 }
  0x8d   : > { %v12844_v36 = vld [vmem:[#allocation2 + $0x100] sm:$0xf0]  ;;  %719 = vst [vmem:[#allocation2 + $0x144] sm:$0xf] %v665_v17 }
  0x8e   : > { %v10376_v37 = vor.u32 %v12844_v36, %v10375_v21  ;;  %1094 = vst [vmem:[#allocation2 + $0xc0] sm:$0xf] %v664_v35  ;;  %v446_v36 = vld [vmem:[%s13766_s23 + $0x24] sm:$0xf] }
  0x8f   : > { %1095 = vst [vmem:[#allocation2 + $0xe4] sm:$0xf] %v665_v17 }
  0x90   : > { %3812 = vmatmul.bf16.gmra.mxu2 %v10376_v37  ;;  %1149 = vst [vmem:[#allocation2 + $0xe8] sm:$0xf] %v443_v41  ;;  %v772_v41 = vpack.c.bf16 %v14065_v54, %v14065_v54  ;;  %v552_v54 = vrot.slane %v14122_v38, 7 }
  0x91   : > { %1253 = vst [vmem:[#allocation2 + $0x60] sm:$0xf] %v664_v35 }
  0x92   : > { %1254 = vst [vmem:[#allocation2 + $0x84] sm:$0xf] %v665_v17  ;;  %v648_v40 = vsel %vm601_vm0, %v551_v24, %v552_v54  ;;  %v13092_v24 = vld [vmem:[#allocation3 + $0x128] sm:$0xff] }
  0x93   : > { %v10403_v47 = vld [vmem:[#allocation2 + $0x120] sm:$0xf]  ;;  %760 = vst [vmem:[#allocation2 + $0x708] sm:$0xf] %v706_v42  ;;  %v666_v16 = vpack.c.bf16 %v648_v40, %v648_v40  ;;  %4079 = vmatpush.bf16.msrb.mxu0 %v13092_v24 }
  0x94   : > { %v12852_v44 = vld [vmem:[#allocation2 + $0x140] sm:$0xf0]  ;;  %761 = vst [vmem:[#allocation2 + $0x72c] sm:$0xf] %v707_v2 }
  0x95   : > { %v10404_v45 = vor.u32 %v12852_v44, %v10403_v47  ;;  %1136 = vst [vmem:[#allocation2 + $0x6a8] sm:$0xf] %v706_v42  ;;  %v880_v44 = vrot.slane %v14135_v56, 1 }
  0x96   : > { %1137 = vst [vmem:[#allocation2 + $0x6cc] sm:$0xf] %v707_v2 }
  0x97   : > { %3529 = vmatmul.bf16.gmra.mxu0 %v10404_v45  ;;  %1190 = vst [vmem:[#allocation2 + $0x6ac] sm:$0xf] %v484_v10  ;;  %v486_v10 = vld [vmem:[%s13766_s23 + $0xc4] sm:$0xf]  ;;  %v972_v53 = vsel %vm926_vm1, %v879_v3, %v880_v44 }
  0x98   : > { %1191 = vst [vmem:[#allocation2 + $0x6d0] sm:$0xf] %v485_v39  ;;  %v553_v39 = vrot.slane %v14135_v56, 7  ;;  %v14148_v9 = vunpack.c.l.bf16 %v486_v10 }
  0x99   : > { %1295 = vst [vmem:[#allocation2 + $0x648] sm:$0xf] %v706_v42 }
  0x9a   : > { %v11159_v61 = vld [vmem:[#allocation2 + $0x708] sm:$0xf]  ;;  %1296 = vst [vmem:[#allocation2 + $0x66c] sm:$0xf] %v707_v2  ;;  %v647_v46 = vsel %vm601_vm0, %v552_v54, %v553_v39  ;;  %v594_v52 = vrot.slane %v14148_v9, 7  ;;  %v14174_v2 = vunpack.c.l.bf16 %v446_v36 }
  0x9b   : > { %v13041_v62 = vld [vmem:[#allocation2 + $0x728] sm:$0xf0]  ;;  %826 = vst [vmem:[#allocation2 + $0x124] sm:$0xf] %v772_v41  ;;  %v667_v57 = vpack.c.bf16 %v647_v46, %v647_v46 }
  0x9c   : > { %17697 = vst [vmem:[#allocation19_spill] sm:$0xff] %v14142_v5  ;;  %v11160_v63 = vor.u32 %v13041_v62, %v11159_v61  ;;  %v606_v58 = vsel %vm601_vm0, %v593_v4, %v594_v52  ;;  %v605_v37 = vsel %vm601_vm0, %v594_v52, %v595_v25  ;;  %v881_v60 = vrot.slane %v14174_v2, 1  ;;  %v447_v25 = vld [vmem:[%s13766_s23 + $0x28] sm:$0xf] }
  0x9d   : > { %827 = vst [vmem:[#allocation2 + $0x148] sm:$0xf] %v773_v50  ;;  %v708_v42 = vpack.c.bf16 %v606_v58, %v606_v58  ;;  %v709_v47 = vpack.c.bf16 %v605_v37, %v605_v37  ;;  %v14187_v59 = vunpack.c.l.bf16 %v447_v25  ;;  %v554_v54 = vrot.slane %v14174_v2, 7 }
  0x9e   : > { %17698 = vst [vmem:[#allocation20_spill] sm:$0xff] %v14145_v48  ;;  %3634 = vmatmul.bf16.gmra.mxu3 %v11160_v63  ;;  %v971_v61 = vsel %vm926_vm1, %v880_v44, %v881_v60 }
  0x9f   : > { %1307 = vst [vmem:[#allocation2 + $0x64] sm:$0xf] %v772_v41  ;;  %v555_v3 = vrot.slane %v14187_v59, 7  ;;  %v646_v46 = vsel %vm601_vm0, %v553_v39, %v554_v54  ;;  %v448_v39 = vld [vmem:[%s13766_s23 + $0x2c] sm:$0xf]  ;;  %v882_v37 = vrot.slane %v14187_v59, 1 }
  0xa0   : > { %1308 = vst [vmem:[#allocation2 + $0x88] sm:$0xf] %v773_v50  ;;  %v774_v50 = vpack.c.bf16 %v14122_v38, %v14122_v38  ;;  %v14196_v38 = vpack.c.bf16 %v971_v61, %v971_v61  ;;  %v668_v52 = vpack.c.bf16 %v646_v46, %v646_v46 }
  0xa1   : > { %1043 = vst [vmem:[#allocation2 + $0x128] sm:$0xf] %v14142_v5 }
  0xa2   : > { %1044 = vst [vmem:[#allocation2 + $0x14c] sm:$0xf] %v14145_v48  ;;  %v12848_v35 = vld [vmem:[#allocation2 + $0x124] sm:$0xf] }
  0xa3   : > { %1150 = vst [vmem:[#allocation2 + $0x10c] sm:$0xf] %v444_v55 }
  0xa4   : > { %1202 = vst [vmem:[#allocation2 + $0xc8] sm:$0xf] %v14142_v5  ;;  %v10405_v17 = vld [vmem:[#allocation2 + $0x144] sm:$0xf0] }
  0xa5   : > { %1203 = vst [vmem:[#allocation2 + $0xec] sm:$0xf] %v14145_v48  ;;  %v10408_v27 = vor.u32 %v12848_v35, %v10405_v17  ;;  %v645_v35 = vsel %vm601_vm0, %v554_v54, %v555_v3 }
  0xa6   : > { %1361 = vst [vmem:[#allocation2 + $0x68] sm:$0xf] %v14142_v5 }
  0xa7   : > { %1362 = vst [vmem:[#allocation2 + $0x8c] sm:$0xf] %v14145_v48  ;;  %3673 = vmatmul.bf16.gmra.mxu1 %v10408_v27  ;;  %v17626_v48 = vrot.slane %v13890_v26, 1 }
  0xa8   : > { %v10411_v21 = vld [vmem:[#allocation2 + $0x128] sm:$0xf]  ;;  %720 = vst [vmem:[#allocation2 + $0x168] sm:$0xf] %v666_v16 }
  0xa9   : > { %v12853_v13 = vld [vmem:[#allocation2 + $0x148] sm:$0xf0]  ;;  %721 = vst [vmem:[#allocation2 + $0x18c] sm:$0xf] %v667_v57 }
  0xaa   : > { %v10412_v55 = vor.u32 %v12853_v13, %v10411_v21  ;;  %1096 = vst [vmem:[#allocation2 + $0x108] sm:$0xf] %v666_v16  ;;  %v14214_v21 = vunpack.c.l.bf16 %v448_v39  ;;  %v777_v13 = vpack.c.bf16 %v14187_v59, %v14187_v59 }
  0xab   : > { %1097 = vst [vmem:[#allocation2 + $0x12c] sm:$0xf] %v667_v57 }
  0xac   : > { %3817 = vmatmul.bf16.gmra.mxu2 %v10412_v55  ;;  %1151 = vst [vmem:[#allocation2 + $0x130] sm:$0xf] %v445_v0  ;;  %v775_v0 = vpack.c.bf16 %v14135_v56, %v14135_v56  ;;  %v883_v55 = vrot.slane %v14214_v21, 1  ;;  %v556_v61 = vrot.slane %v14214_v21, 7 }
  0xad   : > { %1255 = vst [vmem:[#allocation2 + $0xa8] sm:$0xf] %v666_v16 }
  0xae   : > { %1256 = vst [vmem:[#allocation2 + $0xcc] sm:$0xf] %v667_v57  ;;  %v669_v57 = vpack.c.bf16 %v645_v35, %v645_v35 }
  0xaf   : > { %v10439_v4 = vld [vmem:[#allocation2 + $0x168] sm:$0xf]  ;;  %762 = vst [vmem:[#allocation2 + $0x750] sm:$0xf] %v708_v42  ;;  %v3510_v35 = vpop.f32.mrf.mxu0 }
  0xb0   : > { %v12861_v45 = vld [vmem:[#allocation2 + $0x188] sm:$0xf0]  ;;  %763 = vst [vmem:[#allocation2 + $0x774] sm:$0xf] %v709_v47 }
  0xb1   : > { %v10440_v41 = vor.u32 %v12861_v45, %v10439_v4  ;;  %1138 = vst [vmem:[#allocation2 + $0x6f0] sm:$0xf] %v708_v42  ;;  %v806_v4 = vpack.c.bf16 %v13791_v23, %v13791_v23  ;;  %v807_v45 = vpack.c.bf16 %v13800_v28, %v13800_v28 }
  0xb2   : > { %1139 = vst [vmem:[#allocation2 + $0x714] sm:$0xf] %v709_v47 }
  0xb3   : > { %3534 = vmatmul.bf16.gmra.mxu0 %v10440_v41  ;;  %1192 = vst [vmem:[#allocation2 + $0x6f4] sm:$0xf] %v486_v10  ;;  %v14193_v10 = vpack.c.bf16 %v972_v53, %v972_v53 }
  0xb4   : > { %1297 = vst [vmem:[#allocation2 + $0x690] sm:$0xf] %v708_v42  ;;  %v449_v42 = vld [vmem:[%s13766_s23 + $0x30] sm:$0xf] }
  0xb5   : > { %1298 = vst [vmem:[#allocation2 + $0x6b4] sm:$0xf] %v709_v47  ;;  %v14231_v41 = vunpack.c.l.bf16 %v449_v42 }
  0xb6   : > { %v11195_v62 = vld [vmem:[#allocation2 + $0x750] sm:$0xf]  ;;  %828 = vst [vmem:[#allocation2 + $0x16c] sm:$0xf] %v774_v50 }
  0xb7   : > { %17699 = vst [vmem:[#allocation21_spill] sm:$0xff] %v14193_v10  ;;  %v13050_v63 = vld [vmem:[#allocation2 + $0x770] sm:$0xf0] }
  0xb8   : > { %829 = vst [vmem:[#allocation2 + $0x190] sm:$0xf] %v775_v0  ;;  %v11196_v40 = vor.u32 %v13050_v63, %v11195_v62  ;;  %v644_v63 = vsel %vm601_vm0, %v555_v3, %v556_v61 }
  0xb9   : > { %17700 = vst [vmem:[#allocation22_spill] sm:$0xff] %v14196_v38  ;;  %v670_v59 = vpack.c.bf16 %v644_v63, %v644_v63 }
  0xba   : > { %1309 = vst [vmem:[#allocation2 + $0xac] sm:$0xf] %v774_v50  ;;  %3639 = vmatmul.bf16.gmra.mxu3 %v11196_v40 }
  0xbb   : > { %1310 = vst [vmem:[#allocation2 + $0xd0] sm:$0xf] %v775_v0  ;;  %v969_v0 = vsel %vm926_vm1, %v882_v37, %v883_v55 }
  0xbc   : > { %1045 = vst [vmem:[#allocation2 + $0x170] sm:$0xf] %v14193_v10 }
  0xbd   : > { %1046 = vst [vmem:[#allocation2 + $0x194] sm:$0xf] %v14196_v38  ;;  %v12857_v16 = vld [vmem:[#allocation2 + $0x16c] sm:$0xf] }
  0xbe   : > { %1152 = vst [vmem:[#allocation2 + $0x154] sm:$0xf] %v446_v36  ;;  %v776_v36 = vpack.c.bf16 %v14174_v2, %v14174_v2  ;;  %v14240_v2 = vpack.c.bf16 %v969_v0, %v969_v0 }
  0xbf   : > { %1204 = vst [vmem:[#allocation2 + $0x110] sm:$0xf] %v14193_v10  ;;  %v10441_v17 = vld [vmem:[#allocation2 + $0x18c] sm:$0xf0] }
  0xc0   : > { %1205 = vst [vmem:[#allocation2 + $0x134] sm:$0xf] %v14196_v38  ;;  %v10444_v56 = vor.u32 %v12857_v16, %v10441_v17  ;;  %v3654_v16 = vpop.f32.mrf.mxu1 }
  0xc1   : > { %1363 = vst [vmem:[#allocation2 + $0xb0] sm:$0xf] %v14193_v10  ;;  %v3655_v17 = vadd.f32 %v3654_v16, %v3510_v35 }
  0xc2   : > { %1364 = vst [vmem:[#allocation2 + $0xd4] sm:$0xf] %v14196_v38  ;;  %3678 = vmatmul.bf16.gmra.mxu1 %v10444_v56 }
  0xc3   : > { %v10447_v24 = vld [vmem:[#allocation2 + $0x170] sm:$0xf]  ;;  %722 = vst [vmem:[#allocation2 + $0x1b0] sm:$0xf] %v668_v52 }
  0xc4   : > { %v12862_v27 = vld [vmem:[#allocation2 + $0x190] sm:$0xf0]  ;;  %723 = vst [vmem:[#allocation2 + $0x1d4] sm:$0xf] %v669_v57 }
  0xc5   : > { %v10448_v58 = vor.u32 %v12862_v27, %v10447_v24  ;;  %1098 = vst [vmem:[#allocation2 + $0x150] sm:$0xf] %v668_v52  ;;  %v450_v27 = vld [vmem:[%s13766_s23 + $0x34] sm:$0xf] }
  0xc6   : > { %1099 = vst [vmem:[#allocation2 + $0x174] sm:$0xf] %v669_v57 }
  0xc7   : > { %3822 = vmatmul.bf16.gmra.mxu2 %v10448_v58  ;;  %1153 = vst [vmem:[#allocation2 + $0x178] sm:$0xf] %v447_v25  ;;  %v970_v25 = vsel %vm926_vm1, %v881_v60, %v882_v37  ;;  %v557_v60 = vrot.slane %v14231_v41, 7  ;;  %v778_v37 = vpack.c.bf16 %v14214_v21, %v14214_v21 }
  0xc8   : > { %1257 = vst [vmem:[#allocation2 + $0xf0] sm:$0xf] %v668_v52  ;;  %v14237_v53 = vpack.c.bf16 %v970_v25, %v970_v25  ;;  %v13091_v52 = vld [vmem:[#allocation3 + $0x120] sm:$0xff] }
  0xc9   : > { %1258 = vst [vmem:[#allocation2 + $0x114] sm:$0xf] %v669_v57  ;;  %v643_v46 = vsel %vm601_vm0, %v556_v61, %v557_v60  ;;  %4080 = vmatpush.bf16.msrb.mxu0 %v13091_v52 }
  0xca   : > { %v10475_v47 = vld [vmem:[#allocation2 + $0x1b0] sm:$0xf]  ;;  %830 = vst [vmem:[#allocation2 + $0x1b4] sm:$0xf] %v776_v36  ;;  %v671_v56 = vpack.c.bf16 %v643_v46, %v643_v46 }
  0xcb   : > { %v12870_v44 = vld [vmem:[#allocation2 + $0x1d0] sm:$0xf0]  ;;  %831 = vst [vmem:[#allocation2 + $0x1d8] sm:$0xf] %v777_v13 }
  0xcc   : > { %v10476_v50 = vor.u32 %v12870_v44, %v10475_v47  ;;  %1311 = vst [vmem:[#allocation2 + $0xf4] sm:$0xf] %v776_v36  ;;  %v14258_v36 = vunpack.c.l.bf16 %v450_v27  ;;  %v779_v47 = vpack.c.bf16 %v14231_v41, %v14231_v41 }
  0xcd   : > { %1312 = vst [vmem:[#allocation2 + $0x118] sm:$0xf] %v777_v13 }
  0xce   : > { %3539 = vmatmul.bf16.gmra.mxu0 %v10476_v50  ;;  %860 = vst [vmem:[#allocation2 + $0x5ec] sm:$0xf] %v806_v4  ;;  %v885_v44 = vrot.slane %v14258_v36, 1  ;;  %v808_v50 = vpack.c.bf16 %v13890_v26, %v13890_v26  ;;  %v558_v46 = vrot.slane %v14258_v36, 7 }
  0xcf   : > { %17701 = vst [vmem:[#allocation23_spill] sm:$0xff] %v14237_v53 }
  0xd0   : > { %861 = vst [vmem:[#allocation2 + $0x610] sm:$0xf] %v807_v45  ;;  %v642_v52 = vsel %vm601_vm0, %v557_v60, %v558_v46 }
  0xd1   : > { %17702 = vst [vmem:[#allocation24_spill] sm:$0xff] %v14240_v2  ;;  %v12866_v62 = vld [vmem:[#allocation2 + $0x1b4] sm:$0xf]  ;;  %v672_v60 = vpack.c.bf16 %v642_v52, %v642_v52 }
  0xd2   : > { %1341 = vst [vmem:[#allocation2 + $0x52c] sm:$0xf] %v806_v4  ;;  %v10477_v54 = vld [vmem:[#allocation2 + $0x1d4] sm:$0xf0]  ;;  %v884_v4 = vrot.slane %v14231_v41, 1 }
  0xd3   : > { %1342 = vst [vmem:[#allocation2 + $0x550] sm:$0xf] %v807_v45  ;;  %v10480_v40 = vor.u32 %v12866_v62, %v10477_v54  ;;  %v451_v45 = vld [vmem:[%s13766_s23 + $0x38] sm:$0xf] }
  0xd4   : > { %1047 = vst [vmem:[#allocation2 + $0x1b8] sm:$0xf] %v14237_v53  ;;  %v968_v61 = vsel %vm926_vm1, %v883_v55, %v884_v4  ;;  %v14275_v62 = vunpack.c.l.bf16 %v451_v45  ;;  %v967_v63 = vsel %vm926_vm1, %v884_v4, %v885_v44 }
  0xd5   : > { %1048 = vst [vmem:[#allocation2 + $0x1dc] sm:$0xf] %v14240_v2  ;;  %3683 = vmatmul.bf16.gmra.mxu1 %v10480_v40  ;;  %v13001_v57 = vld [vmem:[#allocation2 + $0x5ec] sm:$0xf]  ;;  %v14281_v40 = vpack.c.bf16 %v968_v61, %v968_v61  ;;  %v14284_v21 = vpack.c.bf16 %v967_v63, %v967_v63 }
  0xd6   : > { %1154 = vst [vmem:[#allocation2 + $0x19c] sm:$0xf] %v448_v39  ;;  %v559_v55 = vrot.slane %v14275_v62, 7  ;;  %v781_v61 = vpack.c.bf16 %v14275_v62, %v14275_v62 }
  0xd7   : > { %1206 = vst [vmem:[#allocation2 + $0x158] sm:$0xf] %v14237_v53  ;;  %v11017_v3 = vld [vmem:[#allocation2 + $0x60c] sm:$0xf0] }
  0xd8   : > { %1207 = vst [vmem:[#allocation2 + $0x17c] sm:$0xf] %v14240_v2  ;;  %v11020_v24 = vor.u32 %v13001_v57, %v11017_v3  ;;  %v3798_v3 = vpop.f32.mrf.mxu2 }
  0xd9   : > { %1365 = vst [vmem:[#allocation2 + $0xf8] sm:$0xf] %v14237_v53 }
  0xda   : > { %1366 = vst [vmem:[#allocation2 + $0x11c] sm:$0xf] %v14240_v2  ;;  %3758 = vmatmul.bf16.vlgmr.msrb.gmra.mxu3 %v11020_v24  ;;  %v14299_v24 = vpop.f32.mrf.mxu0 }
  0xdb   : > { %v10483_v39 = vld [vmem:[#allocation2 + $0x1b8] sm:$0xf]  ;;  %724 = vst [vmem:[#allocation2 + $0x1f8] sm:$0xf] %v670_v59 }
  0xdc   : > { %v12871_v58 = vld [vmem:[#allocation2 + $0x1d8] sm:$0xf0]  ;;  %725 = vst [vmem:[#allocation2 + $0x21c] sm:$0xf] %v671_v56 }
  0xdd   : > { %v10484_v13 = vor.u32 %v12871_v58, %v10483_v39  ;;  %1100 = vst [vmem:[#allocation2 + $0x198] sm:$0xf] %v670_v59  ;;  %v14301_v39 = vpop.f32.mrf.mxu1 }
  0xde   : > { %1101 = vst [vmem:[#allocation2 + $0x1bc] sm:$0xf] %v671_v56 }
  0xdf   : > { %3827 = vmatmul.bf16.gmra.mxu2 %v10484_v13  ;;  %1155 = vst [vmem:[#allocation2 + $0x1c0] sm:$0xf] %v449_v42  ;;  %v809_v42 = vpack.c.bf16 %v13900_v31, %v13900_v31 }
  0xe0   : > { %1259 = vst [vmem:[#allocation2 + $0x138] sm:$0xf] %v670_v59  ;;  %v641_v59 = vsel %vm601_vm0, %v558_v46, %v559_v55 }
  0xe1   : > { %1260 = vst [vmem:[#allocation2 + $0x15c] sm:$0xf] %v671_v56  ;;  %v14297_v56 = vadd.f32 %v3798_v3, %v3655_v17  ;;  %v673_v13 = vpack.c.bf16 %v641_v59, %v641_v59 }
  0xe2   : > { %v10511_v25 = vld [vmem:[#allocation2 + $0x1f8] sm:$0xf]  ;;  %832 = vst [vmem:[#allocation2 + $0x1fc] sm:$0xf] %v778_v37 }
  0xe3   : > { %v12879_v0 = vld [vmem:[#allocation2 + $0x218] sm:$0xf0]  ;;  %833 = vst [vmem:[#allocation2 + $0x220] sm:$0xf] %v779_v47 }
  0xe4   : > { %v10512_v54 = vor.u32 %v12879_v0, %v10511_v25  ;;  %1313 = vst [vmem:[#allocation2 + $0x13c] sm:$0xf] %v778_v37  ;;  %v3515_v0 = vpop.f32.mrf.mxu0 }
  0xe5   : > { %1314 = vst [vmem:[#allocation2 + $0x160] sm:$0xf] %v779_v47  ;;  %v452_v47 = vld [vmem:[%s13766_s23 + $0x3c] sm:$0xf] }
  0xe6   : > { %3544 = vmatmul.bf16.gmra.mxu0 %v10512_v54  ;;  %862 = vst [vmem:[#allocation2 + $0x634] sm:$0xf] %v808_v50  ;;  %v14308_v4 = vunpack.c.l.bf16 %v452_v47  ;;  %v886_v54 = vrot.slane %v14275_v62, 1 }
  0xe7   : > { %17703 = vst [vmem:[#allocation25_spill] sm:$0xff] %v14281_v40 }
  0xe8   : > { %863 = vst [vmem:[#allocation2 + $0x658] sm:$0xf] %v809_v42  ;;  %v887_v46 = vrot.slane %v14308_v4, 1  ;;  %v966_v3 = vsel %vm926_vm1, %v885_v44, %v886_v54 }
  0xe9   : > { %17704 = vst [vmem:[#allocation26_spill] sm:$0xff] %v14284_v21  ;;  %v12875_v35 = vld [vmem:[#allocation2 + $0x1fc] sm:$0xf] }
  0xea   : > { %1343 = vst [vmem:[#allocation2 + $0x574] sm:$0xf] %v808_v50  ;;  %v10513_v16 = vld [vmem:[#allocation2 + $0x21c] sm:$0xf0]  ;;  %v780_v50 = vpack.c.bf16 %v14258_v36, %v14258_v36 }
  0xeb   : > { %1344 = vst [vmem:[#allocation2 + $0x598] sm:$0xf] %v809_v42  ;;  %v10516_v57 = vor.u32 %v12875_v35, %v10513_v16  ;;  %v3659_v42 = vpop.f32.mrf.mxu1  ;;  %v453_v35 = vld [vmem:[%s13766_s23 + $0x40] sm:$0xf]  ;;  %v14317_v16 = vpop.f32.mrf.mxu2 }
  0xec   : > { %1049 = vst [vmem:[#allocation2 + $0x200] sm:$0xf] %v14281_v40  ;;  %v3660_v63 = vadd.f32 %v3659_v42, %v3515_v0 }
  0xed   : > { %1050 = vst [vmem:[#allocation2 + $0x224] sm:$0xf] %v14284_v21  ;;  %3688 = vmatmul.bf16.gmra.mxu1 %v10516_v57  ;;  %v13010_v41 = vld [vmem:[#allocation2 + $0x634] sm:$0xf]  ;;  %v810_v57 = vpack.c.bf16 %v13965_v32, %v13965_v32 }
  0xee   : > { %1156 = vst [vmem:[#allocation2 + $0x1e4] sm:$0xf] %v450_v27 }
  0xef   : > { %1208 = vst [vmem:[#allocation2 + $0x1a0] sm:$0xf] %v14281_v40  ;;  %v11053_v58 = vld [vmem:[#allocation2 + $0x654] sm:$0xf0] }
  0xf0   : > { %1209 = vst [vmem:[#allocation2 + $0x1c4] sm:$0xf] %v14284_v21  ;;  %v11056_v37 = vor.u32 %v13010_v41, %v11053_v58  ;;  %v14327_v41 = vunpack.c.l.bf16 %v453_v35  ;;  %v965_v58 = vsel %vm926_vm1, %v886_v54, %v887_v46  ;;  %v14351_v54 = vpop.f32.mrf.mxu0 }
  0xf1   : > { %1367 = vst [vmem:[#allocation2 + $0x140] sm:$0xf] %v14281_v40  ;;  %v14336_v36 = vpack.c.bf16 %v965_v58, %v965_v58 }
  0xf2   : > { %1368 = vst [vmem:[#allocation2 + $0x164] sm:$0xf] %v14284_v21  ;;  %3763 = vmatmul.bf16.gmra.mxu3 %v11056_v37  ;;  %v560_v37 = vrot.slane %v14308_v4, 7  ;;  %v17595_v44 = vrot.slane %v14327_v41, 7 }
  0xf3   : > { %v10519_v17 = vld [vmem:[#allocation2 + $0x200] sm:$0xf]  ;;  %726 = vst [vmem:[#allocation2 + $0x240] sm:$0xf] %v672_v60  ;;  %v3803_v42 = vpop.f32.mrf.mxu2 }
  0xf4   : > { %v12880_v27 = vld [vmem:[#allocation2 + $0x220] sm:$0xf0]  ;;  %727 = vst [vmem:[#allocation2 + $0x264] sm:$0xf] %v673_v13  ;;  %v639_v0 = vsel %vm601_vm0, %v560_v37, %v17595_v44 }
  0xf5   : > { %v10520_v25 = vor.u32 %v12880_v27, %v10519_v17  ;;  %1102 = vst [vmem:[#allocation2 + $0x1e0] sm:$0xf] %v672_v60 }
  0xf6   : > { %1103 = vst [vmem:[#allocation2 + $0x204] sm:$0xf] %v673_v13 }
  0xf7   : > { %3832 = vmatmul.bf16.gmra.mxu2 %v10520_v25  ;;  %1157 = vst [vmem:[#allocation2 + $0x208] sm:$0xf] %v451_v45  ;;  %v811_v45 = vpack.c.bf16 %v13972_v33, %v13972_v33  ;;  %v640_v25 = vsel %vm601_vm0, %v559_v55, %v560_v37  ;;  %v14362_v37 = vpop.f32.mrf.mxu3 }
  0xf8   : > { %1261 = vst [vmem:[#allocation2 + $0x180] sm:$0xf] %v672_v60  ;;  %v674_v55 = vpack.c.bf16 %v640_v25, %v640_v25 }
  0xf9   : > { %1262 = vst [vmem:[#allocation2 + $0x1a4] sm:$0xf] %v673_v13  ;;  %v14333_v13 = vpack.c.bf16 %v966_v3, %v966_v3  ;;  %v454_v3 = vld [vmem:[%s13766_s23 + $0x44] sm:$0xf] }
  0xfa   : > { %v10547_v52 = vld [vmem:[#allocation2 + $0x240] sm:$0xf]  ;;  %834 = vst [vmem:[#allocation2 + $0x244] sm:$0xf] %v780_v50 }
  0xfb   : > { %v12888_v59 = vld [vmem:[#allocation2 + $0x260] sm:$0xf0]  ;;  %835 = vst [vmem:[#allocation2 + $0x268] sm:$0xf] %v781_v61 }
  0xfc   : > { %v10548_v60 = vor.u32 %v12888_v59, %v10547_v52  ;;  %1315 = vst [vmem:[#allocation2 + $0x184] sm:$0xf] %v780_v50  ;;  %v14353_v52 = vpop.f32.mrf.mxu1  ;;  %v675_v59 = vpack.c.bf16 %v639_v0, %v639_v0  ;;  %v888_v0 = vrot.slane %v14327_v41, 1 }
  0xfd   : > { %1316 = vst [vmem:[#allocation2 + $0x1a8] sm:$0xf] %v781_v61  ;;  %v14349_v61 = vadd.f32 %v3803_v42, %v3660_v63 }
  0xfe   : > { %3549 = vmatmul.bf16.gmra.mxu0 %v10548_v60  ;;  %864 = vst [vmem:[#allocation2 + $0x67c] sm:$0xf] %v810_v57  ;;  %v14360_v60 = vunpack.c.l.bf16 %v454_v3 }
  0xff   : > { %17705 = vst [vmem:[#allocation27_spill] sm:$0xff] %v14333_v13  ;;  %v14396_v44 = vpop.f32.mrf.mxu3 }
 0x100   : > { %865 = vst [vmem:[#allocation2 + $0x6a0] sm:$0xf] %v811_v45  ;;  %v17711_v11 = vrot.slane %v14360_v60, 1 }
 0x101   : > { %17706 = vst [vmem:[#allocation28_spill] sm:$0xff] %v14336_v36  ;;  %v12884_v17 = vld [vmem:[#allocation2 + $0x244] sm:$0xf] }
 0x102   : > { %1345 = vst [vmem:[#allocation2 + $0x5bc] sm:$0xf] %v810_v57  ;;  %v10549_v27 = vld [vmem:[#allocation2 + $0x264] sm:$0xf0] }
 0x103   : > { %1346 = vst [vmem:[#allocation2 + $0x5e0] sm:$0xf] %v811_v45  ;;  %v10552_v50 = vor.u32 %v12884_v17, %v10549_v27  ;;  %v782_v17 = vpack.c.bf16 %v14308_v4, %v14308_v4  ;;  %v3520_v27 = vpop.f32.mrf.mxu0  ;;  %v562_v4 = vrot.slane %v14360_v60, 7 }
 0x104   : > { %1051 = vst [vmem:[#allocation2 + $0x248] sm:$0xf] %v14333_v13  ;;  %v3664_v25 = vpop.f32.mrf.mxu1 }
 0x105   : > { %1052 = vst [vmem:[#allocation2 + $0x26c] sm:$0xf] %v14336_v36  ;;  %3693 = vmatmul.bf16.gmra.mxu1 %v10552_v50  ;;  %v13019_v62 = vld [vmem:[#allocation2 + $0x67c] sm:$0xf]  ;;  %v783_v50 = vpack.c.bf16 %v14327_v41, %v14327_v41  ;;  %v3665_v42 = vadd.f32 %v3664_v25, %v3520_v27 }
 0x106   : > { %1158 = vst [vmem:[#allocation2 + $0x22c] sm:$0xf] %v452_v47 }
 0x107   : > { %1210 = vst [vmem:[#allocation2 + $0x1e8] sm:$0xf] %v14333_v13  ;;  %v11089_v57 = vld [vmem:[#allocation2 + $0x69c] sm:$0xf0] }
 0x108   : > { %1211 = vst [vmem:[#allocation2 + $0x20c] sm:$0xf] %v14336_v36  ;;  %v11092_v45 = vor.u32 %v13019_v62, %v11089_v57  ;;  %v17596_v62 = vrot.slane %v14360_v60, 1  ;;  %v14371_v57 = vld [vmem:[%s13766_s23 + $0x48] sm:$0xf] }
 0x109   : > { %1369 = vst [vmem:[#allocation2 + $0x188] sm:$0xf] %v14333_v13  ;;  %v14384_v27 = vunpack.c.l.bf16 %v14371_v57 }
 0x10a   : > { %1370 = vst [vmem:[#allocation2 + $0x1ac] sm:$0xf] %v14336_v36  ;;  %3768 = vmatmul.bf16.gmra.mxu3 %v11092_v45  ;;  %v14373_v45 = vpop.f32.mrf.mxu2  ;;  %v963_v25 = vsel %vm926_vm1, %v888_v0, %v17596_v62  ;;  %v459_v36 = vld [vmem:[%s13766_s23 + $0x58] sm:$0xf] }
 0x10b   : > { %v10555_v47 = vld [vmem:[#allocation2 + $0x248] sm:$0xf]  ;;  %728 = vst [vmem:[#allocation2 + $0x288] sm:$0xf] %v674_v55  ;;  %v14393_v49 = vpack.c.bf16 %v963_v25, %v963_v25  ;;  %v13110_v25 = vld [vmem:[#allocation3 + $0x1b8] sm:$0xff] }
 0x10c   : > { %v12889_v63 = vld [vmem:[#allocation2 + $0x268] sm:$0xf0]  ;;  %729 = vst [vmem:[#allocation2 + $0x2ac] sm:$0xf] %v675_v59  ;;  %v14412_v12 = vpop.f32.mrf.mxu1  ;;  %4365 = vmatpush.bf16.msrb.mxu2 %v13110_v25 }
 0x10d   : > { %v10556_v58 = vor.u32 %v12889_v63, %v10555_v47  ;;  %1104 = vst [vmem:[#allocation2 + $0x228] sm:$0xf] %v674_v55  ;;  %v812_v63 = vpack.c.bf16 %v14033_v18, %v14033_v18 }
 0x10e   : > { %1105 = vst [vmem:[#allocation2 + $0x24c] sm:$0xf] %v675_v59 }
 0x10f   : > { %3837 = vmatmul.bf16.gmra.mxu2 %v10556_v58  ;;  %1159 = vst [vmem:[#allocation2 + $0x250] sm:$0xf] %v453_v35  ;;  %v813_v58 = vpack.c.bf16 %v14040_v30, %v14040_v30 }
 0x110   : > { %1263 = vst [vmem:[#allocation2 + $0x1c8] sm:$0xf] %v674_v55  ;;  %v964_v55 = vsel %vm926_vm1, %v887_v46, %v888_v0  ;;  %v17598_v46 = vrot.slane %v14384_v27, 7 }
 0x111   : > { %1264 = vst [vmem:[#allocation2 + $0x1ec] sm:$0xf] %v675_v59  ;;  %v14390_v29 = vpack.c.bf16 %v964_v55, %v964_v55 }
 0x112   : > { %v10583_v47 = vld [vmem:[#allocation2 + $0x288] sm:$0xf]  ;;  %836 = vst [vmem:[#allocation2 + $0x28c] sm:$0xf] %v782_v17  ;;  %v637_v55 = vsel %vm601_vm0, %v562_v4, %v17598_v46  ;;  %v14419_v46 = vpop.f32.mrf.mxu3 }
 0x113   : > { %v12897_v35 = vld [vmem:[#allocation2 + $0x2a8] sm:$0xf0]  ;;  %837 = vst [vmem:[#allocation2 + $0x2b0] sm:$0xf] %v783_v50 }
 0x114   : > { %v10584_v59 = vor.u32 %v12897_v35, %v10583_v47  ;;  %1317 = vst [vmem:[#allocation2 + $0x1cc] sm:$0xf] %v782_v17 }
 0x115   : > { %1318 = vst [vmem:[#allocation2 + $0x1f0] sm:$0xf] %v783_v50  ;;  %v17710_v50 = vrot.slane %v14327_v41, 7  ;;  %v14410_v41 = vpop.f32.mrf.mxu0 }
 0x116   : > { %3554 = vmatmul.bf16.gmra.mxu0 %v10584_v59  ;;  %866 = vst [vmem:[#allocation2 + $0x6c4] sm:$0xf] %v812_v63  ;;  %v3808_v59 = vpop.f32.mrf.mxu2 }
 0x117   : > { %17707 = vst [vmem:[#allocation29_spill] sm:$0xff] %v14390_v29  ;;  %v638_v0 = vsel %vm601_vm0, %v17710_v50, %v562_v4  ;;  %v14408_v62 = vadd.f32 %v3808_v59, %v3665_v42  ;;  %v677_v4 = vpack.c.bf16 %v637_v55, %v637_v55  ;;  %v456_v42 = vld [vmem:[%s13766_s23 + $0x4c] sm:$0xf]  ;;  %v784_v55 = vpack.c.bf16 %v14360_v60, %v14360_v60 }
 0x118   : > { %867 = vst [vmem:[#allocation2 + $0x6e8] sm:$0xf] %v813_v58 }
 0x119   : > { %17708 = vst [vmem:[#allocation30_spill] sm:$0xff] %v14393_v49  ;;  %v12893_v17 = vld [vmem:[#allocation2 + $0x28c] sm:$0xf] }
 0x11a   : > { %17709 = vst [vmem:[#allocation31_spill] sm:$0xff] %v14396_v44  ;;  %v10585_v47 = vld [vmem:[#allocation2 + $0x2ac] sm:$0xf0]  ;;  %v14447_v1 = vpop.f32.mrf.mxu3 }
 0x11b   : > { %1347 = vst [vmem:[#allocation2 + $0x604] sm:$0xf] %v812_v63  ;;  %v10588_v35 = vor.u32 %v12893_v17, %v10585_v47  ;;  %v13090_v63 = vld [vmem:[#allocation3 + $0x118] sm:$0xff]  ;;  %v676_v47 = vpack.c.bf16 %v638_v0, %v638_v0  ;;  %v14421_v0 = vunpack.c.l.bf16 %v456_v42 }
 0x11c   : > { %1348 = vst [vmem:[#allocation2 + $0x628] sm:$0xf] %v813_v58  ;;  %v13102_v58 = vld [vmem:[#allocation3 + $0x178] sm:$0xff]  ;;  %4081 = vmatpush.bf16.msrb.mxu0 %v13090_v63 }
 0x11d   : > { %1053 = vst [vmem:[#allocation2 + $0x290] sm:$0xf] %v14390_v29  ;;  %3698 = vmatmul.bf16.gmra.mxu1 %v10588_v35  ;;  %v13028_v17 = vld [vmem:[#allocation2 + $0x6c4] sm:$0xf]  ;;  %v3525_v25 = vpop.f32.mrf.mxu0  ;;  %v17605_v8 = vrot.slane %v14421_v0, 1  ;;  %v564_v60 = vrot.slane %v14421_v0, 7 }
 0x11e   : > { %1054 = vst [vmem:[#allocation2 + $0x2b4] sm:$0xf] %v14393_v49  ;;  %4221 = vmatpush.bf16.msrb.mxu1 %v13102_v58  ;;  %v3669_v58 = vpop.f32.mrf.mxu1 }
 0x11f   : > { %1160 = vst [vmem:[#allocation2 + $0x274] sm:$0xf] %v454_v3  ;;  %v11125_v50 = vld [vmem:[#allocation2 + $0x6e4] sm:$0xf0] }
 0x120   : > { %1212 = vst [vmem:[#allocation2 + $0x230] sm:$0xf] %v14390_v29  ;;  %v11128_v3 = vor.u32 %v13028_v17, %v11125_v50  ;;  %v785_v17 = vpack.c.bf16 %v14384_v27, %v14384_v27  ;;  %v890_v50 = vrot.slane %v14384_v27, 1 }
 0x121   : > { %1213 = vst [vmem:[#allocation2 + $0x254] sm:$0xf] %v14393_v49 }
 0x122   : > { %1371 = vst [vmem:[#allocation2 + $0x1d0] sm:$0xf] %v14390_v29  ;;  %3773 = vmatmul.bf16.gmra.mxu3 %v11128_v3  ;;  %v3670_v3 = vadd.f32 %v3669_v58, %v3525_v25  ;;  %v961_v58 = vsel %vm926_vm1, %v890_v50, %v17605_v8  ;;  %4222 = vmatpush.bf16.msrb.mxu1 %v13101_v20 }
 0x123   : > { %1372 = vst [vmem:[#allocation2 + $0x1f4] sm:$0xf] %v14393_v49 }
 0x124   : > { %v10591_v59 = vld [vmem:[#allocation2 + $0x290] sm:$0xf]  ;;  %730 = vst [vmem:[#allocation2 + $0x2d0] sm:$0xf] %v676_v47 }
 0x125   : > { %v12898_v35 = vld [vmem:[#allocation2 + $0x2b0] sm:$0xf0]  ;;  %731 = vst [vmem:[#allocation2 + $0x2f4] sm:$0xf] %v677_v4 }
 0x126   : > { %v10592_v63 = vor.u32 %v12898_v35, %v10591_v59  ;;  %1106 = vst [vmem:[#allocation2 + $0x270] sm:$0xf] %v676_v47  ;;  %v457_v59 = vld [vmem:[%s13766_s23 + $0x50] sm:$0xf]  ;;  %v14431_v35 = vpop.f32.mrf.mxu2  ;;  %v14469_v8 = vpop.f32.mrf.mxu1 }
 0x127   : > { %1107 = vst [vmem:[#allocation2 + $0x294] sm:$0xf] %v677_v4  ;;  %v14441_v25 = vunpack.c.l.bf16 %v457_v59 }
 0x128   : > { %3842 = vmatmul.bf16.gmra.mxu2 %v10592_v63  ;;  %1161 = vst [vmem:[#allocation2 + $0x298] sm:$0xf] %v14371_v57  ;;  %v814_v63 = vpack.c.bf16 %v14093_v34, %v14093_v34  ;;  %v815_v57 = vpack.c.bf16 %v14100_v51, %v14100_v51 }
 0x129   : > { %1265 = vst [vmem:[#allocation2 + $0x210] sm:$0xf] %v676_v47  ;;  %v962_v47 = vsel %vm926_vm1, %v17711_v11, %v890_v50  ;;  %v14452_v11 = vpack.c.bf16 %v961_v58, %v961_v58  ;;  %v14467_v58 = vpop.f32.mrf.mxu0 }
 0x12a   : > { %1266 = vst [vmem:[#allocation2 + $0x234] sm:$0xf] %v677_v4  ;;  %v14449_v49 = vpack.c.bf16 %v962_v47, %v962_v47 }
 0x12b   : > { %v10619_v19 = vld [vmem:[#allocation2 + $0x2d0] sm:$0xf]  ;;  %838 = vst [vmem:[#allocation2 + $0x2d4] sm:$0xf] %v784_v55 }
 0x12c   : > { %v12906_v43 = vld [vmem:[#allocation2 + $0x2f0] sm:$0xf0]  ;;  %839 = vst [vmem:[#allocation2 + $0x2f8] sm:$0xf] %v785_v17 }
 0x12d   : > { %v10620_v4 = vor.u32 %v12906_v43, %v10619_v19  ;;  %1319 = vst [vmem:[#allocation2 + $0x214] sm:$0xf] %v784_v55  ;;  %v17607_v43 = vrot.slane %v14441_v25, 7 }
 0x12e   : > { %1320 = vst [vmem:[#allocation2 + $0x238] sm:$0xf] %v785_v17  ;;  %v17715_v17 = vrot.slane %v14384_v27, 7 }
 0x12f   : > { %17712 = vst [vmem:[#allocation32_spill] sm:$0xff] %v14447_v1  ;;  %3559 = vmatmul.bf16.gmra.mxu0 %v10620_v4  ;;  %v635_v4 = vsel %vm601_vm0, %v564_v60, %v17607_v43  ;;  %v892_v43 = vrot.slane %v14441_v25, 1 }
 0x130   : > { %868 = vst [vmem:[#allocation2 + $0x70c] sm:$0xf] %v814_v63  ;;  %v636_v50 = vsel %vm601_vm0, %v17715_v17, %v564_v60  ;;  %v679_v17 = vpack.c.bf16 %v635_v4, %v635_v4  ;;  %v458_v60 = vld [vmem:[%s13766_s23 + $0x54] sm:$0xf]  ;;  %v786_v4 = vpack.c.bf16 %v14421_v0, %v14421_v0 }
 0x131   : > { %17713 = vst [vmem:[#allocation33_spill] sm:$0xff] %v14449_v49 }
 0x132   : > { %869 = vst [vmem:[#allocation2 + $0x730] sm:$0xf] %v815_v57  ;;  %v12902_v19 = vld [vmem:[#allocation2 + $0x2d4] sm:$0xf] }
 0x133   : > { %17714 = vst [vmem:[#allocation34_spill] sm:$0xff] %v14452_v11  ;;  %v10621_v55 = vld [vmem:[#allocation2 + $0x2f4] sm:$0xf0] }
 0x134   : > { %1349 = vst [vmem:[#allocation2 + $0x64c] sm:$0xf] %v814_v63  ;;  %v10624_v47 = vor.u32 %v12902_v19, %v10621_v55  ;;  %v3813_v63 = vpop.f32.mrf.mxu2  ;;  %v678_v19 = vpack.c.bf16 %v636_v50, %v636_v50 }
 0x135   : > { %1350 = vst [vmem:[#allocation2 + $0x670] sm:$0xf] %v815_v57  ;;  %v14465_v57 = vadd.f32 %v3813_v63, %v3670_v3  ;;  %v14478_v63 = vunpack.c.l.bf16 %v458_v60 }
 0x136   : > { %1055 = vst [vmem:[#allocation2 + $0x2d8] sm:$0xf] %v14449_v49  ;;  %3703 = vmatmul.bf16.gmra.mxu1 %v10624_v47 }
 0x137   : > { %1056 = vst [vmem:[#allocation2 + $0x2fc] sm:$0xf] %v14452_v11  ;;  %v13037_v27 = vld [vmem:[#allocation2 + $0x70c] sm:$0xf] }
 0x138   : > { %1162 = vst [vmem:[#allocation2 + $0x2bc] sm:$0xf] %v456_v42  ;;  %v14476_v42 = vpop.f32.mrf.mxu3 }
 0x139   : > { %1214 = vst [vmem:[#allocation2 + $0x278] sm:$0xf] %v14449_v49  ;;  %v11161_v55 = vld [vmem:[#allocation2 + $0x72c] sm:$0xf0] }
 0x13a   : > { %1215 = vst [vmem:[#allocation2 + $0x29c] sm:$0xf] %v14452_v11  ;;  %v11164_v29 = vor.u32 %v13037_v27, %v11161_v55  ;;  %v3530_v27 = vpop.f32.mrf.mxu0  ;;  %v3674_v55 = vpop.f32.mrf.mxu1 }
 0x13b   : > { %1373 = vst [vmem:[#allocation2 + $0x218] sm:$0xf] %v14449_v49  ;;  %v17615_v49 = vrot.slane %v14478_v63, 1 }
 0x13c   : > { %1374 = vst [vmem:[#allocation2 + $0x23c] sm:$0xf] %v14452_v11  ;;  %3778 = vmatmul.bf16.gmra.mxu3 %v11164_v29  ;;  %v787_v29 = vpack.c.bf16 %v14441_v25, %v14441_v25  ;;  %v3675_v11 = vadd.f32 %v3674_v55, %v3530_v27  ;;  %v14503_v40 = vpop.f32.mrf.mxu2 }
 0x13d   : > { %v10627_v3 = vld [vmem:[#allocation2 + $0x2d8] sm:$0xf]  ;;  %732 = vst [vmem:[#allocation2 + $0x318] sm:$0xf] %v678_v19  ;;  %v959_v21 = vsel %vm926_vm1, %v892_v43, %v17615_v49 }
 0x13e   : > { %v12907_v47 = vld [vmem:[#allocation2 + $0x2f8] sm:$0xf0]  ;;  %733 = vst [vmem:[#allocation2 + $0x33c] sm:$0xf] %v679_v17  ;;  %v14508_v2 = vpack.c.bf16 %v959_v21, %v959_v21 }
 0x13f   : > { %v10628_v50 = vor.u32 %v12907_v47, %v10627_v3  ;;  %1108 = vst [vmem:[#allocation2 + $0x2b8] sm:$0xf] %v678_v19  ;;  %v816_v47 = vpack.c.bf16 %v14148_v9, %v14148_v9 }
 0x140   : > { %1109 = vst [vmem:[#allocation2 + $0x2dc] sm:$0xf] %v679_v17  ;;  %v14497_v55 = vpop.f32.mrf.mxu3 }
 0x141   : > { %3847 = vmatmul.bf16.gmra.mxu2 %v10628_v50  ;;  %1163 = vst [vmem:[#allocation2 + $0x2e0] sm:$0xf] %v457_v59  ;;  %v817_v59 = vpack.c.bf16 %v13778_v14, %v13778_v14  ;;  %v17716_v50 = vrot.slane %v14421_v0, 1 }
 0x142   : > { %1267 = vst [vmem:[#allocation2 + $0x258] sm:$0xf] %v678_v19  ;;  %v14495_v19 = vunpack.c.l.bf16 %v459_v36 }
 0x143   : > { %1268 = vst [vmem:[#allocation2 + $0x27c] sm:$0xf] %v679_v17  ;;  %v960_v27 = vsel %vm926_vm1, %v17716_v50, %v892_v43  ;;  %v566_v50 = vrot.slane %v14478_v63, 7  ;;  %v17720_v43 = vrot.slane %v14441_v25, 7 }
 0x144   : > { %v10655_v3 = vld [vmem:[#allocation2 + $0x318] sm:$0xf]  ;;  %840 = vst [vmem:[#allocation2 + $0x31c] sm:$0xf] %v786_v4  ;;  %v14505_v0 = vpack.c.bf16 %v960_v27, %v960_v27 }
 0x145   : > { %v12915_v13 = vld [vmem:[#allocation2 + $0x338] sm:$0xf0]  ;;  %841 = vst [vmem:[#allocation2 + $0x340] sm:$0xf] %v787_v29 }
 0x146   : > { %17717 = vst [vmem:[#allocation35_spill] sm:$0xff] %v14497_v55  ;;  %v10656_v17 = vor.u32 %v12915_v13, %v10655_v3  ;;  %v17617_v13 = vrot.slane %v14495_v19, 7 }
 0x147   : > { %1321 = vst [vmem:[#allocation2 + $0x25c] sm:$0xf] %v786_v4 }
 0x148   : > { %1322 = vst [vmem:[#allocation2 + $0x280] sm:$0xf] %v787_v29  ;;  %3564 = vmatmul.bf16.gmra.mxu0 %v10656_v17  ;;  %v634_v29 = vsel %vm601_vm0, %v17720_v43, %v566_v50  ;;  %v633_v21 = vsel %vm601_vm0, %v566_v50, %v17617_v13  ;;  %v460_v17 = vld [vmem:[%s13766_s23 + $0x5c] sm:$0xf]  ;;  %v14524_v25 = vpop.f32.mrf.mxu3  ;;  %v3818_v43 = vpop.f32.mrf.mxu2  ;;  %v894_v13 = vrot.slane %v14495_v19, 1 }
 0x149   : > { %870 = vst [vmem:[#allocation2 + $0x754] sm:$0xf] %v816_v47  ;;  %v14529_v50 = vadd.f32 %v3818_v43, %v3675_v11  ;;  %v788_v11 = vpack.c.bf16 %v14478_v63, %v14478_v63 }
 0x14a   : > { %17718 = vst [vmem:[#allocation36_spill] sm:$0xff] %v14505_v0 }
 0x14b   : > { %871 = vst [vmem:[#allocation2 + $0x778] sm:$0xf] %v817_v59  ;;  %v12911_v4 = vld [vmem:[#allocation2 + $0x31c] sm:$0xf] }
 0x14c   : > { %17719 = vst [vmem:[#allocation37_spill] sm:$0xff] %v14508_v2  ;;  %v10657_v3 = vld [vmem:[#allocation2 + $0x33c] sm:$0xf0] }
 0x14d   : > { %1351 = vst [vmem:[#allocation2 + $0x694] sm:$0xf] %v816_v47  ;;  %v10660_v27 = vor.u32 %v12911_v4, %v10657_v3  ;;  %v681_v4 = vpack.c.bf16 %v633_v21, %v633_v21  ;;  %v14526_v3 = vunpack.c.l.bf16 %v460_v17 }
 0x14e   : > { %1352 = vst [vmem:[#allocation2 + $0x6b8] sm:$0xf] %v817_v59  ;;  %v680_v59 = vpack.c.bf16 %v634_v29, %v634_v29 }
 0x14f   : > { %1057 = vst [vmem:[#allocation2 + $0x320] sm:$0xf] %v14505_v0  ;;  %3708 = vmatmul.bf16.gmra.mxu1 %v10660_v27  ;;  %v14533_v27 = vpop.f32.mrf.mxu1  ;;  %v17624_v38 = vrot.slane %v14526_v3, 1  ;;  %v17729_v20 = vrot.slane %v14526_v3, 1 }
 0x150   : > { %1058 = vst [vmem:[#allocation2 + $0x344] sm:$0xf] %v14508_v2  ;;  %v13046_v47 = vld [vmem:[#allocation2 + $0x754] sm:$0xf] }
 0x151   : > { %1164 = vst [vmem:[#allocation2 + $0x304] sm:$0xf] %v458_v60  ;;  %v14531_v60 = vpop.f32.mrf.mxu0 }
 0x152   : > { %1216 = vst [vmem:[#allocation2 + $0x2c0] sm:$0xf] %v14505_v0  ;;  %v11197_v49 = vld [vmem:[#allocation2 + $0x774] sm:$0xf0] }
 0x153   : > { %1217 = vst [vmem:[#allocation2 + $0x2e4] sm:$0xf] %v14508_v2  ;;  %v11200_v53 = vor.u32 %v13046_v47, %v11197_v49  ;;  %v17721_v47 = vrot.slane %v14478_v63, 1 }
 0x154   : > { %1375 = vst [vmem:[#allocation2 + $0x260] sm:$0xf] %v14505_v0  ;;  %v14552_v0 = vpop.f32.mrf.mxu3 }
 0x155   : > { %1376 = vst [vmem:[#allocation2 + $0x284] sm:$0xf] %v14508_v2  ;;  %3783 = vmatmul.bf16.gmra.mxu3 %v11200_v53  ;;  %v789_v53 = vpack.c.bf16 %v14495_v19, %v14495_v19  ;;  %v958_v43 = vsel %vm926_vm1, %v17721_v47, %v894_v13 }
 0x156   : > { %v10663_v29 = vld [vmem:[#allocation2 + $0x320] sm:$0xf]  ;;  %734 = vst [vmem:[#allocation2 + $0x360] sm:$0xf] %v680_v59  ;;  %v14554_v63 = vpack.c.bf16 %v958_v43, %v958_v43 }
 0x157   : > { %v12916_v21 = vld [vmem:[#allocation2 + $0x340] sm:$0xf0]  ;;  %735 = vst [vmem:[#allocation2 + $0x384] sm:$0xf] %v681_v4  ;;  %v3679_v2 = vpop.f32.mrf.mxu1 }
 0x158   : > { %v10664_v49 = vor.u32 %v12916_v21, %v10663_v29  ;;  %1110 = vst [vmem:[#allocation2 + $0x300] sm:$0xf] %v680_v59  ;;  %v957_v29 = vsel %vm926_vm1, %v894_v13, %v17624_v38  ;;  %v17625_v21 = vrot.slane %v13791_v23, 1 }
 0x159   : > { %1111 = vst [vmem:[#allocation2 + $0x324] sm:$0xf] %v681_v4  ;;  %v14560_v13 = vpack.c.bf16 %v957_v29, %v957_v29 }
 0x15a   : > { %3852 = vmatmul.bf16.gmra.mxu2 %v10664_v49  ;;  %1165 = vst [vmem:[#allocation2 + $0x328] sm:$0xf] %v459_v36  ;;  %v912_v49 = vrot.slane %v13800_v28, 1  ;;  %v3535_v36 = vpop.f32.mrf.mxu0 }
 0x15b   : > { %1269 = vst [vmem:[#allocation2 + $0x2a0] sm:$0xf] %v680_v59  ;;  %v3680_v47 = vadd.f32 %v3679_v2, %v3535_v36  ;;  %v14557_v59 = vld [vmem:[%s13766_s23 + $0x60] sm:$0xf] }
 0x15c   : > { %1270 = vst [vmem:[#allocation2 + $0x2c4] sm:$0xf] %v681_v4  ;;  %v14563_v28 = vunpack.c.l.bf16 %v14557_v59  ;;  %v940_v2 = vsel %vm926_vm1, %v17625_v21, %v912_v49  ;;  %v14570_v4 = vpop.f32.mrf.mxu2 }
 0x15d   : > { %17722 = vst [vmem:[#allocation38_spill] sm:$0xff] %v14552_v0  ;;  %v10691_v10 = vld [vmem:[#allocation2 + $0x360] sm:$0xf] }
 0x15e   : > { %842 = vst [vmem:[#allocation2 + $0x364] sm:$0xf] %v788_v11  ;;  %v12924_v5 = vld [vmem:[#allocation2 + $0x380] sm:$0xf0] }
 0x15f   : > { %17723 = vst [vmem:[#allocation39_spill] sm:$0xff] %v14554_v63  ;;  %v10692_v38 = vor.u32 %v12924_v5, %v10691_v10  ;;  %v939_v5 = vsel %vm926_vm1, %v912_v49, %v17626_v48  ;;  %v568_v10 = vrot.slane %v14526_v3, 7  ;;  %v17727_v49 = vrot.slane %v14495_v19, 7 }
 0x160   : > { %843 = vst [vmem:[#allocation2 + $0x388] sm:$0xf] %v789_v53  ;;  %v14583_v29 = vpack.c.bf16 %v939_v5, %v939_v5 }
 0x161   : > { %17724 = vst [vmem:[#allocation40_spill] sm:$0xff] %v14560_v13  ;;  %3569 = vmatmul.bf16.gmra.mxu0 %v10692_v38 }
 0x162   : > { %1323 = vst [vmem:[#allocation2 + $0x2a4] sm:$0xf] %v788_v11  ;;  %v14579_v11 = vpack.c.bf16 %v940_v2, %v940_v2  ;;  %v632_v2 = vsel %vm601_vm0, %v17727_v49, %v568_v10 }
 0x163   : > { %1324 = vst [vmem:[#allocation2 + $0x2c8] sm:$0xf] %v789_v53  ;;  %v17631_v53 = vrot.slane %v14563_v28, 7  ;;  %v682_v19 = vpack.c.bf16 %v632_v2, %v632_v2  ;;  %v896_v2 = vrot.slane %v14563_v28, 1 }
 0x164   : > { %1059 = vst [vmem:[#allocation2 + $0x368] sm:$0xf] %v14554_v63  ;;  %v3823_v6 = vpop.f32.mrf.mxu2 }
 0x165   : > { %1060 = vst [vmem:[#allocation2 + $0x38c] sm:$0xf] %v14560_v13  ;;  %v12920_v38 = vld [vmem:[#allocation2 + $0x364] sm:$0xf]  ;;  %v631_v5 = vsel %vm601_vm0, %v568_v10, %v17631_v53  ;;  %v14608_v10 = vadd.f32 %v3823_v6, %v3680_v47  ;;  %v14610_v53 = vpop.f32.mrf.mxu0 }
 0x166   : > { %1166 = vst [vmem:[#allocation2 + $0x34c] sm:$0xf] %v460_v17  ;;  %v14587_v17 = vpop.f32.mrf.mxu3 }
 0x167   : > { %1218 = vst [vmem:[#allocation2 + $0x308] sm:$0xf] %v14554_v63  ;;  %v10693_v43 = vld [vmem:[#allocation2 + $0x384] sm:$0xf0] }
 0x168   : > { %17725 = vst [vmem:[#allocation41_spill] sm:$0xff] %v14579_v11  ;;  %v10696_v36 = vor.u32 %v12920_v38, %v10693_v43  ;;  %v14599_v38 = vld [vmem:[%s13766_s23 + $0x64] sm:$0xf] }
 0x169   : > { %1219 = vst [vmem:[#allocation2 + $0x32c] sm:$0xf] %v14560_v13  ;;  %v14605_v49 = vunpack.c.l.bf16 %v14599_v38 }
 0x16a   : > { %17726 = vst [vmem:[#allocation42_spill] sm:$0xff] %v14583_v29  ;;  %3713 = vmatmul.bf16.gmra.mxu1 %v10696_v36  ;;  %v683_v36 = vpack.c.bf16 %v631_v5, %v631_v5 }
 0x16b   : > { %1377 = vst [vmem:[#allocation2 + $0x2a8] sm:$0xf] %v14554_v63  ;;  %v10699_v21 = vld [vmem:[#allocation2 + $0x368] sm:$0xf] }
 0x16c   : > { %1378 = vst [vmem:[#allocation2 + $0x2cc] sm:$0xf] %v14560_v13  ;;  %v12925_v43 = vld [vmem:[#allocation2 + $0x388] sm:$0xf0] }
 0x16d   : > { %1077 = vst [vmem:[#allocation2 + $0x5f0] sm:$0xf] %v14579_v11  ;;  %v10700_v48 = vor.u32 %v12925_v43, %v10699_v21  ;;  %v13089_v13 = vld [vmem:[#allocation3 + $0x110] sm:$0xff]  ;;  %v14612_v21 = vpop.f32.mrf.mxu1 }
 0x16e   : > { %1078 = vst [vmem:[#allocation2 + $0x614] sm:$0xf] %v14583_v29  ;;  %v13109_v63 = vld [vmem:[#allocation3 + $0x1b0] sm:$0xff]  ;;  %4082 = vmatpush.bf16.msrb.mxu0 %v13089_v13  ;;  %v14617_v47 = vpop.f32.mrf.mxu3  ;;  %v956_v13 = vsel %vm926_vm1, %v17729_v20, %v896_v2 }
 0x16f   : > { %1236 = vst [vmem:[#allocation2 + $0x590] sm:$0xf] %v14579_v11  ;;  %3857 = vmatmul.bf16.gmra.mxu2 %v10700_v48  ;;  %v17635_v48 = vrot.slane %v14605_v49, 1  ;;  %v14633_v55 = vpack.c.bf16 %v956_v13, %v956_v13 }
 0x170   : > { %1237 = vst [vmem:[#allocation2 + $0x5b4] sm:$0xf] %v14583_v29  ;;  %4366 = vmatpush.bf16.msrb.mxu2 %v13109_v63  ;;  %v791_v63 = vpack.c.bf16 %v14563_v28, %v14563_v28 }
 0x171   : > { %1395 = vst [vmem:[#allocation2 + $0x530] sm:$0xf] %v14579_v11  ;;  %v3540_v11 = vpop.f32.mrf.mxu0 }
 0x172   : > { %1396 = vst [vmem:[#allocation2 + $0x554] sm:$0xf] %v14583_v29  ;;  %v790_v29 = vpack.c.bf16 %v14526_v3, %v14526_v3 }
 0x173   : > { %736 = vst [vmem:[#allocation2 + $0x3a8] sm:$0xf] %v682_v19 }
 0x174   : > { %v11023_v5 = vld [vmem:[#allocation2 + $0x5f0] sm:$0xf]  ;;  %737 = vst [vmem:[#allocation2 + $0x3cc] sm:$0xf] %v683_v36 }
 0x175   : > { %v13006_v43 = vld [vmem:[#allocation2 + $0x610] sm:$0xf0]  ;;  %1112 = vst [vmem:[#allocation2 + $0x348] sm:$0xf] %v682_v19 }
 0x176   : > { %v11024_v6 = vor.u32 %v13006_v43, %v11023_v5  ;;  %17728 = vst [vmem:[#allocation43_spill] sm:$0xff] %v14617_v47  ;;  %v955_v5 = vsel %vm926_vm1, %v896_v2, %v17635_v48  ;;  %v914_v43 = vrot.slane %v13900_v31, 1  ;;  %v463_v47 = vld [vmem:[%s13766_s23 + $0x68] sm:$0xf]  ;;  %v17732_v31 = vrot.slane %v13890_v26, 1  ;;  %v14646_v2 = vpop.f32.mrf.mxu2  ;;  %v13086_v48 = vld [vmem:[#allocation3 + $0xf8] sm:$0xff] }
 0x177   : > { %1113 = vst [vmem:[#allocation2 + $0x36c] sm:$0xf] %v683_v36  ;;  %3933 = vmatpush.bf16.msrb.mxu3 %v13086_v48  ;;  %v17739_v48 = vrot.slane %v14605_v49, 1 }
 0x178   : > { %1167 = vst [vmem:[#allocation2 + $0x370] sm:$0xf] %v14557_v59  ;;  %3902 = vmatmul.bf16.vlgmr.msra.gmra.mxu3 %v11024_v6  ;;  %v3684_v59 = vpop.f32.mrf.mxu1  ;;  %v14636_v6 = vpack.c.bf16 %v955_v5, %v955_v5 }
 0x179   : > { %1271 = vst [vmem:[#allocation2 + $0x2e8] sm:$0xf] %v682_v19  ;;  %v3685_v3 = vadd.f32 %v3684_v59, %v3540_v11  ;;  %v17634_v19 = vrot.slane %v13965_v32, 1  ;;  %v938_v11 = vsel %vm926_vm1, %v17732_v31, %v914_v43 }
 0x17a   : > { %1272 = vst [vmem:[#allocation2 + $0x30c] sm:$0xf] %v683_v36  ;;  %v10727_v0 = vld [vmem:[#allocation2 + $0x3a8] sm:$0xf]  ;;  %v14639_v36 = vunpack.c.l.bf16 %v463_v47 }
 0x17b   : > { %844 = vst [vmem:[#allocation2 + $0x3ac] sm:$0xf] %v790_v29  ;;  %v12933_v1 = vld [vmem:[#allocation2 + $0x3c8] sm:$0xf0] }
 0x17c   : > { %17730 = vst [vmem:[#allocation44_spill] sm:$0xff] %v14633_v55  ;;  %v10728_v20 = vor.u32 %v12933_v1, %v10727_v0  ;;  %v937_v1 = vsel %vm926_vm1, %v914_v43, %v17634_v19  ;;  %v14654_v0 = vpop.f32.mrf.mxu3  ;;  %v17637_v13 = vrot.slane %v14639_v36, 7 }
 0x17d   : > { %845 = vst [vmem:[#allocation2 + $0x3d0] sm:$0xf] %v791_v63  ;;  %v14662_v59 = vpack.c.bf16 %v937_v1, %v937_v1  ;;  %v464_v1 = vld [vmem:[%s13766_s23 + $0x6c] sm:$0xf] }
 0x17e   : > { %17731 = vst [vmem:[#allocation45_spill] sm:$0xff] %v14636_v6  ;;  %3574 = vmatmul.bf16.gmra.mxu0 %v10728_v20  ;;  %v3828_v19 = vpop.f32.mrf.mxu2 }
 0x17f   : > { %1325 = vst [vmem:[#allocation2 + $0x2ec] sm:$0xf] %v790_v29  ;;  %v570_v29 = vrot.slane %v14605_v49, 7 }
 0x180   : > { %1326 = vst [vmem:[#allocation2 + $0x310] sm:$0xf] %v791_v63  ;;  %v14658_v63 = vpack.c.bf16 %v938_v11, %v938_v11 }
 0x181   : > { %1061 = vst [vmem:[#allocation2 + $0x3b0] sm:$0xf] %v14633_v55  ;;  %v629_v11 = vsel %vm601_vm0, %v570_v29, %v17637_v13  ;;  %v14686_v13 = vpop.f32.mrf.mxu1 }
 0x182   : > { %1062 = vst [vmem:[#allocation2 + $0x3d4] sm:$0xf] %v14636_v6  ;;  %v12929_v26 = vld [vmem:[#allocation2 + $0x3ac] sm:$0xf] }
 0x183   : > { %1168 = vst [vmem:[#allocation2 + $0x394] sm:$0xf] %v14599_v38  ;;  %v17735_v38 = vrot.slane %v14563_v28, 7 }
 0x184   : > { %1220 = vst [vmem:[#allocation2 + $0x350] sm:$0xf] %v14633_v55  ;;  %v10729_v5 = vld [vmem:[#allocation2 + $0x3cc] sm:$0xf0] }
 0x185   : > { %17733 = vst [vmem:[#allocation46_spill] sm:$0xff] %v14658_v63  ;;  %v10732_v43 = vor.u32 %v12929_v26, %v10729_v5  ;;  %v630_v20 = vsel %vm601_vm0, %v17735_v38, %v570_v29  ;;  %v685_v38 = vpack.c.bf16 %v629_v11, %v629_v11  ;;  %v14684_v29 = vpop.f32.mrf.mxu0 }
 0x186   : > { %1221 = vst [vmem:[#allocation2 + $0x374] sm:$0xf] %v14636_v6  ;;  %v684_v28 = vpack.c.bf16 %v630_v20, %v630_v20  ;;  %v898_v20 = vrot.slane %v14639_v36, 1 }
 0x187   : > { %17734 = vst [vmem:[#allocation47_spill] sm:$0xff] %v14662_v59  ;;  %3718 = vmatmul.bf16.gmra.mxu1 %v10732_v43  ;;  %v14679_v43 = vunpack.c.l.bf16 %v464_v1 }
 0x188   : > { %1379 = vst [vmem:[#allocation2 + $0x2f0] sm:$0xf] %v14633_v55  ;;  %v10735_v31 = vld [vmem:[#allocation2 + $0x3b0] sm:$0xf] }
 0x189   : > { %1380 = vst [vmem:[#allocation2 + $0x314] sm:$0xf] %v14636_v6  ;;  %v12934_v26 = vld [vmem:[#allocation2 + $0x3d0] sm:$0xf0]  ;;  %v14682_v6 = vadd.f32 %v3828_v19, %v3685_v3  ;;  %v792_v19 = vpack.c.bf16 %v14605_v49, %v14605_v49 }
 0x18a   : > { %1079 = vst [vmem:[#allocation2 + $0x638] sm:$0xf] %v14658_v63  ;;  %v10736_v5 = vor.u32 %v12934_v26, %v10735_v31  ;;  %v14689_v31 = vpop.f32.mrf.mxu3  ;;  %v17642_v26 = vrot.slane %v14679_v43, 1 }
 0x18b   : > { %1080 = vst [vmem:[#allocation2 + $0x65c] sm:$0xf] %v14662_v59 }
 0x18c   : > { %1238 = vst [vmem:[#allocation2 + $0x5d8] sm:$0xf] %v14658_v63  ;;  %3862 = vmatmul.bf16.gmra.mxu2 %v10736_v5 }
 0x18d   : > { %1239 = vst [vmem:[#allocation2 + $0x5fc] sm:$0xf] %v14662_v59  ;;  %v3545_v55 = vpop.f32.mrf.mxu0 }
 0x18e   : > { %1397 = vst [vmem:[#allocation2 + $0x578] sm:$0xf] %v14658_v63  ;;  %v954_v63 = vsel %vm926_vm1, %v17739_v48, %v898_v20 }
 0x18f   : > { %17736 = vst [vmem:[#allocation48_spill] sm:$0xff] %v14684_v29  ;;  %v14706_v44 = vpack.c.bf16 %v954_v63, %v954_v63 }
 0x190   : > { %17737 = vst [vmem:[#allocation49_spill] sm:$0xff] %v14686_v13  ;;  %v14709_v13 = vld [vmem:[%s13766_s23 + $0x70] sm:$0xf] }
 0x191   : > { %1398 = vst [vmem:[#allocation2 + $0x59c] sm:$0xf] %v14662_v59  ;;  %v11059_v11 = vld [vmem:[#allocation2 + $0x638] sm:$0xf]  ;;  %v793_v59 = vpack.c.bf16 %v14639_v36, %v14639_v36 }
 0x192   : > { %17738 = vst [vmem:[#allocation50_spill] sm:$0xff] %v14689_v31  ;;  %v13015_v5 = vld [vmem:[#allocation2 + $0x658] sm:$0xf0] }
 0x193   : > { %738 = vst [vmem:[#allocation2 + $0x3f0] sm:$0xf] %v684_v28  ;;  %v11060_v3 = vor.u32 %v13015_v5, %v11059_v11  ;;  %v953_v11 = vsel %vm926_vm1, %v898_v20, %v17642_v26  ;;  %v916_v5 = vrot.slane %v13972_v33, 1  ;;  %v14717_v33 = vunpack.c.l.bf16 %v14709_v13  ;;  %v14724_v20 = vpop.f32.mrf.mxu2 }
 0x194   : > { %739 = vst [vmem:[#allocation2 + $0x414] sm:$0xf] %v685_v38 }
 0x195   : > { %1114 = vst [vmem:[#allocation2 + $0x390] sm:$0xf] %v684_v28  ;;  %3907 = vmatmul.bf16.gmra.mxu3 %v11060_v3  ;;  %v17641_v3 = vrot.slane %v14033_v18, 1 }
 0x196   : > { %1115 = vst [vmem:[#allocation2 + $0x3b4] sm:$0xf] %v685_v38 }
 0x197   : > { %1169 = vst [vmem:[#allocation2 + $0x3b8] sm:$0xf] %v463_v47  ;;  %v3689_v47 = vpop.f32.mrf.mxu1 }
 0x198   : > { %1273 = vst [vmem:[#allocation2 + $0x330] sm:$0xf] %v684_v28  ;;  %v3690_v49 = vadd.f32 %v3689_v47, %v3545_v55  ;;  %v14711_v28 = vpack.c.bf16 %v953_v11, %v953_v11  ;;  %v17742_v55 = vrot.slane %v13965_v32, 1 }
 0x199   : > { %1274 = vst [vmem:[#allocation2 + $0x354] sm:$0xf] %v685_v38  ;;  %v14714_v38 = vpop.f32.mrf.mxu3 }
 0x19a   : > { %v10763_v31 = vld [vmem:[#allocation2 + $0x3f0] sm:$0xf]  ;;  %846 = vst [vmem:[#allocation2 + $0x3f4] sm:$0xf] %v792_v19  ;;  %v936_v63 = vsel %vm926_vm1, %v17742_v55, %v916_v5 }
 0x19b   : > { %17740 = vst [vmem:[#allocation51_spill] sm:$0xff] %v14706_v44  ;;  %v12942_v48 = vld [vmem:[#allocation2 + $0x410] sm:$0xf0]  ;;  %v14733_v32 = vpack.c.bf16 %v936_v63, %v936_v63  ;;  %v3833_v26 = vpop.f32.mrf.mxu2 }
 0x19c   : > { %847 = vst [vmem:[#allocation2 + $0x418] sm:$0xf] %v793_v59  ;;  %v10764_v29 = vor.u32 %v12942_v48, %v10763_v31  ;;  %v572_v31 = vrot.slane %v14679_v43, 7 }
 0x19d   : > { %17741 = vst [vmem:[#allocation52_spill] sm:$0xff] %v14711_v28 }
 0x19e   : > { %1327 = vst [vmem:[#allocation2 + $0x334] sm:$0xf] %v792_v19  ;;  %3579 = vmatmul.bf16.gmra.mxu0 %v10764_v29  ;;  %v17644_v19 = vrot.slane %v14717_v33, 7 }
 0x19f   : > { %1328 = vst [vmem:[#allocation2 + $0x358] sm:$0xf] %v793_v59  ;;  %v935_v59 = vsel %vm926_vm1, %v916_v5, %v17641_v3 }
 0x1a0   : > { %1063 = vst [vmem:[#allocation2 + $0x3f8] sm:$0xf] %v14706_v44  ;;  %v14737_v47 = vpack.c.bf16 %v935_v59, %v935_v59  ;;  %v627_v63 = vsel %vm601_vm0, %v572_v31, %v17644_v19  ;;  %v14751_v59 = vld [vmem:[%s13766_s23 + $0x74] sm:$0xf]  ;;  %v13108_v19 = vld [vmem:[#allocation3 + $0x1a8] sm:$0xff] }
 0x1a1   : > { %17743 = vst [vmem:[#allocation53_spill] sm:$0xff] %v14724_v20  ;;  %v12938_v29 = vld [vmem:[#allocation2 + $0x3f4] sm:$0xf]  ;;  %v14759_v3 = vunpack.c.l.bf16 %v14751_v59  ;;  %4367 = vmatpush.bf16.msrb.mxu2 %v13108_v19  ;;  %v14870_v20 = vld [vmem:[%s13766_s23 + $0x80] sm:$0xf] }
 0x1a2   : > { %1064 = vst [vmem:[#allocation2 + $0x41c] sm:$0xf] %v14711_v28 }
 0x1a3   : > { %1170 = vst [vmem:[#allocation2 + $0x3dc] sm:$0xf] %v464_v1  ;;  %v10765_v11 = vld [vmem:[#allocation2 + $0x414] sm:$0xf0]  ;;  %v17746_v1 = vrot.slane %v14639_v36, 7 }
 0x1a4   : > { %1222 = vst [vmem:[#allocation2 + $0x398] sm:$0xf] %v14706_v44  ;;  %v10768_v48 = vor.u32 %v12938_v29, %v10765_v11  ;;  %v14754_v11 = vpop.f32.mrf.mxu3 }
 0x1a5   : > { %17744 = vst [vmem:[#allocation54_spill] sm:$0xff] %v14733_v32  ;;  %v628_v5 = vsel %vm601_vm0, %v17746_v1, %v572_v31  ;;  %v13088_v31 = vld [vmem:[#allocation3 + $0x108] sm:$0xff] }
 0x1a6   : > { %1223 = vst [vmem:[#allocation2 + $0x3bc] sm:$0xf] %v14711_v28  ;;  %3723 = vmatmul.bf16.gmra.mxu1 %v10768_v48  ;;  %v686_v1 = vpack.c.bf16 %v628_v5, %v628_v5  ;;  %v687_v48 = vpack.c.bf16 %v627_v63, %v627_v63  ;;  %4083 = vmatpush.bf16.msrb.mxu0 %v13088_v31  ;;  %v900_v5 = vrot.slane %v14717_v33, 1  ;;  %v17750_v31 = vrot.slane %v14679_v43, 1 }
 0x1a7   : > { %17745 = vst [vmem:[#allocation55_spill] sm:$0xff] %v14737_v47  ;;  %v10771_v55 = vld [vmem:[#allocation2 + $0x3f8] sm:$0xf] }
 0x1a8   : > { %1381 = vst [vmem:[#allocation2 + $0x338] sm:$0xf] %v14706_v44  ;;  %v14762_v44 = vadd.f32 %v3833_v26, %v3690_v49  ;;  %v794_v49 = vpack.c.bf16 %v14679_v43, %v14679_v43  ;;  %v952_v19 = vsel %vm926_vm1, %v17750_v31, %v900_v5  ;;  %v14790_v31 = vld [vmem:[%s13766_s23 + $0x78] sm:$0xf] }
 0x1a9   : > { %1382 = vst [vmem:[#allocation2 + $0x35c] sm:$0xf] %v14711_v28  ;;  %v12943_v29 = vld [vmem:[#allocation2 + $0x418] sm:$0xf0]  ;;  %v13085_v28 = vld [vmem:[#allocation3 + $0xf0] sm:$0xff]  ;;  %v14787_v43 = vpack.c.bf16 %v952_v19, %v952_v19 }
 0x1aa   : > { %1081 = vst [vmem:[#allocation2 + $0x680] sm:$0xf] %v14733_v32  ;;  %v10772_v36 = vor.u32 %v12943_v29, %v10771_v55  ;;  %v14766_v55 = vpop.f32.mrf.mxu1  ;;  %3934 = vmatpush.bf16.msrb.mxu3 %v13085_v28  ;;  %v17648_v29 = vrot.slane %v14759_v3, 1  ;;  %v795_v28 = vpack.c.bf16 %v14717_v33, %v14717_v33 }
 0x1ab   : > { %1082 = vst [vmem:[#allocation2 + $0x6a4] sm:$0xf] %v14737_v47 }
 0x1ac   : > { %17747 = vst [vmem:[#allocation56_spill] sm:$0xff] %v14754_v11  ;;  %3867 = vmatmul.bf16.gmra.mxu2 %v10772_v36  ;;  %v14764_v11 = vpop.f32.mrf.mxu0 }
 0x1ad   : > { %1240 = vst [vmem:[#allocation2 + $0x620] sm:$0xf] %v14733_v32 }
 0x1ae   : > { %1241 = vst [vmem:[#allocation2 + $0x644] sm:$0xf] %v14737_v47 }
 0x1af   : > { %1399 = vst [vmem:[#allocation2 + $0x5c0] sm:$0xf] %v14733_v32 }
 0x1b0   : > { %17748 = vst [vmem:[#allocation57_spill] sm:$0xff] %v14764_v11 }
 0x1b1   : > { %17749 = vst [vmem:[#allocation58_spill] sm:$0xff] %v14766_v55  ;;  %v11095_v63 = vld [vmem:[#allocation2 + $0x680] sm:$0xf] }
 0x1b2   : > { %1400 = vst [vmem:[#allocation2 + $0x5e4] sm:$0xf] %v14737_v47  ;;  %v13024_v36 = vld [vmem:[#allocation2 + $0x6a0] sm:$0xf0]  ;;  %v3694_v32 = vpop.f32.mrf.mxu1 }
 0x1b3   : > { %740 = vst [vmem:[#allocation2 + $0x438] sm:$0xf] %v686_v1  ;;  %v11096_v26 = vor.u32 %v13024_v36, %v11095_v63  ;;  %v951_v63 = vsel %vm926_vm1, %v900_v5, %v17648_v29  ;;  %v14784_v36 = vpop.f32.mrf.mxu3  ;;  %v17649_v5 = vrot.slane %v14093_v34, 1 }
 0x1b4   : > { %741 = vst [vmem:[#allocation2 + $0x45c] sm:$0xf] %v687_v48  ;;  %v3550_v47 = vpop.f32.mrf.mxu0 }
 0x1b5   : > { %1116 = vst [vmem:[#allocation2 + $0x3d8] sm:$0xf] %v686_v1  ;;  %3912 = vmatmul.bf16.gmra.mxu3 %v11096_v26  ;;  %v3695_v11 = vadd.f32 %v3694_v32, %v3550_v47  ;;  %v14792_v26 = vpack.c.bf16 %v951_v63, %v951_v63  ;;  %v14803_v47 = vpop.f32.mrf.mxu2 }
 0x1b6   : > { %1117 = vst [vmem:[#allocation2 + $0x3fc] sm:$0xf] %v687_v48 }
 0x1b7   : > { %1171 = vst [vmem:[#allocation2 + $0x400] sm:$0xf] %v14709_v13  ;;  %v918_v13 = vrot.slane %v14040_v30, 1  ;;  %v14796_v30 = vunpack.c.l.bf16 %v14790_v31 }
 0x1b8   : > { %1275 = vst [vmem:[#allocation2 + $0x378] sm:$0xf] %v686_v1 }
 0x1b9   : > { %1276 = vst [vmem:[#allocation2 + $0x39c] sm:$0xf] %v687_v48  ;;  %v17753_v48 = vrot.slane %v14033_v18, 1 }
 0x1ba   : > { %v10799_v55 = vld [vmem:[#allocation2 + $0x438] sm:$0xf]  ;;  %848 = vst [vmem:[#allocation2 + $0x43c] sm:$0xf] %v794_v49 }
 0x1bb   : > { %17751 = vst [vmem:[#allocation59_spill] sm:$0xff] %v14787_v43  ;;  %v12951_v1 = vld [vmem:[#allocation2 + $0x458] sm:$0xf0]  ;;  %v934_v32 = vsel %vm926_vm1, %v17753_v48, %v918_v13 }
 0x1bc   : > { %849 = vst [vmem:[#allocation2 + $0x460] sm:$0xf] %v795_v28  ;;  %v10800_v29 = vor.u32 %v12951_v1, %v10799_v55  ;;  %v933_v55 = vsel %vm926_vm1, %v918_v13, %v17649_v5  ;;  %v14813_v18 = vpack.c.bf16 %v934_v32, %v934_v32  ;;  %v14819_v1 = vpop.f32.mrf.mxu3  ;;  %v14833_v5 = vld [vmem:[%s13766_s23 + $0x7c] sm:$0xf] }
 0x1bd   : > { %17752 = vst [vmem:[#allocation60_spill] sm:$0xff] %v14792_v26  ;;  %v14817_v63 = vpack.c.bf16 %v933_v55, %v933_v55 }
 0x1be   : > { %1329 = vst [vmem:[#allocation2 + $0x37c] sm:$0xf] %v794_v49  ;;  %3584 = vmatmul.bf16.gmra.mxu0 %v10800_v29  ;;  %v574_v29 = vrot.slane %v14759_v3, 7 }
 0x1bf   : > { %1330 = vst [vmem:[#allocation2 + $0x3a0] sm:$0xf] %v795_v28  ;;  %v17652_v28 = vrot.slane %v14796_v30, 7 }
 0x1c0   : > { %1065 = vst [vmem:[#allocation2 + $0x440] sm:$0xf] %v14787_v43 }
 0x1c1   : > { %17754 = vst [vmem:[#allocation61_spill] sm:$0xff] %v14803_v47  ;;  %v12947_v49 = vld [vmem:[#allocation2 + $0x43c] sm:$0xf]  ;;  %v625_v55 = vsel %vm601_vm0, %v574_v29, %v17652_v28  ;;  %v14844_v28 = vpop.f32.mrf.mxu0 }
 0x1c2   : > { %1066 = vst [vmem:[#allocation2 + $0x464] sm:$0xf] %v14792_v26 }
 0x1c3   : > { %1172 = vst [vmem:[#allocation2 + $0x424] sm:$0xf] %v14751_v59  ;;  %v10801_v19 = vld [vmem:[#allocation2 + $0x45c] sm:$0xf0]  ;;  %v17758_v59 = vrot.slane %v14717_v33, 7 }
 0x1c4   : > { %1224 = vst [vmem:[#allocation2 + $0x3e0] sm:$0xf] %v14787_v43  ;;  %v10804_v13 = vor.u32 %v12947_v49, %v10801_v19  ;;  %v14851_v47 = vpop.f32.mrf.mxu3 }
 0x1c5   : > { %17755 = vst [vmem:[#allocation62_spill] sm:$0xff] %v14813_v18  ;;  %v626_v48 = vsel %vm601_vm0, %v17758_v59, %v574_v29  ;;  %v14839_v59 = vunpack.c.l.bf16 %v14833_v5 }
 0x1c6   : > { %1225 = vst [vmem:[#allocation2 + $0x404] sm:$0xf] %v14792_v26  ;;  %3728 = vmatmul.bf16.gmra.mxu1 %v10804_v13  ;;  %v688_v33 = vpack.c.bf16 %v626_v48, %v626_v48  ;;  %v689_v13 = vpack.c.bf16 %v625_v55, %v625_v55  ;;  %v13083_v48 = vld [vmem:[#allocation3 + $0xe0] sm:$0xff]  ;;  %v902_v55 = vrot.slane %v14796_v30, 1 }
 0x1c7   : > { %17756 = vst [vmem:[#allocation63_spill] sm:$0xff] %v14817_v63  ;;  %v10807_v32 = vld [vmem:[#allocation2 + $0x440] sm:$0xf] }
 0x1c8   : > { %17757 = vst [vmem:[#allocation64_spill] sm:$0xff] %v14819_v1  ;;  %v3838_v1 = vpop.f32.mrf.mxu2 }
 0x1c9   : > { %1383 = vst [vmem:[#allocation2 + $0x380] sm:$0xf] %v14787_v43  ;;  %v12952_v49 = vld [vmem:[#allocation2 + $0x460] sm:$0xf0]  ;;  %v14842_v29 = vadd.f32 %v3838_v1, %v3695_v11 }
 0x1ca   : > { %1384 = vst [vmem:[#allocation2 + $0x3a4] sm:$0xf] %v14792_v26  ;;  %v10808_v19 = vor.u32 %v12952_v49, %v10807_v32  ;;  %v13084_v26 = vld [vmem:[#allocation3 + $0xe8] sm:$0xff]  ;;  %v14846_v32 = vpop.f32.mrf.mxu1 }
 0x1cb   : > { %1083 = vst [vmem:[#allocation2 + $0x6c8] sm:$0xf] %v14813_v18  ;;  %v13100_v43 = vld [vmem:[#allocation3 + $0x168] sm:$0xff]  ;;  %3935 = vmatpush.bf16.msrb.mxu3 %v13084_v26  ;;  %v17762_v26 = vrot.slane %v14759_v3, 1 }
 0x1cc   : > { %1084 = vst [vmem:[#allocation2 + $0x6ec] sm:$0xf] %v14817_v63  ;;  %3872 = vmatmul.bf16.gmra.mxu2 %v10808_v19  ;;  %4223 = vmatpush.bf16.msrb.mxu1 %v13100_v43  ;;  %v797_v43 = vpack.c.bf16 %v14796_v30, %v14796_v30 }
 0x1cd   : > { %1242 = vst [vmem:[#allocation2 + $0x668] sm:$0xf] %v14813_v18  ;;  %v950_v19 = vsel %vm926_vm1, %v17762_v26, %v902_v55 }
 0x1ce   : > { %1243 = vst [vmem:[#allocation2 + $0x68c] sm:$0xf] %v14817_v63 }
 0x1cf   : > { %1401 = vst [vmem:[#allocation2 + $0x608] sm:$0xf] %v14813_v18  ;;  %v796_v18 = vpack.c.bf16 %v14759_v3, %v14759_v3  ;;  %3936 = vmatpush.bf16.msrb.mxu3 %v13083_v48  ;;  %v920_v48 = vrot.slane %v14100_v51, 1  ;;  %v14876_v51 = vunpack.c.l.bf16 %v14870_v20 }
 0x1d0   : > { %17759 = vst [vmem:[#allocation65_spill] sm:$0xff] %v14842_v29 }
 0x1d1   : > { %17760 = vst [vmem:[#allocation66_spill] sm:$0xff] %v14844_v28  ;;  %v14867_v28 = vpack.c.bf16 %v950_v19, %v950_v19  ;;  %v14885_v19 = vpop.f32.mrf.mxu2 }
 0x1d2   : > { %17761 = vst [vmem:[#allocation67_spill] sm:$0xff] %v14846_v32  ;;  %v11131_v49 = vld [vmem:[#allocation2 + $0x6c8] sm:$0xf] }
 0x1d3   : > { %1402 = vst [vmem:[#allocation2 + $0x62c] sm:$0xf] %v14817_v63  ;;  %v13033_v11 = vld [vmem:[#allocation2 + $0x6e8] sm:$0xf0]  ;;  %v3555_v63 = vpop.f32.mrf.mxu0 }
 0x1d4   : > { %742 = vst [vmem:[#allocation2 + $0x480] sm:$0xf] %v688_v33  ;;  %v11132_v1 = vor.u32 %v13033_v11, %v11131_v49  ;;  %v17763_v49 = vrot.slane %v14839_v59, 1 }
 0x1d5   : > { %743 = vst [vmem:[#allocation2 + $0x4a4] sm:$0xf] %v689_v13 }
 0x1d6   : > { %1118 = vst [vmem:[#allocation2 + $0x420] sm:$0xf] %v688_v33  ;;  %3917 = vmatmul.bf16.gmra.mxu3 %v11132_v1  ;;  %v949_v11 = vsel %vm926_vm1, %v902_v55, %v17763_v49  ;;  %v17655_v1 = vrot.slane %v14148_v9, 1  ;;  %v14883_v55 = vpop.f32.mrf.mxu3 }
 0x1d7   : > { %1119 = vst [vmem:[#allocation2 + $0x444] sm:$0xf] %v689_v13 }
 0x1d8   : > { %1173 = vst [vmem:[#allocation2 + $0x448] sm:$0xf] %v14790_v31  ;;  %v3699_v31 = vpop.f32.mrf.mxu1 }
 0x1d9   : > { %1277 = vst [vmem:[#allocation2 + $0x3c0] sm:$0xf] %v688_v33  ;;  %v3700_v3 = vadd.f32 %v3699_v31, %v3555_v63  ;;  %v14872_v33 = vpack.c.bf16 %v949_v11, %v949_v11 }
 0x1da   : > { %1278 = vst [vmem:[#allocation2 + $0x3e4] sm:$0xf] %v689_v13  ;;  %v17766_v13 = vrot.slane %v14093_v34, 1 }
 0x1db   : > { %v10835_v32 = vld [vmem:[#allocation2 + $0x480] sm:$0xf]  ;;  %850 = vst [vmem:[#allocation2 + $0x484] sm:$0xf] %v796_v18 }
 0x1dc   : > { %17764 = vst [vmem:[#allocation68_spill] sm:$0xff] %v14867_v28  ;;  %v12960_v26 = vld [vmem:[#allocation2 + $0x4a0] sm:$0xf0]  ;;  %v932_v63 = vsel %vm926_vm1, %v17766_v13, %v920_v48 }
 0x1dd   : > { %851 = vst [vmem:[#allocation2 + $0x4a8] sm:$0xf] %v797_v43  ;;  %v10836_v29 = vor.u32 %v12960_v26, %v10835_v32  ;;  %v14895_v32 = vpack.c.bf16 %v932_v63, %v932_v63  ;;  %v14913_v63 = vld [vmem:[%s13766_s23 + $0x84] sm:$0xf] }
 0x1de   : > { %17765 = vst [vmem:[#allocation69_spill] sm:$0xff] %v14872_v33 }
 0x1df   : > { %1331 = vst [vmem:[#allocation2 + $0x3c4] sm:$0xf] %v796_v18  ;;  %3589 = vmatmul.bf16.gmra.mxu0 %v10836_v29  ;;  %v931_v18 = vsel %vm926_vm1, %v920_v48, %v17655_v1  ;;  %v576_v29 = vrot.slane %v14839_v59, 7  ;;  %v14921_v1 = vpop.f32.mrf.mxu3 }
 0x1e0   : > { %1332 = vst [vmem:[#allocation2 + $0x3e8] sm:$0xf] %v797_v43  ;;  %v17657_v43 = vrot.slane %v14876_v51, 7  ;;  %v14899_v11 = vpack.c.bf16 %v931_v18, %v931_v18 }
 0x1e1   : > { %1067 = vst [vmem:[#allocation2 + $0x488] sm:$0xf] %v14867_v28 }
 0x1e2   : > { %17767 = vst [vmem:[#allocation70_spill] sm:$0xff] %v14883_v55  ;;  %v12956_v34 = vld [vmem:[#allocation2 + $0x484] sm:$0xf]  ;;  %v623_v13 = vsel %vm601_vm0, %v576_v29, %v17657_v43 }
 0x1e3   : > { %17768 = vst [vmem:[#allocation71_spill] sm:$0xff] %v14885_v19 }
 0x1e4   : > { %1068 = vst [vmem:[#allocation2 + $0x4ac] sm:$0xf] %v14872_v33  ;;  %v10837_v49 = vld [vmem:[#allocation2 + $0x4a4] sm:$0xf0] }
 0x1e5   : > { %1174 = vst [vmem:[#allocation2 + $0x46c] sm:$0xf] %v14833_v5  ;;  %v10840_v31 = vor.u32 %v12956_v34, %v10837_v49  ;;  %v17771_v5 = vrot.slane %v14796_v30, 7  ;;  %v13082_v49 = vld [vmem:[#allocation3 + $0xd8] sm:$0xff] }
 0x1e6   : > { %1226 = vst [vmem:[#allocation2 + $0x428] sm:$0xf] %v14867_v28  ;;  %3937 = vmatpush.bf16.msrb.mxu3 %v13082_v49  ;;  %v13080_v49 = vld [vmem:[#allocation3 + $0xc8] sm:$0xff] }
 0x1e7   : > { %17769 = vst [vmem:[#allocation72_spill] sm:$0xff] %v14895_v32  ;;  %v624_v48 = vsel %vm601_vm0, %v17771_v5, %v576_v29  ;;  %3733 = vmatmul.bf16.gmra.mxu1 %v10840_v31  ;;  %v691_v31 = vpack.c.bf16 %v623_v13, %v623_v13  ;;  %v14919_v5 = vunpack.c.l.bf16 %v14913_v63  ;;  %v904_v13 = vrot.slane %v14876_v51, 1 }
 0x1e8   : > { %1227 = vst [vmem:[#allocation2 + $0x44c] sm:$0xf] %v14872_v33  ;;  %v10843_v26 = vld [vmem:[#allocation2 + $0x488] sm:$0xf]  ;;  %v690_v30 = vpack.c.bf16 %v624_v48, %v624_v48 }
 0x1e9   : > { %17770 = vst [vmem:[#allocation73_spill] sm:$0xff] %v14899_v11  ;;  %v13081_v48 = vld [vmem:[#allocation3 + $0xd0] sm:$0xff] }
 0x1ea   : > { %1385 = vst [vmem:[#allocation2 + $0x3c8] sm:$0xf] %v14867_v28  ;;  %3938 = vmatpush.bf16.msrb.mxu3 %v13081_v48  ;;  %v17776_v48 = vrot.slane %v14919_v5, 1 }
 0x1eb   : > { %1386 = vst [vmem:[#allocation2 + $0x3ec] sm:$0xf] %v14872_v33  ;;  %v12961_v18 = vld [vmem:[#allocation2 + $0x4a8] sm:$0xf0]  ;;  %v3843_v33 = vpop.f32.mrf.mxu2 }
 0x1ec   : > { %1085 = vst [vmem:[#allocation2 + $0x710] sm:$0xf] %v14895_v32  ;;  %v10844_v34 = vor.u32 %v12961_v18, %v10843_v26  ;;  %v14924_v29 = vadd.f32 %v3843_v33, %v3700_v3  ;;  %v14926_v26 = vpop.f32.mrf.mxu0  ;;  %v14928_v18 = vpop.f32.mrf.mxu1  ;;  %v798_v33 = vpack.c.bf16 %v14839_v59, %v14839_v59 }
 0x1ed   : > { %1086 = vst [vmem:[#allocation2 + $0x734] sm:$0xf] %v14899_v11 }
 0x1ee   : > { %1244 = vst [vmem:[#allocation2 + $0x6b0] sm:$0xf] %v14895_v32  ;;  %3877 = vmatmul.bf16.gmra.mxu2 %v10844_v34  ;;  %3939 = vmatpush.bf16.msrb.mxu3 %v13080_v49 }
 0x1ef   : > { %1245 = vst [vmem:[#allocation2 + $0x6d4] sm:$0xf] %v14899_v11 }
 0x1f0   : > { %1403 = vst [vmem:[#allocation2 + $0x650] sm:$0xf] %v14895_v32  ;;  %v17775_v32 = vrot.slane %v14839_v59, 1  ;;  %v14951_v59 = vld [vmem:[%s13766_s23 + $0x88] sm:$0xf] }
 0x1f1   : > { %17772 = vst [vmem:[#allocation74_spill] sm:$0xff] %v14924_v29 }
 0x1f2   : > { %17773 = vst [vmem:[#allocation75_spill] sm:$0xff] %v14926_v26  ;;  %v948_v28 = vsel %vm926_vm1, %v17775_v32, %v904_v13  ;;  %v13079_v26 = vld [vmem:[#allocation3 + $0xc0] sm:$0xff] }
 0x1f3   : > { %17774 = vst [vmem:[#allocation76_spill] sm:$0xff] %v14928_v18  ;;  %v11167_v43 = vld [vmem:[#allocation2 + $0x710] sm:$0xf]  ;;  %v14948_v55 = vpop.f32.mrf.mxu2  ;;  %v14953_v32 = vpack.c.bf16 %v948_v28, %v948_v28  ;;  %3940 = vmatpush.bf16.msrb.mxu3 %v13079_v26  ;;  %v17781_v28 = vrot.slane %v14148_v9, 1 }
 0x1f4   : > { %1404 = vst [vmem:[#allocation2 + $0x674] sm:$0xf] %v14899_v11  ;;  %v13042_v34 = vld [vmem:[#allocation2 + $0x730] sm:$0xf0]  ;;  %v799_v11 = vpack.c.bf16 %v14876_v51, %v14876_v51  ;;  %v3704_v18 = vpop.f32.mrf.mxu1 }
 0x1f5   : > { %744 = vst [vmem:[#allocation2 + $0x4c8] sm:$0xf] %v690_v30  ;;  %v11168_v3 = vor.u32 %v13042_v34, %v11167_v43  ;;  %v947_v43 = vsel %vm926_vm1, %v904_v13, %v17776_v48  ;;  %v14946_v34 = vpop.f32.mrf.mxu3 }
 0x1f6   : > { %745 = vst [vmem:[#allocation2 + $0x4ec] sm:$0xf] %v691_v31  ;;  %v14956_v13 = vpack.c.bf16 %v947_v43, %v947_v43  ;;  %v13087_v43 = vld [vmem:[#allocation3 + $0x100] sm:$0xff] }
 0x1f7   : > { %1120 = vst [vmem:[#allocation2 + $0x468] sm:$0xf] %v690_v30  ;;  %3922 = vmatmul.bf16.gmra.mxu3 %v11168_v3  ;;  %4084 = vmatpush.bf16.msrb.mxu0 %v13087_v43 }
 0x1f8   : > { %1121 = vst [vmem:[#allocation2 + $0x48c] sm:$0xf] %v691_v31 }
 0x1f9   : > { %1175 = vst [vmem:[#allocation2 + $0x490] sm:$0xf] %v14870_v20  ;;  %v3560_v20 = vpop.f32.mrf.mxu0 }
 0x1fa   : > { %1279 = vst [vmem:[#allocation2 + $0x408] sm:$0xf] %v690_v30  ;;  %v922_v30 = vrot.slane %v13778_v14, 1  ;;  %v3705_v3 = vadd.f32 %v3704_v18, %v3560_v20  ;;  %v17782_v18 = vrot.slane %v13780_v15, 1  ;;  %v13107_v15 = vld [vmem:[#allocation3 + $0x1a0] sm:$0xff] }
 0x1fb   : > { %17777 = vst [vmem:[#allocation77_spill] sm:$0xff] %v14946_v34  ;;  %4368 = vmatpush.bf16.msrb.mxu2 %v13107_v15  ;;  %v14995_v34 = vld [vmem:[%s13766_s23 + $0x8c] sm:$0xf] }
 0x1fc   : > { %17778 = vst [vmem:[#allocation78_spill] sm:$0xff] %v14948_v55  ;;  %v10871_v19 = vld [vmem:[#allocation2 + $0x4c8] sm:$0xf]  ;;  %v930_v14 = vsel %vm926_vm1, %v17781_v28, %v922_v30  ;;  %v14986_v28 = vpop.f32.mrf.mxu1 }
 0x1fd   : > { %1280 = vst [vmem:[#allocation2 + $0x42c] sm:$0xf] %v691_v31  ;;  %v12969_v29 = vld [vmem:[#allocation2 + $0x4e8] sm:$0xf0]  ;;  %v14959_v31 = vunpack.c.l.bf16 %v14951_v59  ;;  %v14975_v9 = vpack.c.bf16 %v930_v14, %v930_v14  ;;  %v14977_v49 = vpop.f32.mrf.mxu3 }
 0x1fe   : > { %852 = vst [vmem:[#allocation2 + $0x4cc] sm:$0xf] %v798_v33  ;;  %v10872_v48 = vor.u32 %v12969_v29, %v10871_v19  ;;  %v929_v19 = vsel %vm926_vm1, %v922_v30, %v17782_v18  ;;  %v13099_v18 = vld [vmem:[#allocation3 + $0x160] sm:$0xff]  ;;  %v17788_v29 = vrot.slane %v14876_v51, 7 }
 0x1ff   : > { %17779 = vst [vmem:[#allocation79_spill] sm:$0xff] %v14953_v32  ;;  %v14980_v30 = vpack.c.bf16 %v929_v19, %v929_v19  ;;  %4224 = vmatpush.bf16.msrb.mxu1 %v13099_v18 }
 0x200   : > { %853 = vst [vmem:[#allocation2 + $0x4f0] sm:$0xf] %v799_v11  ;;  %3594 = vmatmul.bf16.gmra.mxu0 %v10872_v48 }
 0x201   : > { %17780 = vst [vmem:[#allocation80_spill] sm:$0xff] %v14956_v13  ;;  %v14984_v48 = vpop.f32.mrf.mxu0 }
 0x202   : > { %1333 = vst [vmem:[#allocation2 + $0x40c] sm:$0xf] %v798_v33  ;;  %v3848_v33 = vpop.f32.mrf.mxu2 }
 0x203   : > { %1334 = vst [vmem:[#allocation2 + $0x430] sm:$0xf] %v799_v11  ;;  %v578_v11 = vrot.slane %v14919_v5, 7 }
 0x204   : > { %1069 = vst [vmem:[#allocation2 + $0x4d0] sm:$0xf] %v14953_v32 }
 0x205   : > { %1070 = vst [vmem:[#allocation2 + $0x4f4] sm:$0xf] %v14956_v13  ;;  %v12965_v26 = vld [vmem:[#allocation2 + $0x4cc] sm:$0xf]  ;;  %v622_v19 = vsel %vm601_vm0, %v17788_v29, %v578_v11  ;;  %v15005_v29 = vunpack.c.l.bf16 %v14995_v34  ;;  %v15009_v18 = vpop.f32.mrf.mxu3 }
 0x206   : > { %1176 = vst [vmem:[#allocation2 + $0x4b4] sm:$0xf] %v14913_v63  ;;  %v14982_v63 = vadd.f32 %v3848_v33, %v3705_v3  ;;  %v692_v51 = vpack.c.bf16 %v622_v19, %v622_v19  ;;  %v906_v19 = vrot.slane %v14959_v31, 1 }
 0x207   : > { %1228 = vst [vmem:[#allocation2 + $0x470] sm:$0xf] %v14953_v32  ;;  %v10873_v20 = vld [vmem:[#allocation2 + $0x4ec] sm:$0xf0] }
 0x208   : > { %17783 = vst [vmem:[#allocation81_spill] sm:$0xff] %v14975_v9  ;;  %v10876_v14 = vor.u32 %v12965_v26, %v10873_v20  ;;  %v17789_v26 = vrot.slane %v14959_v31, 7 }
 0x209   : > { %1229 = vst [vmem:[#allocation2 + $0x494] sm:$0xf] %v14956_v13 }
 0x20a   : > { %17784 = vst [vmem:[#allocation82_spill] sm:$0xff] %v14980_v30  ;;  %3738 = vmatmul.bf16.gmra.mxu1 %v10876_v14  ;;  %v621_v33 = vsel %vm601_vm0, %v578_v11, %v17789_v26  ;;  %v15011_v11 = vpop.f32.mrf.mxu2  ;;  %v3565_v14 = vpop.f32.mrf.mxu0  ;;  %v17665_v26 = vrot.slane %v15005_v29, 1 }
 0x20b   : > { %17785 = vst [vmem:[#allocation83_spill] sm:$0xff] %v14982_v63  ;;  %v10879_v3 = vld [vmem:[#allocation2 + $0x4d0] sm:$0xf]  ;;  %v693_v20 = vpack.c.bf16 %v621_v33, %v621_v33 }
 0x20c   : > { %17786 = vst [vmem:[#allocation84_spill] sm:$0xff] %v14984_v48  ;;  %v12970_v43 = vld [vmem:[#allocation2 + $0x4f0] sm:$0xf0]  ;;  %v15017_v33 = vld [vmem:[%s13766_s23 + $0x90] sm:$0xf] }
 0x20d   : > { %17787 = vst [vmem:[#allocation85_spill] sm:$0xff] %v14986_v28  ;;  %v10880_v15 = vor.u32 %v12970_v43, %v10879_v3  ;;  %v3709_v3 = vpop.f32.mrf.mxu1 }
 0x20e   : > { %1387 = vst [vmem:[#allocation2 + $0x410] sm:$0xf] %v14953_v32  ;;  %v3710_v43 = vadd.f32 %v3709_v3, %v3565_v14  ;;  %v800_v32 = vpack.c.bf16 %v14919_v5, %v14919_v5  ;;  %v15029_v3 = vunpack.c.l.bf16 %v15017_v33 }
 0x20f   : > { %1388 = vst [vmem:[#allocation2 + $0x434] sm:$0xf] %v14956_v13  ;;  %3882 = vmatmul.bf16.gmra.mxu2 %v10880_v15 }
 0x210   : > { %1087 = vst [vmem:[#allocation2 + $0x758] sm:$0xf] %v14975_v9 }
 0x211   : > { %1088 = vst [vmem:[#allocation2 + $0x77c] sm:$0xf] %v14980_v30 }
 0x212   : > { %1246 = vst [vmem:[#allocation2 + $0x6f8] sm:$0xf] %v14975_v9  ;;  %v3853_v28 = vpop.f32.mrf.mxu2 }
 0x213   : > { %1247 = vst [vmem:[#allocation2 + $0x71c] sm:$0xf] %v14980_v30 }
 0x214   : > { %1405 = vst [vmem:[#allocation2 + $0x698] sm:$0xf] %v14975_v9 }
 0x215   : > { %17790 = vst [vmem:[#allocation86_spill] sm:$0xff] %v15009_v18  ;;  %v17792_v18 = vrot.slane %v14919_v5, 1  ;;  %v580_v5 = vrot.slane %v15005_v29, 7 }
 0x216   : > { %17791 = vst [vmem:[#allocation87_spill] sm:$0xff] %v15011_v11 }
 0x217   : > { %1406 = vst [vmem:[#allocation2 + $0x6bc] sm:$0xf] %v14980_v30  ;;  %v11203_v13 = vld [vmem:[#allocation2 + $0x758] sm:$0xf]  ;;  %v801_v30 = vpack.c.bf16 %v14959_v31, %v14959_v31  ;;  %v946_v14 = vsel %vm926_vm1, %v17792_v18, %v906_v19 }
 0x218   : > { %746 = vst [vmem:[#allocation2 + $0x510] sm:$0xf] %v692_v51  ;;  %v13051_v15 = vld [vmem:[#allocation2 + $0x778] sm:$0xf0] }
 0x219   : > { %747 = vst [vmem:[#allocation2 + $0x534] sm:$0xf] %v693_v20  ;;  %v11204_v9 = vor.u32 %v13051_v15, %v11203_v13  ;;  %v945_v13 = vsel %vm926_vm1, %v906_v19, %v17665_v26  ;;  %v15035_v15 = vpack.c.bf16 %v946_v14, %v946_v14  ;;  %v15043_v19 = vadd.f32 %v3853_v28, %v3710_v43  ;;  %v15047_v14 = vpop.f32.mrf.mxu1  ;;  %v15060_v28 = vld [vmem:[%s13766_s23 + $0x94] sm:$0xf]  ;;  %s17258_s23 = scalar_lea.vmem %s17592_s11, %s12811_s20 }
 0x21a   : > { %1122 = vst [vmem:[#allocation2 + $0x4b0] sm:$0xf] %v692_v51  ;;  %v15038_v18 = vpack.c.bf16 %v945_v13, %v945_v13  ;;  %v17798_v13 = vrot.slane %v14959_v31, 7 }
 0x21b   : > { %1123 = vst [vmem:[#allocation2 + $0x4d4] sm:$0xf] %v693_v20  ;;  %3927 = vmatmul.bf16.gmra.mxu3 %v11204_v9  ;;  %v17666_v9 = vrot.slane %v15029_v3, 7 }
 0x21c   : > { %1177 = vst [vmem:[#allocation2 + $0x4d8] sm:$0xf] %v14951_v59  ;;  %v620_v26 = vsel %vm601_vm0, %v17798_v13, %v580_v5  ;;  %v15066_v13 = vunpack.c.l.bf16 %v15060_v28 }
 0x21d   : > { %1281 = vst [vmem:[#allocation2 + $0x450] sm:$0xf] %v692_v51  ;;  %v15041_v51 = vpop.f32.mrf.mxu3  ;;  %v694_v31 = vpack.c.bf16 %v620_v26, %v620_v26 }
 0x21e   : > { %1282 = vst [vmem:[#allocation2 + $0x474] sm:$0xf] %v693_v20  ;;  %v15045_v20 = vpop.f32.mrf.mxu0 }
 0x21f   : > { %v10907_v59 = vld [vmem:[#allocation2 + $0x510] sm:$0xf]  ;;  %854 = vst [vmem:[#allocation2 + $0x514] sm:$0xf] %v800_v32 }
 0x220   : > { %17793 = vst [vmem:[#allocation88_spill] sm:$0xff] %v15035_v15  ;;  %v12978_v11 = vld [vmem:[#allocation2 + $0x530] sm:$0xf0] }
 0x221   : > { %855 = vst [vmem:[#allocation2 + $0x538] sm:$0xf] %v801_v30  ;;  %v10908_v48 = vor.u32 %v12978_v11, %v10907_v59  ;;  %v10269_v11 = vld [vmem:[#allocation2 + $0x2c] sm:$0xf0]  ;;  %v3714_v55 = vpop.f32.mrf.mxu1 }
 0x222   : > { %17794 = vst [vmem:[#allocation89_spill] sm:$0xff] %v15038_v18 }
 0x223   : > { %1335 = vst [vmem:[#allocation2 + $0x454] sm:$0xf] %v800_v32  ;;  %3599 = vmatmul.bf16.gmra.mxu0 %v10908_v48  ;;  %v619_v32 = vsel %vm601_vm0, %v580_v5, %v17666_v9  ;;  %v15071_v9 = vpop.f32.mrf.mxu2 }
 0x224   : > { %17795 = vst [vmem:[#allocation90_spill] sm:$0xff] %v15043_v19  ;;  %v695_v59 = vpack.c.bf16 %v619_v32, %v619_v32  ;;  %v908_v32 = vrot.slane %v15029_v3, 1 }
 0x225   : > { %17796 = vst [vmem:[#allocation91_spill] sm:$0xff] %v15045_v20  ;;  %v15069_v5 = vpop.f32.mrf.mxu3 }
 0x226   : > { %17797 = vst [vmem:[#allocation92_spill] sm:$0xff] %v15047_v14  ;;  %v12974_v48 = vld [vmem:[#allocation2 + $0x514] sm:$0xf]  ;;  %v3570_v20 = vpop.f32.mrf.mxu0 }
 0x227   : > { %1336 = vst [vmem:[#allocation2 + $0x478] sm:$0xf] %v801_v30  ;;  %v12813_v30 = vld [vmem:[#allocation2 + $0xc] sm:$0xf]  ;;  %v3715_v19 = vadd.f32 %v3714_v55, %v3570_v20  ;;  %v3760_v20 = vadd.f32 %v14714_v38, %v14362_v37 }
 0x228   : > { %1071 = vst [vmem:[#allocation2 + $0x518] sm:$0xf] %v15035_v15  ;;  %v10909_v43 = vld [vmem:[#allocation2 + $0x534] sm:$0xf0] }
 0x229   : > { %1072 = vst [vmem:[#allocation2 + $0x53c] sm:$0xf] %v15038_v18  ;;  %v10912_v14 = vor.u32 %v12974_v48, %v10909_v43  ;;  %v17669_v48 = vrot.slane %v15066_v13, 1  ;;  %v15102_v38 = vpop.f32.mrf.mxu1 }
 0x22a   : > { %1178 = vst [vmem:[#allocation2 + $0x4fc] sm:$0xf] %v14995_v34  ;;  %v10272_v34 = vor.u32 %v12813_v30, %v10269_v11  ;;  %v17801_v30 = vrot.slane %v15005_v29, 1  ;;  %v13106_v11 = vld [vmem:[#allocation3 + $0x198] sm:$0xff] }
 0x22b   : > { %1230 = vst [vmem:[#allocation2 + $0x4b8] sm:$0xf] %v15035_v15  ;;  %3743 = vmatmul.bf16.gmra.mxu1 %v10912_v14  ;;  %v803_v14 = vpack.c.bf16 %v15029_v3, %v15029_v3  ;;  %4369 = vmatpush.bf16.msrb.mxu2 %v13106_v11  ;;  %v10305_v11 = vld [vmem:[#allocation2 + $0x74] sm:$0xf0] }
 0x22c   : > { %1231 = vst [vmem:[#allocation2 + $0x4dc] sm:$0xf] %v15038_v18  ;;  %3941 = vmatmul.bf16.vlgmr.msrb.gmra.mxu3 %v10272_v34  ;;  %v944_v55 = vsel %vm926_vm1, %v17801_v30, %v908_v32  ;;  %v13098_v30 = vld [vmem:[#allocation3 + $0x158] sm:$0xff] }
 0x22d   : > { %1389 = vst [vmem:[#allocation2 + $0x458] sm:$0xf] %v15035_v15  ;;  %v15091_v34 = vpack.c.bf16 %v944_v55, %v944_v55  ;;  %v13118_v55 = vld [vmem:[#allocation3 + $0x1f8] sm:$0xff]  ;;  %4225 = vmatpush.bf16.msrb.mxu1 %v13098_v30 }
 0x22e   : > { %17799 = vst [vmem:[#allocation93_spill] sm:$0xff] %v15069_v5  ;;  %v15100_v37 = vpop.f32.mrf.mxu0  ;;  %4509 = vmatpush.bf16.msra.mxu3 %v13118_v55 }
 0x22f   : > { %17800 = vst [vmem:[#allocation94_spill] sm:$0xff] %v15071_v9  ;;  %v10915_v26 = vld [vmem:[#allocation2 + $0x518] sm:$0xf]  ;;  %v13097_v9 = vld [vmem:[#allocation3 + $0x150] sm:$0xff] }
 0x230   : > { %1390 = vst [vmem:[#allocation2 + $0x47c] sm:$0xf] %v15038_v18  ;;  %v12979_v63 = vld [vmem:[#allocation2 + $0x538] sm:$0xf0]  ;;  %v802_v18 = vpack.c.bf16 %v15005_v29, %v15005_v29  ;;  %v582_v29 = vrot.slane %v15066_v13, 7 }
 0x231   : > { %748 = vst [vmem:[#allocation2 + $0x558] sm:$0xf] %v694_v31  ;;  %v10916_v43 = vor.u32 %v12979_v63, %v10915_v26  ;;  %v943_v63 = vsel %vm926_vm1, %v908_v32, %v17669_v48  ;;  %v3858_v26 = vpop.f32.mrf.mxu2  ;;  %4226 = vmatpush.bf16.msrb.mxu1 %v13097_v9  ;;  %v3719_v9 = vpop.f32.mrf.mxu1 }
 0x232   : > { %749 = vst [vmem:[#allocation2 + $0x57c] sm:$0xf] %v695_v59  ;;  %v15094_v15 = vpack.c.bf16 %v943_v63, %v943_v63  ;;  %v15096_v32 = vadd.f32 %v3858_v26, %v3715_v19  ;;  %v12822_v63 = vld [vmem:[#allocation2 + $0x54] sm:$0xf]  ;;  %v17805_v19 = vrot.slane %v15029_v3, 7  ;;  %v17806_v26 = vrot.slane %v13789_v22, 7 }
 0x233   : > { %1124 = vst [vmem:[#allocation2 + $0x4f8] sm:$0xf] %v694_v31  ;;  %3887 = vmatmul.bf16.gmra.mxu2 %v10916_v43  ;;  %v3903_v43 = vpop.f32.mrf.mxu3  ;;  %v10308_v30 = vor.u32 %v12822_v63, %v10305_v11 }
 0x234   : > { %1125 = vst [vmem:[#allocation2 + $0x51c] sm:$0xf] %v695_v59  ;;  %v15098_v48 = vadd.f32 %v3903_v43, %v3760_v20  ;;  %v618_v20 = vsel %vm601_vm0, %v17805_v19, %v582_v29 }
 0x235   : > { %1179 = vst [vmem:[#allocation2 + $0x520] sm:$0xf] %v15017_v33  ;;  %v696_v3 = vpack.c.bf16 %v618_v20, %v618_v20  ;;  %v910_v20 = vrot.slane %v13789_v22, 1 }
 0x236   : > { %1283 = vst [vmem:[#allocation2 + $0x498] sm:$0xf] %v694_v31 }
 0x237   : > { %1284 = vst [vmem:[#allocation2 + $0x4bc] sm:$0xf] %v695_v59  ;;  %v13105_v59 = vld [vmem:[#allocation3 + $0x190] sm:$0xff] }
 0x238   : > { %v10943_v33 = vld [vmem:[#allocation2 + $0x558] sm:$0xf]  ;;  %856 = vst [vmem:[#allocation2 + $0x55c] sm:$0xf] %v802_v18  ;;  %4370 = vmatpush.bf16.msrb.mxu2 %v13105_v59 }
 0x239   : > { %17802 = vst [vmem:[#allocation95_spill] sm:$0xff] %v15091_v34  ;;  %v12987_v31 = vld [vmem:[#allocation2 + $0x578] sm:$0xf0]  ;;  %v15117_v55 = vpop.f32.mrf.mxu2 }
 0x23a   : > { %857 = vst [vmem:[#allocation2 + $0x580] sm:$0xf] %v803_v14  ;;  %v10944_v5 = vor.u32 %v12987_v31, %v10943_v33  ;;  %v13103_v59 = vld [vmem:[#allocation3 + $0x180] sm:$0xff] }
 0x23b   : > { %17803 = vst [vmem:[#allocation96_spill] sm:$0xff] %v15094_v15  ;;  %v15119_v19 = vpop.f32.mrf.mxu3 }
 0x23c   : > { %17804 = vst [vmem:[#allocation97_spill] sm:$0xff] %v15098_v48  ;;  %3604 = vmatmul.bf16.gmra.mxu0 %v10944_v5  ;;  %v13096_v5 = vld [vmem:[#allocation3 + $0x148] sm:$0xff]  ;;  %v13095_v48 = vld [vmem:[#allocation3 + $0x140] sm:$0xff]  ;;  %3946 = vmatmul.bf16.gmra.mxu3 %v10308_v30  ;;  %v3765_v30 = vadd.f32 %v14784_v36, %v14419_v46  ;;  %v15146_v46 = vpop.f32.mrf.mxu1 }
 0x23d   : > { %1337 = vst [vmem:[#allocation2 + $0x49c] sm:$0xf] %v802_v18  ;;  %v617_v18 = vsel %vm601_vm0, %v582_v29, %v17806_v26  ;;  %4227 = vmatpush.bf16.msrb.mxu1 %v13096_v5  ;;  %v17808_v5 = vrot.slane %v15066_v13, 1 }
 0x23e   : > { %1338 = vst [vmem:[#allocation2 + $0x4c0] sm:$0xf] %v803_v14  ;;  %v13104_v14 = vld [vmem:[#allocation3 + $0x188] sm:$0xff]  ;;  %v697_v31 = vpack.c.bf16 %v617_v18, %v617_v18 }
 0x23f   : > { %1073 = vst [vmem:[#allocation2 + $0x560] sm:$0xf] %v15091_v34  ;;  %v12983_v33 = vld [vmem:[#allocation2 + $0x55c] sm:$0xf]  ;;  %4371 = vmatpush.bf16.msrb.mxu2 %v13104_v14  ;;  %v804_v14 = vpack.c.bf16 %v15066_v13, %v15066_v13 }
 0x240   : > { %1074 = vst [vmem:[#allocation2 + $0x584] sm:$0xf] %v15094_v15 }
 0x241   : > { %1180 = vst [vmem:[#allocation2 + $0x544] sm:$0xf] %v15060_v28  ;;  %v10945_v43 = vld [vmem:[#allocation2 + $0x57c] sm:$0xf0]  ;;  %v3575_v28 = vpop.f32.mrf.mxu0  ;;  %4228 = vmatpush.bf16.msrb.mxu1 %v13095_v48 }
 0x242   : > { %1232 = vst [vmem:[#allocation2 + $0x500] sm:$0xf] %v15091_v34  ;;  %v10948_v29 = vor.u32 %v12983_v33, %v10945_v43  ;;  %v3720_v26 = vadd.f32 %v3719_v9, %v3575_v28  ;;  %v805_v33 = vpack.c.bf16 %v13789_v22, %v13789_v22  ;;  %v942_v43 = vsel %vm926_vm1, %v17808_v5, %v910_v20  ;;  %v13126_v9 = vld [vmem:[#allocation3 + $0x238] sm:$0xff] }
 0x243   : > { %1233 = vst [vmem:[#allocation2 + $0x524] sm:$0xf] %v15094_v15  ;;  %4372 = vmatpush.bf16.msrb.mxu2 %v13103_v59  ;;  %v3863_v59 = vpop.f32.mrf.mxu2  ;;  %v3908_v22 = vpop.f32.mrf.mxu3  ;;  %v15138_v13 = vpack.c.bf16 %v942_v43, %v942_v43  ;;  %4653 = vmatpush.bf16.msra.mxu0 %v13126_v9 }
 0x244   : > { %17807 = vst [vmem:[#allocation98_spill] sm:$0xff] %v15119_v19  ;;  %3748 = vmatmul.bf16.gmra.mxu1 %v10948_v29  ;;  %v17809_v29 = vrot.slane %v13791_v23, 1  ;;  %v15142_v48 = vadd.f32 %v3908_v22, %v3765_v30  ;;  %v12827_v19 = vld [vmem:[#allocation2 + $0x78] sm:$0xf0] }
 0x245   : > { %1391 = vst [vmem:[#allocation2 + $0x4a0] sm:$0xf] %v15091_v34 }
 0x246   : > { %1392 = vst [vmem:[#allocation2 + $0x4c4] sm:$0xf] %v15094_v15  ;;  %v10951_v63 = vld [vmem:[#allocation2 + $0x560] sm:$0xf]  ;;  %v941_v28 = vsel %vm926_vm1, %v910_v20, %v17809_v29  ;;  %v12831_v20 = vld [vmem:[#allocation2 + $0x9c] sm:$0xf] }
 0x247   : > { %750 = vst [vmem:[#allocation2 + $0x5a0] sm:$0xf] %v696_v3  ;;  %v12988_v11 = vld [vmem:[#allocation2 + $0x580] sm:$0xf0]  ;;  %v15148_v23 = vpack.c.bf16 %v941_v28, %v941_v28 }
 0x248   : > { %751 = vst [vmem:[#allocation2 + $0x5c4] sm:$0xf] %v697_v31  ;;  %v10952_v18 = vor.u32 %v12988_v11, %v10951_v63  ;;  %v15140_v63 = vadd.f32 %v3863_v59, %v3720_v26  ;;  %v10341_v26 = vld [vmem:[#allocation2 + $0xbc] sm:$0xf0] }
 0x249   : > { %1126 = vst [vmem:[#allocation2 + $0x540] sm:$0xf] %v696_v3  ;;  %v15144_v11 = vpop.f32.mrf.mxu0  ;;  %v10344_v5 = vor.u32 %v12831_v20, %v10341_v26 }
 0x24a   : > { %1127 = vst [vmem:[#allocation2 + $0x564] sm:$0xf] %v697_v31  ;;  %3892 = vmatmul.bf16.gmra.mxu2 %v10952_v18 }
 0x24b   : > { %1285 = vst [vmem:[#allocation2 + $0x4e0] sm:$0xf] %v696_v3  ;;  %v15154_v43 = vpop.f32.mrf.mxu2  ;;  %v15158_v22 = vpop.f32.mrf.mxu3 }
 0x24c   : > { %1286 = vst [vmem:[#allocation2 + $0x504] sm:$0xf] %v697_v31  ;;  %3951 = vmatmul.bf16.gmra.mxu3 %v10344_v5  ;;  %v3770_v5 = vadd.f32 %v14851_v47, %v14476_v42  ;;  %v13117_v42 = vld [vmem:[#allocation3 + $0x1f0] sm:$0xff] }
 0x24d   : > { %858 = vst [vmem:[#allocation2 + $0x5a4] sm:$0xf] %v804_v14  ;;  %4510 = vmatpush.bf16.msra.mxu3 %v13117_v42 }
 0x24e   : > { %17810 = vst [vmem:[#allocation99_spill] sm:$0xff] %v15138_v13  ;;  %v10979_v36 = vld [vmem:[#allocation2 + $0x5a0] sm:$0xf] }
 0x24f   : > { %17811 = vst [vmem:[#allocation100_spill] sm:$0xff] %v15142_v48  ;;  %v12996_v3 = vld [vmem:[#allocation2 + $0x5c0] sm:$0xf0] }
 0x250   : > { %859 = vst [vmem:[#allocation2 + $0x5c8] sm:$0xf] %v805_v33  ;;  %v10980_v31 = vor.u32 %v12996_v3, %v10979_v36  ;;  %v10275_v3 = vld [vmem:[#allocation2 + $0x10] sm:$0xf] }
 0x251   : > { %17812 = vst [vmem:[#allocation101_spill] sm:$0xff] %v15148_v23 }
 0x252   : > { %1339 = vst [vmem:[#allocation2 + $0x4e4] sm:$0xf] %v804_v14  ;;  %3609 = vmatmul.bf16.gmra.mxu0 %v10980_v31  ;;  %v3580_v14 = vpop.f32.mrf.mxu0  ;;  %v12818_v31 = vld [vmem:[#allocation2 + $0x30] sm:$0xf0] }
 0x253   : > { %1340 = vst [vmem:[#allocation2 + $0x508] sm:$0xf] %v805_v33  ;;  %v3724_v33 = vpop.f32.mrf.mxu1  ;;  %v3868_v20 = vpop.f32.mrf.mxu2 }
 0x254   : > { %1075 = vst [vmem:[#allocation2 + $0x5a8] sm:$0xf] %v15138_v13  ;;  %v12992_v18 = vld [vmem:[#allocation2 + $0x5a4] sm:$0xf]  ;;  %v3725_v28 = vadd.f32 %v3724_v33, %v3580_v14  ;;  %v10377_v14 = vld [vmem:[#allocation2 + $0x104] sm:$0xf0] }
 0x255   : > { %1076 = vst [vmem:[#allocation2 + $0x5cc] sm:$0xf] %v15148_v23  ;;  %v12814_v33 = vld [vmem:[#allocation2 + $0x14] sm:$0xf] }
 0x256   : > { %1234 = vst [vmem:[#allocation2 + $0x548] sm:$0xf] %v15138_v13  ;;  %v15160_v26 = vadd.f32 %v3868_v20, %v3725_v28  ;;  %v10283_v28 = vld [vmem:[#allocation2 + $0x18] sm:$0xf]  ;;  %v12819_v20 = vld [vmem:[#allocation2 + $0x38] sm:$0xf0] }
 0x257   : > { %1235 = vst [vmem:[#allocation2 + $0x56c] sm:$0xf] %v15148_v23  ;;  %v10981_v30 = vld [vmem:[#allocation2 + $0x5c4] sm:$0xf0] }
 0x258   : > { %1393 = vst [vmem:[#allocation2 + $0x4e8] sm:$0xf] %v15138_v13  ;;  %v10984_v29 = vor.u32 %v12992_v18, %v10981_v30  ;;  %v10276_v13 = vor.u32 %v12818_v31, %v10275_v3  ;;  %v12840_v18 = vld [vmem:[#allocation2 + $0xe4] sm:$0xf]  ;;  %v10284_v3 = vor.u32 %v12819_v20, %v10283_v28 }
 0x259   : > { %1394 = vst [vmem:[#allocation2 + $0x50c] sm:$0xf] %v15148_v23  ;;  %v12828_v28 = vld [vmem:[#allocation2 + $0x80] sm:$0xf0] }
 0x25a   : > { %3753 = vmatmul.bf16.gmra.mxu1 %v10984_v29  ;;  %17813 = vst [vmem:[#allocation102_spill] sm:$0xff] %v15158_v22  ;;  %v15162_v15 = vpop.f32.mrf.mxu0  ;;  %v10277_v29 = vld [vmem:[#allocation2 + $0x34] sm:$0xf0] }
 0x25b   : > { %v10987_v9 = vld [vmem:[#allocation2 + $0x5a8] sm:$0xf]  ;;  %v15164_v30 = vpop.f32.mrf.mxu1  ;;  %v10280_v23 = vor.u32 %v12814_v33, %v10277_v29  ;;  %v15170_v34 = vpop.f32.mrf.mxu2  ;;  %v10311_v22 = vld [vmem:[#allocation2 + $0x58] sm:$0xf]  ;;  %v10313_v33 = vld [vmem:[#allocation2 + $0x7c] sm:$0xf0] }
 0x25c   : > { %v12997_v59 = vld [vmem:[#allocation2 + $0x5c8] sm:$0xf0]  ;;  %v10312_v47 = vor.u32 %v12827_v19, %v10311_v22  ;;  %v3775_v22 = vadd.f32 %v14921_v1, %v14524_v25 }
 0x25d   : > { %v10988_v36 = vor.u32 %v12997_v59, %v10987_v9  ;;  %v3913_v9 = vpop.f32.mrf.mxu3  ;;  %v10380_v59 = vor.u32 %v12840_v18, %v10377_v14  ;;  %v10413_v18 = vld [vmem:[#allocation2 + $0x14c] sm:$0xf0]  ;;  %v12823_v14 = vld [vmem:[#allocation2 + $0x5c] sm:$0xf] }
 0x25f   : > { %3897 = vmatmul.bf16.gmra.mxu2 %v10988_v36  ;;  %v15168_v36 = vadd.f32 %v3913_v9, %v3770_v5  ;;  %3956 = vmatmul.bf16.gmra.mxu3 %v10380_v59  ;;  %v10319_v59 = vld [vmem:[#allocation2 + $0x60] sm:$0xf] }
 0x261   : > { %17814 = vst [vmem:[#allocation103_spill] sm:$0xff] %v15168_v36 }
 0x262   : > { %4085 = vmatmul.bf16.vlgmr.msrb.gmra.mxu0 %v10276_v13  ;;  %v3585_v31 = vpop.f32.mrf.mxu0  ;;  %v12849_v13 = vld [vmem:[#allocation2 + $0x12c] sm:$0xf] }
 0x263   : > { %v3729_v7 = vpop.f32.mrf.mxu1  ;;  %v10416_v5 = vor.u32 %v12849_v13, %v10413_v18  ;;  %v3873_v9 = vpop.f32.mrf.mxu2  ;;  %v13125_v13 = vld [vmem:[#allocation3 + $0x230] sm:$0xff] }
 0x264   : > { %v3730_v48 = vadd.f32 %v3729_v7, %v3585_v31  ;;  %v10320_v7 = vor.u32 %v12828_v28, %v10319_v59  ;;  %v12836_v31 = vld [vmem:[#allocation2 + $0xc0] sm:$0xf0]  ;;  %4654 = vmatpush.bf16.msra.mxu0 %v13125_v13 }
 0x265   : > { %v15172_v29 = vpop.f32.mrf.mxu3 }
 0x266   : > { %17815 = vst [vmem:[#allocation104_spill] sm:$0xff] %v15172_v29  ;;  %v15174_v20 = vadd.f32 %v3873_v9, %v3730_v48  ;;  %v12858_v48 = vld [vmem:[#allocation2 + $0x174] sm:$0xf]  ;;  %v10349_v9 = vld [vmem:[#allocation2 + $0xc4] sm:$0xf0] }
 0x267   : > { %v10355_v29 = vld [vmem:[#allocation2 + $0xa8] sm:$0xf] }
 0x26a   : > { %4229 = vmatmul.bf16.vlgmr.msrb.gmra.mxu1 %v10280_v23  ;;  %v10316_v23 = vor.u32 %v12823_v14, %v10313_v33  ;;  %v15176_v36 = vpop.f32.mrf.mxu0  ;;  %v10449_v33 = vld [vmem:[#allocation2 + $0x194] sm:$0xf0] }
 0x26b   : > { %17816 = vst [vmem:[#allocation105_spill] sm:$0xff] %v15176_v36  ;;  %v15178_v19 = vpop.f32.mrf.mxu1  ;;  %v10452_v25 = vor.u32 %v12858_v48, %v10449_v33  ;;  %v10485_v48 = vld [vmem:[#allocation2 + $0x1dc] sm:$0xf0]  ;;  %v12841_v33 = vld [vmem:[#allocation2 + $0xec] sm:$0xf] }
 0x26c   : > { %17817 = vst [vmem:[#allocation106_spill] sm:$0xff] %v15178_v19  ;;  %v12837_v19 = vld [vmem:[#allocation2 + $0xc8] sm:$0xf0] }
 0x26d   : > { %v3918_v42 = vpop.f32.mrf.mxu3 }
 0x26f   : > { %4373 = vmatmul.bf16.vlgmr.msrb.gmra.mxu2 %v10284_v3  ;;  %3961 = vmatmul.bf16.gmra.mxu3 %v10416_v5  ;;  %v10347_v3 = vld [vmem:[#allocation2 + $0xa0] sm:$0xf]  ;;  %v12832_v5 = vld [vmem:[#allocation2 + $0xa4] sm:$0xf] }
 0x270   : > { %v10348_v18 = vor.u32 %v12836_v31, %v10347_v3  ;;  %v10352_v1 = vor.u32 %v12832_v5, %v10349_v9  ;;  %v10383_v3 = vld [vmem:[#allocation2 + $0xe8] sm:$0xf]  ;;  %v12845_v31 = vld [vmem:[#allocation2 + $0x108] sm:$0xf0]  ;;  %v10385_v5 = vld [vmem:[#allocation2 + $0x10c] sm:$0xf0] }
 0x272   : > { %4090 = vmatmul.bf16.gmra.mxu0 %v10312_v47  ;;  %v15182_v47 = vadd.f32 %v3918_v42, %v3775_v22  ;;  %v3590_v14 = vpop.f32.mrf.mxu0 }
 0x273   : > { %v3734_v59 = vpop.f32.mrf.mxu1 }
 0x274   : > { %17818 = vst [vmem:[#allocation107_spill] sm:$0xff] %v15182_v47  ;;  %v3735_v28 = vadd.f32 %v3734_v59, %v3590_v14  ;;  %v10384_v47 = vor.u32 %v12845_v31, %v10383_v3  ;;  %v10388_v59 = vor.u32 %v12841_v33, %v10385_v5  ;;  %v10421_v33 = vld [vmem:[#allocation2 + $0x154] sm:$0xf0] }
 0x275   : > { %v15186_v22 = vpop.f32.mrf.mxu3 }
 0x276   : > { %17820 = vst [vmem:[#allocation109_spill] sm:$0xff] %v15186_v22 }
 0x27a   : > { %4234 = vmatmul.bf16.gmra.mxu1 %v10316_v23  ;;  %v15184_v23 = vpop.f32.mrf.mxu2 }
 0x27b   : > { %17819 = vst [vmem:[#allocation108_spill] sm:$0xff] %v15184_v23  ;;  %v12867_v23 = vld [vmem:[#allocation2 + $0x1bc] sm:$0xf]  ;;  %v15192_v14 = vpop.f32.mrf.mxu1 }
 0x27c   : > { %17822 = vst [vmem:[#allocation111_spill] sm:$0xff] %v15192_v14  ;;  %v10488_v9 = vor.u32 %v12867_v23, %v10485_v48  ;;  %v10419_v14 = vld [vmem:[#allocation2 + $0x130] sm:$0xf]  ;;  %v10521_v23 = vld [vmem:[#allocation2 + $0x224] sm:$0xf0] }
 0x27d   : > { %v12850_v48 = vld [vmem:[#allocation2 + $0x134] sm:$0xf] }
 0x27f   : > { %4378 = vmatmul.bf16.gmra.mxu2 %v10320_v7  ;;  %3966 = vmatmul.bf16.gmra.mxu3 %v10452_v25  ;;  %v10356_v7 = vor.u32 %v12837_v19, %v10355_v29  ;;  %v3780_v29 = vadd.f32 %v14977_v49, %v14587_v17  ;;  %v3923_v19 = vpop.f32.mrf.mxu3  ;;  %v12876_v49 = vld [vmem:[#allocation2 + $0x204] sm:$0xf] }
 0x281   : > { %v15196_v25 = vadd.f32 %v3923_v19, %v3780_v29  ;;  %v10524_v29 = vor.u32 %v12876_v49, %v10521_v23  ;;  %v10424_v19 = vor.u32 %v12850_v48, %v10421_v33  ;;  %v13116_v48 = vld [vmem:[#allocation3 + $0x1e8] sm:$0xff]  ;;  %v12885_v33 = vld [vmem:[#allocation2 + $0x24c] sm:$0xf] }
 0x282   : > { %4095 = vmatmul.bf16.gmra.mxu0 %v10348_v18  ;;  %v3878_v42 = vpop.f32.mrf.mxu2  ;;  %v15190_v18 = vpop.f32.mrf.mxu0  ;;  %4511 = vmatpush.bf16.msra.mxu3 %v13116_v48  ;;  %v12872_v48 = vld [vmem:[#allocation2 + $0x1e0] sm:$0xf0] }
 0x283   : > { %v15188_v13 = vadd.f32 %v3878_v42, %v3735_v28  ;;  %17821 = vst [vmem:[#allocation110_spill] sm:$0xff] %v15190_v18  ;;  %v10391_v28 = vld [vmem:[#allocation2 + $0xf0] sm:$0xf]  ;;  %v12854_v18 = vld [vmem:[#allocation2 + $0x150] sm:$0xf0] }
 0x284   : > { %17823 = vst [vmem:[#allocation112_spill] sm:$0xff] %v15196_v25  ;;  %v10420_v17 = vor.u32 %v12854_v18, %v10419_v14  ;;  %v3785_v18 = vadd.f32 %v15041_v51, %v14654_v0  ;;  %v10455_v25 = vld [vmem:[#allocation2 + $0x178] sm:$0xf] }
 0x287   : > { %v3739_v42 = vpop.f32.mrf.mxu1 }
 0x28a   : > { %4239 = vmatmul.bf16.gmra.mxu1 %v10352_v1  ;;  %v12846_v1 = vld [vmem:[#allocation2 + $0x110] sm:$0xf0]  ;;  %v15198_v31 = vpop.f32.mrf.mxu2 }
 0x28b   : > { %v10392_v3 = vor.u32 %v12846_v1, %v10391_v28  ;;  %17824 = vst [vmem:[#allocation113_spill] sm:$0xff] %v15198_v31  ;;  %v12855_v28 = vld [vmem:[#allocation2 + $0x158] sm:$0xf0] }
 0x28c   : > { %v12863_v31 = vld [vmem:[#allocation2 + $0x198] sm:$0xf0] }
 0x28f   : > { %4383 = vmatmul.bf16.gmra.mxu2 %v10356_v7  ;;  %v3595_v7 = vpop.f32.mrf.mxu0  ;;  %3971 = vmatmul.bf16.gmra.mxu3 %v10488_v9 }
 0x290   : > { %v3740_v22 = vadd.f32 %v3739_v42, %v3595_v7 }
 0x292   : > { %4100 = vmatmul.bf16.gmra.mxu0 %v10384_v47  ;;  %v15200_v47 = vpop.f32.mrf.mxu3  ;;  %v3883_v9 = vpop.f32.mrf.mxu2 }
 0x293   : > { %17825 = vst [vmem:[#allocation114_spill] sm:$0xff] %v15200_v47  ;;  %v15202_v1 = vadd.f32 %v3883_v9, %v3740_v22  ;;  %v10456_v22 = vor.u32 %v12863_v31, %v10455_v25  ;;  %v10457_v9 = vld [vmem:[#allocation2 + $0x19c] sm:$0xf0] }
 0x295   : > { %17826 = vst [vmem:[#allocation115_spill] sm:$0xff] %v15202_v1 }
 0x297   : > { %v3597_v5 = vpop.f32.mrf.mxu0 }
 0x29a   : > { %4244 = vmatmul.bf16.gmra.mxu1 %v10388_v59  ;;  %v10427_v59 = vld [vmem:[#allocation2 + $0x138] sm:$0xf]  ;;  %v3885_v49 = vpop.f32.mrf.mxu2 }
 0x29b   : > { %v10428_v7 = vor.u32 %v12855_v28, %v10427_v59 }
 0x29e   : > { %v3928_v14 = vpop.f32.mrf.mxu3 }
 0x29f   : > { %4388 = vmatmul.bf16.gmra.mxu2 %v10392_v3  ;;  %3976 = vmatmul.bf16.gmra.mxu3 %v10524_v29  ;;  %v3741_v3 = vpop.f32.mrf.mxu1  ;;  %v10557_v29 = vld [vmem:[#allocation2 + $0x26c] sm:$0xf0] }
 0x2a0   : > { %v3742_v42 = vadd.f32 %v3741_v3, %v3597_v5  ;;  %v3600_v47 = vpop.f32.mrf.mxu0  ;;  %v10560_v28 = vor.u32 %v12885_v33, %v10557_v29  ;;  %v10463_v3 = vld [vmem:[#allocation2 + $0x180] sm:$0xf] }
 0x2a2   : > { %4105 = vmatmul.bf16.gmra.mxu0 %v10420_v17  ;;  %v15206_v17 = vadd.f32 %v3928_v14, %v3785_v18  ;;  %v15208_v23 = vadd.f32 %v3885_v49, %v3742_v42  ;;  %v12864_v18 = vld [vmem:[#allocation2 + $0x1a0] sm:$0xf0] }
 0x2a3   : > { %v13124_v14 = vld [vmem:[#allocation3 + $0x228] sm:$0xff]  ;;  %v10464_v42 = vor.u32 %v12864_v18, %v10463_v3 }
 0x2a4   : > { %17827 = vst [vmem:[#allocation116_spill] sm:$0xff] %v15206_v17  ;;  %4655 = vmatpush.bf16.msra.mxu0 %v13124_v14  ;;  %v10491_v17 = vld [vmem:[#allocation2 + $0x1c0] sm:$0xf] }
 0x2a5   : > { %17828 = vst [vmem:[#allocation117_spill] sm:$0xff] %v15208_v23  ;;  %v10492_v29 = vor.u32 %v12872_v48, %v10491_v17  ;;  %v10499_v23 = vld [vmem:[#allocation2 + $0x1c8] sm:$0xf] }
 0x2a6   : > { %v15210_v0 = vpop.f32.mrf.mxu3  ;;  %v10527_v48 = vld [vmem:[#allocation2 + $0x208] sm:$0xf] }
 0x2a7   : > { %17829 = vst [vmem:[#allocation118_spill] sm:$0xff] %v15210_v0 }
 0x2a8   : > { %v3744_v59 = vpop.f32.mrf.mxu1  ;;  %v3602_v5 = vpop.f32.mrf.mxu0 }
 0x2a9   : > { %v3745_v51 = vadd.f32 %v3744_v59, %v3600_v47  ;;  %v12868_v59 = vld [vmem:[#allocation2 + $0x1c4] sm:$0xf] }
 0x2aa   : > { %4249 = vmatmul.bf16.gmra.mxu1 %v10424_v19  ;;  %v12859_v19 = vld [vmem:[#allocation2 + $0x17c] sm:$0xf] }
 0x2af   : > { %4393 = vmatmul.bf16.gmra.mxu2 %v10428_v7  ;;  %v10460_v7 = vor.u32 %v12859_v19, %v10457_v9  ;;  %3981 = vmatmul.bf16.gmra.mxu3 %v10560_v28  ;;  %v3942_v31 = vpop.f32.mrf.mxu3  ;;  %v12894_v19 = vld [vmem:[#allocation2 + $0x294] sm:$0xf]  ;;  %v10593_v9 = vld [vmem:[#allocation2 + $0x2b4] sm:$0xf0]  ;;  %v10493_v28 = vld [vmem:[#allocation2 + $0x1e4] sm:$0xf0] }
 0x2b0   : > { %v3746_v25 = vpop.f32.mrf.mxu1  ;;  %v3943_v0 = vadd.f32 %v3942_v31, %v14297_v56  ;;  %v10496_v14 = vor.u32 %v12868_v59, %v10493_v28  ;;  %v12873_v56 = vld [vmem:[#allocation2 + $0x1e8] sm:$0xf0]  ;;  %v12903_v59 = vld [vmem:[#allocation2 + $0x2dc] sm:$0xf]  ;;  %v10629_v28 = vld [vmem:[#allocation2 + $0x2fc] sm:$0xf0] }
 0x2b1   : > { %v3747_v49 = vadd.f32 %v3746_v25, %v3602_v5  ;;  %v10596_v5 = vor.u32 %v12894_v19, %v10593_v9  ;;  %v10500_v31 = vor.u32 %v12873_v56, %v10499_v23 }
 0x2b2   : > { %4110 = vmatmul.bf16.gmra.mxu0 %v10456_v22 }
 0x2b6   : > { %v3888_v22 = vpop.f32.mrf.mxu2 }
 0x2b7   : > { %v15213_v47 = vadd.f32 %v3888_v22, %v3745_v51  ;;  %v12881_v22 = vld [vmem:[#allocation2 + $0x228] sm:$0xf0] }
 0x2b8   : > { %v10528_v9 = vor.u32 %v12881_v22, %v10527_v48  ;;  %v10563_v22 = vld [vmem:[#allocation2 + $0x250] sm:$0xf] }
 0x2b9   : > { %17830 = vst [vmem:[#allocation119_spill] sm:$0xff] %v15213_v47  ;;  %v3605_v33 = vpop.f32.mrf.mxu0 }
 0x2ba   : > { %4254 = vmatmul.bf16.gmra.mxu1 %v10460_v7  ;;  %v15215_v7 = vpop.f32.mrf.mxu3 }
 0x2be   : > { %v3890_v3 = vpop.f32.mrf.mxu2 }
 0x2bf   : > { %4398 = vmatmul.bf16.gmra.mxu2 %v10464_v42  ;;  %v15217_v25 = vadd.f32 %v3890_v3, %v3747_v49  ;;  %3986 = vmatmul.bf16.gmra.mxu3 %v10596_v5  ;;  %v12877_v3 = vld [vmem:[#allocation2 + $0x20c] sm:$0xf]  ;;  %v10632_v5 = vor.u32 %v12903_v59, %v10629_v28 }
 0x2c1   : > { %v3749_v18 = vpop.f32.mrf.mxu1  ;;  %17831 = vst [vmem:[#allocation120_spill] sm:$0xff] %v15217_v25  ;;  %v3607_v51 = vpop.f32.mrf.mxu0 }
 0x2c2   : > { %4115 = vmatmul.bf16.gmra.mxu0 %v10492_v29  ;;  %v3750_v42 = vadd.f32 %v3749_v18, %v3605_v33  ;;  %v3947_v17 = vpop.f32.mrf.mxu3  ;;  %v10529_v18 = vld [vmem:[#allocation2 + $0x22c] sm:$0xf0] }
 0x2c3   : > { %v15220_v29 = vadd.f32 %v3947_v17, %v14349_v61  ;;  %v12882_v61 = vld [vmem:[#allocation2 + $0x230] sm:$0xf0] }
 0x2c9   : > { %v3751_v47 = vpop.f32.mrf.mxu1 }
 0x2ca   : > { %4259 = vmatmul.bf16.gmra.mxu1 %v10496_v14  ;;  %v3752_v36 = vadd.f32 %v3751_v47, %v3607_v51  ;;  %v15224_v23 = vpop.f32.mrf.mxu3  ;;  %v10532_v14 = vor.u32 %v12877_v3, %v10529_v18 }
 0x2cd   : > { %v3893_v19 = vpop.f32.mrf.mxu2 }
 0x2ce   : > { %v15222_v49 = vadd.f32 %v3893_v19, %v3750_v42  ;;  %v12890_v19 = vld [vmem:[#allocation2 + $0x270] sm:$0xf0] }
 0x2cf   : > { %4403 = vmatmul.bf16.gmra.mxu2 %v10500_v31  ;;  %v3610_v33 = vpop.f32.mrf.mxu0  ;;  %v10535_v31 = vld [vmem:[#allocation2 + $0x210] sm:$0xf]  ;;  %3991 = vmatmul.bf16.gmra.mxu3 %v10632_v5  ;;  %v10564_v3 = vor.u32 %v12890_v19, %v10563_v22  ;;  %v10665_v5 = vld [vmem:[#allocation2 + $0x344] sm:$0xf0]  ;;  %v12891_v22 = vld [vmem:[#allocation2 + $0x278] sm:$0xf0] }
 0x2d0   : > { %17832 = vst [vmem:[#allocation121_spill] sm:$0xff] %v15222_v49  ;;  %v10536_v42 = vor.u32 %v12882_v61, %v10535_v31  ;;  %v12886_v31 = vld [vmem:[#allocation2 + $0x254] sm:$0xf]  ;;  %v3657_v61 = vadd.f32 %v14301_v39, %v14299_v24 }
 0x2d2   : > { %4120 = vmatmul.bf16.gmra.mxu0 %v10528_v9  ;;  %v3952_v48 = vpop.f32.mrf.mxu3 }
 0x2d3   : > { %v15229_v9 = vadd.f32 %v3952_v48, %v14408_v62 }
 0x2d5   : > { %v3895_v17 = vpop.f32.mrf.mxu2 }
 0x2d6   : > { %v15226_v47 = vadd.f32 %v3895_v17, %v3752_v36  ;;  %v3801_v17 = vadd.f32 %v14317_v16, %v3657_v61 }
 0x2d7   : > { %v3754_v56 = vpop.f32.mrf.mxu1  ;;  %v3612_v51 = vpop.f32.mrf.mxu0 }
 0x2d8   : > { %v3755_v25 = vadd.f32 %v3754_v56, %v3610_v33  ;;  %v12912_v33 = vld [vmem:[#allocation2 + $0x324] sm:$0xf]  ;;  %v13115_v56 = vld [vmem:[#allocation3 + $0x1e0] sm:$0xff] }
 0x2d9   : > { %4512 = vmatpush.bf16.msra.mxu3 %v13115_v56  ;;  %v10599_v56 = vld [vmem:[#allocation2 + $0x298] sm:$0xf] }
 0x2da   : > { %4264 = vmatmul.bf16.gmra.mxu1 %v10532_v14  ;;  %v10565_v14 = vld [vmem:[#allocation2 + $0x274] sm:$0xf0]  ;;  %v15235_v62 = vpop.f32.mrf.mxu3 }
 0x2df   : > { %4408 = vmatmul.bf16.gmra.mxu2 %v10536_v42  ;;  %v3756_v59 = vpop.f32.mrf.mxu1  ;;  %v4086_v49 = vpop.f32.mrf.mxu0  ;;  %v10568_v42 = vor.u32 %v12886_v31, %v10565_v14 }
 0x2e0   : > { %v3757_v28 = vadd.f32 %v3756_v59, %v3612_v51  ;;  %v4087_v36 = vadd.f32 %v4086_v49, %v3943_v0  ;;  %v10668_v51 = vor.u32 %v12912_v33, %v10665_v5  ;;  %v3945_v0 = vadd.f32 %v15215_v7, %v3801_v17  ;;  %v13123_v33 = vld [vmem:[#allocation3 + $0x220] sm:$0xff]  ;;  %v12921_v17 = vld [vmem:[#allocation2 + $0x36c] sm:$0xf] }
 0x2e1   : > { %4656 = vmatpush.bf16.msra.mxu0 %v13123_v33 }
 0x2e2   : > { %v3898_v18 = vpop.f32.mrf.mxu2  ;;  %4125 = vmatmul.bf16.gmra.mxu0 %v10564_v3  ;;  %3996 = vmatmul.bf16.gmra.mxu3 %v10668_v51  ;;  %v3957_v3 = vpop.f32.mrf.mxu3  ;;  %v13385_v51 = vld [vmem:[#allocation5 + $0x78] sm:$0xff] }
 0x2e3   : > { %v15231_v1 = vadd.f32 %v3898_v18, %v3755_v25  ;;  %v10571_v25 = vld [vmem:[#allocation2 + $0x258] sm:$0xf]  ;;  %v15242_v16 = vadd.f32 %v3957_v3, %v14465_v57  ;;  %v3662_v57 = vadd.f32 %v14353_v52, %v14351_v54  ;;  %8528 = vmatpush.bf16.msra.mxu2 %v13385_v51 }
 0x2e4   : > { %v10572_v24 = vor.u32 %v12891_v22, %v10571_v25  ;;  %v10601_v25 = vld [vmem:[#allocation2 + $0x2bc] sm:$0xf0] }
 0x2e5   : > { %17833 = vst [vmem:[#allocation122_spill] sm:$0xff] %v15231_v1  ;;  %v12899_v1 = vld [vmem:[#allocation2 + $0x2b8] sm:$0xf0] }
 0x2e6   : > { %v10600_v7 = vor.u32 %v12899_v1, %v10599_v56  ;;  %v3806_v1 = vadd.f32 %v14373_v45, %v3662_v57  ;;  %v10635_v45 = vld [vmem:[#allocation2 + $0x2e0] sm:$0xf]  ;;  %v10737_v57 = vld [vmem:[#allocation2 + $0x3d4] sm:$0xf0] }
 0x2e7   : > { %v4230_v48 = vpop.f32.mrf.mxu1  ;;  %v4088_v59 = vpop.f32.mrf.mxu0 }
 0x2e8   : > { %v4231_v49 = vadd.f32 %v4230_v48, %v4087_v36  ;;  %v4089_v39 = vadd.f32 %v4088_v59, %v3945_v0  ;;  %v12895_v48 = vld [vmem:[#allocation2 + $0x29c] sm:$0xf]  ;;  %v10607_v59 = vld [vmem:[#allocation2 + $0x2a0] sm:$0xf] }
 0x2ea   : > { %v3900_v19 = vpop.f32.mrf.mxu2  ;;  %4269 = vmatmul.bf16.gmra.mxu1 %v10568_v42  ;;  %v10701_v42 = vld [vmem:[#allocation2 + $0x38c] sm:$0xf0]  ;;  %v15249_v22 = vpop.f32.mrf.mxu3 }
 0x2eb   : > { %v15239_v18 = vadd.f32 %v3900_v19, %v3757_v28  ;;  %v10704_v0 = vor.u32 %v12921_v17, %v10701_v42  ;;  %v10604_v19 = vor.u32 %v12895_v48, %v10601_v25  ;;  %v12930_v25 = vld [vmem:[#allocation2 + $0x3b4] sm:$0xf] }
 0x2ef   : > { %4413 = vmatmul.bf16.gmra.mxu2 %v10572_v24  ;;  %v4232_v5 = vpop.f32.mrf.mxu1  ;;  %v4091_v14 = vpop.f32.mrf.mxu0  ;;  %v12900_v24 = vld [vmem:[#allocation2 + $0x2c0] sm:$0xf0] }
 0x2f0   : > { %v4233_v31 = vadd.f32 %v4232_v5, %v4089_v39  ;;  %v4092_v61 = vadd.f32 %v4091_v14, %v15220_v29  ;;  %v3950_v29 = vadd.f32 %v15224_v23, %v3806_v1  ;;  %v10608_v54 = vor.u32 %v12900_v24, %v10607_v59  ;;  %v13377_v5 = vld [vmem:[#allocation5 + $0x38] sm:$0xff]  ;;  %v12904_v1 = vld [vmem:[#allocation2 + $0x2e4] sm:$0xf] }
 0x2f1   : > { %8406 = vmatpush.bf16.msra.mxu1 %v13377_v5  ;;  %v10740_v59 = vor.u32 %v12930_v25, %v10737_v57  ;;  %v12939_v25 = vld [vmem:[#allocation2 + $0x3fc] sm:$0xf]  ;;  %v10773_v57 = vld [vmem:[#allocation2 + $0x41c] sm:$0xf0] }
 0x2f2   : > { %v4374_v36 = vpop.f32.mrf.mxu2  ;;  %4130 = vmatmul.bf16.gmra.mxu0 %v10600_v7  ;;  %4001 = vmatmul.bf16.gmra.mxu3 %v10704_v0  ;;  %v3962_v7 = vpop.f32.mrf.mxu3  ;;  %v10637_v0 = vld [vmem:[#allocation2 + $0x304] sm:$0xf0] }
 0x2f3   : > { %v15244_v28 = vadd.f32 %v4374_v36, %v4231_v49  ;;  %v12908_v36 = vld [vmem:[#allocation2 + $0x300] sm:$0xf0]  ;;  %v15256_v14 = vadd.f32 %v3962_v7, %v14529_v50  ;;  %v10640_v24 = vor.u32 %v12904_v1, %v10637_v0  ;;  %v12913_v1 = vld [vmem:[#allocation2 + $0x32c] sm:$0xf]  ;;  %v10673_v0 = vld [vmem:[#allocation2 + $0x34c] sm:$0xf0] }
 0x2f7   : > { %v4235_v49 = vpop.f32.mrf.mxu1  ;;  %v4093_v56 = vpop.f32.mrf.mxu0 }
 0x2f8   : > { %v4236_v39 = vadd.f32 %v4235_v49, %v4092_v61  ;;  %v4094_v52 = vadd.f32 %v4093_v56, %v3950_v29  ;;  %v10636_v61 = vor.u32 %v12908_v36, %v10635_v45  ;;  %v10671_v45 = vld [vmem:[#allocation2 + $0x328] sm:$0xf]  ;;  %v12917_v36 = vld [vmem:[#allocation2 + $0x348] sm:$0xf0] }
 0x2fa   : > { %v4376_v3 = vpop.f32.mrf.mxu2  ;;  %4274 = vmatmul.bf16.gmra.mxu1 %v10604_v19  ;;  %v3667_v19 = vadd.f32 %v14412_v12, %v14410_v41  ;;  %v15263_v49 = vpop.f32.mrf.mxu3 }
 0x2fb   : > { %v15253_v33 = vadd.f32 %v4376_v3, %v4233_v31  ;;  %v10643_v3 = vld [vmem:[#allocation2 + $0x2e8] sm:$0xf] }
 0x2fc   : > { %v3811_v50 = vadd.f32 %v14431_v35, %v3667_v19  ;;  %v3672_v19 = vadd.f32 %v14469_v8, %v14467_v58 }
 0x2fe   : > { %v3955_v56 = vadd.f32 %v15235_v62, %v3811_v50 }
 0x2ff   : > { %4418 = vmatmul.bf16.gmra.mxu2 %v10608_v54  ;;  %v4237_v17 = vpop.f32.mrf.mxu1  ;;  %v4096_v42 = vpop.f32.mrf.mxu0 }
 0x300   : > { %v4238_v23 = vadd.f32 %v4237_v17, %v4094_v52  ;;  %v4097_v48 = vadd.f32 %v4096_v42, %v15229_v9 }
 0x302   : > { %v4379_v51 = vpop.f32.mrf.mxu2  ;;  %4135 = vmatmul.bf16.gmra.mxu0 %v10636_v61  ;;  %4006 = vmatmul.bf16.gmra.mxu3 %v10740_v59  ;;  %v3967_v41 = vpop.f32.mrf.mxu3  ;;  %v10776_v59 = vor.u32 %v12939_v25, %v10773_v57  ;;  %v13122_v25 = vld [vmem:[#allocation3 + $0x218] sm:$0xff]  ;;  %v10809_v57 = vld [vmem:[#allocation2 + $0x464] sm:$0xf0] }
 0x303   : > { %v15258_v31 = vadd.f32 %v4379_v51, %v4236_v39  ;;  %v12909_v39 = vld [vmem:[#allocation2 + $0x308] sm:$0xf0]  ;;  %v15270_v35 = vadd.f32 %v3967_v41, %v14608_v10  ;;  %v10672_v51 = vor.u32 %v12917_v36, %v10671_v45  ;;  %v3816_v10 = vadd.f32 %v14503_v40, %v3672_v19  ;;  %v12926_v41 = vld [vmem:[#allocation2 + $0x390] sm:$0xf0]  ;;  %4657 = vmatpush.bf16.msra.mxu0 %v13122_v25  ;;  %v12931_v25 = vld [vmem:[#allocation2 + $0x3bc] sm:$0xf] }
 0x304   : > { %v10644_v7 = vor.u32 %v12909_v39, %v10643_v3  ;;  %v10679_v3 = vld [vmem:[#allocation2 + $0x330] sm:$0xf]  ;;  %v12918_v39 = vld [vmem:[#allocation2 + $0x350] sm:$0xf0] }
 0x305   : > { %v13114_v45 = vld [vmem:[#allocation3 + $0x1d8] sm:$0xff] }
 0x306   : > { %4513 = vmatpush.bf16.msra.mxu3 %v13114_v45 }
 0x307   : > { %v4240_v29 = vpop.f32.mrf.mxu1  ;;  %v4098_v52 = vpop.f32.mrf.mxu0 }
 0x308   : > { %v4241_v9 = vadd.f32 %v4240_v29, %v4097_v48  ;;  %v4099_v12 = vadd.f32 %v4098_v52, %v3955_v56  ;;  %v3960_v56 = vadd.f32 %v15249_v22, %v3816_v10 }
 0x30a   : > { %v4381_v54 = vpop.f32.mrf.mxu2  ;;  %4279 = vmatmul.bf16.gmra.mxu1 %v10640_v24  ;;  %v15277_v50 = vpop.f32.mrf.mxu3  ;;  %v10676_v24 = vor.u32 %v12913_v1, %v10673_v0  ;;  %v12922_v1 = vld [vmem:[#allocation2 + $0x374] sm:$0xf]  ;;  %v10709_v0 = vld [vmem:[#allocation2 + $0x394] sm:$0xf0] }
 0x30b   : > { %v15267_v5 = vadd.f32 %v4381_v54, %v4238_v23 }
 0x30f   : > { %4423 = vmatmul.bf16.gmra.mxu2 %v10644_v7  ;;  %v4242_v17 = vpop.f32.mrf.mxu1  ;;  %v4101_v42 = vpop.f32.mrf.mxu0  ;;  %v10680_v7 = vor.u32 %v12918_v39, %v10679_v3  ;;  %v10715_v3 = vld [vmem:[#allocation2 + $0x378] sm:$0xf]  ;;  %v12927_v39 = vld [vmem:[#allocation2 + $0x398] sm:$0xf0] }
 0x310   : > { %v4243_v61 = vadd.f32 %v4242_v17, %v4099_v12  ;;  %v4102_v23 = vadd.f32 %v4101_v42, %v15242_v16  ;;  %v10707_v12 = vld [vmem:[#allocation2 + $0x370] sm:$0xf] }
 0x311   : > { %v10708_v22 = vor.u32 %v12926_v41, %v10707_v12 }
 0x312   : > { %v4384_v62 = vpop.f32.mrf.mxu2  ;;  %4140 = vmatmul.bf16.gmra.mxu0 %v10672_v51  ;;  %4011 = vmatmul.bf16.gmra.mxu3 %v10776_v59  ;;  %v3972_v58 = vpop.f32.mrf.mxu3 }
 0x313   : > { %v15272_v48 = vadd.f32 %v4384_v62, %v4241_v9  ;;  %v15284_v40 = vadd.f32 %v3972_v58, %v14682_v6  ;;  %v3677_v6 = vadd.f32 %v14533_v27, %v14531_v60  ;;  %v10716_v60 = vor.u32 %v12927_v39, %v10715_v3  ;;  %v12935_v58 = vld [vmem:[#allocation2 + $0x3d8] sm:$0xf0] }
 0x315   : > { %v3821_v10 = vadd.f32 %v14570_v4, %v3677_v6  ;;  %v10743_v4 = vld [vmem:[#allocation2 + $0x3b8] sm:$0xf] }
 0x316   : > { %v10744_v45 = vor.u32 %v12935_v58, %v10743_v4 }
 0x317   : > { %v4245_v29 = vpop.f32.mrf.mxu1  ;;  %v4103_v54 = vpop.f32.mrf.mxu0 }
 0x318   : > { %v4246_v16 = vadd.f32 %v4245_v29, %v4102_v23  ;;  %v4104_v8 = vadd.f32 %v4103_v54, %v3960_v56  ;;  %v12948_v23 = vld [vmem:[#allocation2 + $0x444] sm:$0xf] }
 0x319   : > { %v10812_v59 = vor.u32 %v12948_v23, %v10809_v57  ;;  %v10845_v23 = vld [vmem:[#allocation2 + $0x4ac] sm:$0xf0]  ;;  %v10745_v57 = vld [vmem:[#allocation2 + $0x3dc] sm:$0xf0] }
 0x31a   : > { %v4386_v9 = vpop.f32.mrf.mxu2  ;;  %4284 = vmatmul.bf16.gmra.mxu1 %v10676_v24  ;;  %v15291_v19 = vpop.f32.mrf.mxu3  ;;  %v10712_v24 = vor.u32 %v12922_v1, %v10709_v0  ;;  %v3682_v1 = vadd.f32 %v14612_v21, %v14610_v53 }
 0x31b   : > { %v15281_v52 = vadd.f32 %v4386_v9, %v4243_v61 }
 0x31c   : > { %v3826_v0 = vadd.f32 %v14646_v2, %v3682_v1  ;;  %v17834_v2 = vld [vmem:[#allocation65_spill] sm:$0xff] }
 0x31f   : > { %4428 = vmatmul.bf16.gmra.mxu2 %v10680_v7  ;;  %v4247_v36 = vpop.f32.mrf.mxu1  ;;  %v4106_v62 = vpop.f32.mrf.mxu0  ;;  %v13384_v7 = vld [vmem:[#allocation5 + $0x70] sm:$0xff] }
 0x320   : > { %v4248_v17 = vadd.f32 %v4247_v36, %v4104_v8  ;;  %v4107_v42 = vadd.f32 %v4106_v62, %v15256_v14  ;;  %v3965_v14 = vadd.f32 %v15263_v49, %v3821_v10  ;;  %8529 = vmatpush.bf16.msra.mxu2 %v13384_v7  ;;  %v12957_v62 = vld [vmem:[#allocation2 + $0x48c] sm:$0xf]  ;;  %v10748_v10 = vor.u32 %v12931_v25, %v10745_v57  ;;  %v17837_v57 = vld [vmem:[#allocation53_spill] sm:$0xff] }
 0x321   : > { %v10848_v6 = vor.u32 %v12957_v62, %v10845_v23  ;;  %v17835_v62 = vld [vmem:[#allocation48_spill] sm:$0xff] }
 0x322   : > { %v4389_v51 = vpop.f32.mrf.mxu2  ;;  %4145 = vmatmul.bf16.gmra.mxu0 %v10708_v22  ;;  %4016 = vmatmul.bf16.gmra.mxu3 %v10812_v59  ;;  %v3977_v8 = vpop.f32.mrf.mxu3 }
 0x323   : > { %v15286_v61 = vadd.f32 %v4389_v51, %v4246_v16  ;;  %v15298_v12 = vadd.f32 %v3977_v8, %v14762_v44 }
 0x327   : > { %v4250_v29 = vpop.f32.mrf.mxu1  ;;  %v4108_v9 = vpop.f32.mrf.mxu0 }
 0x328   : > { %v4251_v56 = vadd.f32 %v4250_v29, %v4107_v42  ;;  %v4109_v27 = vadd.f32 %v4108_v9, %v3965_v14  ;;  %v13376_v42 = vld [vmem:[#allocation5 + $0x30] sm:$0xff]  ;;  %v12936_v29 = vld [vmem:[#allocation2 + $0x3e0] sm:$0xf0]  ;;  %v10779_v9 = vld [vmem:[#allocation2 + $0x400] sm:$0xf] }
 0x329   : > { %8407 = vmatpush.bf16.msra.mxu1 %v13376_v42  ;;  %v17836_v42 = vld [vmem:[#allocation49_spill] sm:$0xff] }
 0x32a   : > { %v4391_v16 = vpop.f32.mrf.mxu2  ;;  %4289 = vmatmul.bf16.gmra.mxu1 %v10712_v24  ;;  %v15305_v44 = vpop.f32.mrf.mxu3  ;;  %v10751_v24 = vld [vmem:[#allocation2 + $0x3c0] sm:$0xf]  ;;  %v3687_v23 = vadd.f32 %v17836_v42, %v17835_v62  ;;  %v10817_v62 = vld [vmem:[#allocation2 + $0x46c] sm:$0xf0] }
 0x32b   : > { %v15295_v54 = vadd.f32 %v4391_v16, %v4248_v17  ;;  %v10752_v53 = vor.u32 %v12936_v29, %v10751_v24  ;;  %v12945_v24 = vld [vmem:[#allocation2 + $0x428] sm:$0xf0]  ;;  %v17839_v42 = vld [vmem:[#allocation57_spill] sm:$0xff] }
 0x32c   : > { %v3831_v1 = vadd.f32 %v17837_v57, %v3687_v23  ;;  %v17840_v23 = vld [vmem:[#allocation58_spill] sm:$0xff] }
 0x32d   : > { %v3692_v57 = vadd.f32 %v17840_v23, %v17839_v42  ;;  %v13383_v42 = vld [vmem:[#allocation5 + $0x68] sm:$0xff] }
 0x32e   : > { %v3975_v29 = vadd.f32 %v15291_v19, %v3831_v1  ;;  %v13375_v23 = vld [vmem:[#allocation5 + $0x28] sm:$0xff]  ;;  %8530 = vmatpush.bf16.msra.mxu2 %v13383_v42 }
 0x32f   : > { %4433 = vmatmul.bf16.gmra.mxu2 %v10716_v60  ;;  %v4252_v41 = vpop.f32.mrf.mxu1  ;;  %v4111_v22 = vpop.f32.mrf.mxu0  ;;  %v12944_v60 = vld [vmem:[#allocation2 + $0x420] sm:$0xf0]  ;;  %8408 = vmatpush.bf16.msra.mxu1 %v13375_v23 }
 0x330   : > { %v4253_v49 = vadd.f32 %v4252_v41, %v4109_v27  ;;  %v4112_v51 = vadd.f32 %v4111_v22, %v15270_v35  ;;  %v3970_v35 = vadd.f32 %v15277_v50, %v3826_v0  ;;  %v10780_v4 = vor.u32 %v12944_v60, %v10779_v9  ;;  %v12940_v22 = vld [vmem:[#allocation2 + $0x404] sm:$0xf]  ;;  %v12953_v9 = vld [vmem:[#allocation2 + $0x468] sm:$0xf0]  ;;  %v17838_v60 = vld [vmem:[#allocation74_spill] sm:$0xff] }
 0x332   : > { %v4394_v36 = vpop.f32.mrf.mxu2  ;;  %4150 = vmatmul.bf16.gmra.mxu0 %v10744_v45  ;;  %4021 = vmatmul.bf16.gmra.mxu3 %v10848_v6  ;;  %v3982_v16 = vpop.f32.mrf.mxu3  ;;  %v12966_v45 = vld [vmem:[#allocation2 + $0x4d4] sm:$0xf] }
 0x333   : > { %v15300_v17 = vadd.f32 %v4394_v36, %v4251_v56  ;;  %v15312_v27 = vadd.f32 %v3982_v16, %v17834_v2  ;;  %v10881_v36 = vld [vmem:[#allocation2 + $0x4f4] sm:$0xf0]  ;;  %v10815_v16 = vld [vmem:[#allocation2 + $0x448] sm:$0xf] }
 0x334   : > { %v10884_v0 = vor.u32 %v12966_v45, %v10881_v36  ;;  %v12975_v45 = vld [vmem:[#allocation2 + $0x51c] sm:$0xf]  ;;  %v13113_v36 = vld [vmem:[#allocation3 + $0x1d0] sm:$0xff] }
 0x335   : > { %4514 = vmatpush.bf16.msra.mxu3 %v13113_v36 }
 0x337   : > { %v4255_v59 = vpop.f32.mrf.mxu1  ;;  %v4113_v14 = vpop.f32.mrf.mxu0 }
 0x338   : > { %v4256_v3 = vadd.f32 %v4255_v59, %v4112_v51  ;;  %v4114_v21 = vadd.f32 %v4113_v14, %v3970_v35  ;;  %v10781_v51 = vld [vmem:[#allocation2 + $0x424] sm:$0xf0] }
 0x339   : > { %v10784_v6 = vor.u32 %v12940_v22, %v10781_v51  ;;  %v10787_v59 = vld [vmem:[#allocation2 + $0x408] sm:$0xf]  ;;  %v10917_v22 = vld [vmem:[#allocation2 + $0x53c] sm:$0xf0]  ;;  %v12949_v51 = vld [vmem:[#allocation2 + $0x44c] sm:$0xf] }
 0x33a   : > { %v4396_v39 = vpop.f32.mrf.mxu2  ;;  %4294 = vmatmul.bf16.gmra.mxu1 %v10748_v10  ;;  %v15319_v25 = vpop.f32.mrf.mxu3  ;;  %v10788_v14 = vor.u32 %v12945_v24, %v10787_v59  ;;  %v10820_v59 = vor.u32 %v12949_v51, %v10817_v62  ;;  %v12984_v62 = vld [vmem:[#allocation2 + $0x564] sm:$0xf] }
 0x33b   : > { %v15309_v56 = vadd.f32 %v4396_v39, %v4253_v49 }
 0x33f   : > { %4438 = vmatmul.bf16.gmra.mxu2 %v10752_v53  ;;  %v4257_v7 = vpop.f32.mrf.mxu1  ;;  %v4116_v58 = vpop.f32.mrf.mxu0 }
 0x340   : > { %v4258_v8 = vadd.f32 %v4257_v7, %v4114_v21  ;;  %v4117_v49 = vadd.f32 %v4116_v58, %v15284_v40 }
 0x342   : > { %v4399_v50 = vpop.f32.mrf.mxu2  ;;  %4155 = vmatmul.bf16.gmra.mxu0 %v10780_v4  ;;  %4026 = vmatmul.bf16.gmra.mxu3 %v10884_v0  ;;  %v3987_v21 = vpop.f32.mrf.mxu3  ;;  %v17841_v0 = vld [vmem:[#allocation61_spill] sm:$0xff] }
 0x343   : > { %v15314_v41 = vadd.f32 %v4399_v50, %v4256_v3  ;;  %v15326_v2 = vadd.f32 %v3987_v21, %v17838_v60  ;;  %v10816_v50 = vor.u32 %v12953_v9, %v10815_v16  ;;  %v13121_v9 = vld [vmem:[#allocation3 + $0x210] sm:$0xff] }
 0x344   : > { %4658 = vmatpush.bf16.msra.mxu0 %v13121_v9 }
 0x347   : > { %v4260_v10 = vpop.f32.mrf.mxu1  ;;  %v4118_v3 = vpop.f32.mrf.mxu0 }
 0x348   : > { %v4261_v40 = vadd.f32 %v4260_v10, %v4117_v49  ;;  %v4119_v53 = vadd.f32 %v4118_v3, %v3975_v29  ;;  %v10920_v10 = vor.u32 %v12975_v45, %v10917_v22  ;;  %v10823_v29 = vld [vmem:[#allocation2 + $0x450] sm:$0xf] }
 0x34a   : > { %v4401_v35 = vpop.f32.mrf.mxu2  ;;  %4299 = vmatmul.bf16.gmra.mxu1 %v10784_v6  ;;  %v15333_v1 = vpop.f32.mrf.mxu3  ;;  %v3836_v6 = vadd.f32 %v17841_v0, %v3692_v57  ;;  %v10953_v57 = vld [vmem:[#allocation2 + $0x584] sm:$0xf0]  ;;  %v12958_v0 = vld [vmem:[#allocation2 + $0x494] sm:$0xf] }
 0x34b   : > { %v15323_v39 = vadd.f32 %v4401_v35, %v4258_v8 }
 0x34f   : > { %4443 = vmatmul.bf16.gmra.mxu2 %v10788_v14  ;;  %v4262_v7 = vpop.f32.mrf.mxu1  ;;  %v4121_v58 = vpop.f32.mrf.mxu0 }
 0x350   : > { %v4263_v4 = vadd.f32 %v4262_v7, %v4119_v53  ;;  %v4122_v8 = vadd.f32 %v4121_v58, %v15298_v12  ;;  %v3980_v12 = vadd.f32 %v15305_v44, %v3836_v6  ;;  %v10851_v7 = vld [vmem:[#allocation2 + $0x490] sm:$0xf]  ;;  %v10853_v6 = vld [vmem:[#allocation2 + $0x4b4] sm:$0xf0] }
 0x352   : > { %v4404_v19 = vpop.f32.mrf.mxu2  ;;  %4160 = vmatmul.bf16.gmra.mxu0 %v10816_v50  ;;  %4031 = vmatmul.bf16.gmra.mxu3 %v10920_v10  ;;  %v3992_v60 = vpop.f32.mrf.mxu3  ;;  %v12962_v50 = vld [vmem:[#allocation2 + $0x4b0] sm:$0xf0]  ;;  %v17843_v10 = vld [vmem:[#allocation66_spill] sm:$0xff] }
 0x353   : > { %v15328_v49 = vadd.f32 %v4404_v19, %v4261_v40  ;;  %v12954_v40 = vld [vmem:[#allocation2 + $0x470] sm:$0xf0]  ;;  %v17842_v19 = vld [vmem:[#allocation83_spill] sm:$0xff] }
 0x354   : > { %v10824_v21 = vor.u32 %v12954_v40, %v10823_v29  ;;  %v15340_v58 = vadd.f32 %v3992_v60, %v17842_v19  ;;  %v17845_v40 = vld [vmem:[#allocation71_spill] sm:$0xff] }
 0x357   : > { %v4265_v24 = vpop.f32.mrf.mxu1  ;;  %v4123_v14 = vpop.f32.mrf.mxu0 }
 0x358   : > { %v4266_v35 = vadd.f32 %v4265_v24, %v4122_v8  ;;  %v4124_v16 = vadd.f32 %v4123_v14, %v3980_v12  ;;  %v10852_v8 = vor.u32 %v12962_v50, %v10851_v7 }
 0x35a   : > { %v4406_v3 = vpop.f32.mrf.mxu2  ;;  %4304 = vmatmul.bf16.gmra.mxu1 %v10820_v59  ;;  %v17844_v59 = vld [vmem:[#allocation67_spill] sm:$0xff]  ;;  %v15347_v29 = vpop.f32.mrf.mxu3 }
 0x35b   : > { %v15337_v53 = vadd.f32 %v4406_v3, %v4263_v4  ;;  %v3697_v24 = vadd.f32 %v17844_v59, %v17843_v10  ;;  %v10856_v3 = vor.u32 %v12958_v0, %v10853_v6  ;;  %v12993_v10 = vld [vmem:[#allocation2 + $0x5ac] sm:$0xf]  ;;  %v10989_v59 = vld [vmem:[#allocation2 + $0x5cc] sm:$0xf0] }
 0x35d   : > { %v3841_v12 = vadd.f32 %v17845_v40, %v3697_v24  ;;  %v12967_v24 = vld [vmem:[#allocation2 + $0x4dc] sm:$0xf]  ;;  %v10889_v40 = vld [vmem:[#allocation2 + $0x4fc] sm:$0xf0] }
 0x35f   : > { %4448 = vmatmul.bf16.gmra.mxu2 %v10824_v21  ;;  %v4267_v45 = vpop.f32.mrf.mxu1  ;;  %v4126_v22 = vpop.f32.mrf.mxu0  ;;  %v12963_v21 = vld [vmem:[#allocation2 + $0x4b8] sm:$0xf0] }
 0x360   : > { %v4268_v44 = vadd.f32 %v4267_v45, %v4124_v16  ;;  %v4127_v51 = vadd.f32 %v4126_v22, %v15312_v27  ;;  %v10859_v27 = vld [vmem:[#allocation2 + $0x498] sm:$0xf]  ;;  %v3985_v16 = vadd.f32 %v15319_v25, %v3841_v12  ;;  %v12971_v22 = vld [vmem:[#allocation2 + $0x4f8] sm:$0xf0]  ;;  %v17847_v12 = vld [vmem:[#allocation75_spill] sm:$0xff] }
 0x361   : > { %v10860_v19 = vor.u32 %v12963_v21, %v10859_v27  ;;  %v17849_v27 = vld [vmem:[#allocation78_spill] sm:$0xff] }
 0x362   : > { %v4409_v36 = vpop.f32.mrf.mxu2  ;;  %4165 = vmatmul.bf16.gmra.mxu0 %v10852_v8 }
 0x363   : > { %v15342_v4 = vadd.f32 %v4409_v36, %v4266_v35  ;;  %v10956_v35 = vor.u32 %v12984_v62, %v10953_v57  ;;  %v10887_v36 = vld [vmem:[#allocation2 + $0x4d8] sm:$0xf] }
 0x364   : > { %v17846_v62 = vld [vmem:[#allocation90_spill] sm:$0xff]  ;;  %v10888_v0 = vor.u32 %v12971_v22, %v10887_v36 }
 0x365   : > { %4036 = vmatmul.bf16.gmra.mxu3 %v10956_v35  ;;  %v3997_v8 = vpop.f32.mrf.mxu3  ;;  %v17848_v35 = vld [vmem:[#allocation76_spill] sm:$0xff] }
 0x366   : > { %v15354_v42 = vadd.f32 %v3997_v8, %v17846_v62 }
 0x367   : > { %v4270_v14 = vpop.f32.mrf.mxu1  ;;  %v4128_v7 = vpop.f32.mrf.mxu0 }
 0x368   : > { %v4271_v9 = vadd.f32 %v4270_v14, %v4127_v51  ;;  %v4129_v45 = vadd.f32 %v4128_v7, %v3985_v16  ;;  %v10992_v16 = vor.u32 %v12993_v10, %v10989_v59 }
 0x36a   : > { %v4411_v60 = vpop.f32.mrf.mxu2  ;;  %4309 = vmatmul.bf16.gmra.mxu1 %v10856_v3  ;;  %v3702_v3 = vadd.f32 %v17848_v35, %v17847_v12  ;;  %v13002_v35 = vld [vmem:[#allocation2 + $0x5f4] sm:$0xf] }
 0x36b   : > { %v15351_v50 = vadd.f32 %v4411_v60, %v4268_v44  ;;  %v10892_v60 = vor.u32 %v12967_v24, %v10889_v40 }
 0x36c   : > { %v3846_v21 = vadd.f32 %v17849_v27, %v3702_v3  ;;  %v11025_v3 = vld [vmem:[#allocation2 + $0x614] sm:$0xf0]  ;;  %v12976_v27 = vld [vmem:[#allocation2 + $0x524] sm:$0xf] }
 0x36d   : > { %v15361_v14 = vpop.f32.mrf.mxu3 }
 0x36f   : > { %4453 = vmatmul.bf16.gmra.mxu2 %v10860_v19  ;;  %v4272_v23 = vpop.f32.mrf.mxu1  ;;  %v4131_v51 = vpop.f32.mrf.mxu0  ;;  %v10895_v19 = vld [vmem:[#allocation2 + $0x4e0] sm:$0xf] }
 0x370   : > { %v4273_v57 = vadd.f32 %v4272_v23, %v4129_v45  ;;  %v4132_v44 = vadd.f32 %v4131_v51, %v15326_v2  ;;  %v3990_v45 = vadd.f32 %v15333_v1, %v3846_v21  ;;  %v12980_v51 = vld [vmem:[#allocation2 + $0x540] sm:$0xf0]  ;;  %v10925_v21 = vld [vmem:[#allocation2 + $0x544] sm:$0xf0] }
 0x372   : > { %v4414_v25 = vpop.f32.mrf.mxu2  ;;  %4170 = vmatmul.bf16.gmra.mxu0 %v10888_v0 }
 0x373   : > { %v15356_v6 = vadd.f32 %v4414_v25, %v4271_v9  ;;  %v12972_v9 = vld [vmem:[#allocation2 + $0x500] sm:$0xf0]  ;;  %v10923_v25 = vld [vmem:[#allocation2 + $0x520] sm:$0xf] }
 0x374   : > { %v10896_v62 = vor.u32 %v12972_v9, %v10895_v19  ;;  %v10924_v40 = vor.u32 %v12980_v51, %v10923_v25 }
 0x375   : > { %4041 = vmatmul.bf16.gmra.mxu3 %v10992_v16  ;;  %v4002_v0 = vpop.f32.mrf.mxu3  ;;  %v17850_v16 = vld [vmem:[#allocation84_spill] sm:$0xff] }
 0x376   : > { %v15368_v10 = vadd.f32 %v4002_v0, %v15096_v32  ;;  %v17852_v32 = vld [vmem:[#allocation87_spill] sm:$0xff] }
 0x377   : > { %v4275_v7 = vpop.f32.mrf.mxu1  ;;  %v4133_v36 = vpop.f32.mrf.mxu0 }
 0x378   : > { %v4276_v2 = vadd.f32 %v4275_v7, %v4132_v44  ;;  %v4134_v23 = vadd.f32 %v4133_v36, %v3990_v45  ;;  %v11028_v45 = vor.u32 %v13002_v35, %v11025_v3  ;;  %v12989_v35 = vld [vmem:[#allocation2 + $0x588] sm:$0xf0] }
 0x37a   : > { %v4416_v8 = vpop.f32.mrf.mxu2  ;;  %4314 = vmatmul.bf16.gmra.mxu1 %v10892_v60  ;;  %v17851_v60 = vld [vmem:[#allocation85_spill] sm:$0xff] }
 0x37b   : > { %v15365_v22 = vadd.f32 %v4416_v8, %v4273_v57  ;;  %v3707_v7 = vadd.f32 %v17851_v60, %v17850_v16  ;;  %v10928_v8 = vor.u32 %v12976_v27, %v10925_v21  ;;  %v10959_v16 = vld [vmem:[#allocation2 + $0x568] sm:$0xf] }
 0x37d   : > { %v15375_v19 = vpop.f32.mrf.mxu3  ;;  %v3851_v9 = vadd.f32 %v17852_v32, %v3707_v7  ;;  %v5075_v7 = vld [vmem:[%s17582_s1] sm:$0xff] }
 0x37f   : > { %4458 = vmatmul.bf16.gmra.mxu2 %v10896_v62  ;;  %v4277_v59 = vpop.f32.mrf.mxu1  ;;  %v4136_v44 = vpop.f32.mrf.mxu0  ;;  %v10931_v62 = vld [vmem:[#allocation2 + $0x528] sm:$0xf] }
 0x380   : > { %v4278_v24 = vadd.f32 %v4277_v59, %v4134_v23  ;;  %v4137_v57 = vadd.f32 %v4136_v44, %v15340_v58  ;;  %v3995_v23 = vadd.f32 %v15347_v29, %v3851_v9  ;;  %v13647_v29 = vmov 0  }
 0x381   : > { %13517 = vset.pattern.permute.xlu0 %v13647_v29  ;;  %13518 = vset.pattern.permute.xlu1 %v13647_v29 }
 0x382   : > { %v4419_v1 = vpop.f32.mrf.mxu2  ;;  %4175 = vmatmul.bf16.gmra.mxu0 %v10924_v40  ;;  %13519 = vset.pattern.permute.xlu2 %v13647_v29 }
 0x383   : > { %v15370_v12 = vadd.f32 %v4419_v1, %v4276_v2  ;;  %v12981_v2 = vld [vmem:[#allocation2 + $0x548] sm:$0xf0]  ;;  %v13112_v1 = vld [vmem:[#allocation3 + $0x1c8] sm:$0xff]  ;;  %5131 = vperm.xlu0 %13517, %v5075_v7  }
 0x384   : > { %v10932_v59 = vor.u32 %v12981_v2, %v10931_v62  ;;  %4515 = vmatpush.bf16.msra.mxu3 %v13112_v1  ;;  %v12985_v62 = vld [vmem:[#allocation2 + $0x56c] sm:$0xf]  ;;  %v10961_v2 = vld [vmem:[#allocation2 + $0x58c] sm:$0xf0] }
 0x385   : > { %4046 = vmatmul.bf16.gmra.mxu3 %v11028_v45  ;;  %v4007_v44 = vpop.f32.mrf.mxu3  ;;  %v13011_v45 = vld [vmem:[#allocation2 + $0x63c] sm:$0xf]  ;;  %v5076_v7 = vld [vmem:[%s17582_s1 + $0x8] sm:$0xff] }
 0x386   : > { %v15382_v3 = vadd.f32 %v4007_v44, %v15140_v63  ;;  %v13120_v63 = vld [vmem:[#allocation3 + $0x208] sm:$0xff]  ;;  %v10964_v44 = vor.u32 %v12985_v62, %v10961_v2  ;;  %v13374_v2 = vld [vmem:[#allocation5 + $0x20] sm:$0xff] }
 0x387   : > { %v4280_v36 = vpop.f32.mrf.mxu1  ;;  %v4138_v25 = vpop.f32.mrf.mxu0  ;;  %4659 = vmatpush.bf16.msra.mxu0 %v13120_v63  ;;  %8409 = vmatpush.bf16.msra.mxu1 %v13374_v2 }
 0x388   : > { %v4281_v58 = vadd.f32 %v4280_v36, %v4137_v57  ;;  %v4139_v40 = vadd.f32 %v4138_v25, %v3995_v23  ;;  %v11061_v36 = vld [vmem:[#allocation2 + $0x65c] sm:$0xf0] }
 0x389   : > { %v17853_v23 = vld [vmem:[#allocation91_spill] sm:$0xff]  ;;  %v11064_v1 = vor.u32 %v13011_v45, %v11061_v36  ;;  %v12998_v36 = vld [vmem:[#allocation2 + $0x5d0] sm:$0xf0] }
 0x38a   : > { %v4421_v0 = vpop.f32.mrf.mxu2  ;;  %4319 = vmatmul.bf16.gmra.mxu1 %v10928_v8  ;;  %v13382_v8 = vld [vmem:[#allocation5 + $0x60] sm:$0xff] }
 0x38b   : > { %v15379_v51 = vadd.f32 %v4421_v0, %v4278_v24  ;;  %v10960_v24 = vor.u32 %v12989_v35, %v10959_v16  ;;  %v17854_v0 = vld [vmem:[#allocation92_spill] sm:$0xff]  ;;  %8531 = vmatpush.bf16.msra.mxu2 %v13382_v8  ;;  %v10967_v16 = vld [vmem:[#allocation2 + $0x570] sm:$0xf]  ;;  %v12990_v35 = vld [vmem:[#allocation2 + $0x590] sm:$0xf0]  ;;  %5136 = vperm.xlu0 %13517, %v5076_v7  }
 0x38c   : > { %v3712_v25 = vadd.f32 %v17854_v0, %v17853_v23  ;;  %v10968_v45 = vor.u32 %v12990_v35, %v10967_v16  ;;  %v11097_v16 = vld [vmem:[#allocation2 + $0x6a4] sm:$0xf0]  ;;  %v12994_v35 = vld [vmem:[#allocation2 + $0x5b4] sm:$0xf] }
 0x38f   : > { %4463 = vmatmul.bf16.gmra.mxu2 %v10932_v59  ;;  %v4282_v27 = vpop.f32.mrf.mxu1  ;;  %v4141_v60 = vpop.f32.mrf.mxu0 }
 0x390   : > { %v4283_v57 = vadd.f32 %v4282_v27, %v4139_v40  ;;  %v4142_v9 = vadd.f32 %v4141_v60, %v15354_v42  ;;  %v15392_v59 = vpop.f32.mrf.mxu3  ;;  %v17855_v40 = vld [vmem:[#allocation94_spill] sm:$0xff] }
 0x392   : > { %v4424_v21 = vpop.f32.mrf.mxu2  ;;  %4180 = vmatmul.bf16.gmra.mxu0 %v10960_v24  ;;  %v5077_v24 = vld [vmem:[%s17582_s1 + $0x10] sm:$0xff] }
 0x393   : > { %v15387_v32 = vadd.f32 %v4424_v21, %v4281_v58  ;;  %v3856_v58 = vadd.f32 %v17855_v40, %v3712_v25  ;;  %5141 = vperm.xlu1 %13518, %v5077_v24  }
 0x395   : > { %v4000_v27 = vadd.f32 %v15361_v14, %v3856_v58  ;;  %4051 = vmatmul.bf16.gmra.mxu3 %v11064_v1  ;;  %v5078_v58 = vld [vmem:[%s17582_s1 + $0x18] sm:$0xff]  ;;  %v5081_v1 = vld [vmem:[%s17582_s1 + $0x30] sm:$0xff] }
 0x396   : > { %5161 = vperm.xlu0 %13517, %v5081_v1  }
 0x397   : > { %v4285_v42 = vpop.f32.mrf.mxu1  ;;  %v4143_v60 = vpop.f32.mrf.mxu0 }
 0x398   : > { %v4286_v29 = vadd.f32 %v4285_v42, %v4142_v9  ;;  %v4144_v8 = vadd.f32 %v4143_v60, %v4000_v27  ;;  %v4012_v14 = vpop.f32.mrf.mxu3  ;;  %v10995_v9 = vld [vmem:[#allocation2 + $0x5b0] sm:$0xf]  ;;  %v13020_v42 = vld [vmem:[#allocation2 + $0x684] sm:$0xf]  ;;  %v10997_v27 = vld [vmem:[#allocation2 + $0x5d4] sm:$0xf0] }
 0x399   : > { %v15405_v62 = vadd.f32 %v4012_v14, %v15160_v26  ;;  %v10996_v25 = vor.u32 %v12998_v36, %v10995_v9  ;;  %v11100_v7 = vor.u32 %v13020_v42, %v11097_v16  ;;  %v12999_v14 = vld [vmem:[#allocation2 + $0x5d8] sm:$0xf0] }
 0x39a   : > { %v4426_v21 = vpop.f32.mrf.mxu2  ;;  %4324 = vmatmul.bf16.gmra.mxu1 %v10964_v44 }
 0x39b   : > { %v15402_v63 = vadd.f32 %v4426_v21, %v4283_v57  ;;  %5146 = vperm.xlu1 %13518, %v5078_v58   ;;  %v3717_v21 = vadd.f32 %v15102_v38, %v15100_v37  ;;  %v5084_v37 = vld [vmem:[%s17582_s1 + $0x48] sm:$0xff] }
 0x39d   : > { %v3861_v24 = vadd.f32 %v15117_v55, %v3717_v21 }
 0x39e   : > { %5176 = vperm.xlu0 %13517, %v5084_v37   ;;  %v13008_v37 = vld [vmem:[#allocation2 + $0x620] sm:$0xf0] }
 0x39f   : > { %4468 = vmatmul.bf16.gmra.mxu2 %v10968_v45  ;;  %v4287_v23 = vpop.f32.mrf.mxu1  ;;  %v4146_v40 = vpop.f32.mrf.mxu0  ;;  %v11000_v45 = vor.u32 %v12994_v35, %v10997_v27  ;;  %v5087_v27 = vld [vmem:[%s17582_s1 + $0x60] sm:$0xff] }
 0x3a0   : > { %v4288_v0 = vadd.f32 %v4287_v23, %v4144_v8  ;;  %v4147_v26 = vadd.f32 %v4146_v40, %v15368_v10  ;;  %v15418_v60 = vpop.f32.mrf.mxu3  ;;  %v11003_v8 = vld [vmem:[#allocation2 + $0x5b8] sm:$0xf]  ;;  %v4005_v10 = vadd.f32 %v15375_v19, %v3861_v24  ;;  %v13007_v40 = vld [vmem:[#allocation2 + $0x618] sm:$0xf0] }
 0x3a1   : > { %v5082_v23 = vld [vmem:[%s17582_s1 + $0x38] sm:$0xff]  ;;  %v11004_v55 = vor.u32 %v12999_v14, %v11003_v8  ;;  %v3722_v8 = vadd.f32 %v15146_v46, %v15144_v11 }
 0x3a2   : > { %v4429_v57 = vpop.f32.mrf.mxu2  ;;  %4185 = vmatmul.bf16.gmra.mxu0 %v10996_v25  ;;  %v5090_v11 = vld [vmem:[%s17582_s1 + $0x78] sm:$0xff] }
 0x3a3   : > { %v15413_v44 = vadd.f32 %v4429_v57, %v4286_v29  ;;  %5166 = vperm.xlu1 %13518, %v5082_v23   ;;  %v11031_v57 = vld [vmem:[#allocation2 + $0x5f8] sm:$0xf]  ;;  %v11039_v23 = vld [vmem:[#allocation2 + $0x600] sm:$0xf] }
 0x3a4   : > { %v11032_v42 = vor.u32 %v13007_v40, %v11031_v57  ;;  %v5088_v57 = vld [vmem:[%s17582_s1 + $0x68] sm:$0xff] }
 0x3a5   : > { %4056 = vmatmul.bf16.gmra.mxu3 %v11100_v7  ;;  %v13029_v7 = vld [vmem:[#allocation2 + $0x6cc] sm:$0xf] }
 0x3a6   : > { %5191 = vperm.xlu0 %13517, %v5087_v27  }
 0x3a7   : > { %v4290_v29 = vpop.f32.mrf.mxu1  ;;  %v4148_v2 = vpop.f32.mrf.mxu0 }
 0x3a8   : > { %v4291_v9 = vadd.f32 %v4290_v29, %v4147_v26  ;;  %v4149_v25 = vadd.f32 %v4148_v2, %v4005_v10  ;;  %v4017_v19 = vpop.f32.mrf.mxu3  ;;  %v11033_v29 = vld [vmem:[#allocation2 + $0x61c] sm:$0xf0]  ;;  %v3866_v10 = vadd.f32 %v15154_v43, %v3722_v8  ;;  %v11040_v43 = vor.u32 %v13008_v37, %v11039_v23  ;;  %v11069_v23 = vld [vmem:[#allocation2 + $0x664] sm:$0xf0] }
 0x3a9   : > { %v15431_v58 = vadd.f32 %v4017_v19, %v15174_v20  ;;  %v11133_v20 = vld [vmem:[#allocation2 + $0x6ec] sm:$0xf0]  ;;  %v3727_v37 = vadd.f32 %v15164_v30, %v15162_v15  ;;  %v5080_v15 = vld [vmem:[%s17582_s1 + $0x28] sm:$0xff]  ;;  %v5094_v30 = vld [vmem:[%s17582_s1 + $0x98] sm:$0xff] }
 0x3aa   : > { %v4431_v36 = vpop.f32.mrf.mxu2  ;;  %4329 = vmatmul.bf16.gmra.mxu1 %v11000_v45  ;;  %v13003_v45 = vld [vmem:[#allocation2 + $0x5fc] sm:$0xf] }
 0x3ab   : > { %v15428_v38 = vadd.f32 %v4431_v36, %v4288_v0  ;;  %v5085_v0 = vld [vmem:[%s17582_s1 + $0x50] sm:$0xff]  ;;  %v11136_v36 = vor.u32 %v13029_v7, %v11133_v20  ;;  %v11036_v2 = vor.u32 %v13003_v45, %v11033_v29  ;;  %v5079_v20 = vld [vmem:[%s17582_s1 + $0x20] sm:$0xff] }
 0x3ac   : > { %5181 = vperm.xlu1 %13518, %v5085_v0   ;;  %v5091_v45 = vld [vmem:[%s17582_s1 + $0x80] sm:$0xff]  ;;  %5151 = vperm.xlu2 %13519, %v5079_v20  }
 0x3ae   : > { %5206 = vperm.xlu0 %13517, %v5090_v11   ;;  %v13017_v11 = vld [vmem:[#allocation2 + $0x668] sm:$0xf0] }
 0x3af   : > { %4473 = vmatmul.bf16.gmra.mxu2 %v11004_v55  ;;  %v4292_v1 = vpop.f32.mrf.mxu1  ;;  %v4151_v35 = vpop.f32.mrf.mxu0 }
 0x3b0   : > { %v4293_v26 = vadd.f32 %v4292_v1, %v4149_v25  ;;  %v4152_v24 = vadd.f32 %v4151_v35, %v15382_v3  ;;  %v15444_v14 = vpop.f32.mrf.mxu3  ;;  %v4010_v3 = vadd.f32 %v15392_v59, %v3866_v10  ;;  %v11067_v1 = vld [vmem:[#allocation2 + $0x640] sm:$0xf]  ;;  %v13111_v35 = vld [vmem:[#allocation3 + $0x1c0] sm:$0xff]  ;;  %v13038_v10 = vld [vmem:[#allocation2 + $0x714] sm:$0xf] }
 0x3b1   : > { %4516 = vmatpush.bf16.msra.mxu3 %v13111_v35 }
 0x3b2   : > { %v4434_v16 = vpop.f32.mrf.mxu2  ;;  %4190 = vmatmul.bf16.gmra.mxu0 %v11032_v42  ;;  %v13016_v42 = vld [vmem:[#allocation2 + $0x660] sm:$0xf0] }
 0x3b3   : > { %v15439_v21 = vadd.f32 %v4434_v16, %v4291_v9 }
 0x3b4   : > { %5196 = vperm.xlu1 %13518, %v5088_v57   ;;  %v11075_v57 = vld [vmem:[#allocation2 + $0x648] sm:$0xf]  ;;  %5156 = vperm.xlu2 %13519, %v5080_v15  }
 0x3b5   : > { %4061 = vmatmul.bf16.gmra.mxu3 %v11136_v36  ;;  %v13119_v36 = vld [vmem:[#allocation3 + $0x200] sm:$0xff]  ;;  %v11076_v35 = vor.u32 %v13017_v11, %v11075_v57  ;;  %v13021_v57 = vld [vmem:[#allocation2 + $0x68c] sm:$0xf]  ;;  %v11105_v11 = vld [vmem:[#allocation2 + $0x6ac] sm:$0xf0] }
 0x3b6   : > { %4660 = vmatpush.bf16.msra.mxu0 %v13119_v36 }
 0x3b7   : > { %v4295_v9 = vpop.f32.mrf.mxu1  ;;  %v4153_v19 = vpop.f32.mrf.mxu0 }
 0x3b8   : > { %v4296_v55 = vadd.f32 %v4295_v9, %v4152_v24  ;;  %v4154_v40 = vadd.f32 %v4153_v19, %v4010_v3  ;;  %v4022_v59 = vpop.f32.mrf.mxu3  ;;  %v11068_v24 = vor.u32 %v13016_v42, %v11067_v1  ;;  %v13012_v9 = vld [vmem:[#allocation2 + $0x644] sm:$0xf] }
 0x3b9   : > { %v15457_v16 = vadd.f32 %v4022_v59, %v15188_v13  ;;  %v5093_v13 = vld [vmem:[%s17582_s1 + $0x90] sm:$0xff]  ;;  %v11072_v19 = vor.u32 %v13012_v9, %v11069_v23  ;;  %v5099_v23 = vld [vmem:[%s17582_s1 + $0xc0] sm:$0xff] }
 0x3ba   : > { %v4436_v25 = vpop.f32.mrf.mxu2  ;;  %4334 = vmatmul.bf16.gmra.mxu1 %v11036_v2  ;;  %v11169_v2 = vld [vmem:[#allocation2 + $0x734] sm:$0xf0]  ;;  %5221 = vperm.xlu0 %13517, %v5093_v13   ;;  %v5097_v9 = vld [vmem:[%s17582_s1 + $0xb0] sm:$0xff] }
 0x3bb   : > { %v15454_v46 = vadd.f32 %v4436_v25, %v4293_v26  ;;  %v11172_v25 = vor.u32 %v13038_v10, %v11169_v2  ;;  %v5083_v2 = vld [vmem:[%s17582_s1 + $0x40] sm:$0xff] }
 0x3bc   : > { %5211 = vperm.xlu1 %13518, %v5091_v45   ;;  %v13381_v45 = vld [vmem:[#allocation5 + $0x58] sm:$0xff]  ;;  %5171 = vperm.xlu2 %13519, %v5083_v2   ;;  %v5102_v2 = vld [vmem:[%s17582_s1 + $0xd8] sm:$0xff] }
 0x3bd   : > { %8532 = vmatpush.bf16.msra.mxu2 %v13381_v45 }
 0x3bf   : > { %4478 = vmatmul.bf16.gmra.mxu2 %v11040_v43  ;;  %v4297_v0 = vpop.f32.mrf.mxu1  ;;  %v4156_v7 = vpop.f32.mrf.mxu0 }
 0x3c0   : > { %v4298_v27 = vadd.f32 %v4297_v0, %v4154_v40  ;;  %v4157_v8 = vadd.f32 %v4156_v7, %v15405_v62  ;;  %v15473_v3 = vpop.f32.mrf.mxu3  ;;  %v17856_v7 = vld [vmem:[#allocation115_spill] sm:$0xff] }
 0x3c2   : > { %v4439_v26 = vpop.f32.mrf.mxu2  ;;  %4195 = vmatmul.bf16.gmra.mxu0 %v11068_v24  ;;  %v11103_v24 = vld [vmem:[#allocation2 + $0x688] sm:$0xf] }
 0x3c3   : > { %v15468_v29 = vadd.f32 %v4439_v26, %v4296_v55  ;;  %v3871_v55 = vadd.f32 %v15170_v34, %v3727_v37  ;;  %v5096_v34 = vld [vmem:[%s17582_s1 + $0xa8] sm:$0xff] }
 0x3c4   : > { %5226 = vperm.xlu1 %13518, %v5094_v30   ;;  %5236 = vperm.xlu0 %13517, %v5096_v34   ;;  %v13025_v26 = vld [vmem:[#allocation2 + $0x6a8] sm:$0xf0] }
 0x3c5   : > { %v4015_v43 = vadd.f32 %v15418_v60, %v3871_v55  ;;  %4066 = vmatmul.bf16.gmra.mxu3 %v11172_v25  ;;  %v11104_v10 = vor.u32 %v13025_v26, %v11103_v24  ;;  %v13047_v25 = vld [vmem:[#allocation2 + $0x75c] sm:$0xf]  ;;  %v17859_v30 = vld [vmem:[#allocation108_spill] sm:$0xff]  ;;  %v11111_v24 = vld [vmem:[#allocation2 + $0x690] sm:$0xf] }
 0x3c6   : > { %v13026_v26 = vld [vmem:[#allocation2 + $0x6b0] sm:$0xf0] }
 0x3c7   : > { %v4300_v62 = vpop.f32.mrf.mxu1  ;;  %v4158_v1 = vpop.f32.mrf.mxu0 }
 0x3c8   : > { %v4301_v40 = vadd.f32 %v4300_v62, %v4157_v8  ;;  %v4159_v60 = vadd.f32 %v4158_v1, %v4015_v43  ;;  %v4027_v0 = vpop.f32.mrf.mxu3  ;;  %v11205_v62 = vld [vmem:[#allocation2 + $0x77c] sm:$0xf0]  ;;  %v17857_v43 = vld [vmem:[#allocation105_spill] sm:$0xff] }
 0x3c9   : > { %v15489_v20 = vadd.f32 %v4027_v0, %v17856_v7 }
 0x3ca   : > { %v4441_v59 = vpop.f32.mrf.mxu2  ;;  %4339 = vmatmul.bf16.gmra.mxu1 %v11072_v19  ;;  %v13373_v19 = vld [vmem:[#allocation5 + $0x18] sm:$0xff] }
 0x3cb   : > { %v15486_v42 = vadd.f32 %v4441_v59, %v4298_v27  ;;  %v17858_v59 = vld [vmem:[#allocation106_spill] sm:$0xff]  ;;  %8410 = vmatpush.bf16.msra.mxu1 %v13373_v19  ;;  %v13034_v19 = vld [vmem:[#allocation2 + $0x6f0] sm:$0xf0] }
 0x3cc   : > { %5241 = vperm.xlu1 %13518, %v5097_v9   ;;  %v3732_v1 = vadd.f32 %v17858_v59, %v17857_v43  ;;  %5251 = vperm.xlu0 %13517, %v5099_v23   ;;  %v11112_v23 = vor.u32 %v13026_v26, %v11111_v24  ;;  %v11141_v24 = vld [vmem:[#allocation2 + $0x6f4] sm:$0xf0] }
 0x3cd   : > { %v17862_v26 = vld [vmem:[#allocation110_spill] sm:$0xff] }
 0x3ce   : > { %v3876_v34 = vadd.f32 %v17859_v30, %v3732_v1  ;;  %v5089_v1 = vld [vmem:[%s17582_s1 + $0x70] sm:$0xff] }
 0x3cf   : > { %4483 = vmatmul.bf16.gmra.mxu2 %v11076_v35  ;;  %v4302_v13 = vpop.f32.mrf.mxu1  ;;  %v4161_v36 = vpop.f32.mrf.mxu0  ;;  %v5105_v30 = vld [vmem:[%s17582_s1 + $0xf0] sm:$0xff] }
 0x3d0   : > { %v4303_v8 = vadd.f32 %v4302_v13, %v4159_v60  ;;  %v4162_v55 = vadd.f32 %v4161_v36, %v15431_v58  ;;  %v4029_v15 = vpop.f32.mrf.mxu3  ;;  %v11208_v58 = vor.u32 %v13047_v25, %v11205_v62  ;;  %v11108_v60 = vor.u32 %v13021_v57, %v11105_v11  ;;  %v5100_v36 = vld [vmem:[%s17582_s1 + $0xc8] sm:$0xff]  ;;  %v11139_v25 = vld [vmem:[#allocation2 + $0x6d0] sm:$0xf]  ;;  %v17861_v62 = vld [vmem:[#allocation119_spill] sm:$0xff] }
 0x3d1   : > { %v4020_v7 = vadd.f32 %v15444_v14, %v3876_v34  ;;  %v11140_v43 = vor.u32 %v13034_v19, %v11139_v25  ;;  %v11147_v25 = vld [vmem:[#allocation2 + $0x6d8] sm:$0xf]  ;;  %v13035_v19 = vld [vmem:[#allocation2 + $0x6f8] sm:$0xf0] }
 0x3d2   : > { %v4444_v27 = vpop.f32.mrf.mxu2  ;;  %4200 = vmatmul.bf16.gmra.mxu0 %v11104_v10  ;;  %v5086_v10 = vld [vmem:[%s17582_s1 + $0x58] sm:$0xff] }
 0x3d3   : > { %v15500_v37 = vadd.f32 %v4444_v27, %v4301_v40  ;;  %v17860_v40 = vld [vmem:[#allocation117_spill] sm:$0xff]  ;;  %5186 = vperm.xlu2 %13519, %v5086_v10  }
 0x3d4   : > { %v15507_v35 = vadd.f32 %v4029_v15, %v17860_v40  ;;  %5256 = vperm.xlu1 %13518, %v5100_v36   ;;  %5266 = vperm.xlu0 %13517, %v5102_v2   ;;  %v5103_v15 = vld [vmem:[%s17582_s1 + $0xe0] sm:$0xff]  ;;  %v17864_v10 = vld [vmem:[#allocation113_spill] sm:$0xff]  ;;  %v17865_v2 = vld [vmem:[#allocation120_spill] sm:$0xff] }
 0x3d5   : > { %4071 = vmatmul.bf16.gmra.mxu3 %v11208_v58  ;;  %v12815_v58 = vld [vmem:[#allocation2 + $0x1c] sm:$0xf] }
 0x3d7   : > { %v4305_v0 = vpop.f32.mrf.mxu1  ;;  %v4163_v27 = vpop.f32.mrf.mxu0 }
 0x3d8   : > { %v4306_v45 = vadd.f32 %v4305_v0, %v4162_v55  ;;  %v15521_v14 = vadd.f32 %v4163_v27, %v4020_v7  ;;  %v4032_v55 = vpop.f32.mrf.mxu3  ;;  %v13030_v0 = vld [vmem:[#allocation2 + $0x6d4] sm:$0xf]  ;;  %v17863_v7 = vld [vmem:[#allocation111_spill] sm:$0xff] }
 0x3d9   : > { %v15524_v57 = vadd.f32 %v4032_v55, %v17861_v62  ;;  %v11144_v55 = vor.u32 %v13030_v0, %v11141_v24  ;;  %v13043_v0 = vld [vmem:[#allocation2 + $0x738] sm:$0xf0]  ;;  %v17867_v24 = vld [vmem:[#allocation121_spill] sm:$0xff] }
 0x3da   : > { %v4446_v13 = vpop.f32.mrf.mxu2  ;;  %4344 = vmatmul.bf16.gmra.mxu1 %v11108_v60  ;;  %v10285_v60 = vld [vmem:[#allocation2 + $0x3c] sm:$0xf0] }
 0x3db   : > { %v15519_v9 = vadd.f32 %v4446_v13, %v4303_v8  ;;  %5201 = vperm.xlu2 %13519, %v5089_v1   ;;  %v3737_v13 = vadd.f32 %v17863_v7, %v17862_v26 }
 0x3dc   : > { %5271 = vperm.xlu1 %13518, %v5103_v15   ;;  %5281 = vperm.xlu0 %13517, %v5105_v30   ;;  %v5106_v15 = vld [vmem:[%s17582_s1 + $0xf8] sm:$0xff]  ;;  %v5108_v30 = vld [vmem:[%s17582_s1 + $0x108] sm:$0xff] }
 0x3dd   : > { %v3881_v36 = vadd.f32 %v17864_v10, %v3737_v13 }
 0x3df   : > { %4488 = vmatmul.bf16.gmra.mxu2 %v11112_v23  ;;  %v15526_v11 = vpop.f32.mrf.mxu1  ;;  %v4166_v59 = vpop.f32.mrf.mxu0  ;;  %v4025_v62 = vadd.f32 %v15473_v3, %v3881_v36  ;;  %v5095_v36 = vld [vmem:[%s17582_s1 + $0xa0] sm:$0xff] }
 0x3e0   : > { %v4167_v40 = vadd.f32 %v4166_v59, %v15457_v16  ;;  %v4034_v27 = vpop.f32.mrf.mxu3 }
 0x3e1   : > { %v15544_v23 = vadd.f32 %v4034_v27, %v17865_v2  ;;  %v5109_v2 = vld [vmem:[%s17582_s1 + $0x110] sm:$0xff] }
 0x3e2   : > { %v4449_v8 = vpop.f32.mrf.mxu2  ;;  %4205 = vmatmul.bf16.gmra.mxu0 %v11140_v43  ;;  %v5092_v43 = vld [vmem:[%s17582_s1 + $0x88] sm:$0xff] }
 0x3e3   : > { %v15537_v34 = vadd.f32 %v4449_v8, %v4306_v45  ;;  %v10288_v45 = vor.u32 %v12815_v58, %v10285_v60  ;;  %v11148_v58 = vor.u32 %v13035_v19, %v11147_v25  ;;  %5216 = vperm.xlu2 %13519, %v5092_v43   ;;  %v11175_v60 = vld [vmem:[#allocation2 + $0x718] sm:$0xf]  ;;  %v12824_v25 = vld [vmem:[#allocation2 + $0x64] sm:$0xf]  ;;  %v10321_v19 = vld [vmem:[#allocation2 + $0x84] sm:$0xf0] }
 0x3e4   : > { %5286 = vperm.xlu1 %13518, %v5106_v15   ;;  %5296 = vperm.xlu0 %13517, %v5108_v30   ;;  %v11176_v13 = vor.u32 %v13043_v0, %v11175_v60  ;;  %v10324_v30 = vor.u32 %v12824_v25, %v10321_v19  ;;  %v11183_v60 = vld [vmem:[#allocation2 + $0x720] sm:$0xf]  ;;  %v17871_v25 = vld [vmem:[#allocation122_spill] sm:$0xff] }
 0x3e5   : > { %4517 = vmatmul.bf16.vlgmr.msra.gmra.mxu3 %v10288_v45  ;;  %v5111_v45 = vld [vmem:[%s17582_s1 + $0x120] sm:$0xff] }
 0x3e7   : > { %v4310_v16 = vpop.f32.mrf.mxu1  ;;  %v4168_v1 = vpop.f32.mrf.mxu0 }
 0x3e8   : > { %v4311_v8 = vadd.f32 %v4310_v16, %v4167_v40  ;;  %v15558_v3 = vadd.f32 %v4168_v1, %v4025_v62  ;;  %v4037_v40 = vpop.f32.mrf.mxu3  ;;  %v13039_v62 = vld [vmem:[#allocation2 + $0x71c] sm:$0xf]  ;;  %v11177_v1 = vld [vmem:[#allocation2 + $0x73c] sm:$0xf0] }
 0x3e9   : > { %v15561_v26 = vadd.f32 %v4037_v40, %v17867_v24 }
 0x3ea   : > { %v15547_v59 = vpop.f32.mrf.mxu2  ;;  %4349 = vmatmul.bf16.gmra.mxu1 %v11144_v55  ;;  %17866 = vst [vmem:[#allocation65_spill] sm:$0xff] %v15558_v3 }
 0x3eb   : > { %5231 = vperm.xlu2 %13519, %v5095_v36  }
 0x3ec   : > { %5301 = vperm.xlu1 %13518, %v5109_v2   ;;  %5311 = vperm.xlu0 %13517, %v5111_v45   ;;  %v11211_v45 = vld [vmem:[#allocation2 + $0x760] sm:$0xf] }
 0x3ef   : > { %4493 = vmatmul.bf16.gmra.mxu2 %v11148_v58  ;;  %v15563_v7 = vpop.f32.mrf.mxu1  ;;  %v4171_v10 = vpop.f32.mrf.mxu0  ;;  %v11180_v58 = vor.u32 %v13039_v62, %v11177_v1 }
 0x3f0   : > { %17868 = vst [vmem:[#allocation48_spill] sm:$0xff] %v15563_v7  ;;  %v4172_v16 = vadd.f32 %v4171_v10, %v15489_v20  ;;  %v4039_v43 = vpop.f32.mrf.mxu3 }
 0x3f1   : > { %v15578_v15 = vadd.f32 %v4039_v43, %v15226_v47  ;;  %v5114_v47 = vld [vmem:[%s17582_s1 + $0x138] sm:$0xff] }
 0x3f2   : > { %v4454_v27 = vpop.f32.mrf.mxu2  ;;  %4210 = vmatmul.bf16.gmra.mxu0 %v11176_v13  ;;  %v5112_v13 = vld [vmem:[%s17582_s1 + $0x128] sm:$0xff] }
 0x3f3   : > { %v15574_v55 = vadd.f32 %v4454_v27, %v4311_v8  ;;  %v13044_v8 = vld [vmem:[#allocation2 + $0x740] sm:$0xf0]  ;;  %v5098_v27 = vld [vmem:[%s17582_s1 + $0xb8] sm:$0xff] }
 0x3f4   : > { %v11184_v10 = vor.u32 %v13044_v8, %v11183_v60  ;;  %5246 = vperm.xlu2 %13519, %v5098_v27   ;;  %5316 = vperm.xlu1 %13518, %v5112_v13   ;;  %v13380_v27 = vld [vmem:[#allocation5 + $0x50] sm:$0xff]  ;;  %v10357_v13 = vld [vmem:[#allocation2 + $0xcc] sm:$0xf0] }
 0x3f5   : > { %4522 = vmatmul.bf16.gmra.mxu3 %v10324_v30  ;;  %5326 = vperm.xlu0 %13517, %v5114_v47   ;;  %v5115_v30 = vld [vmem:[%s17582_s1 + $0x140] sm:$0xff] }
 0x3f6   : > { %v13048_v47 = vld [vmem:[#allocation2 + $0x764] sm:$0xf]  ;;  %8533 = vmatpush.bf16.msra.mxu2 %v13380_v27  ;;  %v10291_v27 = vld [vmem:[#allocation2 + $0x20] sm:$0xf] }
 0x3f7   : > { %v4315_v40 = vpop.f32.mrf.mxu1  ;;  %v4173_v20 = vpop.f32.mrf.mxu0 }
 0x3f8   : > { %v4316_v0 = vadd.f32 %v4315_v40, %v4172_v16  ;;  %v15592_v36 = vadd.f32 %v4173_v20, %v15507_v35  ;;  %v4042_v2 = vpop.f32.mrf.mxu3  ;;  %v13052_v16 = vld [vmem:[#allocation2 + $0x780] sm:$0xf0]  ;;  %v5101_v35 = vld [vmem:[%s17582_s1 + $0xd0] sm:$0xff]  ;;  %v12833_v20 = vld [vmem:[#allocation2 + $0xac] sm:$0xf] }
 0x3f9   : > { %v15595_v19 = vadd.f32 %v4042_v2, %v17871_v25  ;;  %v11212_v1 = vor.u32 %v13052_v16, %v11211_v45  ;;  %v10360_v16 = vor.u32 %v12833_v20, %v10357_v13  ;;  %v12820_v13 = vld [vmem:[#allocation2 + $0x40] sm:$0xf0] }
 0x3fa   : > { %v15580_v24 = vpop.f32.mrf.mxu2  ;;  %4354 = vmatmul.bf16.gmra.mxu1 %v11180_v58  ;;  %17870 = vst [vmem:[#allocation53_spill] sm:$0xff] %v15592_v36  ;;  %v5117_v58 = vld [vmem:[%s17582_s1 + $0x150] sm:$0xff] }
 0x3fb   : > { %17869 = vst [vmem:[#allocation49_spill] sm:$0xff] %v15580_v24 }
 0x3fc   : > { %5261 = vperm.xlu2 %13519, %v5101_v35   ;;  %5331 = vperm.xlu1 %13518, %v5115_v30   ;;  %v5104_v35 = vld [vmem:[%s17582_s1 + $0xe8] sm:$0xff] }
 0x3fd   : > { %5341 = vperm.xlu0 %13517, %v5117_v58  }
 0x3ff   : > { %4498 = vmatmul.bf16.gmra.mxu2 %v11184_v10  ;;  %v15597_v62 = vpop.f32.mrf.mxu1  ;;  %v4176_v40 = vpop.f32.mrf.mxu0  ;;  %v11213_v10 = vld [vmem:[#allocation2 + $0x784] sm:$0xf0] }
 0x400   : > { %17872 = vst [vmem:[#allocation74_spill] sm:$0xff] %v15597_v62  ;;  %v4177_v8 = vadd.f32 %v4176_v40, %v15524_v57  ;;  %v4044_v2 = vpop.f32.mrf.mxu3  ;;  %v11216_v25 = vor.u32 %v13048_v47, %v11213_v10  ;;  %v13053_v62 = vld [vmem:[#allocation2 + $0x788] sm:$0xf0]  ;;  %v17876_v47 = vld [vmem:[#allocation97_spill] sm:$0xff] }
 0x401   : > { %v15612_v45 = vadd.f32 %v4044_v2, %v15239_v18  ;;  %v5120_v18 = vld [vmem:[%s17582_s1 + $0x168] sm:$0xff] }
 0x402   : > { %v4459_v43 = vpop.f32.mrf.mxu2  ;;  %4215 = vmatmul.bf16.gmra.mxu0 %v11212_v1  ;;  %v5118_v1 = vld [vmem:[%s17582_s1 + $0x158] sm:$0xff] }
 0x403   : > { %v15608_v60 = vadd.f32 %v4459_v43, %v4316_v0  ;;  %v11219_v43 = vld [vmem:[#allocation2 + $0x768] sm:$0xf] }
 0x404   : > { %v11220_v30 = vor.u32 %v13053_v62, %v11219_v43  ;;  %5276 = vperm.xlu2 %13519, %v5104_v35   ;;  %5346 = vperm.xlu1 %13518, %v5118_v1   ;;  %v10292_v62 = vor.u32 %v12820_v13, %v10291_v27  ;;  %v12842_v1 = vld [vmem:[#allocation2 + $0xf4] sm:$0xf] }
 0x405   : > { %17873 = vst [vmem:[#allocation57_spill] sm:$0xff] %v15608_v60  ;;  %4527 = vmatmul.bf16.gmra.mxu3 %v10360_v16  ;;  %5356 = vperm.xlu0 %13517, %v5120_v18   ;;  %v10393_v18 = vld [vmem:[#allocation2 + $0x114] sm:$0xf0] }
 0x407   : > { %v4320_v0 = vpop.f32.mrf.mxu1  ;;  %v4178_v36 = vpop.f32.mrf.mxu0 }
 0x408   : > { %v4321_v57 = vadd.f32 %v4320_v0, %v4177_v8  ;;  %v15626_v58 = vadd.f32 %v4178_v36, %v15544_v23  ;;  %v13372_v8 = vld [vmem:[#allocation5 + $0x10] sm:$0xff]  ;;  %v4047_v20 = vpop.f32.mrf.mxu3  ;;  %v5107_v23 = vld [vmem:[%s17582_s1 + $0x100] sm:$0xff]  ;;  %v5121_v36 = vld [vmem:[%s17582_s1 + $0x170] sm:$0xff] }
 0x409   : > { %8411 = vmatpush.bf16.msra.mxu1 %v13372_v8  ;;  %v15629_v10 = vadd.f32 %v4047_v20, %v17876_v47  ;;  %v5123_v0 = vld [vmem:[%s17582_s1 + $0x180] sm:$0xff]  ;;  %v10396_v8 = vor.u32 %v12842_v1, %v10393_v18 }
 0x40a   : > { %v15614_v40 = vpop.f32.mrf.mxu2  ;;  %4359 = vmatmul.bf16.gmra.mxu1 %v11216_v25  ;;  %17875 = vst [vmem:[#allocation61_spill] sm:$0xff] %v15626_v58 }
 0x40b   : > { %17874 = vst [vmem:[#allocation58_spill] sm:$0xff] %v15614_v40 }
 0x40c   : > { %5291 = vperm.xlu2 %13519, %v5107_v23   ;;  %5361 = vperm.xlu1 %13518, %v5121_v36   ;;  %v10327_v23 = vld [vmem:[#allocation2 + $0x68] sm:$0xf]  ;;  %v12829_v36 = vld [vmem:[#allocation2 + $0x88] sm:$0xf0] }
 0x40d   : > { %5371 = vperm.xlu0 %13517, %v5123_v0   ;;  %v17881_v0 = vld [vmem:[#allocation100_spill] sm:$0xff]  ;;  %v10328_v18 = vor.u32 %v12829_v36, %v10327_v23 }
 0x40f   : > { %4503 = vmatmul.bf16.gmra.mxu2 %v11220_v30  ;;  %v15631_v2 = vpop.f32.mrf.mxu1  ;;  %v4181_v25 = vpop.f32.mrf.mxu0 }
 0x410   : > { %17877 = vst [vmem:[#allocation83_spill] sm:$0xff] %v15631_v2  ;;  %v4182_v35 = vadd.f32 %v4181_v25, %v15561_v26  ;;  %v4049_v30 = vpop.f32.mrf.mxu3  ;;  %v5124_v26 = vld [vmem:[%s17582_s1 + $0x188] sm:$0xff] }
 0x411   : > { %v5116_v2 = vld [vmem:[%s17582_s1 + $0x148] sm:$0xff] }
 0x412   : > { %v4464_v16 = vpop.f32.mrf.mxu2  ;;  %4661 = vmatmul.bf16.vlgmr.msra.gmra.mxu0 %v10292_v62  ;;  %v5126_v62 = vld [vmem:[%s17582_s1 + $0x198] sm:$0xff] }
 0x413   : > { %v15642_v43 = vadd.f32 %v4464_v16, %v4321_v57  ;;  %v5110_v57 = vld [vmem:[%s17582_s1 + $0x118] sm:$0xff] }
 0x414   : > { %5306 = vperm.xlu2 %13519, %v5110_v57   ;;  %5376 = vperm.xlu1 %13518, %v5124_v26   ;;  %v12851_v26 = vld [vmem:[#allocation2 + $0x13c] sm:$0xf] }
 0x415   : > { %17878 = vst [vmem:[#allocation66_spill] sm:$0xff] %v15642_v43  ;;  %4532 = vmatmul.bf16.gmra.mxu3 %v10396_v8  ;;  %5386 = vperm.xlu0 %13517, %v5126_v62   ;;  %v5113_v8 = vld [vmem:[%s17582_s1 + $0x130] sm:$0xff]  ;;  %v10429_v62 = vld [vmem:[#allocation2 + $0x15c] sm:$0xf0] }
 0x416   : > { %v10432_v23 = vor.u32 %v12851_v26, %v10429_v62 }
 0x417   : > { %v4325_v20 = vpop.f32.mrf.mxu1  ;;  %v4183_v47 = vpop.f32.mrf.mxu0 }
 0x418   : > { %v4326_v27 = vadd.f32 %v4325_v20, %v4182_v35  ;;  %v15657_v16 = vadd.f32 %v4183_v47, %v15578_v15  ;;  %v4052_v25 = vpop.f32.mrf.mxu3  ;;  %v5127_v15 = vld [vmem:[%s17582_s1 + $0x1a0] sm:$0xff] }
 0x419   : > { %v15660_v35 = vadd.f32 %v4052_v25, %v17881_v0 }
 0x41a   : > { %v15645_v13 = vpop.f32.mrf.mxu2  ;;  %17880 = vst [vmem:[#allocation71_spill] sm:$0xff] %v15657_v16 }
 0x41b   : > { %17879 = vst [vmem:[#allocation67_spill] sm:$0xff] %v15645_v13 }
 0x41c   : > { %5321 = vperm.xlu2 %13519, %v5113_v8   ;;  %5391 = vperm.xlu1 %13518, %v5127_v15  }
 0x41f   : > { %v15662_v1 = vpop.f32.mrf.mxu1  ;;  %v4186_v13 = vpop.f32.mrf.mxu0 }
 0x420   : > { %17882 = vst [vmem:[#allocation90_spill] sm:$0xff] %v15662_v1  ;;  %v4187_v57 = vadd.f32 %v4186_v13, %v15595_v19  ;;  %v4054_v25 = vpop.f32.mrf.mxu3  ;;  %v10363_v13 = vld [vmem:[#allocation2 + $0xb0] sm:$0xf] }
 0x422   : > { %v4469_v20 = vpop.f32.mrf.mxu2  ;;  %4666 = vmatmul.bf16.gmra.mxu0 %v10328_v18  ;;  %v17886_v18 = vld [vmem:[#allocation103_spill] sm:$0xff] }
 0x423   : > { %v15670_v47 = vadd.f32 %v4469_v20, %v4326_v27  ;;  %v12838_v20 = vld [vmem:[#allocation2 + $0xd0] sm:$0xf0] }
 0x424   : > { %5336 = vperm.xlu2 %13519, %v5116_v2   ;;  %v12860_v2 = vld [vmem:[#allocation2 + $0x184] sm:$0xf] }
 0x425   : > { %17883 = vst [vmem:[#allocation75_spill] sm:$0xff] %v15670_v47  ;;  %4537 = vmatmul.bf16.gmra.mxu3 %v10432_v23 }
 0x427   : > { %v4330_v36 = vpop.f32.mrf.mxu1  ;;  %v4188_v16 = vpop.f32.mrf.mxu0 }
 0x428   : > { %v4331_v0 = vadd.f32 %v4330_v36, %v4187_v57  ;;  %v15679_v27 = vadd.f32 %v4188_v16, %v15612_v45  ;;  %v4057_v19 = vpop.f32.mrf.mxu3  ;;  %v10364_v57 = vor.u32 %v12838_v20, %v10363_v13  ;;  %v5119_v36 = vld [vmem:[%s17582_s1 + $0x160] sm:$0xff]  ;;  %v10465_v16 = vld [vmem:[#allocation2 + $0x1a4] sm:$0xf0]  ;;  %v17891_v13 = vld [vmem:[#allocation98_spill] sm:$0xff] }
 0x429   : > { %v15682_v8 = vadd.f32 %v4057_v19, %v17886_v18 }
 0x42a   : > { %v15673_v1 = vpop.f32.mrf.mxu2  ;;  %17885 = vst [vmem:[#allocation78_spill] sm:$0xff] %v15679_v27  ;;  %v17889_v27 = vld [vmem:[#allocation31_spill] sm:$0xff] }
 0x42b   : > { %17884 = vst [vmem:[#allocation76_spill] sm:$0xff] %v15673_v1  ;;  %v17890_v1 = vld [vmem:[#allocation56_spill] sm:$0xff] }
 0x42c   : > { %5351 = vperm.xlu2 %13519, %v5119_v36   ;;  %v3762_v19 = vadd.f32 %v17890_v1, %v17889_v27  ;;  %v13379_v1 = vld [vmem:[#allocation5 + $0x48] sm:$0xff]  ;;  %v12847_v36 = vld [vmem:[#allocation2 + $0x118] sm:$0xf0] }
 0x42d   : > { %v13371_v27 = vld [vmem:[#allocation5 + $0x8] sm:$0xff]  ;;  %8534 = vmatpush.bf16.msra.mxu2 %v13379_v1  ;;  %v17898_v1 = vld [vmem:[#allocation64_spill] sm:$0xff] }
 0x42e   : > { %v3906_v20 = vadd.f32 %v17891_v13, %v3762_v19  ;;  %8412 = vmatpush.bf16.msra.mxu1 %v13371_v27 }
 0x42f   : > { %v15684_v15 = vpop.f32.mrf.mxu1  ;;  %v4191_v62 = vpop.f32.mrf.mxu0 }
 0x430   : > { %17887 = vst [vmem:[#allocation84_spill] sm:$0xff] %v15684_v15  ;;  %v4192_v45 = vadd.f32 %v4191_v62, %v15629_v10  ;;  %v15694_v18 = vpop.f32.mrf.mxu3  ;;  %v10468_v15 = vor.u32 %v12860_v2, %v10465_v16  ;;  %v4050_v58 = vadd.f32 %v4049_v30, %v3906_v20  ;;  %v5122_v10 = vld [vmem:[%s17582_s1 + $0x178] sm:$0xff]  ;;  %v17894_v30 = vld [vmem:[#allocation107_spill] sm:$0xff]  ;;  %v12869_v20 = vld [vmem:[#allocation2 + $0x1cc] sm:$0xf] }
 0x431   : > { %v10399_v62 = vld [vmem:[#allocation2 + $0xf8] sm:$0xf] }
 0x432   : > { %v4474_v26 = vpop.f32.mrf.mxu2  ;;  %4671 = vmatmul.bf16.gmra.mxu0 %v10364_v57  ;;  %v10400_v2 = vor.u32 %v12847_v36, %v10399_v62 }
 0x433   : > { %v15689_v23 = vadd.f32 %v4474_v26, %v4331_v0 }
 0x434   : > { %5366 = vperm.xlu2 %13519, %v5122_v10   ;;  %v17897_v10 = vld [vmem:[#allocation32_spill] sm:$0xff] }
 0x435   : > { %17888 = vst [vmem:[#allocation85_spill] sm:$0xff] %v15689_v23  ;;  %4542 = vmatmul.bf16.gmra.mxu3 %v10468_v15  ;;  %v3767_v27 = vadd.f32 %v17898_v1, %v17897_v10  ;;  %v17902_v10 = vld [vmem:[#allocation112_spill] sm:$0xff] }
 0x437   : > { %v4335_v47 = vpop.f32.mrf.mxu1  ;;  %v4193_v0 = vpop.f32.mrf.mxu0 }
 0x438   : > { %v4336_v43 = vadd.f32 %v4335_v47, %v4192_v45  ;;  %v15702_v26 = vadd.f32 %v4193_v0, %v4050_v58  ;;  %v4062_v57 = vpop.f32.mrf.mxu3  ;;  %v5125_v58 = vld [vmem:[%s17582_s1 + $0x190] sm:$0xff] }
 0x439   : > { %v4063_v47 = vadd.f32 %v4062_v57, %v17894_v30  ;;  %v10501_v0 = vld [vmem:[#allocation2 + $0x1ec] sm:$0xf0]  ;;  %v17899_v30 = vld [vmem:[#allocation102_spill] sm:$0xff] }
 0x43a   : > { %v15697_v40 = vpop.f32.mrf.mxu2  ;;  %17893 = vst [vmem:[#allocation91_spill] sm:$0xff] %v15702_v26  ;;  %v3911_v62 = vadd.f32 %v17899_v30, %v3767_v27  ;;  %v10504_v36 = vor.u32 %v12869_v20, %v10501_v0  ;;  %v17904_v0 = vld [vmem:[#allocation43_spill] sm:$0xff]  ;;  %v17905_v27 = vld [vmem:[#allocation86_spill] sm:$0xff] }
 0x43b   : > { %17892 = vst [vmem:[#allocation87_spill] sm:$0xff] %v15697_v40  ;;  %v3782_v30 = vadd.f32 %v17905_v27, %v17904_v0 }
 0x43c   : > { %5381 = vperm.xlu2 %13519, %v5125_v58   ;;  %v4055_v26 = vadd.f32 %v4054_v25, %v3911_v62  ;;  %v12856_v58 = vld [vmem:[#allocation2 + $0x160] sm:$0xf0] }
 0x43f   : > { %v15705_v45 = vpop.f32.mrf.mxu1  ;;  %v4196_v19 = vpop.f32.mrf.mxu0 }
 0x440   : > { %17895 = vst [vmem:[#allocation92_spill] sm:$0xff] %v15705_v45  ;;  %v4197_v13 = vadd.f32 %v4196_v19, %v15660_v35  ;;  %v4064_v57 = vpop.f32.mrf.mxu3  ;;  %v5128_v35 = vld [vmem:[%s17582_s1 + $0x1a8] sm:$0xff] }
 0x442   : > { %v4479_v16 = vpop.f32.mrf.mxu2  ;;  %4676 = vmatmul.bf16.gmra.mxu0 %v10400_v2  ;;  %v10435_v2 = vld [vmem:[#allocation2 + $0x140] sm:$0xf] }
 0x443   : > { %v15710_v15 = vadd.f32 %v4479_v16, %v4336_v43  ;;  %v10436_v25 = vor.u32 %v12856_v58, %v10435_v2 }
 0x444   : > { %5396 = vperm.xlu2 %13519, %v5128_v35   ;;  %v17907_v35 = vld [vmem:[#allocation35_spill] sm:$0xff] }
 0x445   : > { %17896 = vst [vmem:[#allocation94_spill] sm:$0xff] %v15710_v15  ;;  %4547 = vmatmul.bf16.gmra.mxu3 %v10504_v36  ;;  %v17909_v15 = vld [vmem:[#allocation114_spill] sm:$0xff] }
 0x446   : > { %v3926_v60 = vadd.f32 %v17909_v15, %v3782_v30  ;;  %v17913_v15 = vld [vmem:[#allocation116_spill] sm:$0xff] }
 0x447   : > { %v4340_v45 = vpop.f32.mrf.mxu1  ;;  %v4198_v43 = vpop.f32.mrf.mxu0 }
 0x448   : > { %v4341_v40 = vadd.f32 %v4340_v45, %v4197_v13  ;;  %v15721_v16 = vadd.f32 %v4198_v43, %v4055_v26  ;;  %v4067_v19 = vpop.f32.mrf.mxu3  ;;  %v12878_v26 = vld [vmem:[#allocation2 + $0x214] sm:$0xf]  ;;  %v10537_v43 = vld [vmem:[#allocation2 + $0x234] sm:$0xf0] }
 0x449   : > { %v4068_v1 = vadd.f32 %v4067_v19, %v17902_v10  ;;  %v17910_v10 = vld [vmem:[#allocation104_spill] sm:$0xff] }
 0x44a   : > { %v15716_v23 = vpop.f32.mrf.mxu2  ;;  %17901 = vst [vmem:[#allocation105_spill] sm:$0xff] %v15721_v16  ;;  %v17908_v16 = vld [vmem:[#allocation70_spill] sm:$0xff] }
 0x44b   : > { %17900 = vst [vmem:[#allocation115_spill] sm:$0xff] %v15716_v23  ;;  %v3772_v23 = vadd.f32 %v17908_v16, %v17907_v35  ;;  %v10471_v16 = vld [vmem:[#allocation2 + $0x188] sm:$0xf]  ;;  %v12865_v35 = vld [vmem:[#allocation2 + $0x1a8] sm:$0xf0] }
 0x44d   : > { %v3916_v2 = vadd.f32 %v17910_v10, %v3772_v23  ;;  %v10472_v23 = vor.u32 %v12865_v35, %v10471_v16  ;;  %v12887_v10 = vld [vmem:[#allocation2 + $0x25c] sm:$0xf] }
 0x44f   : > { %v15724_v20 = vpop.f32.mrf.mxu1  ;;  %v4201_v13 = vpop.f32.mrf.mxu0  ;;  %v4060_v0 = vadd.f32 %v15694_v18, %v3916_v2  ;;  %v17918_v2 = vld [vmem:[#allocation38_spill] sm:$0xff] }
 0x450   : > { %17903 = vst [vmem:[#allocation106_spill] sm:$0xff] %v15724_v20  ;;  %v4202_v36 = vadd.f32 %v4201_v13, %v15682_v8  ;;  %v4069_v19 = vpop.f32.mrf.mxu3  ;;  %v10540_v20 = vor.u32 %v12878_v26, %v10537_v43  ;;  %v17915_v43 = vld [vmem:[#allocation50_spill] sm:$0xff] }
 0x451   : > { %v4070_v58 = vadd.f32 %v4069_v19, %v3926_v60  ;;  %v17916_v19 = vld [vmem:[#allocation93_spill] sm:$0xff] }
 0x452   : > { %v4484_v45 = vpop.f32.mrf.mxu2  ;;  %4681 = vmatmul.bf16.gmra.mxu0 %v10436_v25  ;;  %v3787_v18 = vadd.f32 %v17916_v19, %v17915_v43  ;;  %v10507_v19 = vld [vmem:[#allocation2 + $0x1d0] sm:$0xf] }
 0x453   : > { %v15728_v62 = vadd.f32 %v4484_v45, %v4341_v40 }
 0x455   : > { %17906 = vst [vmem:[#allocation108_spill] sm:$0xff] %v15728_v62  ;;  %4552 = vmatmul.bf16.gmra.mxu3 %v10540_v20  ;;  %v10573_v20 = vld [vmem:[#allocation2 + $0x27c] sm:$0xf0] }
 0x456   : > { %v10576_v35 = vor.u32 %v12887_v10, %v10573_v20 }
 0x457   : > { %v4345_v24 = vpop.f32.mrf.mxu1  ;;  %v4203_v8 = vpop.f32.mrf.mxu0 }
 0x458   : > { %v4346_v40 = vadd.f32 %v4345_v24, %v4202_v36  ;;  %v15738_v13 = vadd.f32 %v4203_v8, %v4060_v0  ;;  %v4072_v27 = vpop.f32.mrf.mxu3  ;;  %v17919_v0 = vld [vmem:[#allocation77_spill] sm:$0xff] }
 0x459   : > { %v4073_v25 = vadd.f32 %v4072_v27, %v17913_v15  ;;  %v3777_v8 = vadd.f32 %v17919_v0, %v17918_v2  ;;  %v17921_v15 = vld [vmem:[#allocation109_spill] sm:$0xff] }
 0x45a   : > { %v15736_v45 = vpop.f32.mrf.mxu2  ;;  %17912 = vst [vmem:[#allocation119_spill] sm:$0xff] %v15738_v13  ;;  %v17920_v13 = vld [vmem:[#allocation118_spill] sm:$0xff]  ;;  %v12874_v2 = vld [vmem:[#allocation2 + $0x1f0] sm:$0xf0] }
 0x45b   : > { %17911 = vst [vmem:[#allocation117_spill] sm:$0xff] %v15736_v45  ;;  %v3931_v45 = vadd.f32 %v17920_v13, %v3787_v18 }
 0x45f   : > { %v15741_v30 = vpop.f32.mrf.mxu1  ;;  %v4206_v26 = vpop.f32.mrf.mxu0 }
 0x460   : > { %17914 = vst [vmem:[#allocation110_spill] sm:$0xff] %v15741_v30  ;;  %v4207_v36 = vadd.f32 %v4206_v26, %v4063_v47  ;;  %v4074_v27 = vpop.f32.mrf.mxu3  ;;  %v3921_v30 = vadd.f32 %v17921_v15, %v3777_v8 }
 0x461   : > { %v4075_v16 = vadd.f32 %v4074_v27, %v3931_v45 }
 0x462   : > { %v4489_v60 = vpop.f32.mrf.mxu2  ;;  %4686 = vmatmul.bf16.gmra.mxu0 %v10472_v23  ;;  %v4065_v7 = vadd.f32 %v4064_v57, %v3921_v30  ;;  %v10508_v23 = vor.u32 %v12874_v2, %v10507_v19  ;;  %v12896_v30 = vld [vmem:[#allocation2 + $0x2a4] sm:$0xf] }
 0x463   : > { %v15745_v24 = vadd.f32 %v4489_v60, %v4346_v40  ;;  %v13378_v60 = vld [vmem:[#allocation5 + $0x40] sm:$0xff] }
 0x464   : > { %8535 = vmatpush.bf16.msra.mxu2 %v13378_v60  ;;  %v10543_v60 = vld [vmem:[#allocation2 + $0x218] sm:$0xf] }
 0x465   : > { %17917 = vst [vmem:[#allocation111_spill] sm:$0xff] %v15745_v24  ;;  %4557 = vmatmul.bf16.gmra.mxu3 %v10576_v35 }
 0x467   : > { %v4350_v62 = vpop.f32.mrf.mxu1  ;;  %v4208_v40 = vpop.f32.mrf.mxu0 }
 0x468   : > { %v4351_v3 = vadd.f32 %v4350_v62, %v4207_v36  ;;  %v15753_v47 = vadd.f32 %v4208_v40, %v4065_v7  ;;  %v4518_v26 = vpop.f32.mrf.mxu3  ;;  %v13370_v62 = vld [vmem:[#allocation5] sm:$0xff]  ;;  %v10609_v36 = vld [vmem:[#allocation2 + $0x2c4] sm:$0xf0] }
 0x469   : > { %8413 = vmatpush.bf16.msra.mxu1 %v13370_v62  ;;  %v10612_v20 = vor.u32 %v12896_v30, %v10609_v36  ;;  %v12905_v62 = vld [vmem:[#allocation2 + $0x2ec] sm:$0xf]  ;;  %v10645_v30 = vld [vmem:[#allocation2 + $0x30c] sm:$0xf0] }
 0x46a   : > { %v15751_v43 = vpop.f32.mrf.mxu2  ;;  %17923 = vst [vmem:[#allocation120_spill] sm:$0xff] %v15753_v47  ;;  %v10648_v36 = vor.u32 %v12905_v62, %v10645_v30 }
 0x46b   : > { %17922 = vst [vmem:[#allocation113_spill] sm:$0xff] %v15751_v43 }
 0x46f   : > { %v15755_v13 = vpop.f32.mrf.mxu1  ;;  %v4211_v45 = vpop.f32.mrf.mxu0 }
 0x470   : > { %17924 = vst [vmem:[#allocation121_spill] sm:$0xff] %v15755_v13  ;;  %v4212_v57 = vadd.f32 %v4211_v45, %v4068_v1  ;;  %v4520_v7 = vpop.f32.mrf.mxu3  ;;  %v15840_v13 = vld [vmem:[#allocation2 + $0x6fc] sm:$0xf0] }
 0x472   : > { %v4494_v18 = vpop.f32.mrf.mxu2  ;;  %4691 = vmatmul.bf16.gmra.mxu0 %v10508_v23 }
 0x473   : > { %v15757_v10 = vadd.f32 %v4494_v18, %v4351_v3  ;;  %v12883_v3 = vld [vmem:[#allocation2 + $0x238] sm:$0xf0] }
 0x474   : > { %v10544_v1 = vor.u32 %v12883_v3, %v10543_v60  ;;  %v10579_v3 = vld [vmem:[#allocation2 + $0x260] sm:$0xf] }
 0x475   : > { %17925 = vst [vmem:[#allocation122_spill] sm:$0xff] %v15757_v10  ;;  %4562 = vmatmul.bf16.gmra.mxu3 %v10612_v20  ;;  %v13409_v10 = vld [vmem:[#allocation5 + $0x138] sm:$0xff] }
 0x476   : > { %8894 = vmatpush.bf16.msrb.mxu1 %v13409_v10 }
 0x477   : > { %v4355_v0 = vpop.f32.mrf.mxu1  ;;  %v4213_v15 = vpop.f32.mrf.mxu0 }
 0x478   : > { %v4356_v8 = vadd.f32 %v4355_v0, %v4212_v57  ;;  %v15761_v35 = vadd.f32 %v4213_v15, %v4070_v58  ;;  %v4523_v40 = vpop.f32.mrf.mxu3 }
 0x47a   : > { %v15759_v27 = vpop.f32.mrf.mxu2  ;;  %17927 = vst [vmem:[#allocation100_spill] sm:$0xff] %v15761_v35 }
 0x47b   : > { %17926 = vst [vmem:[#allocation97_spill] sm:$0xff] %v15759_v27 }
 0x47f   : > { %v15763_v19 = vpop.f32.mrf.mxu1  ;;  %v4216_v18 = vpop.f32.mrf.mxu0 }
 0x480   : > { %17928 = vst [vmem:[#allocation103_spill] sm:$0xff] %v15763_v19  ;;  %v4217_v45 = vadd.f32 %v4216_v18, %v4073_v25  ;;  %v15767_v57 = vpop.f32.mrf.mxu3  ;;  %v4519_v25 = vadd.f32 %v4518_v26, %v15244_v28 }
 0x482   : > { %v4499_v2 = vpop.f32.mrf.mxu2  ;;  %4696 = vmatmul.bf16.gmra.mxu0 %v10544_v1  ;;  %v15779_v1 = vld [vmem:[%s17584_s3] ss:$0 sm:$0xff] }
 0x483   : > { %v15765_v23 = vadd.f32 %v4499_v2, %v4356_v8  ;;  %v12892_v8 = vld [vmem:[#allocation2 + $0x280] sm:$0xf0] }
 0x484   : > { %v10580_v2 = vor.u32 %v12892_v8, %v10579_v3  ;;  %v5132_v8 = vpop.permute.xlu0 %5131 }
 0x485   : > { %17929 = vst [vmem:[#allocation31_spill] sm:$0xff] %v15765_v23  ;;  %4567 = vmatmul.bf16.gmra.mxu3 %v10648_v36  ;;  %v12914_v36 = vld [vmem:[#allocation2 + $0x334] sm:$0xf] }
 0x487   : > { %v4360_v20 = vpop.f32.mrf.mxu1  ;;  %v4218_v15 = vpop.f32.mrf.mxu0 }
 0x488   : > { %v4361_v58 = vadd.f32 %v4360_v20, %v4217_v45  ;;  %v15771_v35 = vadd.f32 %v4218_v15, %v4075_v16  ;;  %v15773_v60 = vpop.f32.mrf.mxu3  ;;  %v15786_v16 = vld [vmem:[%s17585_s4] ss:$0 sm:$0xff]  ;;  %v10681_v20 = vld [vmem:[#allocation2 + $0x354] sm:$0xf0] }
 0x489   : > { %v10684_v3 = vor.u32 %v12914_v36, %v10681_v20  ;;  %v12901_v36 = vld [vmem:[#allocation2 + $0x2c8] sm:$0xf0] }
 0x48a   : > { %v15769_v0 = vpop.f32.mrf.mxu2  ;;  %17931 = vst [vmem:[#allocation98_spill] sm:$0xff] %v15771_v35 }
 0x48b   : > { %17930 = vst [vmem:[#allocation56_spill] sm:$0xff] %v15769_v0 }
 0x48f   : > { %v4662_v45 = vpop.f32.mrf.mxu0 }
 0x490   : > { %v4663_v30 = vadd.f32 %v4662_v45, %v4519_v25  ;;  %v15789_v26 = vpop.f32.mrf.mxu3 }
 0x492   : > { %v4504_v18 = vpop.f32.mrf.mxu2  ;;  %v4801_v28 = vmul.f32 %v15779_v1, %v4663_v30  ;;  %4701 = vmatmul.bf16.gmra.mxu0 %v10580_v2 }
 0x493   : > { %v15781_v62 = vadd.f32 %v4504_v18, %v4361_v58  ;;  %v4521_v58 = vadd.f32 %v4520_v7, %v15253_v33  ;;  %v4524_v33 = vadd.f32 %v4523_v40, %v15258_v31 }
 0x494   : > { %v4859_v15 = vadd.f32 %v15786_v16, %v4801_v28  ;;  %v10615_v28 = vld [vmem:[#allocation2 + $0x2a8] sm:$0xf] }
 0x495   : > { %17932 = vst [vmem:[#allocation107_spill] sm:$0xff] %v15781_v62  ;;  %4572 = vmatmul.bf16.gmra.mxu3 %v10684_v3 }
 0x496   : > { %vm4913_vm2 = vcmp.ge.f32.partialorder %v4859_v15, 0.0  ;;  %v4967_v25 = vmul.f32 0.01, %v4859_v15 }
 0x497   : > { %v4664_v18 = vpop.f32.mrf.mxu0 }
 0x498   : > { %v5021_v45 = vsel %vm4913_vm2, %v4859_v15, %v4967_v25  ;;  %v4665_v35 = vadd.f32 %v4664_v18, %v4521_v58  ;;  %v15798_v30 = vpop.f32.mrf.mxu3  ;;  %v10616_v15 = vor.u32 %v12901_v36, %v10615_v28  ;;  %v12923_v18 = vld [vmem:[#allocation2 + $0x37c] sm:$0xf] }
 0x499   : > { %v15793_v62 = vmul.f32 %v5132_v8, %v5021_v45  ;;  %v5137_v8 = vpop.permute.xlu0 %5136  ;;  %v10717_v45 = vld [vmem:[#allocation2 + $0x39c] sm:$0xf0] }
 0x49a   : > { %v4802_v0 = vmul.f32 %v15779_v1, %v4665_v35 }
 0x49b   : > { %17933 = vst [vmem:[#allocation32_spill] sm:$0xff] %v15793_v62  ;;  %v5453_v2 = vpack.c.bf16 %v15793_v62, %v15793_v62  ;;  %v17677_v19 = vrot.slane %v15793_v62, 1  ;;  %v17676_v31 = vrot.slane %v15793_v62, 2  ;;  %v13417_v62 = vld [vmem:[#allocation5 + $0x178] sm:$0xff] }
 0x49c   : > { %v4860_v20 = vadd.f32 %v15786_v16, %v4802_v0  ;;  %v17934_v0 = vld [vmem:[#allocation10_spill] sm:$0xff]  ;;  %9016 = vmatpush.bf16.msrb.mxu2 %v13417_v62 }
 0x49d   : > { %5507 = vst [vmem:[#allocation2] sm:$0xf] %v5453_v2  ;;  %vm5831_vm4 = vcmp.lt.s32.totalorder %v17934_v0, 6 }
 0x49e   : > { %6045 = vst [vmem:[#allocation2 + $0x738] sm:$0xf] %v5453_v2  ;;  %vm4914_vm3 = vcmp.ge.f32.partialorder %v4860_v20, 0.0  ;;  %v4968_v7 = vmul.f32 0.01, %v4860_v20 }
 0x49f   : > { %6204 = vst [vmem:[#allocation2 + $0x6d8] sm:$0xf] %v5453_v2  ;;  %v4667_v3 = vpop.f32.mrf.mxu0 }
 0x4a0   : > { %v5022_v35 = vsel %vm4914_vm3, %v4860_v20, %v4968_v7  ;;  %v4668_v58 = vadd.f32 %v4667_v3, %v4524_v33  ;;  %v15806_v2 = vpop.f32.mrf.mxu3  ;;  %v10720_v20 = vor.u32 %v12923_v18, %v10717_v45  ;;  %v4526_v3 = vadd.f32 %v15767_v57, %v15267_v5  ;;  %v15819_v18 = vld [vmem:[#allocation2 + $0x6dc] sm:$0xf]  ;;  %v10651_v57 = vld [vmem:[#allocation2 + $0x2f0] sm:$0xf] }
 0x4a1   : > { %v5400_v25 = vmul.f32 %v5137_v8, %v5022_v35 }
 0x4a2   : > { %v4803_v23 = vmul.f32 %v15779_v1, %v4668_v58  ;;  %4706 = vmatmul.bf16.gmra.mxu0 %v10616_v15  ;;  %v5142_v15 = vpop.permute.xlu1 %5141 }
 0x4a3   : > { %v5454_v40 = vpack.c.bf16 %v5400_v25, %v5400_v25  ;;  %v5562_v27 = vrot.slane %v5400_v25, 1  ;;  %v5778_v28 = vrot.slane %v5400_v25, 2 }
 0x4a4   : > { %v4861_v36 = vadd.f32 %v15786_v16, %v4803_v23 }
 0x4a5   : > { %5508 = vst [vmem:[#allocation2 + $0x24] sm:$0xf] %v5454_v40  ;;  %v5667_v33 = vsel %vm926_vm1, %v17677_v19, %v5562_v27  ;;  %v5884_v7 = vsel %vm5831_vm4, %v17676_v31, %v5778_v28  ;;  %4577 = vmatmul.bf16.gmra.mxu3 %v10720_v20  ;;  %v13393_v19 = vld [vmem:[#allocation5 + $0xb8] sm:$0xff] }
 0x4a6   : > { %v5669_v8 = vpack.c.bf16 %v5667_v33, %v5667_v33  ;;  %6046 = vst [vmem:[#allocation2 + $0x75c] sm:$0xf] %v5454_v40  ;;  %vm4915_vm5 = vcmp.ge.f32.partialorder %v4861_v36, 0.0  ;;  %v4969_v23 = vmul.f32 0.01, %v4861_v36  ;;  %v15821_v45 = vpack.c.bf16 %v5884_v7, %v5884_v7  ;;  %8650 = vmatpush.bf16.msrb.mxu3 %v13393_v19 }
 0x4a7   : > { %6205 = vst [vmem:[#allocation2 + $0x6fc] sm:$0xf] %v5454_v40  ;;  %v4669_v35 = vpop.f32.mrf.mxu0 }
 0x4a8   : > { %5723 = vst [vmem:[#allocation2 + $0x4] sm:$0xf] %v5669_v8  ;;  %v5023_v58 = vsel %vm4915_vm5, %v4861_v36, %v4969_v23  ;;  %v4670_v25 = vadd.f32 %v4669_v35, %v4526_v3  ;;  %v15830_v20 = vpop.f32.mrf.mxu3  ;;  %v12910_v3 = vld [vmem:[#allocation2 + $0x310] sm:$0xf0]  ;;  %v4529_v35 = vadd.f32 %v15773_v60, %v15272_v48 }
 0x4a9   : > { %6099 = vst [vmem:[#allocation2 + $0x73c] sm:$0xf] %v5669_v8  ;;  %v15823_v31 = vmul.f32 %v5142_v15, %v5023_v58  ;;  %v11519_v15 = vld [vmem:[#allocation2] sm:$0xf] }
 0x4aa   : > { %v4804_v5 = vmul.f32 %v15779_v1, %v4670_v25  ;;  %6258 = vst [vmem:[#allocation2 + $0x6dc] sm:$0xf] %v5669_v8  ;;  %v10652_v8 = vor.u32 %v12910_v3, %v10651_v57  ;;  %v5147_v48 = vpop.permute.xlu1 %5146 }
 0x4ab   : > { %v5455_v40 = vpack.c.bf16 %v15823_v31, %v15823_v31  ;;  %v5563_v33 = vrot.slane %v15823_v31, 1  ;;  %v5779_v36 = vrot.slane %v15823_v31, 2  ;;  %5940 = vst [vmem:[#allocation2 + $0x8] sm:$0xf] %v15821_v45 }
 0x4ac   : > { %v4862_v7 = vadd.f32 %v15786_v16, %v4804_v5  ;;  %v13131_v23 = vld [vmem:[#allocation2 + $0x20] sm:$0xf0]  ;;  %6153 = vst [vmem:[#allocation2 + $0x740] sm:$0xf] %v15821_v45 }
 0x4ad   : > { %5509 = vst [vmem:[#allocation2 + $0x48] sm:$0xf] %v5455_v40  ;;  %v5666_v58 = vsel %vm926_vm1, %v5562_v27, %v5563_v33  ;;  %v11520_v31 = vor.u32 %v13131_v23, %v11519_v15  ;;  %v5883_v25 = vsel %vm5831_vm4, %v5778_v28, %v5779_v36  ;;  %v12932_v15 = vld [vmem:[#allocation2 + $0x3c4] sm:$0xf]  ;;  %v10753_v28 = vld [vmem:[#allocation2 + $0x3e4] sm:$0xf0] }
 0x4ae   : > { %v5670_v19 = vpack.c.bf16 %v5666_v58, %v5666_v58  ;;  %6047 = vst [vmem:[#allocation2 + $0x780] sm:$0xf] %v5455_v40  ;;  %vm4916_vm6 = vcmp.ge.f32.partialorder %v4862_v7, 0.0  ;;  %v4970_v62 = vmul.f32 0.01, %v4862_v7  ;;  %v15842_v47 = vpack.c.bf16 %v5883_v25, %v5883_v25  ;;  %v13401_v58 = vld [vmem:[#allocation5 + $0xf8] sm:$0xff] }
 0x4af   : > { %6206 = vst [vmem:[#allocation2 + $0x720] sm:$0xf] %v5455_v40  ;;  %v4672_v5 = vpop.f32.mrf.mxu0  ;;  %8414 = vmatmul.bf16.vlgmr.msra.gmra.mxu1 %v11520_v31  ;;  %8772 = vmatpush.bf16.msrb.mxu0 %v13401_v58  ;;  %v10756_v25 = vor.u32 %v12932_v15, %v10753_v28  ;;  %v15866_v28 = vld [vmem:[#allocation2 + $0x724] sm:$0xf] }
 0x4b0   : > { %5724 = vst [vmem:[#allocation2 + $0x28] sm:$0xf] %v5670_v19  ;;  %v5024_v60 = vsel %vm4916_vm6, %v4862_v7, %v4970_v62  ;;  %v4673_v27 = vadd.f32 %v4672_v5, %v4529_v35  ;;  %v15851_v7 = vpop.f32.mrf.mxu3 }
 0x4b1   : > { %6100 = vst [vmem:[#allocation2 + $0x760] sm:$0xf] %v5670_v19  ;;  %v15844_v23 = vmul.f32 %v5147_v48, %v5024_v60 }
 0x4b2   : > { %v4805_v57 = vmul.f32 %v15779_v1, %v4673_v27  ;;  %4711 = vmatmul.bf16.gmra.mxu0 %v10652_v8  ;;  %6259 = vst [vmem:[#allocation2 + $0x700] sm:$0xf] %v5670_v19  ;;  %v4531_v19 = vadd.f32 %v15789_v26, %v15281_v52  ;;  %v5152_v8 = vpop.permute.xlu2 %5151  ;;  %v13127_v27 = vld [vmem:[#allocation2 + $0x4] sm:$0xf] }
 0x4b3   : > { %v5456_v40 = vpack.c.bf16 %v15844_v23, %v15844_v23  ;;  %v5564_v3 = vrot.slane %v15844_v23, 1  ;;  %v17680_v31 = vrot.slane %v15844_v23, 2  ;;  %5941 = vst [vmem:[#allocation2 + $0x2c] sm:$0xf] %v15842_v47 }
 0x4b4   : > { %v4863_v35 = vadd.f32 %v15786_v16, %v4805_v57  ;;  %6154 = vst [vmem:[#allocation2 + $0x764] sm:$0xf] %v15842_v47 }
 0x4b5   : > { %5510 = vst [vmem:[#allocation2 + $0x6c] sm:$0xf] %v5456_v40  ;;  %v5665_v62 = vsel %vm926_vm1, %v5563_v33, %v5564_v3  ;;  %v15864_v10 = vsel %vm5831_vm4, %v5779_v36, %v17680_v31  ;;  %4582 = vmatmul.bf16.gmra.mxu3 %v10756_v25 }
 0x4b6   : > { %v5671_v5 = vpack.c.bf16 %v5665_v62, %v5665_v62  ;;  %5994 = vst [vmem:[#allocation2 + $0xc] sm:$0xf] %v5456_v40  ;;  %vm4917_vm7 = vcmp.ge.f32.partialorder %v4863_v35, 0.0  ;;  %v4971_v48 = vmul.f32 0.01, %v4863_v35 }
 0x4b7   : > { %6207 = vst [vmem:[#allocation2 + $0x744] sm:$0xf] %v5456_v40  ;;  %v4674_v60 = vpop.f32.mrf.mxu0  ;;  %v11521_v15 = vld [vmem:[#allocation2 + $0x24] sm:$0xf0]  ;;  %v10687_v62 = vld [vmem:[#allocation2 + $0x338] sm:$0xf] }
 0x4b8   : > { %5725 = vst [vmem:[#allocation2 + $0x4c] sm:$0xf] %v5671_v5  ;;  %v5025_v52 = vsel %vm4917_vm7, %v4863_v35, %v4971_v48  ;;  %v4675_v26 = vadd.f32 %v4674_v60, %v4531_v19  ;;  %v11524_v33 = vor.u32 %v13127_v27, %v11521_v15  ;;  %v15874_v31 = vpop.f32.mrf.mxu3  ;;  %v12919_v35 = vld [vmem:[#allocation2 + $0x358] sm:$0xf0]  ;;  %v11555_v19 = vld [vmem:[#allocation2 + $0x48] sm:$0xf] }
 0x4b9   : > { %6101 = vst [vmem:[#allocation2 + $0x784] sm:$0xf] %v5671_v5  ;;  %v15868_v58 = vmul.f32 %v5152_v8, %v5025_v52  ;;  %v4534_v8 = vadd.f32 %v15798_v30, %v15286_v61 }
 0x4ba   : > { %v4806_v57 = vmul.f32 %v15779_v1, %v4675_v26  ;;  %8536 = vmatmul.bf16.vlgmr.msra.gmra.mxu2 %v11524_v33  ;;  %6260 = vst [vmem:[#allocation2 + $0x724] sm:$0xf] %v5671_v5  ;;  %v10688_v26 = vor.u32 %v12919_v35, %v10687_v62  ;;  %v15882_v33 = vld [vmem:[#allocation2 + $0x744] sm:$0xf0]  ;;  %v5157_v43 = vpop.permute.xlu2 %5156 }
 0x4bb   : > { %17935 = vst [vmem:[#allocation64_spill] sm:$0xff] %v15868_v58  ;;  %v5457_v36 = vpack.c.bf16 %v15868_v58, %v15868_v58  ;;  %v5565_v40 = vrot.slane %v15868_v58, 1  ;;  %v17681_v61 = vrot.slane %v15868_v58, 2  ;;  %v12928_v58 = vld [vmem:[#allocation2 + $0x3a0] sm:$0xf0] }
 0x4bc   : > { %v4864_v25 = vadd.f32 %v15786_v16, %v4806_v57  ;;  %v13140_v48 = vld [vmem:[#allocation2 + $0x68] sm:$0xf0]  ;;  %v15884_v57 = vld [vmem:[#allocation2 + $0x6e0] sm:$0xf] }
 0x4bd   : > { %5511 = vst [vmem:[#allocation2 + $0x90] sm:$0xf] %v5457_v36  ;;  %v5664_v60 = vsel %vm926_vm1, %v5564_v3, %v5565_v40  ;;  %v11556_v27 = vor.u32 %v13140_v48, %v11555_v19  ;;  %v12941_v3 = vld [vmem:[#allocation2 + $0x40c] sm:$0xf]  ;;  %v10789_v48 = vld [vmem:[#allocation2 + $0x42c] sm:$0xf0] }
 0x4be   : > { %v5672_v15 = vpack.c.bf16 %v5664_v60, %v5664_v60  ;;  %5995 = vst [vmem:[#allocation2 + $0x30] sm:$0xf] %v5457_v36  ;;  %vm4918_vm8 = vcmp.ge.f32.partialorder %v4864_v25, 0.0  ;;  %v4972_v52 = vmul.f32 0.01, %v4864_v25 }
 0x4bf   : > { %6208 = vst [vmem:[#allocation2 + $0x768] sm:$0xf] %v5457_v36  ;;  %v4677_v5 = vpop.f32.mrf.mxu0  ;;  %8419 = vmatmul.bf16.gmra.mxu1 %v11556_v27  ;;  %v15889_v60 = vld [vmem:[#allocation2 + $0x700] sm:$0xf0] }
 0x4c0   : > { %5726 = vst [vmem:[#allocation2 + $0x70] sm:$0xf] %v5672_v15  ;;  %v5026_v30 = vsel %vm4918_vm8, %v4864_v25, %v4972_v52  ;;  %v4678_v24 = vadd.f32 %v4677_v5, %v4534_v8  ;;  %v15895_v27 = vpop.f32.mrf.mxu3  ;;  %v13136_v52 = vld [vmem:[#allocation2 + $0x4c] sm:$0xf] }
 0x4c1   : > { %6048 = vst [vmem:[#allocation2 + $0x10] sm:$0xf] %v5672_v15  ;;  %v15887_v19 = vmul.f32 %v5157_v43, %v5026_v30  ;;  %v10792_v43 = vor.u32 %v12941_v3, %v10789_v48  ;;  %v15910_v3 = vld [vmem:[#allocation2 + $0x76c] sm:$0xf] }
 0x4c2   : > { %17937 = vst [vmem:[#allocation112_spill] sm:$0xff] %v15889_v60  ;;  %v4807_v62 = vmul.f32 %v15779_v1, %v4678_v24  ;;  %4716 = vmatmul.bf16.gmra.mxu0 %v10688_v26  ;;  %v17938_v24 = vrot.slane %v15844_v23, 2  ;;  %v15914_v23 = vpack.c.bf16 %v15864_v10, %v15864_v10  ;;  %v10825_v60 = vld [vmem:[#allocation2 + $0x474] sm:$0xf0] }
 0x4c3   : > { %17936 = vst [vmem:[#allocation102_spill] sm:$0xff] %v15887_v19  ;;  %v5458_v36 = vpack.c.bf16 %v15887_v19, %v15887_v19  ;;  %v5566_v35 = vrot.slane %v15887_v19, 1 }
 0x4c4   : > { %6261 = vst [vmem:[#allocation2 + $0x748] sm:$0xf] %v5672_v15  ;;  %v4865_v25 = vadd.f32 %v15786_v16, %v4807_v62  ;;  %v5881_v8 = vsel %vm5831_vm4, %v17938_v24, %v17681_v61 }
 0x4c5   : > { %6312 = vst [vmem:[#allocation2 + $0x6e0] sm:$0xf] %v15821_v45  ;;  %v5663_v15 = vsel %vm926_vm1, %v5565_v40, %v5566_v35  ;;  %v4536_v45 = vadd.f32 %v15806_v2, %v15295_v54  ;;  %v15916_v48 = vpack.c.bf16 %v5881_v8, %v5881_v8  ;;  %v5162_v40 = vpop.permute.xlu0 %5161  ;;  %4587 = vmatmul.bf16.gmra.mxu3 %v10792_v43  ;;  %v11591_v43 = vld [vmem:[#allocation2 + $0x90] sm:$0xf] }
 0x4c6   : > { %6313 = vst [vmem:[#allocation2 + $0x704] sm:$0xf] %v15842_v47  ;;  %v5673_v26 = vpack.c.bf16 %v5663_v15, %v5663_v15  ;;  %vm4919_vm9 = vcmp.ge.f32.partialorder %v4865_v25, 0.0  ;;  %v4973_v5 = vmul.f32 0.01, %v4865_v25 }
 0x4c7   : > { %5512 = vst [vmem:[#allocation2 + $0xb4] sm:$0xf] %v5458_v36  ;;  %v4679_v47 = vpop.f32.mrf.mxu0  ;;  %v11557_v30 = vld [vmem:[#allocation2 + $0x6c] sm:$0xf0]  ;;  %v10723_v15 = vld [vmem:[#allocation2 + $0x380] sm:$0xf] }
 0x4c8   : > { %5996 = vst [vmem:[#allocation2 + $0x54] sm:$0xf] %v5458_v36  ;;  %v5027_v62 = vsel %vm4919_vm9, %v4865_v25, %v4973_v5  ;;  %v4680_v54 = vadd.f32 %v4679_v47, %v4536_v45  ;;  %v11560_v2 = vor.u32 %v13136_v52, %v11557_v30  ;;  %v15924_v61 = vpop.f32.mrf.mxu3  ;;  %v4539_v45 = vadd.f32 %v15830_v20, %v15300_v17  ;;  %v12950_v20 = vld [vmem:[#allocation2 + $0x454] sm:$0xf] }
 0x4c9   : > { %6209 = vst [vmem:[#allocation2 + $0x78c] sm:$0xf] %v5458_v36  ;;  %v15918_v24 = vmul.f32 %v5162_v40, %v5027_v62  ;;  %v10724_v40 = vor.u32 %v12928_v58, %v10723_v15 }
 0x4ca   : > { %17939 = vst [vmem:[#allocation43_spill] sm:$0xff] %v15916_v48  ;;  %v4808_v36 = vmul.f32 %v15779_v1, %v4680_v54  ;;  %8541 = vmatmul.bf16.gmra.mxu2 %v11560_v2  ;;  %v15933_v54 = vld [vmem:[#allocation2 + $0x78c] sm:$0xf0]  ;;  %v5167_v2 = vpop.permute.xlu1 %5166 }
 0x4cb   : > { %5727 = vst [vmem:[#allocation2 + $0x94] sm:$0xf] %v5673_v26  ;;  %v5459_v10 = vpack.c.bf16 %v15918_v24, %v15918_v24  ;;  %v5567_v8 = vrot.slane %v15918_v24, 1 }
 0x4cc   : > { %6049 = vst [vmem:[#allocation2 + $0x34] sm:$0xf] %v5673_v26  ;;  %v4866_v25 = vadd.f32 %v15786_v16, %v4808_v36 }
 0x4cd   : > { %17940 = vst [vmem:[#allocation86_spill] sm:$0xff] %v15918_v24 }
 0x4ce   : > { %6262 = vst [vmem:[#allocation2 + $0x76c] sm:$0xf] %v5673_v26  ;;  %v13149_v52 = vld [vmem:[#allocation2 + $0xb0] sm:$0xf0]  ;;  %v5662_v26 = vsel %vm926_vm1, %v5566_v35, %v5567_v8  ;;  %vm4920_vm10 = vcmp.ge.f32.partialorder %v4866_v25, 0.0 }
 0x4cf   : > { %5942 = vst [vmem:[#allocation2 + $0x50] sm:$0xf] %v15914_v23  ;;  %v11592_v5 = vor.u32 %v13149_v52, %v11591_v43  ;;  %v5674_v47 = vpack.c.bf16 %v5662_v26, %v5662_v26  ;;  %v4974_v30 = vmul.f32 0.01, %v4866_v25  ;;  %v4682_v62 = vpop.f32.mrf.mxu0  ;;  %v17684_v43 = vrot.slane %v15918_v24, 2 }
 0x4d0   : > { %5943 = vst [vmem:[#allocation2 + $0x74] sm:$0xf] %v15916_v48  ;;  %v4683_v19 = vadd.f32 %v4682_v62, %v4539_v45  ;;  %v15937_v52 = vpop.f32.mrf.mxu3  ;;  %v10828_v45 = vor.u32 %v12950_v20, %v10825_v60  ;;  %v4541_v26 = vadd.f32 %v15851_v7, %v15309_v56 }
 0x4d1   : > { %5513 = vst [vmem:[#allocation2 + $0xd8] sm:$0xf] %v5459_v10  ;;  %8423 = vmatmul.bf16.gmra.mxu1 %v11592_v5  ;;  %v5028_v36 = vsel %vm4920_vm10, %v4866_v25, %v4974_v30 }
 0x4d2   : > { %5997 = vst [vmem:[#allocation2 + $0x78] sm:$0xf] %v5459_v10  ;;  %v5406_v17 = vmul.f32 %v5167_v2, %v5028_v36  ;;  %v4809_v35 = vmul.f32 %v15779_v1, %v4683_v19  ;;  %4721 = vmatmul.bf16.gmra.mxu0 %v10724_v40  ;;  %v13145_v62 = vld [vmem:[#allocation2 + $0x94] sm:$0xf]  ;;  %v5172_v36 = vpop.permute.xlu2 %5171 }
 0x4d3   : > { %6156 = vst [vmem:[#allocation2 + $0x18] sm:$0xf] %v5459_v10 }
 0x4d4   : > { %5728 = vst [vmem:[#allocation2 + $0xb8] sm:$0xf] %v5674_v47  ;;  %v5460_v58 = vpack.c.bf16 %v5406_v17, %v5406_v17  ;;  %v5568_v15 = vrot.slane %v5406_v17, 1  ;;  %v5784_v10 = vrot.slane %v5406_v17, 2  ;;  %v4867_v25 = vadd.f32 %v15786_v16, %v4809_v35  ;;  %v10759_v35 = vld [vmem:[#allocation2 + $0x3c8] sm:$0xf] }
 0x4d5   : > { %6050 = vst [vmem:[#allocation2 + $0x58] sm:$0xf] %v5674_v47  ;;  %4592 = vmatmul.bf16.gmra.mxu3 %v10828_v45 }
 0x4d6   : > { %6263 = vst [vmem:[#allocation2 + $0x790] sm:$0xf] %v5674_v47  ;;  %v5661_v19 = vsel %vm926_vm1, %v5567_v8, %v5568_v15  ;;  %v5878_v5 = vsel %vm5831_vm4, %v17684_v43, %v5784_v10  ;;  %vm4921_vm11 = vcmp.ge.f32.partialorder %v4867_v25, 0.0  ;;  %v4975_v40 = vmul.f32 0.01, %v4867_v25 }
 0x4d7   : > { %6102 = vst [vmem:[#allocation2 + $0x14] sm:$0xf] %v15916_v48  ;;  %v5675_v47 = vpack.c.bf16 %v5661_v19, %v5661_v19  ;;  %v5892_v30 = vpack.c.bf16 %v5878_v5, %v5878_v5  ;;  %v4684_v60 = vpop.f32.mrf.mxu0  ;;  %v12937_v19 = vld [vmem:[#allocation2 + $0x3e8] sm:$0xf0] }
 0x4d8   : > { %6155 = vst [vmem:[#allocation2 + $0x788] sm:$0xf] %v15914_v23  ;;  %v5029_v56 = vsel %vm4921_vm11, %v4867_v25, %v4975_v40  ;;  %v4685_v7 = vadd.f32 %v4684_v60, %v4541_v26  ;;  %v15951_v24 = vpop.f32.mrf.mxu3  ;;  %v4544_v25 = vadd.f32 %v15874_v31, %v15314_v41  ;;  %v11627_v26 = vld [vmem:[#allocation2 + $0xd8] sm:$0xf]  ;;  %v5177_v31 = vpop.permute.xlu0 %5176 }
 0x4d9   : > { %5514 = vst [vmem:[#allocation2 + $0xfc] sm:$0xf] %v5460_v58  ;;  %v5407_v17 = vmul.f32 %v5172_v36, %v5029_v56  ;;  %v10760_v36 = vor.u32 %v12937_v19, %v10759_v35 }
 0x4da   : > { %5998 = vst [vmem:[#allocation2 + $0x9c] sm:$0xf] %v5460_v58  ;;  %v4810_v20 = vmul.f32 %v15779_v1, %v4685_v7 }
 0x4db   : > { %6157 = vst [vmem:[#allocation2 + $0x3c] sm:$0xf] %v5460_v58  ;;  %v11593_v2 = vld [vmem:[#allocation2 + $0xb4] sm:$0xf0]  ;;  %v5461_v5 = vpack.c.bf16 %v5407_v17, %v5407_v17  ;;  %v5569_v58 = vrot.slane %v5407_v17, 1  ;;  %v5785_v43 = vrot.slane %v5407_v17, 2 }
 0x4dc   : > { %5729 = vst [vmem:[#allocation2 + $0xdc] sm:$0xf] %v5675_v47  ;;  %v11596_v8 = vor.u32 %v13145_v62, %v11593_v2  ;;  %v4868_v45 = vadd.f32 %v15786_v16, %v4810_v20  ;;  %v10861_v20 = vld [vmem:[#allocation2 + $0x4bc] sm:$0xf0] }
 0x4dd   : > { %5946 = vst [vmem:[#allocation2 + $0xe0] sm:$0xf] %v5892_v30  ;;  %v5660_v60 = vsel %vm926_vm1, %v5568_v15, %v5569_v58  ;;  %v5877_v62 = vsel %vm5831_vm4, %v5784_v10, %v5785_v43  ;;  %v12959_v15 = vld [vmem:[#allocation2 + $0x49c] sm:$0xf] }
 0x4de   : > { %6051 = vst [vmem:[#allocation2 + $0x7c] sm:$0xf] %v5675_v47  ;;  %8545 = vmatmul.bf16.gmra.mxu2 %v11596_v8  ;;  %v5676_v56 = vpack.c.bf16 %v5660_v60, %v5660_v60  ;;  %v5893_v7 = vpack.c.bf16 %v5877_v62, %v5877_v62  ;;  %vm4922_vm12 = vcmp.ge.f32.partialorder %v4868_v45, 0.0  ;;  %v4976_v8 = vmul.f32 0.01, %v4868_v45 }
 0x4df   : > { %6105 = vst [vmem:[#allocation2 + $0x80] sm:$0xf] %v5892_v30  ;;  %v4687_v41 = vpop.f32.mrf.mxu0  ;;  %v10864_v62 = vor.u32 %v12959_v15, %v10861_v20  ;;  %v12946_v15 = vld [vmem:[#allocation2 + $0x430] sm:$0xf0]  ;;  %v13416_v20 = vld [vmem:[#allocation5 + $0x170] sm:$0xff] }
 0x4e0   : > { %6210 = vst [vmem:[#allocation2 + $0x1c] sm:$0xf] %v5675_v47  ;;  %v13158_v40 = vld [vmem:[#allocation2 + $0xf8] sm:$0xf0]  ;;  %v5030_v47 = vsel %vm4922_vm12, %v4868_v45, %v4976_v8  ;;  %9017 = vmatpush.bf16.msrb.mxu2 %v13416_v20 }
 0x4e1   : > { %6264 = vst [vmem:[#allocation2 + $0x20] sm:$0xf] %v5892_v30  ;;  %v11628_v2 = vor.u32 %v13158_v40, %v11627_v26  ;;  %v4688_v30 = vadd.f32 %v4687_v41, %v4544_v25  ;;  %v5408_v17 = vmul.f32 %v5177_v31, %v5030_v47  ;;  %v15961_v40 = vpop.f32.mrf.mxu3  ;;  %v4546_v25 = vadd.f32 %v15895_v27, %v15323_v39 }
 0x4e2   : > { %5515 = vst [vmem:[#allocation2 + $0x120] sm:$0xf] %v5461_v5  ;;  %4726 = vmatmul.bf16.gmra.mxu0 %v10760_v36 }
 0x4e3   : > { %5999 = vst [vmem:[#allocation2 + $0xc0] sm:$0xf] %v5461_v5  ;;  %8427 = vmatmul.bf16.gmra.mxu1 %v11628_v2  ;;  %v4811_v10 = vmul.f32 %v15779_v1, %v4688_v30  ;;  %v5462_v35 = vpack.c.bf16 %v5408_v17, %v5408_v17  ;;  %v5570_v19 = vrot.slane %v5408_v17, 1  ;;  %v5786_v26 = vrot.slane %v5408_v17, 2  ;;  %v13154_v31 = vld [vmem:[#allocation2 + $0xdc] sm:$0xf]  ;;  %v5182_v30 = vpop.permute.xlu1 %5181 }
 0x4e4   : > { %5730 = vst [vmem:[#allocation2 + $0x100] sm:$0xf] %v5676_v56 }
 0x4e5   : > { %5947 = vst [vmem:[#allocation2 + $0x104] sm:$0xf] %v5893_v7  ;;  %v4869_v60 = vadd.f32 %v15786_v16, %v4811_v10  ;;  %v5659_v45 = vsel %vm926_vm1, %v5569_v58, %v5570_v19  ;;  %v5876_v2 = vsel %vm5831_vm4, %v5785_v43, %v5786_v26  ;;  %4597 = vmatmul.bf16.gmra.mxu3 %v10864_v62  ;;  %v13400_v10 = vld [vmem:[#allocation5 + $0xf0] sm:$0xff] }
 0x4e6   : > { %6052 = vst [vmem:[#allocation2 + $0xa0] sm:$0xf] %v5676_v56  ;;  %v5677_v36 = vpack.c.bf16 %v5659_v45, %v5659_v45  ;;  %v5894_v8 = vpack.c.bf16 %v5876_v2, %v5876_v2  ;;  %v4549_v62 = vadd.f32 %v15924_v61, %v15328_v49  ;;  %8773 = vmatpush.bf16.msrb.mxu0 %v13400_v10 }
 0x4e7   : > { %6106 = vst [vmem:[#allocation2 + $0xa4] sm:$0xf] %v5893_v7  ;;  %vm4923_vm13 = vcmp.ge.f32.partialorder %v4869_v60, 0.0  ;;  %v4977_v41 = vmul.f32 0.01, %v4869_v60 }
 0x4e8   : > { %6158 = vst [vmem:[#allocation2 + $0x60] sm:$0xf] %v5461_v5  ;;  %v4689_v5 = vpop.f32.mrf.mxu0 }
 0x4e9   : > { %6211 = vst [vmem:[#allocation2 + $0x40] sm:$0xf] %v5676_v56  ;;  %v5031_v17 = vsel %vm4923_vm13, %v4869_v60, %v4977_v41  ;;  %v4690_v39 = vadd.f32 %v4689_v5, %v4546_v25  ;;  %v10795_v56 = vld [vmem:[#allocation2 + $0x410] sm:$0xf]  ;;  %v15971_v48 = vpop.f32.mrf.mxu3  ;;  %v13408_v60 = vld [vmem:[#allocation5 + $0x130] sm:$0xff] }
 0x4ea   : > { %6265 = vst [vmem:[#allocation2 + $0x44] sm:$0xf] %v5893_v7  ;;  %v5409_v58 = vmul.f32 %v5182_v30, %v5031_v17  ;;  %v13392_v7 = vld [vmem:[#allocation5 + $0xb0] sm:$0xff]  ;;  %8895 = vmatpush.bf16.msrb.mxu1 %v13408_v60 }
 0x4eb   : > { %5516 = vst [vmem:[#allocation2 + $0x144] sm:$0xf] %v5462_v35  ;;  %v11629_v47 = vld [vmem:[#allocation2 + $0xfc] sm:$0xf0]  ;;  %v4812_v43 = vmul.f32 %v15779_v1, %v4690_v39  ;;  %8651 = vmatpush.bf16.msrb.mxu3 %v13392_v7 }
 0x4ec   : > { %5731 = vst [vmem:[#allocation2 + $0x124] sm:$0xf] %v5677_v36  ;;  %v11632_v27 = vor.u32 %v13154_v31, %v11629_v47  ;;  %v5571_v45 = vrot.slane %v5409_v58, 1  ;;  %v5787_v2 = vrot.slane %v5409_v58, 2  ;;  %v5463_v25 = vpack.c.bf16 %v5409_v58, %v5409_v58  ;;  %v11663_v39 = vld [vmem:[#allocation2 + $0x120] sm:$0xf]  ;;  %v5187_v58 = vpop.permute.xlu2 %5186 }
 0x4ed   : > { %5948 = vst [vmem:[#allocation2 + $0x128] sm:$0xf] %v5894_v8  ;;  %v4870_v41 = vadd.f32 %v15786_v16, %v4812_v43  ;;  %v10796_v47 = vor.u32 %v12946_v15, %v10795_v56  ;;  %v10897_v56 = vld [vmem:[#allocation2 + $0x504] sm:$0xf0] }
 0x4ee   : > { %6000 = vst [vmem:[#allocation2 + $0xe4] sm:$0xf] %v5462_v35  ;;  %8549 = vmatmul.bf16.gmra.mxu2 %v11632_v27  ;;  %v5658_v5 = vsel %vm926_vm1, %v5570_v19, %v5571_v45  ;;  %v5875_v31 = vsel %vm5831_vm4, %v5786_v26, %v5787_v2  ;;  %v12968_v26 = vld [vmem:[#allocation2 + $0x4e4] sm:$0xf] }
 0x4ef   : > { %6053 = vst [vmem:[#allocation2 + $0xc4] sm:$0xf] %v5677_v36  ;;  %v5678_v30 = vpack.c.bf16 %v5658_v5, %v5658_v5  ;;  %v5895_v17 = vpack.c.bf16 %v5875_v31, %v5875_v31  ;;  %vm4924_vm14 = vcmp.ge.f32.partialorder %v4870_v41, 0.0  ;;  %v4978_v49 = vmul.f32 0.01, %v4870_v41 }
 0x4f0   : > { %6107 = vst [vmem:[#allocation2 + $0xc8] sm:$0xf] %v5894_v8  ;;  %v4692_v61 = vpop.f32.mrf.mxu0  ;;  %v10900_v60 = vor.u32 %v12968_v26, %v10897_v56  ;;  %v4551_v31 = vadd.f32 %v15937_v52, %v15337_v53  ;;  %v10831_v52 = vld [vmem:[#allocation2 + $0x458] sm:$0xf]  ;;  %v12955_v26 = vld [vmem:[#allocation2 + $0x478] sm:$0xf0]  ;;  %v4554_v56 = vadd.f32 %v15951_v24, %v15342_v4 }
 0x4f1   : > { %6159 = vst [vmem:[#allocation2 + $0x84] sm:$0xf] %v5462_v35  ;;  %v5032_v35 = vsel %vm4924_vm14, %v4870_v41, %v4978_v49  ;;  %v4693_v43 = vadd.f32 %v4692_v61, %v4549_v62  ;;  %v15981_v20 = vpop.f32.mrf.mxu3 }
 0x4f2   : > { %6212 = vst [vmem:[#allocation2 + $0x64] sm:$0xf] %v5677_v36  ;;  %v13167_v27 = vld [vmem:[#allocation2 + $0x140] sm:$0xf0]  ;;  %v5410_v7 = vmul.f32 %v5187_v58, %v5032_v35  ;;  %4731 = vmatmul.bf16.gmra.mxu0 %v10796_v47 }
 0x4f3   : > { %6266 = vst [vmem:[#allocation2 + $0x68] sm:$0xf] %v5894_v8  ;;  %v11664_v19 = vor.u32 %v13167_v27, %v11663_v39  ;;  %v4813_v36 = vmul.f32 %v15779_v1, %v4693_v43  ;;  %v5192_v27 = vpop.permute.xlu0 %5191  ;;  %v13163_v43 = vld [vmem:[#allocation2 + $0x124] sm:$0xf] }
 0x4f4   : > { %5517 = vst [vmem:[#allocation2 + $0x168] sm:$0xf] %v5463_v25  ;;  %v5572_v15 = vrot.slane %v5410_v7, 1  ;;  %v5788_v8 = vrot.slane %v5410_v7, 2  ;;  %v5464_v62 = vpack.c.bf16 %v5410_v7, %v5410_v7 }
 0x4f5   : > { %5732 = vst [vmem:[#allocation2 + $0x148] sm:$0xf] %v5678_v30  ;;  %8432 = vmatmul.bf16.gmra.mxu1 %v11664_v19  ;;  %v4871_v10 = vadd.f32 %v15786_v16, %v4813_v36  ;;  %4602 = vmatmul.bf16.gmra.mxu3 %v10900_v60 }
 0x4f6   : > { %5949 = vst [vmem:[#allocation2 + $0x14c] sm:$0xf] %v5895_v17  ;;  %v5657_v41 = vsel %vm926_vm1, %v5571_v45, %v5572_v15  ;;  %v5874_v5 = vsel %vm5831_vm4, %v5787_v2, %v5788_v8 }
 0x4f7   : > { %6001 = vst [vmem:[#allocation2 + $0x108] sm:$0xf] %v5463_v25  ;;  %v5679_v47 = vpack.c.bf16 %v5657_v41, %v5657_v41  ;;  %vm4925_vm15 = vcmp.ge.f32.partialorder %v4871_v10, 0.0  ;;  %v4979_v49 = vmul.f32 0.01, %v4871_v10  ;;  %v5896_v61 = vpack.c.bf16 %v5874_v5, %v5874_v5 }
 0x4f8   : > { %6054 = vst [vmem:[#allocation2 + $0xe8] sm:$0xf] %v5678_v30  ;;  %v4694_v39 = vpop.f32.mrf.mxu0  ;;  %v10832_v5 = vor.u32 %v12955_v26, %v10831_v52 }
 0x4f9   : > { %6108 = vst [vmem:[#allocation2 + $0xec] sm:$0xf] %v5895_v17  ;;  %v5033_v58 = vsel %vm4925_vm15, %v4871_v10, %v4979_v49  ;;  %v4695_v35 = vadd.f32 %v4694_v39, %v4551_v31  ;;  %v5197_v39 = vpop.permute.xlu1 %5196 }
 0x4fa   : > { %6160 = vst [vmem:[#allocation2 + $0xa8] sm:$0xf] %v5463_v25  ;;  %v5411_v19 = vmul.f32 %v5192_v27, %v5033_v58 }
 0x4fb   : > { %6213 = vst [vmem:[#allocation2 + $0x88] sm:$0xf] %v5678_v30  ;;  %v4814_v53 = vmul.f32 %v15779_v1, %v4695_v35  ;;  %v15991_v30 = vpop.f32.mrf.mxu3  ;;  %v11699_v24 = vld [vmem:[#allocation2 + $0x168] sm:$0xf] }
 0x4fc   : > { %6267 = vst [vmem:[#allocation2 + $0x8c] sm:$0xf] %v5895_v17  ;;  %v11665_v45 = vld [vmem:[#allocation2 + $0x144] sm:$0xf0]  ;;  %v5573_v25 = vrot.slane %v5411_v19, 1  ;;  %v5789_v7 = vrot.slane %v5411_v19, 2  ;;  %v5465_v60 = vpack.c.bf16 %v5411_v19, %v5411_v19 }
 0x4fd   : > { %5518 = vst [vmem:[#allocation2 + $0x18c] sm:$0xf] %v5464_v62  ;;  %v11668_v2 = vor.u32 %v13163_v43, %v11665_v45  ;;  %v4872_v17 = vadd.f32 %v15786_v16, %v4814_v53  ;;  %v12977_v45 = vld [vmem:[#allocation2 + $0x52c] sm:$0xf] }
 0x4fe   : > { %5733 = vst [vmem:[#allocation2 + $0x16c] sm:$0xf] %v5679_v47  ;;  %v5656_v36 = vsel %vm926_vm1, %v5572_v15, %v5573_v25  ;;  %v5873_v10 = vsel %vm5831_vm4, %v5788_v8, %v5789_v7  ;;  %v10933_v8 = vld [vmem:[#allocation2 + $0x54c] sm:$0xf0] }
 0x4ff   : > { %5950 = vst [vmem:[#allocation2 + $0x170] sm:$0xf] %v5896_v61  ;;  %8554 = vmatmul.bf16.gmra.mxu2 %v11668_v2  ;;  %vm4926_vm0 = vcmp.ge.f32.partialorder %v4872_v17, 0.0  ;;  %v4980_v41 = vmul.f32 0.01, %v4872_v17  ;;  %v5680_v31 = vpack.c.bf16 %v5656_v36, %v5656_v36  ;;  %v5897_v27 = vpack.c.bf16 %v5873_v10, %v5873_v10 }
 0x500   : > { %6002 = vst [vmem:[#allocation2 + $0x12c] sm:$0xf] %v5464_v62  ;;  %v4697_v49 = vpop.f32.mrf.mxu0  ;;  %v10936_v52 = vor.u32 %v12977_v45, %v10933_v8 }
 0x501   : > { %6055 = vst [vmem:[#allocation2 + $0x10c] sm:$0xf] %v5679_v47  ;;  %v5034_v58 = vsel %vm4926_vm0, %v4872_v17, %v4980_v41  ;;  %v4698_v4 = vadd.f32 %v4697_v49, %v4554_v56  ;;  %v4556_v17 = vadd.f32 %v15961_v40, %v15351_v50  ;;  %v5202_v41 = vpop.permute.xlu2 %5201 }
 0x502   : > { %6109 = vst [vmem:[#allocation2 + $0x110] sm:$0xf] %v5896_v61  ;;  %v5412_v15 = vmul.f32 %v5197_v39, %v5034_v58  ;;  %4736 = vmatmul.bf16.gmra.mxu0 %v10832_v5 }
 0x503   : > { %6161 = vst [vmem:[#allocation2 + $0xcc] sm:$0xf] %v5464_v62  ;;  %v4815_v19 = vmul.f32 %v15779_v1, %v4698_v4  ;;  %v16001_v53 = vpop.f32.mrf.mxu3  ;;  %v10867_v4 = vld [vmem:[#allocation2 + $0x4a0] sm:$0xf] }
 0x504   : > { %6214 = vst [vmem:[#allocation2 + $0xac] sm:$0xf] %v5679_v47  ;;  %v13176_v35 = vld [vmem:[#allocation2 + $0x188] sm:$0xf0]  ;;  %v5574_v62 = vrot.slane %v5412_v15, 1  ;;  %v5790_v2 = vrot.slane %v5412_v15, 2  ;;  %v5466_v36 = vpack.c.bf16 %v5412_v15, %v5412_v15 }
 0x505   : > { %6268 = vst [vmem:[#allocation2 + $0xb0] sm:$0xf] %v5896_v61  ;;  %v11700_v43 = vor.u32 %v13176_v35, %v11699_v24  ;;  %v4873_v47 = vadd.f32 %v15786_v16, %v4815_v19  ;;  %4607 = vmatmul.bf16.gmra.mxu3 %v10936_v52  ;;  %v13172_v50 = vld [vmem:[#allocation2 + $0x16c] sm:$0xf]  ;;  %v5207_v52 = vpop.permute.xlu0 %5206 }
 0x506   : > { %5519 = vst [vmem:[#allocation2 + $0x1b0] sm:$0xf] %v5465_v60  ;;  %v5655_v61 = vsel %vm926_vm1, %v5573_v25, %v5574_v62  ;;  %v5872_v26 = vsel %vm5831_vm4, %v5789_v7, %v5790_v2 }
 0x507   : > { %5734 = vst [vmem:[#allocation2 + $0x190] sm:$0xf] %v5680_v31  ;;  %8436 = vmatmul.bf16.gmra.mxu1 %v11700_v43  ;;  %vm4927_vm2 = vcmp.ge.f32.partialorder %v4873_v47, 0.0  ;;  %v4981_v56 = vmul.f32 0.01, %v4873_v47  ;;  %v5681_v5 = vpack.c.bf16 %v5655_v61, %v5655_v61  ;;  %v5898_v25 = vpack.c.bf16 %v5872_v26, %v5872_v26 }
 0x508   : > { %5951 = vst [vmem:[#allocation2 + $0x194] sm:$0xf] %v5897_v27  ;;  %v4699_v10 = vpop.f32.mrf.mxu0 }
 0x509   : > { %6003 = vst [vmem:[#allocation2 + $0x150] sm:$0xf] %v5465_v60  ;;  %v5035_v49 = vsel %vm4927_vm2, %v4873_v47, %v4981_v56  ;;  %v4700_v39 = vadd.f32 %v4699_v10, %v4556_v17  ;;  %v12986_v56 = vld [vmem:[#allocation2 + $0x574] sm:$0xf] }
 0x50a   : > { %6056 = vst [vmem:[#allocation2 + $0x130] sm:$0xf] %v5680_v31  ;;  %v5413_v58 = vmul.f32 %v5202_v41, %v5035_v49 }
 0x50b   : > { %6110 = vst [vmem:[#allocation2 + $0x134] sm:$0xf] %v5897_v27  ;;  %v4816_v7 = vmul.f32 %v15779_v1, %v4700_v39  ;;  %v16011_v15 = vpop.f32.mrf.mxu3  ;;  %v4559_v1 = vadd.f32 %v15971_v48, %v15356_v6  ;;  %v16023_v6 = vld [vmem:[%s17584_s3] ss:$0 sm:$0xff] }
 0x50c   : > { %6162 = vst [vmem:[#allocation2 + $0xf0] sm:$0xf] %v5465_v60  ;;  %v5575_v24 = vrot.slane %v5413_v58, 1  ;;  %v5791_v35 = vrot.slane %v5413_v58, 2  ;;  %v12964_v60 = vld [vmem:[#allocation2 + $0x4c0] sm:$0xf0] }
 0x50d   : > { %6215 = vst [vmem:[#allocation2 + $0xd0] sm:$0xf] %v5680_v31  ;;  %v4874_v45 = vadd.f32 %v15786_v16, %v4816_v7  ;;  %v10868_v19 = vor.u32 %v12964_v60, %v10867_v4  ;;  %v5467_v16 = vpack.c.bf16 %v5413_v58, %v5413_v58  ;;  %v11735_v41 = vld [vmem:[#allocation2 + $0x1b0] sm:$0xf] }
 0x50e   : > { %6269 = vst [vmem:[#allocation2 + $0xd4] sm:$0xf] %v5897_v27  ;;  %v11701_v40 = vld [vmem:[#allocation2 + $0x18c] sm:$0xf0]  ;;  %v5654_v31 = vsel %vm926_vm1, %v5574_v62, %v5575_v24  ;;  %v5871_v27 = vsel %vm5831_vm4, %v5790_v2, %v5791_v35  ;;  %v10969_v2 = vld [vmem:[#allocation2 + $0x594] sm:$0xf0] }
 0x50f   : > { %5520 = vst [vmem:[#allocation2 + $0x1d4] sm:$0xf] %v5466_v36  ;;  %v11704_v43 = vor.u32 %v13172_v50, %v11701_v40  ;;  %vm4928_vm3 = vcmp.ge.f32.partialorder %v4874_v45, 0.0  ;;  %v4982_v8 = vmul.f32 0.01, %v4874_v45  ;;  %v5682_v62 = vpack.c.bf16 %v5654_v31, %v5654_v31  ;;  %v5212_v31 = vpop.permute.xlu1 %5211 }
 0x510   : > { %5735 = vst [vmem:[#allocation2 + $0x1b4] sm:$0xf] %v5681_v5  ;;  %v4702_v47 = vpop.f32.mrf.mxu0  ;;  %v5899_v10 = vpack.c.bf16 %v5871_v27, %v5871_v27  ;;  %v10972_v50 = vor.u32 %v12986_v56, %v10969_v2 }
 0x511   : > { %5952 = vst [vmem:[#allocation2 + $0x1b8] sm:$0xf] %v5898_v25  ;;  %8558 = vmatmul.bf16.gmra.mxu2 %v11704_v43  ;;  %v5036_v61 = vsel %vm4928_vm3, %v4874_v45, %v4982_v8  ;;  %v4703_v26 = vadd.f32 %v4702_v47, %v4559_v1  ;;  %v4561_v43 = vadd.f32 %v15981_v20, %v15365_v22  ;;  %v10903_v47 = vld [vmem:[#allocation2 + $0x4e8] sm:$0xf] }
 0x512   : > { %6004 = vst [vmem:[#allocation2 + $0x174] sm:$0xf] %v5466_v36  ;;  %v5414_v17 = vmul.f32 %v5207_v52, %v5036_v61  ;;  %4741 = vmatmul.bf16.gmra.mxu0 %v10868_v19 }
 0x513   : > { %6057 = vst [vmem:[#allocation2 + $0x154] sm:$0xf] %v5681_v5  ;;  %v4817_v48 = vmul.f32 %v16023_v6, %v4703_v26  ;;  %v12973_v26 = vld [vmem:[#allocation2 + $0x508] sm:$0xf0] }
 0x514   : > { %6111 = vst [vmem:[#allocation2 + $0x158] sm:$0xf] %v5898_v25  ;;  %v5576_v39 = vrot.slane %v5414_v17, 1  ;;  %v5792_v58 = vrot.slane %v5414_v17, 2  ;;  %v5468_v8 = vpack.c.bf16 %v5414_v17, %v5414_v17 }
 0x515   : > { %6163 = vst [vmem:[#allocation2 + $0x114] sm:$0xf] %v5466_v36  ;;  %v16026_v36 = vpop.f32.mrf.mxu3  ;;  %4612 = vmatmul.bf16.gmra.mxu3 %v10972_v50 }
 0x516   : > { %6216 = vst [vmem:[#allocation2 + $0xf4] sm:$0xf] %v5681_v5  ;;  %v13185_v49 = vld [vmem:[#allocation2 + $0x1d0] sm:$0xf0]  ;;  %v16031_v5 = vld [vmem:[%s17585_s4] ss:$0 sm:$0xff]  ;;  %v5653_v40 = vsel %vm926_vm1, %v5575_v24, %v5576_v39 }
 0x517   : > { %6270 = vst [vmem:[#allocation2 + $0xf8] sm:$0xf] %v5898_v25  ;;  %v11736_v4 = vor.u32 %v13185_v49, %v11735_v41  ;;  %v4875_v7 = vadd.f32 %v16031_v5, %v4817_v48  ;;  %v5870_v25 = vsel %vm5831_vm4, %v5791_v35, %v5792_v58  ;;  %v5683_v19 = vpack.c.bf16 %v5653_v40, %v5653_v40  ;;  %v13181_v2 = vld [vmem:[#allocation2 + $0x1b4] sm:$0xf] }
 0x518   : > { %5521 = vst [vmem:[#allocation2 + $0x1f8] sm:$0xf] %v5467_v16  ;;  %v4704_v45 = vpop.f32.mrf.mxu0  ;;  %v5900_v22 = vpack.c.bf16 %v5870_v25, %v5870_v25  ;;  %v13391_v25 = vld [vmem:[#allocation5 + $0xa8] sm:$0xff] }
 0x519   : > { %5736 = vst [vmem:[#allocation2 + $0x1d8] sm:$0xf] %v5682_v62  ;;  %8440 = vmatmul.bf16.gmra.mxu1 %v11736_v4  ;;  %vm4929_vm5 = vcmp.ge.f32.partialorder %v4875_v7, 0.0  ;;  %v4983_v60 = vmul.f32 0.01, %v4875_v7  ;;  %v4705_v1 = vadd.f32 %v4704_v45, %v4561_v43  ;;  %v10904_v4 = vor.u32 %v12973_v26, %v10903_v47  ;;  %8652 = vmatpush.bf16.msrb.mxu3 %v13391_v25 }
 0x51a   : > { %5953 = vst [vmem:[#allocation2 + $0x1dc] sm:$0xf] %v5899_v10  ;;  %v12982_v25 = vld [vmem:[#allocation2 + $0x550] sm:$0xf0] }
 0x51b   : > { %6005 = vst [vmem:[#allocation2 + $0x198] sm:$0xf] %v5467_v16  ;;  %v5037_v27 = vsel %vm4929_vm5, %v4875_v7, %v4983_v60  ;;  %v4818_v35 = vmul.f32 %v16023_v6, %v4705_v1  ;;  %v5217_v7 = vpop.permute.xlu2 %5216  ;;  %v11005_v60 = vld [vmem:[#allocation2 + $0x5dc] sm:$0xf0] }
 0x51c   : > { %6058 = vst [vmem:[#allocation2 + $0x178] sm:$0xf] %v5682_v62  ;;  %v5415_v24 = vmul.f32 %v5212_v31, %v5037_v27 }
 0x51d   : > { %6112 = vst [vmem:[#allocation2 + $0x17c] sm:$0xf] %v5899_v10  ;;  %v16041_v61 = vpop.f32.mrf.mxu3  ;;  %v4876_v56 = vadd.f32 %v16031_v5, %v4818_v35  ;;  %v16053_v35 = vpop.f32.mrf.mxu1 }
 0x51e   : > { %6164 = vst [vmem:[#allocation2 + $0x138] sm:$0xf] %v5467_v16  ;;  %v5577_v20 = vrot.slane %v5415_v24, 1  ;;  %v5793_v52 = vrot.slane %v5415_v24, 2  ;;  %v5469_v45 = vpack.c.bf16 %v5415_v24, %v5415_v24 }
 0x51f   : > { %6217 = vst [vmem:[#allocation2 + $0x118] sm:$0xf] %v5682_v62  ;;  %v4564_v62 = vadd.f32 %v15991_v30, %v15370_v12  ;;  %vm4930_vm6 = vcmp.ge.f32.partialorder %v4876_v56, 0.0  ;;  %v4984_v49 = vmul.f32 0.01, %v4876_v56 }
 0x520   : > { %6271 = vst [vmem:[#allocation2 + $0x11c] sm:$0xf] %v5899_v10  ;;  %v11737_v48 = vld [vmem:[#allocation2 + $0x1d4] sm:$0xf0]  ;;  %v5652_v16 = vsel %vm926_vm1, %v5576_v39, %v5577_v20  ;;  %v5869_v17 = vsel %vm5831_vm4, %v5792_v58, %v5793_v52  ;;  %v4707_v10 = vpop.f32.mrf.mxu0  ;;  %v13415_v39 = vld [vmem:[#allocation5 + $0x168] sm:$0xff] }
 0x521   : > { %5522 = vst [vmem:[#allocation2 + $0x21c] sm:$0xf] %v5468_v8  ;;  %v11740_v41 = vor.u32 %v13181_v2, %v11737_v48  ;;  %v5038_v50 = vsel %vm4930_vm6, %v4876_v56, %v4984_v49  ;;  %v4708_v40 = vadd.f32 %v4707_v10, %v4564_v62  ;;  %v12995_v58 = vld [vmem:[#allocation2 + $0x5bc] sm:$0xf]  ;;  %v5684_v30 = vpack.c.bf16 %v5652_v16, %v5652_v16  ;;  %v11771_v56 = vld [vmem:[#allocation2 + $0x1f8] sm:$0xf]  ;;  %v5222_v62 = vpop.permute.xlu0 %5221 }
 0x522   : > { %5737 = vst [vmem:[#allocation2 + $0x1fc] sm:$0xf] %v5683_v19  ;;  %v5416_v43 = vmul.f32 %v5217_v7, %v5038_v50  ;;  %4746 = vmatmul.bf16.gmra.mxu0 %v10904_v4  ;;  %9018 = vmatpush.bf16.msrb.mxu2 %v13415_v39  ;;  %v5901_v47 = vpack.c.bf16 %v5869_v17, %v5869_v17  ;;  %v13399_v4 = vld [vmem:[#allocation5 + $0xe8] sm:$0xff]  ;;  %v10939_v7 = vld [vmem:[#allocation2 + $0x530] sm:$0xf] }
 0x523   : > { %5954 = vst [vmem:[#allocation2 + $0x200] sm:$0xf] %v5900_v22  ;;  %8562 = vmatmul.bf16.gmra.mxu2 %v11740_v41  ;;  %v4819_v12 = vmul.f32 %v16023_v6, %v4708_v40  ;;  %v11008_v24 = vor.u32 %v12995_v58, %v11005_v60  ;;  %v4566_v41 = vadd.f32 %v16001_v53, %v15379_v51  ;;  %v13407_v10 = vld [vmem:[#allocation5 + $0x128] sm:$0xff] }
 0x524   : > { %6006 = vst [vmem:[#allocation2 + $0x1bc] sm:$0xf] %v5468_v8  ;;  %v5578_v31 = vrot.slane %v5416_v43, 1  ;;  %v5794_v27 = vrot.slane %v5416_v43, 2  ;;  %v5470_v51 = vpack.c.bf16 %v5416_v43, %v5416_v43  ;;  %8774 = vmatpush.bf16.msrb.mxu0 %v13399_v4  ;;  %8896 = vmatpush.bf16.msrb.mxu1 %v13407_v10 }
 0x525   : > { %6059 = vst [vmem:[#allocation2 + $0x19c] sm:$0xf] %v5683_v19  ;;  %v16051_v1 = vpop.f32.mrf.mxu3  ;;  %v4877_v26 = vadd.f32 %v16031_v5, %v4819_v12  ;;  %4617 = vmatmul.bf16.gmra.mxu3 %v11008_v24 }
 0x526   : > { %6113 = vst [vmem:[#allocation2 + $0x1a0] sm:$0xf] %v5900_v22  ;;  %v5651_v48 = vsel %vm926_vm1, %v5577_v20, %v5578_v31 }
 0x527   : > { %6165 = vst [vmem:[#allocation2 + $0x15c] sm:$0xf] %v5468_v8  ;;  %v5868_v8 = vsel %vm5831_vm4, %v5793_v52, %v5794_v27  ;;  %vm4931_vm7 = vcmp.ge.f32.partialorder %v4877_v26, 0.0  ;;  %v5685_v39 = vpack.c.bf16 %v5651_v48, %v5651_v48 }
 0x528   : > { %6218 = vst [vmem:[#allocation2 + $0x13c] sm:$0xf] %v5683_v19  ;;  %v13194_v2 = vld [vmem:[#allocation2 + $0x218] sm:$0xf0]  ;;  %v4985_v19 = vmul.f32 0.01, %v4877_v26  ;;  %v4709_v17 = vpop.f32.mrf.mxu0  ;;  %v5902_v12 = vpack.c.bf16 %v5868_v8, %v5868_v8 }
 0x529   : > { %6272 = vst [vmem:[#allocation2 + $0x140] sm:$0xf] %v5900_v22  ;;  %v11772_v16 = vor.u32 %v13194_v2, %v11771_v56  ;;  %v4710_v22 = vadd.f32 %v4709_v17, %v4566_v41  ;;  %v4569_v56 = vadd.f32 %v16011_v15, %v15387_v32  ;;  %v13190_v24 = vld [vmem:[#allocation2 + $0x1fc] sm:$0xf]  ;;  %v5227_v41 = vpop.permute.xlu1 %5226  ;;  %v13004_v17 = vld [vmem:[#allocation2 + $0x604] sm:$0xf] }
 0x52a   : > { %5523 = vst [vmem:[#allocation2 + $0x240] sm:$0xf] %v5469_v45  ;;  %v5039_v49 = vsel %vm4931_vm7, %v4877_v26, %v4985_v19 }
 0x52b   : > { %5738 = vst [vmem:[#allocation2 + $0x220] sm:$0xf] %v5684_v30  ;;  %8445 = vmatmul.bf16.gmra.mxu1 %v11772_v16  ;;  %v5417_v20 = vmul.f32 %v5222_v62, %v5039_v49  ;;  %v4820_v52 = vmul.f32 %v16023_v6, %v4710_v22 }
 0x52c   : > { %5955 = vst [vmem:[#allocation2 + $0x224] sm:$0xf] %v5901_v47  ;;  %v16066_v60 = vpop.f32.mrf.mxu1 }
 0x52d   : > { %6007 = vst [vmem:[#allocation2 + $0x1e0] sm:$0xf] %v5469_v45  ;;  %v5579_v53 = vrot.slane %v5417_v20, 1  ;;  %v5795_v50 = vrot.slane %v5417_v20, 2  ;;  %v16063_v40 = vpop.f32.mrf.mxu3  ;;  %v4878_v58 = vadd.f32 %v16031_v5, %v4820_v52  ;;  %v5471_v49 = vpack.c.bf16 %v5417_v20, %v5417_v20  ;;  %v16080_v52 = vpop.f32.mrf.mxu2 }
 0x52e   : > { %6060 = vst [vmem:[#allocation2 + $0x1c0] sm:$0xf] %v5684_v30 }
 0x52f   : > { %6114 = vst [vmem:[#allocation2 + $0x1c4] sm:$0xf] %v5901_v47  ;;  %v5650_v26 = vsel %vm926_vm1, %v5578_v31, %v5579_v53  ;;  %v5867_v43 = vsel %vm5831_vm4, %v5794_v27, %v5795_v50  ;;  %vm4932_vm8 = vcmp.ge.f32.partialorder %v4878_v58, 0.0  ;;  %v4986_v2 = vmul.f32 0.01, %v4878_v58 }
 0x530   : > { %6166 = vst [vmem:[#allocation2 + $0x180] sm:$0xf] %v5469_v45  ;;  %v10940_v45 = vor.u32 %v12982_v25, %v10939_v7  ;;  %v4712_v16 = vpop.f32.mrf.mxu0  ;;  %v11041_v27 = vld [vmem:[#allocation2 + $0x624] sm:$0xf0]  ;;  %v5686_v7 = vpack.c.bf16 %v5650_v26, %v5650_v26  ;;  %v5903_v20 = vpack.c.bf16 %v5867_v43, %v5867_v43  ;;  %v12991_v43 = vld [vmem:[#allocation2 + $0x598] sm:$0xf0] }
 0x531   : > { %6219 = vst [vmem:[#allocation2 + $0x160] sm:$0xf] %v5684_v30  ;;  %v5040_v30 = vsel %vm4932_vm8, %v4878_v58, %v4986_v2  ;;  %v4713_v19 = vadd.f32 %v4712_v16, %v4569_v56  ;;  %v11044_v4 = vor.u32 %v13004_v17, %v11041_v27  ;;  %v4571_v56 = vadd.f32 %v16026_v36, %v15402_v63  ;;  %v5232_v16 = vpop.permute.xlu2 %5231  ;;  %v10975_v36 = vld [vmem:[#allocation2 + $0x578] sm:$0xf] }
 0x532   : > { %6273 = vst [vmem:[#allocation2 + $0x164] sm:$0xf] %v5901_v47  ;;  %v11773_v48 = vld [vmem:[#allocation2 + $0x21c] sm:$0xf0]  ;;  %v5418_v31 = vmul.f32 %v5227_v41, %v5040_v30  ;;  %4751 = vmatmul.bf16.gmra.mxu0 %v10940_v45 }
 0x533   : > { %5524 = vst [vmem:[#allocation2 + $0x264] sm:$0xf] %v5470_v51  ;;  %v11776_v8 = vor.u32 %v13190_v24, %v11773_v48  ;;  %v4821_v32 = vmul.f32 %v16023_v6, %v4713_v19  ;;  %v11807_v45 = vld [vmem:[#allocation2 + $0x240] sm:$0xf]  ;;  %v4574_v19 = vadd.f32 %v16041_v61, %v15413_v44  ;;  %v5237_v61 = vpop.permute.xlu0 %5236 }
 0x534   : > { %5739 = vst [vmem:[#allocation2 + $0x244] sm:$0xf] %v5685_v39  ;;  %v5580_v15 = vrot.slane %v5418_v31, 1  ;;  %v5796_v47 = vrot.slane %v5418_v31, 2  ;;  %v16078_v10 = vpop.f32.mrf.mxu1  ;;  %v5472_v17 = vpack.c.bf16 %v5418_v31, %v5418_v31 }
 0x535   : > { %5956 = vst [vmem:[#allocation2 + $0x248] sm:$0xf] %v5902_v12  ;;  %8567 = vmatmul.bf16.gmra.mxu2 %v11776_v8  ;;  %v16075_v62 = vpop.f32.mrf.mxu3  ;;  %v4879_v22 = vadd.f32 %v16031_v5, %v4821_v32  ;;  %4622 = vmatmul.bf16.gmra.mxu3 %v11044_v4 }
 0x536   : > { %6008 = vst [vmem:[#allocation2 + $0x204] sm:$0xf] %v5470_v51  ;;  %v5649_v25 = vsel %vm926_vm1, %v5579_v53, %v5580_v15  ;;  %v5866_v58 = vsel %vm5831_vm4, %v5795_v50, %v5796_v47 }
 0x537   : > { %6061 = vst [vmem:[#allocation2 + $0x1e4] sm:$0xf] %v5685_v39  ;;  %vm4933_vm9 = vcmp.ge.f32.partialorder %v4879_v22, 0.0  ;;  %v4987_v2 = vmul.f32 0.01, %v4879_v22  ;;  %v5687_v4 = vpack.c.bf16 %v5649_v25, %v5649_v25 }
 0x538   : > { %6115 = vst [vmem:[#allocation2 + $0x1e8] sm:$0xf] %v5902_v12  ;;  %v4714_v48 = vpop.f32.mrf.mxu0  ;;  %v11077_v25 = vld [vmem:[#allocation2 + $0x66c] sm:$0xf0] }
 0x539   : > { %6167 = vst [vmem:[#allocation2 + $0x1a4] sm:$0xf] %v5470_v51  ;;  %v5041_v51 = vsel %vm4933_vm9, %v4879_v22, %v4987_v2  ;;  %v4715_v53 = vadd.f32 %v4714_v48, %v4571_v56  ;;  %v10976_v2 = vor.u32 %v12991_v43, %v10975_v36 }
 0x53a   : > { %6220 = vst [vmem:[#allocation2 + $0x184] sm:$0xf] %v5685_v39  ;;  %v13203_v24 = vld [vmem:[#allocation2 + $0x260] sm:$0xf0]  ;;  %v5419_v41 = vmul.f32 %v5232_v16, %v5041_v51 }
 0x53b   : > { %6274 = vst [vmem:[#allocation2 + $0x188] sm:$0xf] %v5902_v12  ;;  %v11808_v26 = vor.u32 %v13203_v24, %v11807_v45  ;;  %v4822_v63 = vmul.f32 %v16023_v6, %v4715_v53  ;;  %v5904_v45 = vpack.c.bf16 %v5866_v58, %v5866_v58  ;;  %v13199_v48 = vld [vmem:[#allocation2 + $0x244] sm:$0xf] }
 0x53c   : > { %5525 = vst [vmem:[#allocation2 + $0x288] sm:$0xf] %v5471_v49  ;;  %v5581_v50 = vrot.slane %v5419_v41, 1  ;;  %v5797_v39 = vrot.slane %v5419_v41, 2  ;;  %v8420_v8 = vpop.f32.mrf.mxu1 }
 0x53d   : > { %5740 = vst [vmem:[#allocation2 + $0x268] sm:$0xf] %v5686_v7  ;;  %8449 = vmatmul.bf16.gmra.mxu1 %v11808_v26  ;;  %v16089_v12 = vpop.f32.mrf.mxu3  ;;  %v4880_v30 = vadd.f32 %v16031_v5, %v4822_v63  ;;  %v8537_v22 = vpop.f32.mrf.mxu2  ;;  %v4576_v8 = vadd.f32 %v16051_v1, %v15428_v38  ;;  %v11011_v1 = vld [vmem:[#allocation2 + $0x5c0] sm:$0xf] }
 0x53e   : > { %5957 = vst [vmem:[#allocation2 + $0x26c] sm:$0xf] %v5903_v20  ;;  %v5648_v27 = vsel %vm926_vm1, %v5580_v15, %v5581_v50  ;;  %v5865_v32 = vsel %vm5831_vm4, %v5796_v47, %v5797_v39  ;;  %v16099_v24 = vadd.f32 %v8537_v22, %v16066_v60 }
 0x53f   : > { %6009 = vst [vmem:[#allocation2 + $0x228] sm:$0xf] %v5471_v49  ;;  %vm4934_vm10 = vcmp.ge.f32.partialorder %v4880_v30, 0.0  ;;  %v4988_v56 = vmul.f32 0.01, %v4880_v30 }
 0x540   : > { %6062 = vst [vmem:[#allocation2 + $0x208] sm:$0xf] %v5686_v7  ;;  %v4717_v44 = vpop.f32.mrf.mxu0 }
 0x541   : > { %6116 = vst [vmem:[#allocation2 + $0x20c] sm:$0xf] %v5903_v20  ;;  %v5042_v31 = vsel %vm4934_vm10, %v4880_v30, %v4988_v56  ;;  %v4718_v16 = vadd.f32 %v4717_v44, %v4574_v19  ;;  %v5473_v19 = vpack.c.bf16 %v5419_v41, %v5419_v41  ;;  %v5688_v56 = vpack.c.bf16 %v5648_v27, %v5648_v27  ;;  %v5242_v44 = vpop.permute.xlu1 %5241 }
 0x542   : > { %6168 = vst [vmem:[#allocation2 + $0x1c8] sm:$0xf] %v5471_v49  ;;  %v5420_v47 = vmul.f32 %v5237_v61, %v5042_v31  ;;  %v13013_v49 = vld [vmem:[#allocation2 + $0x64c] sm:$0xf]  ;;  %4756 = vmatmul.bf16.gmra.mxu0 %v10976_v2  ;;  %v5905_v61 = vpack.c.bf16 %v5865_v32, %v5865_v32 }
 0x543   : > { %6221 = vst [vmem:[#allocation2 + $0x1a8] sm:$0xf] %v5686_v7  ;;  %v4823_v26 = vmul.f32 %v16023_v6, %v4718_v16  ;;  %v11080_v53 = vor.u32 %v13013_v49, %v11077_v25 }
 0x544   : > { %6275 = vst [vmem:[#allocation2 + $0x1ac] sm:$0xf] %v5903_v20  ;;  %v11809_v15 = vld [vmem:[#allocation2 + $0x264] sm:$0xf0]  ;;  %v5582_v7 = vrot.slane %v5420_v47, 1  ;;  %v5798_v60 = vrot.slane %v5420_v47, 2  ;;  %v16105_v63 = vpop.f32.mrf.mxu1 }
 0x545   : > { %5526 = vst [vmem:[#allocation2 + $0x2ac] sm:$0xf] %v5472_v17  ;;  %v11812_v51 = vor.u32 %v13199_v48, %v11809_v15  ;;  %v16102_v58 = vpop.f32.mrf.mxu3  ;;  %v4881_v20 = vadd.f32 %v16031_v5, %v4823_v26  ;;  %v16111_v30 = vpop.f32.mrf.mxu2  ;;  %4627 = vmatmul.bf16.gmra.mxu3 %v11080_v53  ;;  %v4579_v26 = vadd.f32 %v16063_v40, %v15439_v21 }
 0x546   : > { %5741 = vst [vmem:[#allocation2 + $0x28c] sm:$0xf] %v5687_v4  ;;  %v5647_v36 = vsel %vm926_vm1, %v5581_v50, %v5582_v7  ;;  %v5864_v43 = vsel %vm5831_vm4, %v5797_v39, %v5798_v60  ;;  %v11843_v50 = vld [vmem:[#allocation2 + $0x288] sm:$0xf] }
 0x547   : > { %5958 = vst [vmem:[#allocation2 + $0x290] sm:$0xf] %v5904_v45  ;;  %8571 = vmatmul.bf16.gmra.mxu2 %v11812_v51  ;;  %vm4935_vm11 = vcmp.ge.f32.partialorder %v4881_v20, 0.0  ;;  %v4989_v22 = vmul.f32 0.01, %v4881_v20 }
 0x548   : > { %6010 = vst [vmem:[#allocation2 + $0x24c] sm:$0xf] %v5472_v17  ;;  %v4719_v2 = vpop.f32.mrf.mxu0 }
 0x549   : > { %6063 = vst [vmem:[#allocation2 + $0x22c] sm:$0xf] %v5687_v4  ;;  %v5043_v31 = vsel %vm4935_vm11, %v4881_v20, %v4989_v22  ;;  %v4720_v39 = vadd.f32 %v4719_v2, %v4576_v8  ;;  %v5474_v8 = vpack.c.bf16 %v5420_v47, %v5420_v47  ;;  %v5247_v2 = vpop.permute.xlu2 %5246 }
 0x54a   : > { %6117 = vst [vmem:[#allocation2 + $0x230] sm:$0xf] %v5904_v45  ;;  %v5421_v15 = vmul.f32 %v5242_v44, %v5043_v31  ;;  %v5689_v44 = vpack.c.bf16 %v5647_v36, %v5647_v36 }
 0x54b   : > { %6169 = vst [vmem:[#allocation2 + $0x1ec] sm:$0xf] %v5472_v17  ;;  %v4824_v38 = vmul.f32 %v16023_v6, %v4720_v39  ;;  %v11113_v39 = vld [vmem:[#allocation2 + $0x6b4] sm:$0xf0] }
 0x54c   : > { %6222 = vst [vmem:[#allocation2 + $0x1cc] sm:$0xf] %v5687_v4  ;;  %v13212_v48 = vld [vmem:[#allocation2 + $0x2a8] sm:$0xf0]  ;;  %v5583_v41 = vrot.slane %v5421_v15, 1  ;;  %v5799_v17 = vrot.slane %v5421_v15, 2 }
 0x54d   : > { %6276 = vst [vmem:[#allocation2 + $0x1d0] sm:$0xf] %v5904_v45  ;;  %v11844_v16 = vor.u32 %v13212_v48, %v11843_v50  ;;  %v16116_v27 = vpop.f32.mrf.mxu3  ;;  %v13000_v4 = vld [vmem:[#allocation2 + $0x5e0] sm:$0xf0]  ;;  %v4882_v32 = vadd.f32 %v16031_v5, %v4824_v38  ;;  %v8542_v25 = vpop.f32.mrf.mxu2  ;;  %v13208_v21 = vld [vmem:[#allocation2 + $0x28c] sm:$0xf] }
 0x54e   : > { %5527 = vst [vmem:[#allocation2 + $0x2d0] sm:$0xf] %v5473_v19  ;;  %v16119_v51 = vpop.f32.mrf.mxu1  ;;  %v5646_v45 = vsel %vm926_vm1, %v5582_v7, %v5583_v41  ;;  %v5863_v49 = vsel %vm5831_vm4, %v5798_v60, %v5799_v17  ;;  %v11012_v53 = vor.u32 %v13000_v4, %v11011_v1  ;;  %v5906_v7 = vpack.c.bf16 %v5864_v43, %v5864_v43  ;;  %v13022_v60 = vld [vmem:[#allocation2 + $0x694] sm:$0xf] }
 0x54f   : > { %5742 = vst [vmem:[#allocation2 + $0x2b0] sm:$0xf] %v5688_v56  ;;  %8453 = vmatmul.bf16.gmra.mxu1 %v11844_v16  ;;  %vm4936_vm12 = vcmp.ge.f32.partialorder %v4882_v32, 0.0  ;;  %v4990_v20 = vmul.f32 0.01, %v4882_v32  ;;  %v4581_v25 = vadd.f32 %v16075_v62, %v15454_v46 }
 0x550   : > { %5959 = vst [vmem:[#allocation2 + $0x2b4] sm:$0xf] %v5905_v61  ;;  %v4722_v22 = vpop.f32.mrf.mxu0  ;;  %v11047_v62 = vld [vmem:[#allocation2 + $0x608] sm:$0xf] }
 0x551   : > { %6011 = vst [vmem:[#allocation2 + $0x270] sm:$0xf] %v5473_v19  ;;  %v5044_v31 = vsel %vm4936_vm12, %v4882_v32, %v4990_v20  ;;  %v4723_v50 = vadd.f32 %v4722_v22, %v4579_v26  ;;  %v5475_v22 = vpack.c.bf16 %v5421_v15, %v5421_v15 }
 0x552   : > { %6064 = vst [vmem:[#allocation2 + $0x250] sm:$0xf] %v5688_v56  ;;  %v16127_v48 = vmul.f32 %v5247_v2, %v5044_v31  ;;  %4761 = vmatmul.bf16.gmra.mxu0 %v11012_v53  ;;  %v5252_v53 = vpop.permute.xlu0 %5251  ;;  %v5690_v31 = vpack.c.bf16 %v5646_v45, %v5646_v45 }
 0x553   : > { %6118 = vst [vmem:[#allocation2 + $0x254] sm:$0xf] %v5905_v61  ;;  %v4825_v16 = vmul.f32 %v16023_v6, %v4723_v50 }
 0x554   : > { %6170 = vst [vmem:[#allocation2 + $0x210] sm:$0xf] %v5473_v19  ;;  %v5584_v47 = vrot.slane %v16127_v48, 1  ;;  %v5800_v19 = vrot.slane %v16127_v48, 2 }
 0x555   : > { %6223 = vst [vmem:[#allocation2 + $0x1f0] sm:$0xf] %v5688_v56  ;;  %v16132_v38 = vpop.f32.mrf.mxu3  ;;  %v4883_v43 = vadd.f32 %v16031_v5, %v4825_v16  ;;  %v11116_v56 = vor.u32 %v13022_v60, %v11113_v39  ;;  %v16139_v32 = vpop.f32.mrf.mxu2  ;;  %v11879_v50 = vld [vmem:[#allocation2 + $0x2d0] sm:$0xf]  ;;  %v5907_v60 = vpack.c.bf16 %v5863_v49, %v5863_v49 }
 0x556   : > { %6277 = vst [vmem:[#allocation2 + $0x1f4] sm:$0xf] %v5905_v61  ;;  %v11845_v40 = vld [vmem:[#allocation2 + $0x2ac] sm:$0xf0]  ;;  %v8426_v1 = vpop.f32.mrf.mxu1  ;;  %v5645_v61 = vsel %vm926_vm1, %v5583_v41, %v5584_v47  ;;  %v5862_v4 = vsel %vm5831_vm4, %v5799_v17, %v5800_v19 }
 0x557   : > { %5528 = vst [vmem:[#allocation2 + $0x2f4] sm:$0xf] %v5474_v8  ;;  %v11848_v36 = vor.u32 %v13208_v21, %v11845_v40  ;;  %vm4937_vm13 = vcmp.ge.f32.partialorder %v4883_v43, 0.0  ;;  %v4991_v26 = vmul.f32 0.01, %v4883_v43  ;;  %4632 = vmatmul.bf16.gmra.mxu3 %v11116_v56 }
 0x558   : > { %5743 = vst [vmem:[#allocation2 + $0x2d4] sm:$0xf] %v5689_v44  ;;  %v4724_v20 = vpop.f32.mrf.mxu0 }
 0x559   : > { %5960 = vst [vmem:[#allocation2 + $0x2d8] sm:$0xf] %v5906_v7  ;;  %8575 = vmatmul.bf16.gmra.mxu2 %v11848_v36  ;;  %v5045_v2 = vsel %vm4937_vm13, %v4883_v43, %v4991_v26  ;;  %v4725_v41 = vadd.f32 %v4724_v20, %v4581_v25  ;;  %v13009_v36 = vld [vmem:[#allocation2 + $0x628] sm:$0xf0]  ;;  %v4584_v43 = vadd.f32 %v16089_v12, %v15468_v29  ;;  %v13390_v25 = vld [vmem:[#allocation5 + $0xa0] sm:$0xff] }
 0x55a   : > { %6012 = vst [vmem:[#allocation2 + $0x294] sm:$0xf] %v5474_v8  ;;  %v16143_v17 = vmul.f32 %v5252_v53, %v5045_v2  ;;  %v11048_v1 = vor.u32 %v13009_v36, %v11047_v62  ;;  %v13414_v26 = vld [vmem:[#allocation5 + $0x160] sm:$0xff]  ;;  %v5257_v53 = vpop.permute.xlu1 %5256  ;;  %8653 = vmatpush.bf16.msrb.mxu3 %v13390_v25  ;;  %v5691_v12 = vpack.c.bf16 %v5645_v61, %v5645_v61 }
 0x55b   : > { %6065 = vst [vmem:[#allocation2 + $0x274] sm:$0xf] %v5689_v44  ;;  %v4826_v46 = vmul.f32 %v16023_v6, %v4725_v41  ;;  %v5476_v41 = vpack.c.bf16 %v16127_v48, %v16127_v48  ;;  %9019 = vmatpush.bf16.msrb.mxu2 %v13414_v26  ;;  %v11083_v26 = vld [vmem:[#allocation2 + $0x650] sm:$0xf] }
 0x55c   : > { %6119 = vst [vmem:[#allocation2 + $0x278] sm:$0xf] %v5906_v7  ;;  %v5585_v21 = vrot.slane %v16143_v17, 1  ;;  %v5801_v40 = vrot.slane %v16143_v17, 2 }
 0x55d   : > { %6171 = vst [vmem:[#allocation2 + $0x234] sm:$0xf] %v5474_v8  ;;  %v16148_v16 = vpop.f32.mrf.mxu3  ;;  %v4884_v45 = vadd.f32 %v16031_v5, %v4826_v46 }
 0x55e   : > { %6224 = vst [vmem:[#allocation2 + $0x214] sm:$0xf] %v5689_v44  ;;  %v13221_v39 = vld [vmem:[#allocation2 + $0x2f0] sm:$0xf0]  ;;  %v16155_v49 = vsel %vm926_vm1, %v5584_v47, %v5585_v21  ;;  %v16159_v44 = vsel %vm5831_vm4, %v5800_v19, %v5801_v40 }
 0x55f   : > { %6278 = vst [vmem:[#allocation2 + $0x218] sm:$0xf] %v5906_v7  ;;  %v11880_v15 = vor.u32 %v13221_v39, %v11879_v50  ;;  %vm4938_vm14 = vcmp.ge.f32.partialorder %v4884_v45, 0.0  ;;  %v4992_v56 = vmul.f32 0.01, %v4884_v45 }
 0x560   : > { %5529 = vst [vmem:[#allocation2 + $0x318] sm:$0xf] %v5475_v22  ;;  %v16151_v8 = vpop.f32.mrf.mxu1  ;;  %v4727_v47 = vpop.f32.mrf.mxu0 }
 0x561   : > { %5744 = vst [vmem:[#allocation2 + $0x2f8] sm:$0xf] %v5690_v31  ;;  %8458 = vmatmul.bf16.gmra.mxu1 %v11880_v15  ;;  %v8546_v7 = vpop.f32.mrf.mxu2  ;;  %v5046_v19 = vsel %vm4938_vm14, %v4884_v45, %v4992_v56  ;;  %v4728_v2 = vadd.f32 %v4727_v47, %v4584_v43  ;;  %v13217_v15 = vld [vmem:[#allocation2 + $0x2d4] sm:$0xf]  ;;  %v13398_v56 = vld [vmem:[#allocation5 + $0xe0] sm:$0xff]  ;;  %v5692_v47 = vpack.c.bf16 %v16155_v49, %v16155_v49 }
 0x562   : > { %5961 = vst [vmem:[#allocation2 + $0x2fc] sm:$0xf] %v5907_v60  ;;  %v16164_v20 = vadd.f32 %v8546_v7, %v16119_v51  ;;  %v16168_v29 = vmul.f32 %v5257_v53, %v5046_v19  ;;  %4766 = vmatmul.bf16.gmra.mxu0 %v11048_v1  ;;  %v5908_v51 = vpack.c.bf16 %v5862_v4, %v5862_v4 }
 0x563   : > { %6013 = vst [vmem:[#allocation2 + $0x2b8] sm:$0xf] %v5475_v22  ;;  %v4827_v50 = vmul.f32 %v16023_v6, %v4728_v2  ;;  %v4586_v7 = vadd.f32 %v16102_v58, %v15486_v42  ;;  %v5477_v42 = vpack.c.bf16 %v16143_v17, %v16143_v17  ;;  %8775 = vmatpush.bf16.msrb.mxu0 %v13398_v56 }
 0x564   : > { %6066 = vst [vmem:[#allocation2 + $0x298] sm:$0xf] %v5690_v31  ;;  %v5586_v39 = vrot.slane %v16168_v29, 1  ;;  %v5802_v46 = vrot.slane %v16168_v29, 2  ;;  %v5909_v17 = vpack.c.bf16 %v16159_v44, %v16159_v44 }
 0x565   : > { %6120 = vst [vmem:[#allocation2 + $0x29c] sm:$0xf] %v5907_v60  ;;  %v16173_v62 = vpop.f32.mrf.mxu3  ;;  %v4885_v36 = vadd.f32 %v16031_v5, %v4827_v50  ;;  %v13018_v50 = vld [vmem:[#allocation2 + $0x670] sm:$0xf0] }
 0x566   : > { %6172 = vst [vmem:[#allocation2 + $0x258] sm:$0xf] %v5475_v22  ;;  %v11152_v22 = vor.u32 %v15819_v18, %v15840_v13  ;;  %v16180_v61 = vsel %vm926_vm1, %v5585_v21, %v5586_v39  ;;  %v16184_v4 = vsel %vm5831_vm4, %v5801_v40, %v5802_v46  ;;  %v5262_v18 = vpop.permute.xlu2 %5261  ;;  %v13406_v40 = vld [vmem:[#allocation5 + $0x120] sm:$0xff] }
 0x567   : > { %6225 = vst [vmem:[#allocation2 + $0x238] sm:$0xf] %v5690_v31  ;;  %vm4939_vm15 = vcmp.ge.f32.partialorder %v4885_v36, 0.0  ;;  %v4993_v43 = vmul.f32 0.01, %v4885_v36  ;;  %8897 = vmatpush.bf16.msrb.mxu1 %v13406_v40  ;;  %v5693_v56 = vpack.c.bf16 %v16180_v61, %v16180_v61 }
 0x568   : > { %6279 = vst [vmem:[#allocation2 + $0x23c] sm:$0xf] %v5907_v60  ;;  %v11881_v48 = vld [vmem:[#allocation2 + $0x2f4] sm:$0xf0]  ;;  %v16186_v45 = vpop.f32.mrf.mxu1  ;;  %v4729_v13 = vpop.f32.mrf.mxu0  ;;  %4637 = vmatmul.bf16.gmra.mxu3 %v11152_v22 }
 0x569   : > { %5530 = vst [vmem:[#allocation2 + $0x33c] sm:$0xf] %v5476_v41  ;;  %v11884_v31 = vor.u32 %v13217_v15, %v11881_v48  ;;  %v8548_v60 = vpop.f32.mrf.mxu2  ;;  %v5047_v21 = vsel %vm4939_vm15, %v4885_v36, %v4993_v43  ;;  %v4730_v1 = vadd.f32 %v4729_v13, %v4586_v7  ;;  %v11915_v15 = vld [vmem:[#allocation2 + $0x318] sm:$0xf]  ;;  %v5267_v43 = vpop.permute.xlu0 %5266 }
 0x56a   : > { %5745 = vst [vmem:[#allocation2 + $0x31c] sm:$0xf] %v5691_v12  ;;  %v16190_v25 = vmul.f32 %v5262_v18, %v5047_v21  ;;  %v11084_v60 = vor.u32 %v13018_v50, %v11083_v26 }
 0x56b   : > { %5962 = vst [vmem:[#allocation2 + $0x320] sm:$0xf] %v5908_v51  ;;  %8580 = vmatmul.bf16.gmra.mxu2 %v11884_v31  ;;  %v4828_v58 = vmul.f32 %v16023_v6, %v4730_v1  ;;  %v11188_v1 = vor.u32 %v15866_v28, %v15882_v33  ;;  %v4591_v28 = vadd.f32 %v16132_v38, %v15519_v9 }
 0x56c   : > { %6014 = vst [vmem:[#allocation2 + $0x2dc] sm:$0xf] %v5476_v41  ;;  %v5587_v53 = vrot.slane %v16190_v25, 1  ;;  %v5803_v19 = vrot.slane %v16190_v25, 2  ;;  %v5479_v38 = vpack.c.bf16 %v16190_v25, %v16190_v25 }
 0x56d   : > { %6067 = vst [vmem:[#allocation2 + $0x2bc] sm:$0xf] %v5691_v12  ;;  %v16199_v2 = vpop.f32.mrf.mxu3  ;;  %v4886_v36 = vadd.f32 %v16031_v5, %v4828_v58  ;;  %v5910_v58 = vpack.c.bf16 %v16184_v4, %v16184_v4 }
 0x56e   : > { %6121 = vst [vmem:[#allocation2 + $0x2c0] sm:$0xf] %v5908_v51  ;;  %v16210_v49 = vsel %vm5831_vm4, %v5802_v46, %v5803_v19 }
 0x56f   : > { %6173 = vst [vmem:[#allocation2 + $0x27c] sm:$0xf] %v5476_v41  ;;  %v16206_v41 = vsel %vm926_vm1, %v5586_v39, %v5587_v53  ;;  %vm4940_vm0 = vcmp.ge.f32.partialorder %v4886_v36, 0.0  ;;  %v4994_v44 = vmul.f32 0.01, %v4886_v36  ;;  %v5911_v25 = vpack.c.bf16 %v16210_v49, %v16210_v49 }
 0x570   : > { %6226 = vst [vmem:[#allocation2 + $0x25c] sm:$0xf] %v5691_v12  ;;  %v13230_v48 = vld [vmem:[#allocation2 + $0x338] sm:$0xf0]  ;;  %v4589_v12 = vadd.f32 %v16116_v27, %v15500_v37  ;;  %v4732_v39 = vpop.f32.mrf.mxu0  ;;  %v5478_v27 = vpack.c.bf16 %v16168_v29, %v16168_v29 }
 0x571   : > { %6280 = vst [vmem:[#allocation2 + $0x260] sm:$0xf] %v5908_v51  ;;  %v11916_v22 = vor.u32 %v13230_v48, %v11915_v15  ;;  %v8550_v31 = vpop.f32.mrf.mxu2  ;;  %v5048_v46 = vsel %vm4940_vm0, %v4886_v36, %v4994_v44  ;;  %v5272_v48 = vpop.permute.xlu1 %5271  ;;  %v4594_v44 = vadd.f32 %v16148_v16, %v15537_v34 }
 0x572   : > { %5531 = vst [vmem:[#allocation2 + $0x360] sm:$0xf] %v5477_v42  ;;  %v8433_v51 = vpop.f32.mrf.mxu1  ;;  %v16215_v7 = vadd.f32 %v8550_v31, %v16151_v8  ;;  %v4733_v13 = vadd.f32 %v4732_v39, %v4589_v12  ;;  %v16217_v18 = vmul.f32 %v5267_v43, %v5048_v46  ;;  %4771 = vmatmul.bf16.gmra.mxu0 %v11084_v60  ;;  %v11119_v12 = vld [vmem:[#allocation2 + $0x698] sm:$0xf]  ;;  %v13027_v43 = vld [vmem:[#allocation2 + $0x6b8] sm:$0xf0] }
 0x573   : > { %5746 = vst [vmem:[#allocation2 + $0x340] sm:$0xf] %v5692_v47  ;;  %8462 = vmatmul.bf16.gmra.mxu1 %v11916_v22  ;;  %v5694_v60 = vpack.c.bf16 %v16206_v41, %v16206_v41  ;;  %v13389_v41 = vld [vmem:[#allocation5 + $0x98] sm:$0xff] }
 0x574   : > { %5963 = vst [vmem:[#allocation2 + $0x344] sm:$0xf] %v5909_v17  ;;  %v4829_v37 = vmul.f32 %v16023_v6, %v4733_v13  ;;  %v5588_v21 = vrot.slane %v16217_v18, 1  ;;  %v5804_v8 = vrot.slane %v16217_v18, 2  ;;  %8654 = vmatpush.bf16.msrb.mxu3 %v13389_v41 }
 0x575   : > { %6015 = vst [vmem:[#allocation2 + $0x300] sm:$0xf] %v5477_v42  ;;  %v16239_v50 = vpop.f32.mrf.mxu3 }
 0x576   : > { %6068 = vst [vmem:[#allocation2 + $0x2e0] sm:$0xf] %v5692_v47  ;;  %v4887_v40 = vadd.f32 %v16031_v5, %v4829_v37  ;;  %v16233_v29 = vsel %vm926_vm1, %v5587_v53, %v5588_v21  ;;  %v16237_v26 = vsel %vm5831_vm4, %v5803_v19, %v5804_v8  ;;  %v11120_v37 = vor.u32 %v13027_v43, %v11119_v12 }
 0x577   : > { %6122 = vst [vmem:[#allocation2 + $0x2e4] sm:$0xf] %v5909_v17 }
 0x578   : > { %6174 = vst [vmem:[#allocation2 + $0x2a0] sm:$0xf] %v5477_v42  ;;  %v13226_v42 = vld [vmem:[#allocation2 + $0x31c] sm:$0xf]  ;;  %vm4941_vm2 = vcmp.ge.f32.partialorder %v4887_v40, 0.0  ;;  %v4734_v15 = vpop.f32.mrf.mxu0  ;;  %4642 = vmatmul.bf16.gmra.mxu3 %v11188_v1 }
 0x579   : > { %6227 = vst [vmem:[#allocation2 + $0x280] sm:$0xf] %v5692_v47  ;;  %v16241_v61 = vpop.f32.mrf.mxu2  ;;  %v4995_v47 = vmul.f32 0.01, %v4887_v40  ;;  %v4735_v19 = vadd.f32 %v4734_v15, %v4591_v28  ;;  %v11951_v51 = vld [vmem:[#allocation2 + $0x360] sm:$0xf]  ;;  %v11224_v15 = vor.u32 %v15910_v3, %v15933_v54 }
 0x57a   : > { %6281 = vst [vmem:[#allocation2 + $0x284] sm:$0xf] %v5909_v17  ;;  %v11917_v33 = vld [vmem:[#allocation2 + $0x33c] sm:$0xf0]  ;;  %v16245_v53 = vpop.f32.mrf.mxu1 }
 0x57b   : > { %5532 = vst [vmem:[#allocation2 + $0x384] sm:$0xf] %v5478_v27  ;;  %v11920_v4 = vor.u32 %v13226_v42, %v11917_v33  ;;  %v5049_v36 = vsel %vm4941_vm2, %v4887_v40, %v4995_v47  ;;  %v4830_v9 = vmul.f32 %v16023_v6, %v4735_v19 }
 0x57c   : > { %5747 = vst [vmem:[#allocation2 + $0x364] sm:$0xf] %v5693_v56  ;;  %v16247_v22 = vmul.f32 %v5272_v48, %v5049_v36  ;;  %v11889_v0 = vld [vmem:[#allocation2 + $0x2fc] sm:$0xf0] }
 0x57d   : > { %5964 = vst [vmem:[#allocation2 + $0x368] sm:$0xf] %v5910_v58  ;;  %8584 = vmatmul.bf16.gmra.mxu2 %v11920_v4  ;;  %v4888_v39 = vadd.f32 %v16031_v5, %v4830_v9  ;;  %v16269_v40 = vpop.f32.mrf.mxu3  ;;  %v13388_v4 = vld [vmem:[#allocation5 + $0x90] sm:$0xff] }
 0x57e   : > { %6016 = vst [vmem:[#allocation2 + $0x324] sm:$0xf] %v5478_v27  ;;  %v5589_v17 = vrot.slane %v16247_v22, 1  ;;  %v5805_v31 = vrot.slane %v16247_v22, 2  ;;  %8655 = vmatpush.bf16.msrb.mxu3 %v13388_v4 }
 0x57f   : > { %6069 = vst [vmem:[#allocation2 + $0x304] sm:$0xf] %v5693_v56  ;;  %vm4942_vm3 = vcmp.ge.f32.partialorder %v4888_v39, 0.0  ;;  %v4996_v49 = vmul.f32 0.01, %v4888_v39 }
 0x580   : > { %6123 = vst [vmem:[#allocation2 + $0x308] sm:$0xf] %v5910_v58  ;;  %v16263_v46 = vsel %vm926_vm1, %v5588_v21, %v5589_v17  ;;  %v16267_v13 = vsel %vm5831_vm4, %v5804_v8, %v5805_v31  ;;  %v5277_v8 = vpop.permute.xlu2 %5276 }
 0x581   : > { %6175 = vst [vmem:[#allocation2 + $0x2c4] sm:$0xf] %v5478_v27  ;;  %v5050_v42 = vsel %vm4942_vm3, %v4888_v39, %v4996_v49  ;;  %v4599_v49 = vadd.f32 %v16199_v2, %v15574_v55 }
 0x582   : > { %6228 = vst [vmem:[#allocation2 + $0x2a4] sm:$0xf] %v5693_v56  ;;  %v13239_v34 = vld [vmem:[#allocation2 + $0x380] sm:$0xf0]  ;;  %v8555_v16 = vpop.f32.mrf.mxu2  ;;  %v4737_v56 = vpop.f32.mrf.mxu0  ;;  %4776 = vmatmul.bf16.gmra.mxu0 %v11120_v37  ;;  %v16276_v33 = vmul.f32 %v5277_v8, %v5050_v42  ;;  %v5696_v8 = vpack.c.bf16 %v16263_v46, %v16263_v46 }
 0x583   : > { %6282 = vst [vmem:[#allocation2 + $0x2a8] sm:$0xf] %v5910_v58  ;;  %v11952_v27 = vor.u32 %v13239_v34, %v11951_v51  ;;  %v4738_v21 = vadd.f32 %v4737_v56, %v4594_v44  ;;  %v4308_v58 = vadd.f32 %v15526_v11, %v15521_v14  ;;  %v5695_v11 = vpack.c.bf16 %v16233_v29, %v16233_v29  ;;  %v13387_v29 = vld [vmem:[#allocation5 + $0x88] sm:$0xff]  ;;  %v13386_v16 = vld [vmem:[#allocation5 + $0x80] sm:$0xff] }
 0x584   : > { %5533 = vst [vmem:[#allocation2 + $0x3a8] sm:$0xf] %v5479_v38  ;;  %v16271_v1 = vpop.f32.mrf.mxu1  ;;  %v5590_v48 = vrot.slane %v16276_v33, 1  ;;  %v5806_v14 = vrot.slane %v16276_v33, 2  ;;  %v13235_v12 = vld [vmem:[#allocation2 + $0x364] sm:$0xf]  ;;  %8656 = vmatpush.bf16.msrb.mxu3 %v13387_v29 }
 0x585   : > { %5748 = vst [vmem:[#allocation2 + $0x388] sm:$0xf] %v5694_v60  ;;  %8466 = vmatmul.bf16.gmra.mxu1 %v11952_v27  ;;  %v4831_v28 = vmul.f32 %v16023_v6, %v4738_v21  ;;  %v4452_v19 = vadd.f32 %v15547_v59, %v4308_v58  ;;  %v5480_v6 = vpack.c.bf16 %v16217_v18, %v16217_v18  ;;  %v16324_v27 = vld [vmem:[%s17585_s4] ss:$0 sm:$0xff]  ;;  %v17941_v58 = vld [vmem:[#allocation112_spill] sm:$0xff]  ;;  %v17944_v29 = vld [vmem:[#allocation49_spill] sm:$0xff] }
 0x586   : > { %5965 = vst [vmem:[#allocation2 + $0x38c] sm:$0xf] %v5911_v25  ;;  %v5912_v59 = vpack.c.bf16 %v16237_v26, %v16237_v26  ;;  %v16295_v54 = vsel %vm926_vm1, %v5589_v17, %v5590_v48  ;;  %v16299_v18 = vsel %vm5831_vm4, %v5805_v31, %v5806_v14  ;;  %v16301_v26 = vpop.f32.mrf.mxu3  ;;  %v5481_v21 = vpack.c.bf16 %v16247_v22, %v16247_v22  ;;  %v5287_v22 = vpop.permute.xlu1 %5286 }
 0x587   : > { %6017 = vst [vmem:[#allocation2 + $0x348] sm:$0xf] %v5479_v38  ;;  %v4889_v47 = vadd.f32 %v16031_v5, %v4831_v28  ;;  %v4596_v3 = vadd.f32 %v16173_v62, %v4452_v19  ;;  %v11156_v4 = vor.u32 %v17941_v58, %v15884_v57 }
 0x588   : > { %6070 = vst [vmem:[#allocation2 + $0x328] sm:$0xf] %v5694_v60  ;;  %4647 = vmatmul.bf16.gmra.mxu3 %v11224_v15 }
 0x589   : > { %6124 = vst [vmem:[#allocation2 + $0x32c] sm:$0xf] %v5911_v25  ;;  %vm4943_vm5 = vcmp.ge.f32.partialorder %v4889_v47, 0.0  ;;  %v4997_v5 = vmul.f32 0.01, %v4889_v47  ;;  %8657 = vmatpush.bf16.msrb.mxu3 %v13386_v16  ;;  %v5482_v16 = vpack.c.bf16 %v16276_v33, %v16276_v33 }
 0x58a   : > { %6176 = vst [vmem:[#allocation2 + $0x2e8] sm:$0xf] %v5479_v38  ;;  %v16288_v36 = vpop.f32.mrf.mxu2  ;;  %v4739_v9 = vpop.f32.mrf.mxu0 }
 0x58b   : > { %6229 = vst [vmem:[#allocation2 + $0x2c8] sm:$0xf] %v5694_v60  ;;  %v5282_v38 = vpop.permute.xlu0 %5281  ;;  %v5051_v51 = vsel %vm4943_vm5, %v4889_v47, %v4997_v5  ;;  %v4740_v17 = vadd.f32 %v4739_v9, %v4596_v3  ;;  %v5913_v47 = vpack.c.bf16 %v16267_v13, %v16267_v13  ;;  %v11987_v55 = vld [vmem:[#allocation2 + $0x3a8] sm:$0xf] }
 0x58c   : > { %6283 = vst [vmem:[#allocation2 + $0x2cc] sm:$0xf] %v5911_v25  ;;  %v11953_v44 = vld [vmem:[#allocation2 + $0x384] sm:$0xf0]  ;;  %v8439_v62 = vpop.f32.mrf.mxu1  ;;  %v16303_v39 = vmul.f32 %v5282_v38, %v5051_v51  ;;  %v16310_v25 = vld [vmem:[%s17584_s3] ss:$0 sm:$0xff] }
 0x58d   : > { %5534 = vst [vmem:[#allocation2 + $0x3cc] sm:$0xf] %v5480_v6  ;;  %v11956_v60 = vor.u32 %v13235_v12, %v11953_v44  ;;  %v4832_v34 = vmul.f32 %v16310_v25, %v4740_v17  ;;  %v17943_v5 = vld [vmem:[#allocation48_spill] sm:$0xff] }
 0x58e   : > { %5749 = vst [vmem:[#allocation2 + $0x3ac] sm:$0xf] %v5695_v11  ;;  %v5591_v31 = vrot.slane %v16303_v39, 1  ;;  %v5807_v43 = vrot.slane %v16303_v39, 2  ;;  %v16347_v9 = vpop.f32.mrf.mxu3  ;;  %v11527_v51 = vld [vmem:[#allocation2 + $0x8] sm:$0xf] }
 0x58f   : > { %5966 = vst [vmem:[#allocation2 + $0x3b0] sm:$0xf] %v5912_v59  ;;  %8588 = vmatmul.bf16.gmra.mxu2 %v11956_v60  ;;  %v4890_v56 = vadd.f32 %v16324_v27, %v4832_v34 }
 0x590   : > { %6018 = vst [vmem:[#allocation2 + $0x36c] sm:$0xf] %v5480_v6  ;;  %v16315_v37 = vsel %vm926_vm1, %v5590_v48, %v5591_v31  ;;  %v16319_v41 = vsel %vm5831_vm4, %v5806_v14, %v5807_v43  ;;  %v17942_v14 = vld [vmem:[#allocation65_spill] sm:$0xff] }
 0x591   : > { %6071 = vst [vmem:[#allocation2 + $0x34c] sm:$0xf] %v5695_v11  ;;  %vm4944_vm6 = vcmp.ge.f32.partialorder %v4890_v56, 0.0  ;;  %v4998_v42 = vmul.f32 0.01, %v4890_v56  ;;  %v4313_v3 = vadd.f32 %v17943_v5, %v17942_v14  ;;  %v13413_v14 = vld [vmem:[#allocation5 + $0x158] sm:$0xff] }
 0x592   : > { %6125 = vst [vmem:[#allocation2 + $0x350] sm:$0xf] %v5912_v59  ;;  %v4742_v28 = vpop.f32.mrf.mxu0  ;;  %4781 = vmatmul.bf16.gmra.mxu0 %v11156_v4  ;;  %9020 = vmatpush.bf16.msrb.mxu2 %v13413_v14 }
 0x593   : > { %6177 = vst [vmem:[#allocation2 + $0x30c] sm:$0xf] %v5480_v6  ;;  %v4743_v19 = vadd.f32 %v4742_v28, %v4599_v49  ;;  %v5052_v48 = vsel %vm4944_vm6, %v4890_v56, %v4998_v42  ;;  %v4457_v38 = vadd.f32 %v17944_v29, %v4313_v3  ;;  %v5292_v28 = vpop.permute.xlu2 %5291  ;;  %v13045_v29 = vld [vmem:[#allocation2 + $0x748] sm:$0xf0] }
 0x594   : > { %6230 = vst [vmem:[#allocation2 + $0x2ec] sm:$0xf] %v5695_v11  ;;  %v13248_v2 = vld [vmem:[#allocation2 + $0x3c8] sm:$0xf0]  ;;  %v8559_v15 = vpop.f32.mrf.mxu2  ;;  %v16342_v57 = vmul.f32 %v5287_v22, %v5052_v48 }
 0x595   : > { %6284 = vst [vmem:[#allocation2 + $0x2f0] sm:$0xf] %v5912_v59  ;;  %v11988_v6 = vor.u32 %v13248_v2, %v11987_v55  ;;  %v16338_v46 = vadd.f32 %v8559_v15, %v16271_v1  ;;  %v4833_v13 = vmul.f32 %v16310_v25, %v4743_v19  ;;  %v13132_v59 = vld [vmem:[#allocation2 + $0x28] sm:$0xf0]  ;;  %v4601_v62 = vadd.f32 %v16239_v50, %v4457_v38  ;;  %v17945_v19 = vld [vmem:[#allocation57_spill] sm:$0xff]  ;;  %v5297_v38 = vpop.permute.xlu0 %5296 }
 0x596   : > { %5535 = vst [vmem:[#allocation2 + $0x3f0] sm:$0xf] %v5481_v21  ;;  %v16344_v11 = vpop.f32.mrf.mxu1  ;;  %v5592_v1 = vrot.slane %v16342_v57, 1  ;;  %v5808_v12 = vrot.slane %v16342_v57, 2  ;;  %v11528_v34 = vor.u32 %v13132_v59, %v11527_v51  ;;  %v5697_v50 = vpack.c.bf16 %v16295_v54, %v16295_v54  ;;  %v13244_v4 = vld [vmem:[#allocation2 + $0x3ac] sm:$0xf] }
 0x597   : > { %5750 = vst [vmem:[#allocation2 + $0x3d0] sm:$0xf] %v5696_v8  ;;  %8471 = vmatmul.bf16.gmra.mxu1 %v11988_v6  ;;  %v4891_v44 = vadd.f32 %v16324_v27, %v4833_v13  ;;  %v4604_v22 = vadd.f32 %v16269_v40, %v17945_v19  ;;  %v5483_v13 = vpack.c.bf16 %v16303_v39, %v16303_v39  ;;  %v11191_v59 = vld [vmem:[#allocation2 + $0x728] sm:$0xf] }
 0x598   : > { %5967 = vst [vmem:[#allocation2 + $0x3d4] sm:$0xf] %v5913_v47  ;;  %v16356_v60 = vsel %vm926_vm1, %v5591_v31, %v5592_v1  ;;  %v16360_v17 = vsel %vm5831_vm4, %v5807_v43, %v5808_v12  ;;  %8658 = vmatmul.bf16.vlgmr.msrb.gmra.mxu3 %v11528_v34  ;;  %v5914_v43 = vpack.c.bf16 %v16299_v18, %v16299_v18  ;;  %v16375_v18 = vpop.f32.mrf.mxu3 }
 0x599   : > { %6019 = vst [vmem:[#allocation2 + $0x390] sm:$0xf] %v5481_v21  ;;  %vm4945_vm7 = vcmp.ge.f32.partialorder %v4891_v44, 0.0  ;;  %v4999_v56 = vmul.f32 0.01, %v4891_v44  ;;  %v5915_v51 = vpack.c.bf16 %v16319_v41, %v16319_v41 }
 0x59a   : > { %6072 = vst [vmem:[#allocation2 + $0x370] sm:$0xf] %v5696_v8  ;;  %v4744_v49 = vpop.f32.mrf.mxu0 }
 0x59b   : > { %6126 = vst [vmem:[#allocation2 + $0x374] sm:$0xf] %v5913_v47  ;;  %v4745_v31 = vadd.f32 %v4744_v49, %v4601_v62  ;;  %v5053_v58 = vsel %vm4945_vm7, %v4891_v44, %v4999_v56  ;;  %v11192_v44 = vor.u32 %v13045_v29, %v11191_v59  ;;  %v17948_v29 = vld [vmem:[#allocation58_spill] sm:$0xff] }
 0x59c   : > { %6178 = vst [vmem:[#allocation2 + $0x330] sm:$0xf] %v5481_v21  ;;  %v8561_v42 = vpop.f32.mrf.mxu2  ;;  %v16368_v33 = vmul.f32 %v5292_v28, %v5053_v58  ;;  %v13397_v58 = vld [vmem:[#allocation5 + $0xd8] sm:$0xff] }
 0x59d   : > { %6231 = vst [vmem:[#allocation2 + $0x310] sm:$0xf] %v5696_v8  ;;  %v4834_v21 = vmul.f32 %v16310_v25, %v4745_v31  ;;  %v12023_v62 = vld [vmem:[#allocation2 + $0x3f0] sm:$0xf]  ;;  %8776 = vmatpush.bf16.msrb.mxu0 %v13397_v58 }
 0x59e   : > { %6285 = vst [vmem:[#allocation2 + $0x314] sm:$0xf] %v5913_v47  ;;  %v11989_v55 = vld [vmem:[#allocation2 + $0x3cc] sm:$0xf0]  ;;  %v16370_v2 = vpop.f32.mrf.mxu1  ;;  %v5593_v15 = vrot.slane %v16368_v33, 1  ;;  %v5809_v8 = vrot.slane %v16368_v33, 2 }
 0x59f   : > { %5536 = vst [vmem:[#allocation2 + $0x414] sm:$0xf] %v5482_v16  ;;  %v11992_v54 = vor.u32 %v13244_v4, %v11989_v55  ;;  %v4892_v47 = vadd.f32 %v16324_v27, %v4834_v21  ;;  %v13405_v4 = vld [vmem:[#allocation5 + $0x118] sm:$0xff]  ;;  %v5484_v21 = vpack.c.bf16 %v16342_v57, %v16342_v57 }
 0x5a0   : > { %5751 = vst [vmem:[#allocation2 + $0x3f4] sm:$0xf] %v5697_v50  ;;  %v16382_v6 = vsel %vm926_vm1, %v5592_v1, %v5593_v15  ;;  %v16386_v48 = vsel %vm5831_vm4, %v5808_v12, %v5809_v8  ;;  %v5698_v1 = vpack.c.bf16 %v16315_v37, %v16315_v37  ;;  %8898 = vmatpush.bf16.msrb.mxu1 %v13405_v4  ;;  %v5307_v4 = vpop.permute.xlu2 %5306 }
 0x5a1   : > { %5968 = vst [vmem:[#allocation2 + $0x3f8] sm:$0xf] %v5914_v43  ;;  %8593 = vmatmul.bf16.gmra.mxu2 %v11992_v54  ;;  %vm4946_vm8 = vcmp.ge.f32.partialorder %v4892_v47, 0.0  ;;  %v5000_v5 = vmul.f32 0.01, %v4892_v47  ;;  %v5302_v54 = vpop.permute.xlu1 %5301 }
 0x5a2   : > { %6020 = vst [vmem:[#allocation2 + $0x3b4] sm:$0xf] %v5482_v16  ;;  %v4747_v3 = vpop.f32.mrf.mxu0  ;;  %4786 = vmatmul.bf16.gmra.mxu0 %v11192_v44  ;;  %v5485_v44 = vpack.c.bf16 %v16368_v33, %v16368_v33 }
 0x5a3   : > { %6073 = vst [vmem:[#allocation2 + $0x394] sm:$0xf] %v5697_v50  ;;  %v4748_v40 = vadd.f32 %v4747_v3, %v4604_v22  ;;  %v5054_v12 = vsel %vm4946_vm8, %v4892_v47, %v5000_v5  ;;  %v5916_v47 = vpack.c.bf16 %v16360_v17, %v16360_v17 }
 0x5a4   : > { %6127 = vst [vmem:[#allocation2 + $0x398] sm:$0xf] %v5914_v43  ;;  %v16394_v56 = vmul.f32 %v5297_v38, %v5054_v12 }
 0x5a5   : > { %6179 = vst [vmem:[#allocation2 + $0x354] sm:$0xf] %v5482_v16  ;;  %v4835_v49 = vmul.f32 %v16310_v25, %v4748_v40  ;;  %v17947_v40 = vld [vmem:[#allocation74_spill] sm:$0xff] }
 0x5a6   : > { %6232 = vst [vmem:[#allocation2 + $0x334] sm:$0xf] %v5697_v50  ;;  %v13257_v34 = vld [vmem:[#allocation2 + $0x410] sm:$0xf0]  ;;  %v8563_v39 = vpop.f32.mrf.mxu2  ;;  %v5594_v37 = vrot.slane %v16394_v56, 1  ;;  %v5810_v50 = vrot.slane %v16394_v56, 2 }
 0x5a7   : > { %6286 = vst [vmem:[#allocation2 + $0x338] sm:$0xf] %v5914_v43  ;;  %v12024_v42 = vor.u32 %v13257_v34, %v12023_v62  ;;  %v16398_v16 = vadd.f32 %v8563_v39, %v16344_v11  ;;  %v4893_v41 = vadd.f32 %v16324_v27, %v4835_v49  ;;  %v16411_v43 = vpop.f32.mrf.mxu3  ;;  %v13253_v22 = vld [vmem:[#allocation2 + $0x3f4] sm:$0xf]  ;;  %v5700_v39 = vpack.c.bf16 %v16382_v6, %v16382_v6 }
 0x5a8   : > { %5537 = vst [vmem:[#allocation2 + $0x438] sm:$0xf] %v5483_v13  ;;  %v8446_v31 = vpop.f32.mrf.mxu1  ;;  %v16405_v28 = vsel %vm926_vm1, %v5593_v15, %v5594_v37  ;;  %v16409_v11 = vsel %vm5831_vm4, %v5809_v8, %v5810_v50  ;;  %v5699_v15 = vpack.c.bf16 %v16356_v60, %v16356_v60  ;;  %v13141_v62 = vld [vmem:[#allocation2 + $0x70] sm:$0xf0] }
 0x5a9   : > { %5752 = vst [vmem:[#allocation2 + $0x418] sm:$0xf] %v5698_v1  ;;  %8475 = vmatmul.bf16.gmra.mxu1 %v12024_v42  ;;  %vm4947_vm9 = vcmp.ge.f32.partialorder %v4893_v41, 0.0  ;;  %v5001_v55 = vmul.f32 0.01, %v4893_v41 }
 0x5aa   : > { %5969 = vst [vmem:[#allocation2 + $0x41c] sm:$0xf] %v5915_v51 }
 0x5ab   : > { %6021 = vst [vmem:[#allocation2 + $0x3d8] sm:$0xf] %v5483_v13  ;;  %v5055_v8 = vsel %vm4947_vm9, %v4893_v41, %v5001_v55 }
 0x5ac   : > { %6074 = vst [vmem:[#allocation2 + $0x3b8] sm:$0xf] %v5698_v1  ;;  %v16419_v19 = vmul.f32 %v5302_v54, %v5055_v8  ;;  %v5486_v54 = vpack.c.bf16 %v16394_v56, %v16394_v56 }
 0x5ad   : > { %6128 = vst [vmem:[#allocation2 + $0x3bc] sm:$0xf] %v5915_v51 }
 0x5ae   : > { %6180 = vst [vmem:[#allocation2 + $0x378] sm:$0xf] %v5483_v13  ;;  %v5595_v57 = vrot.slane %v16419_v19, 1  ;;  %v5811_v3 = vrot.slane %v16419_v19, 2  ;;  %v17946_v13 = vld [vmem:[#allocation53_spill] sm:$0xff]  ;;  %v16447_v42 = vpop.f32.mrf.mxu2 }
 0x5af   : > { %6233 = vst [vmem:[#allocation2 + $0x358] sm:$0xf] %v5698_v1  ;;  %v4318_v59 = vadd.f32 %v17947_v40, %v17946_v13  ;;  %v16438_v1 = vpop.f32.mrf.mxu3  ;;  %v5918_v13 = vpack.c.bf16 %v16409_v11, %v16409_v11 }
 0x5b0   : > { %6287 = vst [vmem:[#allocation2 + $0x35c] sm:$0xf] %v5915_v51  ;;  %v12025_v14 = vld [vmem:[#allocation2 + $0x414] sm:$0xf0]  ;;  %v16429_v60 = vsel %vm926_vm1, %v5594_v37, %v5595_v57  ;;  %v16435_v17 = vsel %vm5831_vm4, %v5810_v50, %v5811_v3  ;;  %v11563_v51 = vld [vmem:[#allocation2 + $0x50] sm:$0xf]  ;;  %v16443_v34 = vpop.f32.mrf.mxu1  ;;  %v4749_v37 = vpop.f32.mrf.mxu0 }
 0x5b1   : > { %5538 = vst [vmem:[#allocation2 + $0x45c] sm:$0xf] %v5484_v21  ;;  %v12028_v5 = vor.u32 %v13253_v22, %v12025_v14  ;;  %v4462_v38 = vadd.f32 %v17948_v29, %v4318_v59  ;;  %v11564_v49 = vor.u32 %v13141_v62, %v11563_v51  ;;  %v12059_v50 = vld [vmem:[#allocation2 + $0x438] sm:$0xf] }
 0x5b2   : > { %5753 = vst [vmem:[#allocation2 + $0x43c] sm:$0xf] %v5699_v15 }
 0x5b3   : > { %5970 = vst [vmem:[#allocation2 + $0x440] sm:$0xf] %v5916_v47  ;;  %8597 = vmatmul.bf16.gmra.mxu2 %v12028_v5  ;;  %v4606_v12 = vadd.f32 %v16301_v26, %v4462_v38  ;;  %v5917_v26 = vpack.c.bf16 %v16386_v48, %v16386_v48  ;;  %8663 = vmatmul.bf16.gmra.mxu3 %v11564_v49  ;;  %v17949_v48 = vld [vmem:[#allocation66_spill] sm:$0xff] }
 0x5b4   : > { %6022 = vst [vmem:[#allocation2 + $0x3fc] sm:$0xf] %v5484_v21 }
 0x5b5   : > { %6075 = vst [vmem:[#allocation2 + $0x3dc] sm:$0xf] %v5699_v15  ;;  %v4750_v41 = vadd.f32 %v4749_v37, %v4606_v12  ;;  %v11227_v37 = vld [vmem:[#allocation2 + $0x770] sm:$0xf] }
 0x5b6   : > { %6129 = vst [vmem:[#allocation2 + $0x3e0] sm:$0xf] %v5916_v47 }
 0x5b7   : > { %6181 = vst [vmem:[#allocation2 + $0x39c] sm:$0xf] %v5484_v21  ;;  %v4836_v58 = vmul.f32 %v16310_v25, %v4750_v41  ;;  %v4609_v21 = vadd.f32 %v16347_v9, %v17949_v48 }
 0x5b8   : > { %6234 = vst [vmem:[#allocation2 + $0x37c] sm:$0xf] %v5699_v15  ;;  %v13266_v31 = vld [vmem:[#allocation2 + $0x458] sm:$0xf0]  ;;  %v16457_v15 = vpop.f32.mrf.mxu3  ;;  %v8568_v14 = vpop.f32.mrf.mxu2 }
 0x5b9   : > { %6288 = vst [vmem:[#allocation2 + $0x380] sm:$0xf] %v5916_v47  ;;  %v12060_v33 = vor.u32 %v13266_v31, %v12059_v50  ;;  %v4894_v6 = vadd.f32 %v16324_v27, %v4836_v58  ;;  %v5701_v47 = vpack.c.bf16 %v16405_v28, %v16405_v28  ;;  %v4752_v5 = vpop.f32.mrf.mxu0  ;;  %v13262_v59 = vld [vmem:[#allocation2 + $0x43c] sm:$0xf]  ;;  %v5312_v50 = vpop.permute.xlu0 %5311 }
 0x5ba   : > { %5539 = vst [vmem:[#allocation2 + $0x480] sm:$0xf] %v5485_v44  ;;  %v16459_v8 = vpop.f32.mrf.mxu1  ;;  %v4753_v40 = vadd.f32 %v4752_v5, %v4609_v21  ;;  %v17950_v21 = vld [vmem:[#allocation61_spill] sm:$0xff] }
 0x5bb   : > { %5754 = vst [vmem:[#allocation2 + $0x460] sm:$0xf] %v5700_v39  ;;  %8479 = vmatmul.bf16.gmra.mxu1 %v12060_v33  ;;  %vm4948_vm10 = vcmp.ge.f32.partialorder %v4894_v6, 0.0  ;;  %v5002_v55 = vmul.f32 0.01, %v4894_v6 }
 0x5bc   : > { %5971 = vst [vmem:[#allocation2 + $0x464] sm:$0xf] %v5917_v26 }
 0x5bd   : > { %6023 = vst [vmem:[#allocation2 + $0x420] sm:$0xf] %v5485_v44  ;;  %v5056_v22 = vsel %vm4948_vm10, %v4894_v6, %v5002_v55 }
 0x5be   : > { %6076 = vst [vmem:[#allocation2 + $0x400] sm:$0xf] %v5700_v39  ;;  %v5434_v9 = vmul.f32 %v5307_v4, %v5056_v22  ;;  %v17952_v22 = vld [vmem:[#allocation67_spill] sm:$0xff] }
 0x5bf   : > { %6130 = vst [vmem:[#allocation2 + $0x404] sm:$0xf] %v5917_v26 }
 0x5c0   : > { %6182 = vst [vmem:[#allocation2 + $0x3c0] sm:$0xf] %v5485_v44  ;;  %v5596_v29 = vrot.slane %v5434_v9, 1  ;;  %v5812_v38 = vrot.slane %v5434_v9, 2  ;;  %v4837_v44 = vmul.f32 %v16310_v25, %v4753_v40  ;;  %v16481_v31 = vpop.f32.mrf.mxu3  ;;  %v5488_v5 = vpack.c.bf16 %v5434_v9, %v5434_v9 }
 0x5c1   : > { %6235 = vst [vmem:[#allocation2 + $0x3a0] sm:$0xf] %v5700_v39  ;;  %v5487_v39 = vpack.c.bf16 %v16419_v19, %v16419_v19  ;;  %v12095_v33 = vld [vmem:[#allocation2 + $0x480] sm:$0xf] }
 0x5c2   : > { %6289 = vst [vmem:[#allocation2 + $0x3a4] sm:$0xf] %v5917_v26  ;;  %v12061_v56 = vld [vmem:[#allocation2 + $0x45c] sm:$0xf0]  ;;  %v5633_v28 = vsel %vm926_vm1, %v5595_v57, %v5596_v29  ;;  %v5850_v11 = vsel %vm5831_vm4, %v5811_v3, %v5812_v38  ;;  %v4895_v51 = vadd.f32 %v16324_v27, %v4837_v44  ;;  %v8452_v62 = vpop.f32.mrf.mxu1  ;;  %v5702_v57 = vpack.c.bf16 %v16429_v60, %v16429_v60  ;;  %v13054_v26 = vld [vmem:[#allocation2 + $0x790] sm:$0xf0] }
 0x5c3   : > { %5540 = vst [vmem:[#allocation2 + $0x4a4] sm:$0xf] %v5486_v54  ;;  %v12064_v12 = vor.u32 %v13262_v59, %v12061_v56  ;;  %v5919_v3 = vpack.c.bf16 %v16435_v17, %v16435_v17  ;;  %v11228_v6 = vor.u32 %v13054_v26, %v11227_v37  ;;  %v5703_v40 = vpack.c.bf16 %v5633_v28, %v5633_v28  ;;  %v16501_v56 = vpop.f32.mrf.mxu2 }
 0x5c4   : > { %5755 = vst [vmem:[#allocation2 + $0x484] sm:$0xf] %v5701_v47  ;;  %vm4949_vm11 = vcmp.ge.f32.partialorder %v4895_v51, 0.0  ;;  %v5003_v49 = vmul.f32 0.01, %v4895_v51 }
 0x5c5   : > { %5972 = vst [vmem:[#allocation2 + $0x488] sm:$0xf] %v5918_v13  ;;  %8601 = vmatmul.bf16.gmra.mxu2 %v12064_v12  ;;  %4791 = vmatmul.bf16.gmra.mxu0 %v11228_v6  ;;  %v17953_v12 = vld [vmem:[#allocation43_spill] sm:$0xff]  ;;  %v5317_v6 = vpop.permute.xlu1 %5316 }
 0x5c6   : > { %6024 = vst [vmem:[#allocation2 + $0x444] sm:$0xf] %v5486_v54  ;;  %v5057_v41 = vsel %vm4949_vm11, %v4895_v51, %v5003_v49  ;;  %v13396_v51 = vld [vmem:[#allocation5 + $0xd0] sm:$0xff] }
 0x5c7   : > { %6077 = vst [vmem:[#allocation2 + $0x424] sm:$0xf] %v5701_v47  ;;  %v16483_v19 = vmul.f32 %v5312_v50, %v5057_v41  ;;  %8777 = vmatpush.bf16.msrb.mxu0 %v13396_v51 }
 0x5c8   : > { %6131 = vst [vmem:[#allocation2 + $0x428] sm:$0xf] %v5918_v13  ;;  %v16499_v59 = vpop.f32.mrf.mxu3 }
 0x5c9   : > { %6183 = vst [vmem:[#allocation2 + $0x3e4] sm:$0xf] %v5486_v54  ;;  %v5597_v60 = vrot.slane %v16483_v19, 1  ;;  %v5813_v55 = vrot.slane %v16483_v19, 2  ;;  %v17951_v54 = vld [vmem:[#allocation83_spill] sm:$0xff]  ;;  %v5489_v37 = vpack.c.bf16 %v16483_v19, %v16483_v19 }
 0x5ca   : > { %6236 = vst [vmem:[#allocation2 + $0x3c4] sm:$0xf] %v5701_v47  ;;  %v13275_v58 = vld [vmem:[#allocation2 + $0x4a0] sm:$0xf0]  ;;  %v4323_v47 = vadd.f32 %v17951_v54, %v17950_v21 }
 0x5cb   : > { %6290 = vst [vmem:[#allocation2 + $0x3c8] sm:$0xf] %v5918_v13  ;;  %v12096_v4 = vor.u32 %v13275_v58, %v12095_v33  ;;  %v5632_v17 = vsel %vm926_vm1, %v5596_v29, %v5597_v60  ;;  %v5849_v48 = vsel %vm5831_vm4, %v5812_v38, %v5813_v55  ;;  %v5920_v29 = vpack.c.bf16 %v5850_v11, %v5850_v11  ;;  %v4754_v38 = vpop.f32.mrf.mxu0  ;;  %v13271_v62 = vld [vmem:[#allocation2 + $0x484] sm:$0xf] }
 0x5cc   : > { %5541 = vst [vmem:[#allocation2 + $0x4c8] sm:$0xf] %v5487_v39  ;;  %v4467_v14 = vadd.f32 %v17952_v22, %v4323_v47  ;;  %v17954_v11 = vld [vmem:[#allocation75_spill] sm:$0xff]  ;;  %v5704_v41 = vpack.c.bf16 %v5632_v17, %v5632_v17 }
 0x5cd   : > { %5756 = vst [vmem:[#allocation2 + $0x4a8] sm:$0xf] %v5702_v57  ;;  %8484 = vmatmul.bf16.gmra.mxu1 %v12096_v4  ;;  %v17955_v4 = vld [vmem:[#allocation102_spill] sm:$0xff] }
 0x5ce   : > { %5973 = vst [vmem:[#allocation2 + $0x4ac] sm:$0xf] %v5919_v3  ;;  %v4611_v13 = vadd.f32 %v16375_v18, %v4467_v14  ;;  %v5782_v21 = vrot.slane %v17955_v4, 2  ;;  %v11529_v14 = vld [vmem:[#allocation2 + $0x2c] sm:$0xf0] }
 0x5cf   : > { %6025 = vst [vmem:[#allocation2 + $0x468] sm:$0xf] %v5487_v39 }
 0x5d0   : > { %6078 = vst [vmem:[#allocation2 + $0x448] sm:$0xf] %v5702_v57  ;;  %v4755_v44 = vadd.f32 %v4754_v38, %v4611_v13  ;;  %v16513_v50 = vpop.f32.mrf.mxu3  ;;  %v17956_v13 = vld [vmem:[#allocation71_spill] sm:$0xff]  ;;  %v17957_v38 = vld [vmem:[#allocation90_spill] sm:$0xff] }
 0x5d1   : > { %6132 = vst [vmem:[#allocation2 + $0x44c] sm:$0xf] %v5919_v3 }
 0x5d2   : > { %6184 = vst [vmem:[#allocation2 + $0x408] sm:$0xf] %v5487_v39  ;;  %v4838_v9 = vmul.f32 %v16310_v25, %v4755_v44  ;;  %v13395_v39 = vld [vmem:[#allocation5 + $0xc8] sm:$0xff] }
 0x5d3   : > { %6237 = vst [vmem:[#allocation2 + $0x3e8] sm:$0xf] %v5702_v57  ;;  %v4614_v57 = vadd.f32 %v16411_v43, %v17954_v11  ;;  %8778 = vmatpush.bf16.msrb.mxu0 %v13395_v39  ;;  %v4757_v58 = vpop.f32.mrf.mxu0  ;;  %v5921_v43 = vpack.c.bf16 %v5849_v48, %v5849_v48 }
 0x5d4   : > { %6291 = vst [vmem:[#allocation2 + $0x3ec] sm:$0xf] %v5919_v3  ;;  %v12097_v18 = vld [vmem:[#allocation2 + $0x4a4] sm:$0xf0]  ;;  %v4896_v49 = vadd.f32 %v16324_v27, %v4838_v9  ;;  %v8572_v3 = vpop.f32.mrf.mxu2 }
 0x5d5   : > { %6314 = vst [vmem:[#allocation2 + $0x728] sm:$0xf] %v15914_v23  ;;  %v12100_v28 = vor.u32 %v13271_v62, %v12097_v18  ;;  %v16507_v23 = vpop.f32.mrf.mxu1  ;;  %v16516_v33 = vadd.f32 %v8572_v3, %v16459_v8  ;;  %v4758_v47 = vadd.f32 %v4757_v58, %v4614_v57  ;;  %v13394_v62 = vld [vmem:[#allocation5 + $0xc0] sm:$0xff]  ;;  %v17959_v18 = vld [vmem:[#allocation64_spill] sm:$0xff] }
 0x5d6   : > { %6315 = vst [vmem:[#allocation2 + $0x74c] sm:$0xf] %v17953_v12  ;;  %vm4950_vm12 = vcmp.ge.f32.partialorder %v4896_v49, 0.0  ;;  %v5004_v26 = vmul.f32 0.01, %v4896_v49  ;;  %v4328_v12 = vadd.f32 %v17957_v38, %v17956_v13  ;;  %v5322_v38 = vpop.permute.xlu2 %5321 }
 0x5d7   : > { %5542 = vst [vmem:[#allocation2 + $0x4ec] sm:$0xf] %v5488_v5  ;;  %8606 = vmatmul.bf16.gmra.mxu2 %v12100_v28  ;;  %v4839_v17 = vmul.f32 %v16310_v25, %v4758_v47  ;;  %8779 = vmatpush.bf16.msrb.mxu0 %v13394_v62  ;;  %v13128_v58 = vld [vmem:[#allocation2 + $0xc] sm:$0xf] }
 0x5d8   : > { %5757 = vst [vmem:[#allocation2 + $0x4cc] sm:$0xf] %v5703_v40  ;;  %v5058_v54 = vsel %vm4950_vm12, %v4896_v49, %v5004_v26  ;;  %v17961_v49 = vld [vmem:[#allocation86_spill] sm:$0xff]  ;;  %v16543_v47 = vpop.f32.mrf.mxu3  ;;  %v13404_v62 = vld [vmem:[#allocation5 + $0x110] sm:$0xff] }
 0x5d9   : > { %5974 = vst [vmem:[#allocation2 + $0x4d0] sm:$0xf] %v5920_v29  ;;  %v5436_v22 = vmul.f32 %v5317_v6, %v5058_v54  ;;  %v4897_v39 = vadd.f32 %v16324_v27, %v4839_v17  ;;  %v17962_v11 = vrot.slane %v17961_v49, 2  ;;  %v11532_v54 = vor.u32 %v13128_v58, %v11529_v14  ;;  %8899 = vmatpush.bf16.msrb.mxu1 %v13404_v62 }
 0x5da   : > { %6026 = vst [vmem:[#allocation2 + $0x48c] sm:$0xf] %v5488_v5 }
 0x5db   : > { %6079 = vst [vmem:[#allocation2 + $0x46c] sm:$0xf] %v5703_v40  ;;  %v5598_v44 = vrot.slane %v5436_v22, 1  ;;  %v5814_v51 = vrot.slane %v5436_v22, 2  ;;  %v5879_v57 = vsel %vm5831_vm4, %v5782_v21, %v17962_v11  ;;  %vm4951_vm13 = vcmp.ge.f32.partialorder %v4897_v39, 0.0  ;;  %v4759_v19 = vpop.f32.mrf.mxu0  ;;  %8780 = vmatmul.bf16.vlgmr.msrb.gmra.mxu0 %v11532_v54 }
 0x5dc   : > { %6133 = vst [vmem:[#allocation2 + $0x470] sm:$0xf] %v5920_v29  ;;  %v5005_v4 = vmul.f32 0.01, %v4897_v39  ;;  %v8574_v13 = vpop.f32.mrf.mxu2 }
 0x5dd   : > { %6185 = vst [vmem:[#allocation2 + $0x42c] sm:$0xf] %v5488_v5  ;;  %v12131_v5 = vld [vmem:[#allocation2 + $0x4c8] sm:$0xf]  ;;  %v5631_v26 = vsel %vm926_vm1, %v5597_v60, %v5598_v44  ;;  %v5848_v3 = vsel %vm5831_vm4, %v5813_v55, %v5814_v51  ;;  %v5891_v55 = vpack.c.bf16 %v5879_v57, %v5879_v57 }
 0x5de   : > { %6238 = vst [vmem:[#allocation2 + $0x40c] sm:$0xf] %v5703_v40  ;;  %v13284_v8 = vld [vmem:[#allocation2 + $0x4e8] sm:$0xf0]  ;;  %v5705_v49 = vpack.c.bf16 %v5631_v26, %v5631_v26  ;;  %v5922_v58 = vpack.c.bf16 %v5848_v3, %v5848_v3  ;;  %v11565_v3 = vld [vmem:[#allocation2 + $0x74] sm:$0xf0] }
 0x5df   : > { %6292 = vst [vmem:[#allocation2 + $0x410] sm:$0xf] %v5920_v29  ;;  %v12132_v9 = vor.u32 %v13284_v8, %v12131_v5  ;;  %v17958_v40 = vld [vmem:[#allocation76_spill] sm:$0xff]  ;;  %v17960_v29 = vrot.slane %v17959_v18, 2 }
 0x5e0   : > { %5543 = vst [vmem:[#allocation2 + $0x510] sm:$0xf] %v5489_v37  ;;  %v4472_v48 = vadd.f32 %v17958_v40, %v4328_v12  ;;  %v5059_v12 = vsel %vm4951_vm13, %v4897_v39, %v5005_v4  ;;  %v5490_v40 = vpack.c.bf16 %v5436_v22, %v5436_v22  ;;  %v13280_v18 = vld [vmem:[#allocation2 + $0x4cc] sm:$0xf]  ;;  %v16553_v57 = vpop.f32.mrf.mxu3  ;;  %v5327_v4 = vpop.permute.xlu0 %5326 }
 0x5e1   : > { %5758 = vst [vmem:[#allocation2 + $0x4f0] sm:$0xf] %v5704_v41  ;;  %v5880_v28 = vsel %vm5831_vm4, %v17960_v29, %v5782_v21  ;;  %8488 = vmatmul.bf16.gmra.mxu1 %v12132_v9  ;;  %v16541_v21 = vpop.f32.mrf.mxu1  ;;  %v13412_v9 = vld [vmem:[#allocation5 + $0x150] sm:$0xff] }
 0x5e2   : > { %5975 = vst [vmem:[#allocation2 + $0x4f4] sm:$0xf] %v5921_v43  ;;  %v4616_v6 = vadd.f32 %v16438_v1, %v4472_v48  ;;  %v5890_v60 = vpack.c.bf16 %v5880_v28, %v5880_v28  ;;  %v5437_v1 = vmul.f32 %v5322_v38, %v5059_v12  ;;  %9021 = vmatpush.bf16.msrb.mxu2 %v13412_v9  ;;  %v17963_v28 = vld [vmem:[#allocation85_spill] sm:$0xff] }
 0x5e3   : > { %6027 = vst [vmem:[#allocation2 + $0x4b0] sm:$0xf] %v5489_v37  ;;  %v4619_v39 = vadd.f32 %v16457_v15, %v17963_v28  ;;  %v17964_v15 = vld [vmem:[#allocation78_spill] sm:$0xff]  ;;  %v13137_v28 = vld [vmem:[#allocation2 + $0x54] sm:$0xf] }
 0x5e4   : > { %6080 = vst [vmem:[#allocation2 + $0x490] sm:$0xf] %v5704_v41  ;;  %v4760_v17 = vadd.f32 %v4759_v19, %v4616_v6  ;;  %v5599_v14 = vrot.slane %v5437_v1, 1  ;;  %v5815_v8 = vrot.slane %v5437_v1, 2  ;;  %v4762_v6 = vpop.f32.mrf.mxu0  ;;  %v17965_v19 = vld [vmem:[#allocation84_spill] sm:$0xff] }
 0x5e5   : > { %6134 = vst [vmem:[#allocation2 + $0x494] sm:$0xf] %v5921_v43  ;;  %v4763_v13 = vadd.f32 %v4762_v6, %v4619_v39  ;;  %v4333_v26 = vadd.f32 %v17965_v19, %v17964_v15  ;;  %v5491_v39 = vpack.c.bf16 %v5437_v1, %v5437_v1 }
 0x5e6   : > { %6186 = vst [vmem:[#allocation2 + $0x450] sm:$0xf] %v5489_v37  ;;  %v4840_v5 = vmul.f32 %v16310_v25, %v4760_v17  ;;  %v5630_v29 = vsel %vm926_vm1, %v5598_v44, %v5599_v14  ;;  %v8576_v44 = vpop.f32.mrf.mxu2  ;;  %v17966_v17 = vld [vmem:[#allocation87_spill] sm:$0xff] }
 0x5e7   : > { %6239 = vst [vmem:[#allocation2 + $0x430] sm:$0xf] %v5704_v41  ;;  %v5847_v41 = vsel %vm5831_vm4, %v5814_v51, %v5815_v8  ;;  %v16556_v54 = vadd.f32 %v8576_v44, %v16507_v23  ;;  %v12167_v15 = vld [vmem:[#allocation2 + $0x510] sm:$0xf] }
 0x5e8   : > { %6293 = vst [vmem:[#allocation2 + $0x434] sm:$0xf] %v5921_v43  ;;  %v4898_v48 = vadd.f32 %v16324_v27, %v4840_v5  ;;  %v12133_v37 = vld [vmem:[#allocation2 + $0x4ec] sm:$0xf0]  ;;  %v4477_v5 = vadd.f32 %v17966_v17, %v4333_v26  ;;  %v16570_v6 = vpop.f32.mrf.mxu3 }
 0x5e9   : > { %5944 = vst [vmem:[#allocation2 + $0x98] sm:$0xf] %v5890_v60  ;;  %v12136_v43 = vor.u32 %v13280_v18, %v12133_v37  ;;  %v8459_v11 = vpop.f32.mrf.mxu1 }
 0x5ea   : > { %5945 = vst [vmem:[#allocation2 + $0xbc] sm:$0xf] %v5891_v55  ;;  %vm4952_vm14 = vcmp.ge.f32.partialorder %v4898_v48, 0.0  ;;  %v5006_v22 = vmul.f32 0.01, %v4898_v48  ;;  %v4621_v18 = vadd.f32 %v16481_v31, %v4477_v5  ;;  %v11568_v11 = vor.u32 %v13137_v28, %v11565_v3  ;;  %v17967_v3 = vld [vmem:[#allocation94_spill] sm:$0xff] }
 0x5eb   : > { %6103 = vst [vmem:[#allocation2 + $0x38] sm:$0xf] %v5890_v60  ;;  %8610 = vmatmul.bf16.gmra.mxu2 %v12136_v43  ;;  %v5706_v31 = vpack.c.bf16 %v5630_v29, %v5630_v29  ;;  %v4624_v17 = vadd.f32 %v16499_v59, %v17967_v3  ;;  %v17970_v3 = vld [vmem:[#allocation115_spill] sm:$0xff] }
 0x5ec   : > { %6104 = vst [vmem:[#allocation2 + $0x5c] sm:$0xf] %v5891_v55  ;;  %v5060_v51 = vsel %vm4952_vm14, %v4898_v48, %v5006_v22  ;;  %8785 = vmatmul.bf16.gmra.mxu0 %v11568_v11 }
 0x5ed   : > { %6316 = vst [vmem:[#allocation2 + $0x770] sm:$0xf] %v5890_v60  ;;  %v5438_v38 = vmul.f32 %v5327_v4, %v5060_v51  ;;  %v4841_v60 = vmul.f32 %v16310_v25, %v4763_v13  ;;  %v4764_v51 = vpop.f32.mrf.mxu0  ;;  %v5923_v13 = vpack.c.bf16 %v5847_v41, %v5847_v41 }
 0x5ee   : > { %6317 = vst [vmem:[#allocation2 + $0x794] sm:$0xf] %v5891_v55  ;;  %v16572_v4 = vpop.f32.mrf.mxu2  ;;  %v4765_v1 = vadd.f32 %v4764_v51, %v4621_v18 }
 0x5ef   : > { %5544 = vst [vmem:[#allocation2 + $0x534] sm:$0xf] %v5490_v40  ;;  %v5600_v55 = vrot.slane %v5438_v38, 1  ;;  %v5816_v62 = vrot.slane %v5438_v38, 2  ;;  %v4899_v23 = vadd.f32 %v16324_v27, %v4841_v60 }
 0x5f0   : > { %v11599_v12 = vld [vmem:[#allocation2 + $0x98] sm:$0xf]  ;;  %5759 = vst [vmem:[#allocation2 + $0x514] sm:$0xf] %v5705_v49  ;;  %v4842_v60 = vmul.f32 %v16310_v25, %v4765_v1 }
 0x5f1   : > { %v13150_v9 = vld [vmem:[#allocation2 + $0xb8] sm:$0xf0]  ;;  %5976 = vst [vmem:[#allocation2 + $0x518] sm:$0xf] %v5922_v58  ;;  %v5629_v37 = vsel %vm926_vm1, %v5599_v14, %v5600_v55  ;;  %v5846_v43 = vsel %vm5831_vm4, %v5815_v8, %v5816_v62  ;;  %vm4953_vm15 = vcmp.ge.f32.partialorder %v4899_v23, 0.0  ;;  %v16568_v44 = vpop.f32.mrf.mxu1  ;;  %v5332_v14 = vpop.permute.xlu1 %5331 }
 0x5f2   : > { %v11600_v48 = vor.u32 %v13150_v9, %v11599_v12  ;;  %6028 = vst [vmem:[#allocation2 + $0x4d4] sm:$0xf] %v5490_v40  ;;  %v5007_v22 = vmul.f32 0.01, %v4899_v23  ;;  %v4900_v41 = vadd.f32 %v16324_v27, %v4842_v60  ;;  %v5924_v59 = vpack.c.bf16 %v5846_v43, %v5846_v43 }
 0x5f3   : > { %6081 = vst [vmem:[#allocation2 + $0x4b4] sm:$0xf] %v5705_v49 }
 0x5f4   : > { %8667 = vmatmul.bf16.gmra.mxu3 %v11600_v48  ;;  %6135 = vst [vmem:[#allocation2 + $0x4b8] sm:$0xf] %v5922_v58  ;;  %v5061_v8 = vsel %vm4953_vm15, %v4899_v23, %v5007_v22  ;;  %vm4954_vm0 = vcmp.ge.f32.partialorder %v4900_v41, 0.0  ;;  %v5008_v5 = vmul.f32 0.01, %v4900_v41  ;;  %v16588_v48 = vpop.f32.mrf.mxu3  ;;  %v5492_v23 = vpack.c.bf16 %v5438_v38, %v5438_v38  ;;  %v5337_v22 = vpop.permute.xlu2 %5336 }
 0x5f5   : > { %6187 = vst [vmem:[#allocation2 + $0x474] sm:$0xf] %v5490_v40  ;;  %v16574_v26 = vmul.f32 %v5332_v14, %v5061_v8  ;;  %v4767_v28 = vpop.f32.mrf.mxu0  ;;  %v13159_v14 = vld [vmem:[#allocation2 + $0x100] sm:$0xf0] }
 0x5f6   : > { %6240 = vst [vmem:[#allocation2 + $0x454] sm:$0xf] %v5705_v49  ;;  %v13293_v19 = vld [vmem:[#allocation2 + $0x530] sm:$0xf0]  ;;  %v8581_v18 = vpop.f32.mrf.mxu2  ;;  %v5062_v11 = vsel %vm4954_vm0, %v4900_v41, %v5008_v5  ;;  %v4768_v51 = vadd.f32 %v4767_v28, %v4624_v17  ;;  %v13146_v28 = vld [vmem:[#allocation2 + $0x9c] sm:$0xf] }
 0x5f7   : > { %6294 = vst [vmem:[#allocation2 + $0x458] sm:$0xf] %v5922_v58  ;;  %v12168_v12 = vor.u32 %v13293_v19, %v12167_v15  ;;  %v5601_v40 = vrot.slane %v16574_v26, 1  ;;  %v5817_v29 = vrot.slane %v16574_v26, 2  ;;  %v16590_v8 = vmul.f32 %v5337_v22, %v5062_v11  ;;  %v17968_v15 = vld [vmem:[#allocation91_spill] sm:$0xff]  ;;  %v17969_v19 = vld [vmem:[#allocation92_spill] sm:$0xff] }
 0x5f8   : > { %5545 = vst [vmem:[#allocation2 + $0x558] sm:$0xf] %v5491_v39  ;;  %v4338_v1 = vadd.f32 %v17969_v19, %v17968_v15  ;;  %v4843_v38 = vmul.f32 %v16310_v25, %v4768_v51 }
 0x5f9   : > { %5760 = vst [vmem:[#allocation2 + $0x538] sm:$0xf] %v5706_v31  ;;  %8492 = vmatmul.bf16.gmra.mxu1 %v12168_v12  ;;  %v5628_v49 = vsel %vm926_vm1, %v5600_v55, %v5601_v40  ;;  %v5845_v58 = vsel %vm5831_vm4, %v5816_v62, %v5817_v29  ;;  %v16586_v9 = vpop.f32.mrf.mxu1  ;;  %v5707_v55 = vpack.c.bf16 %v5629_v37, %v5629_v37  ;;  %v11635_v62 = vld [vmem:[#allocation2 + $0xe0] sm:$0xf]  ;;  %v13289_v12 = vld [vmem:[#allocation2 + $0x514] sm:$0xf] }
 0x5fa   : > { %5977 = vst [vmem:[#allocation2 + $0x53c] sm:$0xf] %v5923_v13  ;;  %v5818_v37 = vrot.slane %v16590_v8, 2  ;;  %v4482_v17 = vadd.f32 %v17970_v3, %v4338_v1  ;;  %v11636_v43 = vor.u32 %v13159_v14, %v11635_v62  ;;  %v4901_v5 = vadd.f32 %v16324_v27, %v4843_v38 }
 0x5fb   : > { %6029 = vst [vmem:[#allocation2 + $0x4f8] sm:$0xf] %v5491_v39  ;;  %v5925_v38 = vpack.c.bf16 %v5845_v58, %v5845_v58 }
 0x5fc   : > { %6082 = vst [vmem:[#allocation2 + $0x4d8] sm:$0xf] %v5706_v31  ;;  %v5844_v18 = vsel %vm5831_vm4, %v5817_v29, %v5818_v37  ;;  %v4626_v22 = vadd.f32 %v16513_v50, %v4482_v17  ;;  %vm4955_vm2 = vcmp.ge.f32.partialorder %v4901_v5, 0.0  ;;  %v5009_v11 = vmul.f32 0.01, %v4901_v5  ;;  %v16604_v14 = vpop.f32.mrf.mxu3 }
 0x5fd   : > { %6136 = vst [vmem:[#allocation2 + $0x4dc] sm:$0xf] %v5923_v13  ;;  %v4769_v19 = vpop.f32.mrf.mxu0  ;;  %v5493_v29 = vpack.c.bf16 %v16574_v26, %v16574_v26 }
 0x5fe   : > { %6188 = vst [vmem:[#allocation2 + $0x498] sm:$0xf] %v5491_v39  ;;  %v5602_v39 = vrot.slane %v16590_v8, 1  ;;  %v16606_v15 = vpop.f32.mrf.mxu2  ;;  %v5063_v1 = vsel %vm4955_vm2, %v4901_v5, %v5009_v11  ;;  %v4770_v50 = vadd.f32 %v4769_v19, %v4626_v22 }
 0x5ff   : > { %6241 = vst [vmem:[#allocation2 + $0x478] sm:$0xf] %v5706_v31  ;;  %v11601_v31 = vld [vmem:[#allocation2 + $0xbc] sm:$0xf0] }
 0x600   : > { %6295 = vst [vmem:[#allocation2 + $0x47c] sm:$0xf] %v5923_v13  ;;  %v12169_v60 = vld [vmem:[#allocation2 + $0x534] sm:$0xf0]  ;;  %v5627_v13 = vsel %vm926_vm1, %v5601_v40, %v5602_v39  ;;  %v11604_v51 = vor.u32 %v13146_v28, %v11601_v31  ;;  %v5342_v40 = vpop.permute.xlu0 %5341  ;;  %v4844_v3 = vmul.f32 %v16310_v25, %v4770_v50  ;;  %v5347_v25 = vpop.permute.xlu1 %5346  ;;  %v5926_v50 = vpack.c.bf16 %v5844_v18, %v5844_v18 }
 0x601   : > { %5546 = vst [vmem:[#allocation2 + $0x57c] sm:$0xf] %v5492_v23  ;;  %v12172_v41 = vor.u32 %v13289_v12, %v12169_v60  ;;  %v8465_v62 = vpop.f32.mrf.mxu1  ;;  %v5708_v12 = vpack.c.bf16 %v5628_v49, %v5628_v49  ;;  %v16610_v60 = vmul.f32 %v5342_v40, %v5063_v1  ;;  %v11671_v40 = vld [vmem:[#allocation2 + $0x128] sm:$0xf]  ;;  %v5709_v1 = vpack.c.bf16 %v5627_v13, %v5627_v13 }
 0x602   : > { %5761 = vst [vmem:[#allocation2 + $0x55c] sm:$0xf] %v5707_v55  ;;  %8789 = vmatmul.bf16.gmra.mxu0 %v11604_v51  ;;  %v4902_v26 = vadd.f32 %v16324_v27, %v4844_v3  ;;  %v5494_v51 = vpack.c.bf16 %v16590_v8, %v16590_v8  ;;  %v16642_v3 = vld [vmem:[%s17584_s3] ss:$0 sm:$0xff] }
 0x603   : > { %5978 = vst [vmem:[#allocation2 + $0x560] sm:$0xf] %v5924_v59  ;;  %8614 = vmatmul.bf16.gmra.mxu2 %v12172_v41  ;;  %v12203_v41 = vld [vmem:[#allocation2 + $0x558] sm:$0xf]  ;;  %v5603_v17 = vrot.slane %v16610_v60, 1 }
 0x604   : > { %8671 = vmatmul.bf16.gmra.mxu3 %v11636_v43  ;;  %6030 = vst [vmem:[#allocation2 + $0x51c] sm:$0xf] %v5492_v23  ;;  %v5819_v43 = vrot.slane %v16610_v60, 2  ;;  %vm4956_vm3 = vcmp.ge.f32.partialorder %v4902_v26, 0.0  ;;  %v16628_v27 = vpop.f32.mrf.mxu3 }
 0x605   : > { %6083 = vst [vmem:[#allocation2 + $0x4fc] sm:$0xf] %v5707_v55  ;;  %v16618_v49 = vsel %vm926_vm1, %v5602_v39, %v5603_v17  ;;  %v4772_v11 = vpop.f32.mrf.mxu0 }
 0x606   : > { %6137 = vst [vmem:[#allocation2 + $0x500] sm:$0xf] %v5924_v59  ;;  %v16622_v58 = vsel %vm5831_vm4, %v5818_v37, %v5819_v43  ;;  %v8585_v22 = vpop.f32.mrf.mxu2  ;;  %v13168_v37 = vld [vmem:[#allocation2 + $0x148] sm:$0xf0] }
 0x607   : > { %6189 = vst [vmem:[#allocation2 + $0x4bc] sm:$0xf] %v5492_v23  ;;  %v5010_v23 = vmul.f32 0.01, %v4902_v26  ;;  %v16635_v19 = vadd.f32 %v8585_v22, %v16586_v9  ;;  %v17972_v9 = vld [vmem:[#allocation105_spill] sm:$0xff] }
 0x608   : > { %6242 = vst [vmem:[#allocation2 + $0x49c] sm:$0xf] %v5707_v55  ;;  %v13302_v31 = vld [vmem:[#allocation2 + $0x578] sm:$0xf0]  ;;  %v17971_v55 = vld [vmem:[#allocation108_spill] sm:$0xff]  ;;  %v17974_v22 = vld [vmem:[#allocation117_spill] sm:$0xff] }
 0x609   : > { %6296 = vst [vmem:[#allocation2 + $0x4a0] sm:$0xf] %v5924_v59  ;;  %v12204_v28 = vor.u32 %v13302_v31, %v12203_v41  ;;  %v4629_v59 = vadd.f32 %v16543_v47, %v17971_v55  ;;  %v16626_v5 = vpop.f32.mrf.mxu1  ;;  %v5064_v39 = vsel %vm4956_vm3, %v4902_v26, %v5010_v23  ;;  %v17973_v26 = vld [vmem:[#allocation106_spill] sm:$0xff] }
 0x60a   : > { %5547 = vst [vmem:[#allocation2 + $0x5a0] sm:$0xf] %v5493_v29  ;;  %v16632_v62 = vmul.f32 %v5347_v25, %v5064_v39  ;;  %v4343_v25 = vadd.f32 %v17973_v26, %v17972_v9  ;;  %v13298_v13 = vld [vmem:[#allocation2 + $0x55c] sm:$0xf]  ;;  %v13155_v39 = vld [vmem:[#allocation2 + $0xe4] sm:$0xf] }
 0x60b   : > { %5762 = vst [vmem:[#allocation2 + $0x580] sm:$0xf] %v5708_v12  ;;  %8497 = vmatmul.bf16.gmra.mxu1 %v12204_v28  ;;  %v4773_v47 = vadd.f32 %v4772_v11, %v4629_v59  ;;  %v11637_v28 = vld [vmem:[#allocation2 + $0x104] sm:$0xf0]  ;;  %v16658_v59 = vld [vmem:[%s17585_s4] ss:$0 sm:$0xff] }
 0x60c   : > { %5979 = vst [vmem:[#allocation2 + $0x584] sm:$0xf] %v5925_v38  ;;  %v5604_v41 = vrot.slane %v16632_v62, 1  ;;  %v5820_v31 = vrot.slane %v16632_v62, 2  ;;  %v4487_v11 = vadd.f32 %v17974_v22, %v4343_v25  ;;  %v16665_v9 = vpop.f32.mrf.mxu3 }
 0x60d   : > { %6031 = vst [vmem:[#allocation2 + $0x540] sm:$0xf] %v5493_v29  ;;  %v4845_v8 = vmul.f32 %v16642_v3, %v4773_v47  ;;  %v4774_v25 = vpop.f32.mrf.mxu0 }
 0x60e   : > { %6084 = vst [vmem:[#allocation2 + $0x520] sm:$0xf] %v5708_v12  ;;  %v16649_v18 = vsel %vm926_vm1, %v5603_v17, %v5604_v41  ;;  %v16653_v23 = vsel %vm5831_vm4, %v5819_v43, %v5820_v31  ;;  %v5352_v17 = vpop.permute.xlu2 %5351  ;;  %v4631_v47 = vadd.f32 %v16553_v57, %v4487_v11  ;;  %v8587_v26 = vpop.f32.mrf.mxu2  ;;  %v5710_v57 = vpack.c.bf16 %v16618_v49, %v16618_v49 }
 0x60f   : > { %6138 = vst [vmem:[#allocation2 + $0x524] sm:$0xf] %v5925_v38  ;;  %v5357_v26 = vpop.permute.xlu0 %5356 }
 0x610   : > { %6190 = vst [vmem:[#allocation2 + $0x4e0] sm:$0xf] %v5493_v29  ;;  %v11672_v29 = vor.u32 %v13168_v37, %v11671_v40  ;;  %v11640_v37 = vor.u32 %v13155_v39, %v11637_v28  ;;  %v5495_v28 = vpack.c.bf16 %v16610_v60, %v16610_v60 }
 0x611   : > { %6243 = vst [vmem:[#allocation2 + $0x4c0] sm:$0xf] %v5708_v12  ;;  %v16663_v40 = vpop.f32.mrf.mxu1 }
 0x612   : > { %6297 = vst [vmem:[#allocation2 + $0x4c4] sm:$0xf] %v5925_v38  ;;  %v12205_v12 = vld [vmem:[#allocation2 + $0x57c] sm:$0xf0]  ;;  %v4903_v38 = vadd.f32 %v16658_v59, %v4845_v8  ;;  %8793 = vmatmul.bf16.gmra.mxu0 %v11640_v37 }
 0x613   : > { %5548 = vst [vmem:[#allocation2 + $0x5c4] sm:$0xf] %v5494_v51  ;;  %v12208_v55 = vor.u32 %v13298_v13, %v12205_v12  ;;  %v4775_v13 = vadd.f32 %v4774_v25, %v4631_v47  ;;  %v12239_v12 = vld [vmem:[#allocation2 + $0x5a0] sm:$0xf] }
 0x614   : > { %8676 = vmatmul.bf16.gmra.mxu3 %v11672_v29  ;;  %5763 = vst [vmem:[#allocation2 + $0x5a4] sm:$0xf] %v5709_v1  ;;  %vm4957_vm5 = vcmp.ge.f32.partialorder %v4903_v38, 0.0  ;;  %v5011_v43 = vmul.f32 0.01, %v4903_v38  ;;  %v16689_v47 = vpop.f32.mrf.mxu3 }
 0x615   : > { %5980 = vst [vmem:[#allocation2 + $0x5a8] sm:$0xf] %v5926_v50  ;;  %8619 = vmatmul.bf16.gmra.mxu2 %v12208_v55  ;;  %v5927_v55 = vpack.c.bf16 %v16622_v58, %v16622_v58  ;;  %v4846_v11 = vmul.f32 %v16642_v3, %v4775_v13  ;;  %v4777_v13 = vpop.f32.mrf.mxu0 }
 0x616   : > { %6032 = vst [vmem:[#allocation2 + $0x564] sm:$0xf] %v5494_v51  ;;  %v5065_v8 = vsel %vm4957_vm5, %v4903_v38, %v5011_v43  ;;  %v13177_v43 = vld [vmem:[#allocation2 + $0x190] sm:$0xf0] }
 0x617   : > { %17975 = vst [vmem:[#allocation35_spill] sm:$0xff] %v16663_v40  ;;  %v16669_v29 = vmul.f32 %v5352_v17, %v5065_v8  ;;  %v4904_v58 = vadd.f32 %v16658_v59, %v4846_v11  ;;  %v17976_v17 = vld [vmem:[#allocation111_spill] sm:$0xff] }
 0x618   : > { %6085 = vst [vmem:[#allocation2 + $0x544] sm:$0xf] %v5709_v1  ;;  %v13411_v8 = vld [vmem:[#allocation5 + $0x148] sm:$0xff] }
 0x619   : > { %6139 = vst [vmem:[#allocation2 + $0x548] sm:$0xf] %v5926_v50  ;;  %v5605_v38 = vrot.slane %v16669_v29, 1  ;;  %v5821_v39 = vrot.slane %v16669_v29, 2  ;;  %vm4958_vm6 = vcmp.ge.f32.partialorder %v4904_v58, 0.0  ;;  %v8472_v37 = vpop.f32.mrf.mxu1  ;;  %9022 = vmatpush.bf16.msrb.mxu2 %v13411_v8  ;;  %v17978_v8 = vld [vmem:[#allocation110_spill] sm:$0xff] }
 0x61a   : > { %6191 = vst [vmem:[#allocation2 + $0x504] sm:$0xf] %v5494_v51  ;;  %v13311_v22 = vld [vmem:[#allocation2 + $0x5c0] sm:$0xf0] }
 0x61b   : > { %6244 = vst [vmem:[#allocation2 + $0x4e4] sm:$0xf] %v5709_v1  ;;  %v12240_v60 = vor.u32 %v13311_v22, %v12239_v12  ;;  %v16680_v51 = vsel %vm926_vm1, %v5604_v41, %v5605_v38  ;;  %v16684_v49 = vsel %vm5831_vm4, %v5820_v31, %v5821_v39  ;;  %v5012_v1 = vmul.f32 0.01, %v4904_v58  ;;  %v8589_v41 = vpop.f32.mrf.mxu2  ;;  %v11707_v12 = vld [vmem:[#allocation2 + $0x170] sm:$0xf] }
 0x61c   : > { %6298 = vst [vmem:[#allocation2 + $0x4e8] sm:$0xf] %v5926_v50  ;;  %v4634_v50 = vadd.f32 %v16570_v6, %v17976_v17  ;;  %v16692_v25 = vadd.f32 %v8589_v41, %v16626_v5  ;;  %v5496_v22 = vpack.c.bf16 %v16632_v62, %v16632_v62  ;;  %v11708_v37 = vor.u32 %v13177_v43, %v11707_v12  ;;  %v13164_v41 = vld [vmem:[#allocation2 + $0x12c] sm:$0xf]  ;;  %v17979_v12 = vld [vmem:[#allocation113_spill] sm:$0xff] }
 0x61d   : > { %5549 = vst [vmem:[#allocation2 + $0x5e8] sm:$0xf] %v5495_v28  ;;  %8501 = vmatmul.bf16.gmra.mxu1 %v12240_v60  ;;  %v5066_v31 = vsel %vm4958_vm6, %v4904_v58, %v5012_v1  ;;  %v11673_v60 = vld [vmem:[#allocation2 + $0x14c] sm:$0xf0]  ;;  %v5711_v17 = vpack.c.bf16 %v16649_v18, %v16649_v18  ;;  %v5928_v5 = vpack.c.bf16 %v16653_v23, %v16653_v23 }
 0x61e   : > { %5764 = vst [vmem:[#allocation2 + $0x5c8] sm:$0xf] %v5710_v57  ;;  %v16696_v11 = vmul.f32 %v5357_v26, %v5066_v31  ;;  %v4778_v6 = vadd.f32 %v4777_v13, %v4634_v50  ;;  %v17977_v26 = vld [vmem:[#allocation119_spill] sm:$0xff]  ;;  %v11676_v31 = vor.u32 %v13164_v41, %v11673_v60  ;;  %v16720_v41 = vpop.f32.mrf.mxu3 }
 0x61f   : > { %5981 = vst [vmem:[#allocation2 + $0x5cc] sm:$0xf] %v5927_v55  ;;  %v4348_v50 = vadd.f32 %v17978_v8, %v17977_v26  ;;  %v13403_v26 = vld [vmem:[#allocation5 + $0x108] sm:$0xff]  ;;  %v4779_v8 = vpop.f32.mrf.mxu0 }
 0x620   : > { %6033 = vst [vmem:[#allocation2 + $0x588] sm:$0xf] %v5495_v28  ;;  %v5606_v58 = vrot.slane %v16696_v11, 1  ;;  %v5822_v1 = vrot.slane %v16696_v11, 2  ;;  %v4847_v62 = vmul.f32 %v16642_v3, %v4778_v6  ;;  %8900 = vmatpush.bf16.msrb.mxu1 %v13403_v26  ;;  %v11743_v26 = vld [vmem:[#allocation2 + $0x1b8] sm:$0xf] }
 0x621   : > { %6086 = vst [vmem:[#allocation2 + $0x568] sm:$0xf] %v5710_v57  ;;  %v4492_v6 = vadd.f32 %v17979_v12, %v4348_v50  ;;  %v5497_v50 = vpack.c.bf16 %v16669_v29, %v16669_v29 }
 0x622   : > { %6140 = vst [vmem:[#allocation2 + $0x56c] sm:$0xf] %v5927_v55  ;;  %v16709_v18 = vsel %vm926_vm1, %v5605_v38, %v5606_v58  ;;  %v16713_v23 = vsel %vm5831_vm4, %v5821_v39, %v5822_v1  ;;  %v4905_v13 = vadd.f32 %v16658_v59, %v4847_v62  ;;  %8798 = vmatmul.bf16.gmra.mxu0 %v11676_v31  ;;  %v16718_v38 = vpop.f32.mrf.mxu1 }
 0x623   : > { %6192 = vst [vmem:[#allocation2 + $0x528] sm:$0xf] %v5495_v28  ;;  %v13307_v28 = vld [vmem:[#allocation2 + $0x5a4] sm:$0xf]  ;;  %v16722_v62 = vpop.f32.mrf.mxu2 }
 0x624   : > { %6245 = vst [vmem:[#allocation2 + $0x508] sm:$0xf] %v5710_v57  ;;  %8680 = vmatmul.bf16.gmra.mxu3 %v11708_v37  ;;  %vm4959_vm7 = vcmp.ge.f32.partialorder %v4905_v13, 0.0  ;;  %v5013_v60 = vmul.f32 0.01, %v4905_v13  ;;  %v4636_v37 = vadd.f32 %v16588_v48, %v4492_v6  ;;  %v5712_v48 = vpack.c.bf16 %v16680_v51, %v16680_v51 }
 0x625   : > { %6299 = vst [vmem:[#allocation2 + $0x50c] sm:$0xf] %v5927_v55  ;;  %v12241_v43 = vld [vmem:[#allocation2 + $0x5c4] sm:$0xf0]  ;;  %v5362_v55 = vpop.permute.xlu1 %5361 }
 0x626   : > { %5550 = vst [vmem:[#allocation2 + $0x60c] sm:$0xf] %v5496_v22  ;;  %v12244_v57 = vor.u32 %v13307_v28, %v12241_v43  ;;  %v5067_v39 = vsel %vm4959_vm7, %v4905_v13, %v5013_v60  ;;  %v4780_v43 = vadd.f32 %v4779_v8, %v4636_v37  ;;  %v12275_v31 = vld [vmem:[#allocation2 + $0x5e8] sm:$0xf]  ;;  %v5367_v60 = vpop.permute.xlu2 %5366  ;;  %v16748_v8 = vpop.f32.mrf.mxu3 }
 0x627   : > { %5765 = vst [vmem:[#allocation2 + $0x5ec] sm:$0xf] %v5711_v17  ;;  %v16726_v28 = vmul.f32 %v5362_v55, %v5067_v39 }
 0x628   : > { %5982 = vst [vmem:[#allocation2 + $0x5f0] sm:$0xf] %v5928_v5  ;;  %8623 = vmatmul.bf16.gmra.mxu2 %v12244_v57  ;;  %v5929_v57 = vpack.c.bf16 %v16684_v49, %v16684_v49  ;;  %v4848_v29 = vmul.f32 %v16642_v3, %v4780_v43 }
 0x629   : > { %6034 = vst [vmem:[#allocation2 + $0x5ac] sm:$0xf] %v5496_v22  ;;  %v5607_v13 = vrot.slane %v16726_v28, 1  ;;  %v5823_v12 = vrot.slane %v16726_v28, 2 }
 0x62a   : > { %17980 = vst [vmem:[#allocation70_spill] sm:$0xff] %v16718_v38  ;;  %v4906_v49 = vadd.f32 %v16658_v59, %v4848_v29  ;;  %v4782_v29 = vpop.f32.mrf.mxu0 }
 0x62b   : > { %6087 = vst [vmem:[#allocation2 + $0x58c] sm:$0xf] %v5711_v17  ;;  %v16741_v51 = vsel %vm5831_vm4, %v5822_v1, %v5823_v12  ;;  %v11709_v1 = vld [vmem:[#allocation2 + $0x194] sm:$0xf0] }
 0x62c   : > { %17981 = vst [vmem:[#allocation114_spill] sm:$0xff] %v16722_v62  ;;  %vm4960_vm8 = vcmp.ge.f32.partialorder %v4906_v49, 0.0  ;;  %v5014_v37 = vmul.f32 0.01, %v4906_v49 }
 0x62d   : > { %6141 = vst [vmem:[#allocation2 + $0x590] sm:$0xf] %v5928_v5  ;;  %v13320_v6 = vld [vmem:[#allocation2 + $0x608] sm:$0xf0] }
 0x62e   : > { %6193 = vst [vmem:[#allocation2 + $0x54c] sm:$0xf] %v5496_v22  ;;  %v12276_v55 = vor.u32 %v13320_v6, %v12275_v31  ;;  %v16737_v22 = vsel %vm926_vm1, %v5606_v58, %v5607_v13  ;;  %v16746_v58 = vpop.f32.mrf.mxu1  ;;  %v5068_v31 = vsel %vm4960_vm8, %v4906_v49, %v5014_v37  ;;  %v8594_v6 = vpop.f32.mrf.mxu2  ;;  %v5930_v49 = vpack.c.bf16 %v16713_v23, %v16713_v23 }
 0x62f   : > { %6246 = vst [vmem:[#allocation2 + $0x52c] sm:$0xf] %v5711_v17  ;;  %v13186_v17 = vld [vmem:[#allocation2 + $0x1d8] sm:$0xf0]  ;;  %v16752_v38 = vmul.f32 %v5367_v60, %v5068_v31  ;;  %v17983_v60 = vld [vmem:[#allocation120_spill] sm:$0xff] }
 0x630   : > { %6300 = vst [vmem:[#allocation2 + $0x530] sm:$0xf] %v5928_v5  ;;  %8505 = vmatmul.bf16.gmra.mxu1 %v12276_v55  ;;  %v17982_v5 = vld [vmem:[#allocation122_spill] sm:$0xff]  ;;  %v11744_v43 = vor.u32 %v13186_v17, %v11743_v26  ;;  %v5498_v55 = vpack.c.bf16 %v16696_v11, %v16696_v11  ;;  %v17984_v26 = vld [vmem:[#allocation121_spill] sm:$0xff] }
 0x631   : > { %5551 = vst [vmem:[#allocation2 + $0x630] sm:$0xf] %v5497_v50  ;;  %v4639_v39 = vadd.f32 %v16604_v14, %v17982_v5  ;;  %v13173_v14 = vld [vmem:[#allocation2 + $0x174] sm:$0xf]  ;;  %v5713_v5 = vpack.c.bf16 %v16709_v18, %v16709_v18  ;;  %v5608_v17 = vrot.slane %v16752_v38, 1  ;;  %v5824_v37 = vrot.slane %v16752_v38, 2 }
 0x632   : > { %5766 = vst [vmem:[#allocation2 + $0x610] sm:$0xf] %v5712_v48  ;;  %v11712_v40 = vor.u32 %v13173_v14, %v11709_v1  ;;  %v5372_v14 = vpop.permute.xlu0 %5371 }
 0x633   : > { %5983 = vst [vmem:[#allocation2 + $0x614] sm:$0xf] %v5929_v57  ;;  %v4783_v62 = vadd.f32 %v4782_v29, %v4639_v39  ;;  %v4353_v39 = vadd.f32 %v17984_v26, %v17983_v60  ;;  %v16765_v18 = vsel %vm926_vm1, %v5607_v13, %v5608_v17  ;;  %v16769_v23 = vsel %vm5831_vm4, %v5823_v12, %v5824_v37  ;;  %v8659_v29 = vpop.f32.mrf.mxu3 }
 0x634   : > { %6035 = vst [vmem:[#allocation2 + $0x5d0] sm:$0xf] %v5497_v50  ;;  %8684 = vmatmul.bf16.gmra.mxu3 %v11744_v43  ;;  %8802 = vmatmul.bf16.gmra.mxu0 %v11712_v40  ;;  %v16777_v60 = vadd.f32 %v8659_v29, %v16099_v24  ;;  %v5499_v26 = vpack.c.bf16 %v16726_v28, %v16726_v28  ;;  %v13195_v28 = vld [vmem:[#allocation2 + $0x220] sm:$0xf0] }
 0x635   : > { %6088 = vst [vmem:[#allocation2 + $0x5b0] sm:$0xf] %v5712_v48  ;;  %v4849_v11 = vmul.f32 %v16642_v3, %v4783_v62  ;;  %v17985_v62 = vld [vmem:[#allocation97_spill] sm:$0xff] }
 0x636   : > { %6142 = vst [vmem:[#allocation2 + $0x5b4] sm:$0xf] %v5929_v57  ;;  %v4497_v31 = vadd.f32 %v17985_v62, %v4353_v39  ;;  %v8478_v40 = vpop.f32.mrf.mxu1  ;;  %v16774_v13 = vpop.f32.mrf.mxu2 }
 0x637   : > { %6194 = vst [vmem:[#allocation2 + $0x570] sm:$0xf] %v5497_v50  ;;  %v13316_v50 = vld [vmem:[#allocation2 + $0x5ec] sm:$0xf]  ;;  %v4907_v1 = vadd.f32 %v16658_v59, %v4849_v11  ;;  %v4784_v11 = vpop.f32.mrf.mxu0  ;;  %v11745_v40 = vld [vmem:[#allocation2 + $0x1dc] sm:$0xf0] }
 0x638   : > { %6247 = vst [vmem:[#allocation2 + $0x550] sm:$0xf] %v5712_v48  ;;  %v4641_v6 = vadd.f32 %v16628_v27, %v4497_v31  ;;  %v5714_v27 = vpack.c.bf16 %v16737_v22, %v16737_v22 }
 0x639   : > { %6301 = vst [vmem:[#allocation2 + $0x554] sm:$0xf] %v5929_v57  ;;  %v12277_v43 = vld [vmem:[#allocation2 + $0x60c] sm:$0xf0]  ;;  %vm4961_vm9 = vcmp.ge.f32.partialorder %v4907_v1, 0.0 }
 0x63a   : > { %5552 = vst [vmem:[#allocation2 + $0x654] sm:$0xf] %v5498_v55  ;;  %v12280_v48 = vor.u32 %v13316_v50, %v12277_v43  ;;  %v5015_v57 = vmul.f32 0.01, %v4907_v1  ;;  %v4785_v50 = vadd.f32 %v4784_v11, %v4641_v6  ;;  %v12311_v43 = vld [vmem:[#allocation2 + $0x630] sm:$0xf]  ;;  %v5377_v6 = vpop.permute.xlu1 %5376 }
 0x63b   : > { %5767 = vst [vmem:[#allocation2 + $0x634] sm:$0xf] %v5713_v5 }
 0x63c   : > { %5984 = vst [vmem:[#allocation2 + $0x638] sm:$0xf] %v5930_v49  ;;  %8627 = vmatmul.bf16.gmra.mxu2 %v12280_v48  ;;  %v5069_v12 = vsel %vm4961_vm9, %v4907_v1, %v5015_v57  ;;  %v5931_v48 = vpack.c.bf16 %v16741_v51, %v16741_v51  ;;  %v4850_v31 = vmul.f32 %v16642_v3, %v4785_v50 }
 0x63d   : > { %6036 = vst [vmem:[#allocation2 + $0x5f4] sm:$0xf] %v5498_v55  ;;  %v16781_v39 = vmul.f32 %v5372_v14, %v5069_v12  ;;  %v17986_v14 = vld [vmem:[#allocation31_spill] sm:$0xff] }
 0x63e   : > { %6089 = vst [vmem:[#allocation2 + $0x5d4] sm:$0xf] %v5713_v5  ;;  %v4908_v51 = vadd.f32 %v16658_v59, %v4850_v31  ;;  %v4644_v12 = vadd.f32 %v16665_v9, %v17986_v14  ;;  %v8598_v11 = vpop.f32.mrf.mxu2  ;;  %v5715_v14 = vpack.c.bf16 %v16765_v18, %v16765_v18 }
 0x63f   : > { %6143 = vst [vmem:[#allocation2 + $0x5d8] sm:$0xf] %v5930_v49  ;;  %v5609_v24 = vrot.slane %v16781_v39, 1  ;;  %v5825_v1 = vrot.slane %v16781_v39, 2  ;;  %v4787_v31 = vpop.f32.mrf.mxu0 }
 0x640   : > { %6195 = vst [vmem:[#allocation2 + $0x594] sm:$0xf] %v5498_v55  ;;  %vm4962_vm10 = vcmp.ge.f32.partialorder %v4908_v51, 0.0  ;;  %v5016_v29 = vmul.f32 0.01, %v4908_v51 }
 0x641   : > { %6248 = vst [vmem:[#allocation2 + $0x574] sm:$0xf] %v5713_v5  ;;  %v13329_v62 = vld [vmem:[#allocation2 + $0x650] sm:$0xf0]  ;;  %v16792_v55 = vsel %vm926_vm1, %v5608_v17, %v5609_v24  ;;  %v16796_v22 = vsel %vm5831_vm4, %v5824_v37, %v5825_v1  ;;  %v11779_v5 = vld [vmem:[#allocation2 + $0x200] sm:$0xf]  ;;  %v16801_v17 = vpop.f32.mrf.mxu1 }
 0x642   : > { %6302 = vst [vmem:[#allocation2 + $0x578] sm:$0xf] %v5930_v49  ;;  %v12312_v57 = vor.u32 %v13329_v62, %v12311_v43  ;;  %v11780_v49 = vor.u32 %v13195_v28, %v11779_v5  ;;  %v13182_v37 = vld [vmem:[#allocation2 + $0x1bc] sm:$0xf]  ;;  %v5070_v50 = vsel %vm4962_vm10, %v4908_v51, %v5016_v29  ;;  %v16804_v43 = vadd.f32 %v8598_v11, %v16746_v58  ;;  %v16806_v62 = vpop.f32.mrf.mxu3  ;;  %v17987_v29 = vld [vmem:[#allocation100_spill] sm:$0xff] }
 0x643   : > { %5553 = vst [vmem:[#allocation2 + $0x678] sm:$0xf] %v5499_v26  ;;  %v11748_v28 = vor.u32 %v13182_v37, %v11745_v40  ;;  %v16810_v9 = vmul.f32 %v5377_v6, %v5070_v50  ;;  %v4788_v5 = vadd.f32 %v4787_v31, %v4644_v12  ;;  %v5932_v58 = vpack.c.bf16 %v16769_v23, %v16769_v23  ;;  %v13325_v12 = vld [vmem:[#allocation2 + $0x634] sm:$0xf]  ;;  %v17989_v37 = vld [vmem:[#allocation56_spill] sm:$0xff] }
 0x644   : > { %5768 = vst [vmem:[#allocation2 + $0x658] sm:$0xf] %v5714_v27  ;;  %8510 = vmatmul.bf16.gmra.mxu1 %v12312_v57  ;;  %8689 = vmatmul.bf16.gmra.mxu3 %v11780_v49  ;;  %v5500_v57 = vpack.c.bf16 %v16752_v38, %v16752_v38  ;;  %v17988_v38 = vld [vmem:[#allocation103_spill] sm:$0xff] }
 0x645   : > { %5985 = vst [vmem:[#allocation2 + $0x65c] sm:$0xf] %v5931_v48  ;;  %8806 = vmatmul.bf16.gmra.mxu0 %v11748_v28  ;;  %v5610_v51 = vrot.slane %v16810_v9, 1  ;;  %v5826_v40 = vrot.slane %v16810_v9, 2  ;;  %v4851_v49 = vmul.f32 %v16642_v3, %v4788_v5  ;;  %v4358_v6 = vadd.f32 %v17988_v38, %v17987_v29  ;;  %v5382_v29 = vpop.permute.xlu2 %5381 }
 0x646   : > { %6037 = vst [vmem:[#allocation2 + $0x618] sm:$0xf] %v5499_v26  ;;  %v8600_v31 = vpop.f32.mrf.mxu2 }
 0x647   : > { %6090 = vst [vmem:[#allocation2 + $0x5f8] sm:$0xf] %v5714_v27  ;;  %v16823_v18 = vsel %vm926_vm1, %v5609_v24, %v5610_v51  ;;  %v16827_v23 = vsel %vm5831_vm4, %v5825_v1, %v5826_v40  ;;  %v4909_v11 = vadd.f32 %v16658_v59, %v4851_v49  ;;  %v4502_v50 = vadd.f32 %v17989_v37, %v4358_v6  ;;  %v4789_v38 = vpop.f32.mrf.mxu0  ;;  %v11815_v31 = vld [vmem:[#allocation2 + $0x248] sm:$0xf] }
 0x648   : > { %6144 = vst [vmem:[#allocation2 + $0x5fc] sm:$0xf] %v5931_v48  ;;  %v5501_v49 = vpack.c.bf16 %v16781_v39, %v16781_v39  ;;  %v5933_v37 = vpack.c.bf16 %v16796_v22, %v16796_v22 }
 0x649   : > { %6196 = vst [vmem:[#allocation2 + $0x5b8] sm:$0xf] %v5499_v26  ;;  %vm4963_vm11 = vcmp.ge.f32.partialorder %v4909_v11, 0.0  ;;  %v4646_v28 = vadd.f32 %v16689_v47, %v4502_v50  ;;  %v16832_v24 = vpop.f32.mrf.mxu1  ;;  %v13204_v47 = vld [vmem:[#allocation2 + $0x268] sm:$0xf0] }
 0x64a   : > { %6249 = vst [vmem:[#allocation2 + $0x598] sm:$0xf] %v5714_v27  ;;  %v8664_v5 = vpop.f32.mrf.mxu3 }
 0x64b   : > { %6303 = vst [vmem:[#allocation2 + $0x59c] sm:$0xf] %v5931_v48  ;;  %v12313_v26 = vld [vmem:[#allocation2 + $0x654] sm:$0xf0]  ;;  %v5017_v48 = vmul.f32 0.01, %v4909_v11  ;;  %v11816_v5 = vor.u32 %v13204_v47, %v11815_v31  ;;  %v5502_v31 = vpack.c.bf16 %v16810_v9, %v16810_v9 }
 0x64c   : > { %5554 = vst [vmem:[#allocation2 + $0x69c] sm:$0xf] %v5500_v57  ;;  %v12316_v27 = vor.u32 %v13325_v12, %v12313_v26  ;;  %v4790_v12 = vadd.f32 %v4789_v38, %v4646_v28  ;;  %v5716_v26 = vpack.c.bf16 %v16792_v55, %v16792_v55 }
 0x64d   : > { %5769 = vst [vmem:[#allocation2 + $0x67c] sm:$0xf] %v5715_v14  ;;  %v5071_v1 = vsel %vm4963_vm11, %v4909_v11, %v5017_v48 }
 0x64e   : > { %5986 = vst [vmem:[#allocation2 + $0x680] sm:$0xf] %v5932_v58  ;;  %8632 = vmatmul.bf16.gmra.mxu2 %v12316_v27  ;;  %v16836_v6 = vmul.f32 %v5382_v29, %v5071_v1  ;;  %v12347_v27 = vld [vmem:[#allocation2 + $0x678] sm:$0xf]  ;;  %v4852_v39 = vmul.f32 %v16642_v3, %v4790_v12  ;;  %v13191_v29 = vld [vmem:[#allocation2 + $0x204] sm:$0xf] }
 0x64f   : > { %6038 = vst [vmem:[#allocation2 + $0x63c] sm:$0xf] %v5500_v57  ;;  %v17990_v12 = vld [vmem:[#allocation107_spill] sm:$0xff] }
 0x650   : > { %6091 = vst [vmem:[#allocation2 + $0x61c] sm:$0xf] %v5715_v14  ;;  %v5611_v11 = vrot.slane %v16836_v6, 1  ;;  %v5827_v50 = vrot.slane %v16836_v6, 2  ;;  %v4649_v47 = vadd.f32 %v16720_v41, %v17990_v12  ;;  %v5717_v41 = vpack.c.bf16 %v16823_v18, %v16823_v18 }
 0x651   : > { %6145 = vst [vmem:[#allocation2 + $0x620] sm:$0xf] %v5932_v58  ;;  %v8485_v1 = vpop.f32.mrf.mxu1 }
 0x652   : > { %6197 = vst [vmem:[#allocation2 + $0x5dc] sm:$0xf] %v5500_v57  ;;  %v11781_v57 = vld [vmem:[#allocation2 + $0x224] sm:$0xf0]  ;;  %v16847_v55 = vsel %vm926_vm1, %v5610_v51, %v5611_v11  ;;  %v16851_v22 = vsel %vm5831_vm4, %v5826_v40, %v5827_v50  ;;  %v8602_v51 = vpop.f32.mrf.mxu2 }
 0x653   : > { %6250 = vst [vmem:[#allocation2 + $0x5bc] sm:$0xf] %v5715_v14  ;;  %v13338_v48 = vld [vmem:[#allocation2 + $0x698] sm:$0xf0]  ;;  %v4910_v14 = vadd.f32 %v16658_v59, %v4852_v39  ;;  %v11784_v38 = vor.u32 %v13191_v29, %v11781_v57  ;;  %v4792_v39 = vpop.f32.mrf.mxu0 }
 0x654   : > { %6304 = vst [vmem:[#allocation2 + $0x5c0] sm:$0xf] %v5932_v58  ;;  %v12348_v28 = vor.u32 %v13338_v48, %v12347_v27  ;;  %8693 = vmatmul.bf16.gmra.mxu3 %v11816_v5  ;;  %v5387_v27 = vpop.permute.xlu0 %5386  ;;  %v16857_v48 = vadd.f32 %v8602_v51, %v16801_v17  ;;  %v4793_v57 = vadd.f32 %v4792_v39, %v4649_v47  ;;  %v13334_v1 = vld [vmem:[#allocation2 + $0x67c] sm:$0xf]  ;;  %v13213_v47 = vld [vmem:[#allocation2 + $0x2b0] sm:$0xf0] }
 0x655   : > { %5555 = vst [vmem:[#allocation2 + $0x6c0] sm:$0xf] %v5501_v49  ;;  %vm4964_vm12 = vcmp.ge.f32.partialorder %v4910_v14, 0.0  ;;  %v5018_v58 = vmul.f32 0.01, %v4910_v14  ;;  %8811 = vmatmul.bf16.gmra.mxu0 %v11784_v38  ;;  %v5934_v5 = vpack.c.bf16 %v16827_v23, %v16827_v23  ;;  %v13410_v51 = vld [vmem:[#allocation5 + $0x140] sm:$0xff] }
 0x656   : > { %5770 = vst [vmem:[#allocation2 + $0x6a0] sm:$0xf] %v5716_v26  ;;  %8514 = vmatmul.bf16.gmra.mxu1 %v12348_v28  ;;  %v4853_v29 = vmul.f32 %v16642_v3, %v4793_v57  ;;  %v11851_v39 = vld [vmem:[#allocation2 + $0x290] sm:$0xf]  ;;  %9023 = vmatpush.bf16.msrb.mxu2 %v13410_v51 }
 0x657   : > { %5987 = vst [vmem:[#allocation2 + $0x6a4] sm:$0xf] %v5933_v37  ;;  %v5072_v40 = vsel %vm4964_vm12, %v4910_v14, %v5018_v58  ;;  %v17991_v58 = vld [vmem:[#allocation98_spill] sm:$0xff] }
 0x658   : > { %6039 = vst [vmem:[#allocation2 + $0x660] sm:$0xf] %v5501_v49  ;;  %v16861_v28 = vmul.f32 %v5387_v27, %v5072_v40  ;;  %v4363_v9 = vadd.f32 %v16053_v35, %v17991_v58  ;;  %v11817_v58 = vld [vmem:[#allocation2 + $0x26c] sm:$0xf0] }
 0x659   : > { %6092 = vst [vmem:[#allocation2 + $0x640] sm:$0xf] %v5716_v26 }
 0x65a   : > { %6146 = vst [vmem:[#allocation2 + $0x644] sm:$0xf] %v5933_v37  ;;  %v5612_v17 = vrot.slane %v16861_v28, 1  ;;  %v5828_v14 = vrot.slane %v16861_v28, 2  ;;  %v4507_v12 = vadd.f32 %v16080_v52, %v4363_v9  ;;  %v16879_v27 = vpop.f32.mrf.mxu2  ;;  %v5503_v52 = vpack.c.bf16 %v16836_v6, %v16836_v6 }
 0x65b   : > { %6198 = vst [vmem:[#allocation2 + $0x600] sm:$0xf] %v5501_v49  ;;  %v4794_v40 = vpop.f32.mrf.mxu0  ;;  %v11852_v9 = vor.u32 %v13213_v47, %v11851_v39  ;;  %v5397_v47 = vpop.permute.xlu2 %5396 }
 0x65c   : > { %6251 = vst [vmem:[#allocation2 + $0x5e0] sm:$0xf] %v5716_v26  ;;  %v5617_v18 = vsel %vm926_vm1, %v5611_v11, %v5612_v17  ;;  %v5834_v49 = vsel %vm5831_vm4, %v5827_v50, %v5828_v14  ;;  %v4911_v26 = vadd.f32 %v16658_v59, %v4853_v29  ;;  %v5392_v11 = vpop.permute.xlu1 %5391 }
 0x65d   : > { %6305 = vst [vmem:[#allocation2 + $0x5e4] sm:$0xf] %v5933_v37  ;;  %v12349_v38 = vld [vmem:[#allocation2 + $0x69c] sm:$0xf0]  ;;  %v4651_v37 = vadd.f32 %v16748_v8, %v4507_v12  ;;  %v5718_v8 = vpack.c.bf16 %v16847_v55, %v16847_v55 }
 0x65e   : > { %5556 = vst [vmem:[#allocation2 + $0x6e4] sm:$0xf] %v5502_v31  ;;  %v12352_v23 = vor.u32 %v13334_v1, %v12349_v38  ;;  %vm4965_vm13 = vcmp.ge.f32.partialorder %v4911_v26, 0.0  ;;  %v5019_v35 = vmul.f32 0.01, %v4911_v26 }
 0x65f   : > { %5771 = vst [vmem:[#allocation2 + $0x6c4] sm:$0xf] %v5717_v41  ;;  %v4795_v29 = vadd.f32 %v4794_v40, %v4651_v37  ;;  %v12383_v1 = vld [vmem:[#allocation2 + $0x6c0] sm:$0xf]  ;;  %v13200_v38 = vld [vmem:[#allocation2 + $0x24c] sm:$0xf] }
 0x660   : > { %5988 = vst [vmem:[#allocation2 + $0x6c8] sm:$0xf] %v5934_v5  ;;  %8636 = vmatmul.bf16.gmra.mxu2 %v12352_v23  ;;  %v5073_v50 = vsel %vm4965_vm13, %v4911_v26, %v5019_v35  ;;  %v5935_v23 = vpack.c.bf16 %v16851_v22, %v16851_v22  ;;  %v11820_v51 = vor.u32 %v13200_v38, %v11817_v58  ;;  %v13222_v38 = vld [vmem:[#allocation2 + $0x2f8] sm:$0xf0] }
 0x661   : > { %6040 = vst [vmem:[#allocation2 + $0x684] sm:$0xf] %v5502_v31  ;;  %v16883_v57 = vmul.f32 %v5392_v11, %v5073_v50  ;;  %v4854_v35 = vmul.f32 %v16642_v3, %v4795_v29  ;;  %v16905_v29 = vpop.f32.mrf.mxu3 }
 0x662   : > { %6093 = vst [vmem:[#allocation2 + $0x664] sm:$0xf] %v5717_v41 }
 0x663   : > { %6147 = vst [vmem:[#allocation2 + $0x668] sm:$0xf] %v5934_v5  ;;  %v5613_v26 = vrot.slane %v16883_v57, 1  ;;  %v5829_v6 = vrot.slane %v16883_v57, 2 }
 0x664   : > { %6199 = vst [vmem:[#allocation2 + $0x624] sm:$0xf] %v5502_v31  ;;  %v16892_v31 = vpop.f32.mrf.mxu1  ;;  %8697 = vmatmul.bf16.gmra.mxu3 %v11852_v9 }
 0x665   : > { %6252 = vst [vmem:[#allocation2 + $0x604] sm:$0xf] %v5717_v41  ;;  %v13347_v12 = vld [vmem:[#allocation2 + $0x6e0] sm:$0xf0]  ;;  %v5616_v55 = vsel %vm926_vm1, %v5612_v17, %v5613_v26  ;;  %v5833_v22 = vsel %vm5831_vm4, %v5828_v14, %v5829_v6  ;;  %v4912_v41 = vadd.f32 %v16658_v59, %v4854_v35  ;;  %8815 = vmatmul.bf16.gmra.mxu0 %v11820_v51 }
 0x666   : > { %6306 = vst [vmem:[#allocation2 + $0x608] sm:$0xf] %v5934_v5  ;;  %v12384_v37 = vor.u32 %v13347_v12, %v12383_v1  ;;  %v8607_v5 = vpop.f32.mrf.mxu2  ;;  %v5504_v17 = vpack.c.bf16 %v16861_v28, %v16861_v28  ;;  %v5719_v14 = vpack.c.bf16 %v5617_v18, %v5617_v18  ;;  %v5936_v59 = vpack.c.bf16 %v5834_v49, %v5834_v49  ;;  %v13343_v18 = vld [vmem:[#allocation2 + $0x6c4] sm:$0xf]  ;;  %v13402_v49 = vld [vmem:[#allocation5 + $0x100] sm:$0xff] }
 0x667   : > { %5557 = vst [vmem:[#allocation2 + $0x708] sm:$0xf] %v5503_v52  ;;  %vm4966_vm14 = vcmp.ge.f32.partialorder %v4912_v41, 0.0  ;;  %v5020_v3 = vmul.f32 0.01, %v4912_v41  ;;  %8901 = vmatpush.bf16.msrb.mxu1 %v13402_v49  ;;  %v5505_v35 = vpack.c.bf16 %v16883_v57, %v16883_v57  ;;  %v5720_v51 = vpack.c.bf16 %v5616_v55, %v5616_v55 }
 0x668   : > { %5772 = vst [vmem:[#allocation2 + $0x6e8] sm:$0xf] %v5718_v8  ;;  %8518 = vmatmul.bf16.gmra.mxu1 %v12384_v37 }
 0x669   : > { %5989 = vst [vmem:[#allocation2 + $0x6ec] sm:$0xf] %v5935_v23  ;;  %v5074_v11 = vsel %vm4966_vm14, %v4912_v41, %v5020_v3  ;;  %v13209_v41 = vld [vmem:[#allocation2 + $0x294] sm:$0xf]  ;;  %v5937_v3 = vpack.c.bf16 %v5833_v22, %v5833_v22  ;;  %v17992_v22 = vld [vmem:[#allocation32_spill] sm:$0xff] }
 0x66a   : > { %6041 = vst [vmem:[#allocation2 + $0x6a8] sm:$0xf] %v5503_v52  ;;  %v16901_v50 = vmul.f32 %v5397_v47, %v5074_v11 }
 0x66b   : > { %6094 = vst [vmem:[#allocation2 + $0x688] sm:$0xf] %v5718_v8 }
 0x66c   : > { %6148 = vst [vmem:[#allocation2 + $0x68c] sm:$0xf] %v5935_v23  ;;  %v5614_v40 = vrot.slane %v16901_v50, 1  ;;  %v5830_v39 = vrot.slane %v16901_v50, 2  ;;  %v8489_v1 = vpop.f32.mrf.mxu1  ;;  %v5506_v49 = vpack.c.bf16 %v16901_v50, %v16901_v50  ;;  %v13231_v50 = vld [vmem:[#allocation2 + $0x340] sm:$0xf0] }
 0x66d   : > { %6200 = vst [vmem:[#allocation2 + $0x648] sm:$0xf] %v5503_v52  ;;  %v8781_v52 = vpop.f32.mrf.mxu0 }
 0x66e   : > { %6253 = vst [vmem:[#allocation2 + $0x628] sm:$0xf] %v5718_v8  ;;  %v5615_v58 = vsel %vm926_vm1, %v5613_v26, %v5614_v40  ;;  %v5832_v28 = vsel %vm5831_vm4, %v5829_v6, %v5830_v39  ;;  %v16911_v8 = vpop.f32.mrf.mxu2  ;;  %v16914_v12 = vadd.f32 %v8781_v52, %v16777_v60  ;;  %v11887_v26 = vld [vmem:[#allocation2 + $0x2d8] sm:$0xf]  ;;  %v12419_v5 = vld [vmem:[#allocation2 + $0x708] sm:$0xf] }
 0x66f   : > { %6307 = vst [vmem:[#allocation2 + $0x62c] sm:$0xf] %v5935_v23  ;;  %v12385_v9 = vld [vmem:[#allocation2 + $0x6e4] sm:$0xf0]  ;;  %v11853_v6 = vld [vmem:[#allocation2 + $0x2b4] sm:$0xf0]  ;;  %v11888_v37 = vor.u32 %v13222_v38, %v11887_v26  ;;  %v5721_v38 = vpack.c.bf16 %v5615_v58, %v5615_v58 }
 0x670   : > { %5558 = vst [vmem:[#allocation2 + $0x72c] sm:$0xf] %v5504_v17  ;;  %v12388_v23 = vor.u32 %v13343_v18, %v12385_v9  ;;  %v11856_v47 = vor.u32 %v13209_v41, %v11853_v6  ;;  %v11923_v58 = vld [vmem:[#allocation2 + $0x320] sm:$0xf] }
 0x671   : > { %5773 = vst [vmem:[#allocation2 + $0x70c] sm:$0xf] %v5719_v14 }
 0x672   : > { %5990 = vst [vmem:[#allocation2 + $0x710] sm:$0xf] %v5936_v59  ;;  %8640 = vmatmul.bf16.gmra.mxu2 %v12388_v23 }
 0x673   : > { %6042 = vst [vmem:[#allocation2 + $0x6cc] sm:$0xf] %v5504_v17 }
 0x674   : > { %6095 = vst [vmem:[#allocation2 + $0x6ac] sm:$0xf] %v5719_v14  ;;  %8702 = vmatmul.bf16.gmra.mxu3 %v11888_v37  ;;  %v8491_v9 = vpop.f32.mrf.mxu1  ;;  %v5938_v37 = vpack.c.bf16 %v5832_v28, %v5832_v28 }
 0x675   : > { %6149 = vst [vmem:[#allocation2 + $0x6b0] sm:$0xf] %v5936_v59  ;;  %v16918_v52 = vpop.f32.mrf.mxu0  ;;  %8819 = vmatmul.bf16.gmra.mxu0 %v11856_v47 }
 0x676   : > { %6201 = vst [vmem:[#allocation2 + $0x66c] sm:$0xf] %v5504_v17  ;;  %v8611_v18 = vpop.f32.mrf.mxu2 }
 0x677   : > { %6254 = vst [vmem:[#allocation2 + $0x64c] sm:$0xf] %v5719_v14  ;;  %v13356_v60 = vld [vmem:[#allocation2 + $0x728] sm:$0xf0]  ;;  %v8668_v57 = vpop.f32.mrf.mxu3  ;;  %v16920_v17 = vadd.f32 %v8611_v18, %v8489_v1  ;;  %v17993_v14 = vrot.slane %v17992_v22, 1  ;;  %v17994_v1 = vrot.slane %v17992_v22, 2 }
 0x678   : > { %6308 = vst [vmem:[#allocation2 + $0x650] sm:$0xf] %v5936_v59  ;;  %v12420_v11 = vor.u32 %v13356_v60, %v12419_v5  ;;  %v16923_v55 = vadd.f32 %v8668_v57, %v16164_v20  ;;  %v13352_v41 = vld [vmem:[#allocation2 + $0x70c] sm:$0xf] }
 0x679   : > { %5559 = vst [vmem:[#allocation2 + $0x750] sm:$0xf] %v5505_v35  ;;  %v5668_v59 = vsel %vm926_vm1, %v5614_v40, %v17993_v14  ;;  %v5885_v23 = vsel %vm5831_vm4, %v5830_v39, %v17994_v1  ;;  %v11924_v39 = vor.u32 %v13231_v50, %v11923_v58  ;;  %vm10124_vm4 = vcmask 64512  }
 0x67a   : > { %5774 = vst [vmem:[#allocation2 + $0x730] sm:$0xf] %v5720_v51  ;;  %8521 = vmatmul.bf16.gmra.mxu1 %v12420_v11  ;;  %v5722_v20 = vpack.c.bf16 %v5668_v59, %v5668_v59  ;;  %v5939_v60 = vpack.c.bf16 %v5885_v23, %v5885_v23  ;;  %v13425_v23 = vld [vmem:[#allocation5 + $0x1b8] sm:$0xff] }
 0x67b   : > { %5991 = vst [vmem:[#allocation2 + $0x734] sm:$0xf] %v5937_v3  ;;  %9138 = vmatpush.bf16.msra.mxu3 %v13425_v23 }
 0x67c   : > { %6043 = vst [vmem:[#allocation2 + $0x6f0] sm:$0xf] %v5505_v35  ;;  %v8493_v26 = vpop.f32.mrf.mxu1 }
 0x67d   : > { %6096 = vst [vmem:[#allocation2 + $0x6d0] sm:$0xf] %v5720_v51  ;;  %v8786_v6 = vpop.f32.mrf.mxu0 }
 0x67e   : > { %6150 = vst [vmem:[#allocation2 + $0x6d4] sm:$0xf] %v5937_v3  ;;  %v8613_v40 = vpop.f32.mrf.mxu2  ;;  %v13449_v6 = vld [vmem:[#allocation7 + $0x38] sm:$0xff] }
 0x67f   : > { %6202 = vst [vmem:[#allocation2 + $0x690] sm:$0xf] %v5505_v35  ;;  %v8670_v47 = vpop.f32.mrf.mxu3  ;;  %9802 = vmatpush.bf16.msra.mxu2 %v13449_v6 }
 0x680   : > { %6255 = vst [vmem:[#allocation2 + $0x670] sm:$0xf] %v5720_v51  ;;  %v13218_v51 = vld [vmem:[#allocation2 + $0x2dc] sm:$0xf]  ;;  %v12455_v9 = vld [vmem:[#allocation2 + $0x750] sm:$0xf] }
 0x681   : > { %6309 = vst [vmem:[#allocation2 + $0x674] sm:$0xf] %v5937_v3  ;;  %v12421_v5 = vld [vmem:[#allocation2 + $0x72c] sm:$0xf0]  ;;  %v11892_v28 = vor.u32 %v13218_v51, %v11889_v0 }
 0x682   : > { %5560 = vst [vmem:[#allocation2 + $0x774] sm:$0xf] %v5506_v49  ;;  %v12424_v35 = vor.u32 %v13352_v41, %v12421_v5  ;;  %v13441_v0 = vld [vmem:[#allocation5 + $0x238] sm:$0xff] }
 0x683   : > { %5775 = vst [vmem:[#allocation2 + $0x754] sm:$0xf] %v5721_v38  ;;  %9382 = vmatpush.bf16.msra.mxu1 %v13441_v0 }
 0x684   : > { %5776 = vst [vmem:[#allocation2 + $0x778] sm:$0xf] %v5722_v20  ;;  %8643 = vmatmul.bf16.gmra.mxu2 %v12424_v35  ;;  %8706 = vmatmul.bf16.gmra.mxu3 %v11924_v39  ;;  %v16935_v3 = vpop.f32.mrf.mxu1  ;;  %v13240_v35 = vld [vmem:[#allocation2 + $0x388] sm:$0xf0]  ;;  %v13227_v39 = vld [vmem:[#allocation2 + $0x324] sm:$0xf] }
 0x685   : > { %5992 = vst [vmem:[#allocation2 + $0x758] sm:$0xf] %v5938_v37  ;;  %v16937_v11 = vpop.f32.mrf.mxu0  ;;  %8824 = vmatmul.bf16.gmra.mxu0 %v11892_v28 }
 0x686   : > { %5993 = vst [vmem:[#allocation2 + $0x77c] sm:$0xf] %v5939_v60  ;;  %v8615_v57 = vpop.f32.mrf.mxu2 }
 0x687   : > { %6044 = vst [vmem:[#allocation2 + $0x714] sm:$0xf] %v5506_v49  ;;  %v8672_v22 = vpop.f32.mrf.mxu3  ;;  %v16939_v59 = vadd.f32 %v8615_v57, %v8493_v26 }
 0x688   : > { %6097 = vst [vmem:[#allocation2 + $0x6f4] sm:$0xf] %v5721_v38  ;;  %v8673_v1 = vadd.f32 %v8672_v22, %v16215_v7 }
 0x689   : > { %6098 = vst [vmem:[#allocation2 + $0x718] sm:$0xf] %v5722_v20  ;;  %v13365_v18 = vld [vmem:[#allocation2 + $0x770] sm:$0xf0] }
 0x68a   : > { %6151 = vst [vmem:[#allocation2 + $0x6f8] sm:$0xf] %v5938_v37  ;;  %v12456_v14 = vor.u32 %v13365_v18, %v12455_v9  ;;  %v13361_v41 = vld [vmem:[#allocation2 + $0x754] sm:$0xf]  ;;  %v11535_v9 = vld [vmem:[#allocation2 + $0x10] sm:$0xf] }
 0x68b   : > { %6152 = vst [vmem:[#allocation2 + $0x71c] sm:$0xf] %v5939_v60  ;;  %v12457_v5 = vld [vmem:[#allocation2 + $0x774] sm:$0xf0] }
 0x68c   : > { %6203 = vst [vmem:[#allocation2 + $0x6b4] sm:$0xf] %v5506_v49  ;;  %8524 = vmatmul.bf16.gmra.mxu1 %v12456_v14  ;;  %v8498_v40 = vpop.f32.mrf.mxu1  ;;  %v12460_v58 = vor.u32 %v13361_v41, %v12457_v5  ;;  %v13433_v49 = vld [vmem:[#allocation5 + $0x1f8] sm:$0xff]  ;;  %v11537_v14 = vld [vmem:[#allocation2 + $0x34] sm:$0xf0] }
 0x68d   : > { %6256 = vst [vmem:[#allocation2 + $0x694] sm:$0xf] %v5721_v38  ;;  %v8790_v47 = vpop.f32.mrf.mxu0  ;;  %v11959_v38 = vld [vmem:[#allocation2 + $0x368] sm:$0xf]  ;;  %9260 = vmatpush.bf16.msra.mxu0 %v13433_v49  ;;  %v13129_v41 = vld [vmem:[#allocation2 + $0x14] sm:$0xf] }
 0x68e   : > { %6257 = vst [vmem:[#allocation2 + $0x6b8] sm:$0xf] %v5722_v20  ;;  %v16943_v26 = vadd.f32 %v8790_v47, %v16923_v55  ;;  %v16945_v50 = vpop.f32.mrf.mxu2  ;;  %v11925_v20 = vld [vmem:[#allocation2 + $0x344] sm:$0xf0]  ;;  %v13249_v47 = vld [vmem:[#allocation2 + $0x3d0] sm:$0xf0] }
 0x68f   : > { %6310 = vst [vmem:[#allocation2 + $0x698] sm:$0xf] %v5938_v37  ;;  %v8674_v7 = vpop.f32.mrf.mxu3  ;;  %v11960_v37 = vor.u32 %v13240_v35, %v11959_v38  ;;  %v11928_v51 = vor.u32 %v13227_v39, %v11925_v20  ;;  %v11540_v35 = vor.u32 %v13129_v41, %v11537_v14  ;;  %v11995_v49 = vld [vmem:[#allocation2 + $0x3b0] sm:$0xf]  ;;  %v8553_v20 = vadd.f32 %v16241_v61, %v16186_v45  ;;  %v13236_v39 = vld [vmem:[#allocation2 + $0x36c] sm:$0xf] }
 0x690   : > { %6311 = vst [vmem:[#allocation2 + $0x6bc] sm:$0xf] %v5939_v60  ;;  %v13133_v60 = vld [vmem:[#allocation2 + $0x30] sm:$0xf0]  ;;  %v11961_v38 = vld [vmem:[#allocation2 + $0x38c] sm:$0xf0] }
 0x691   : > { %v11536_v57 = vor.u32 %v13133_v60, %v11535_v9  ;;  %v8675_v60 = vadd.f32 %v8674_v7, %v8553_v20  ;;  %v11573_v45 = vld [vmem:[#allocation2 + $0x7c] sm:$0xf0]  ;;  %v11997_v20 = vld [vmem:[#allocation2 + $0x3d4] sm:$0xf0] }
 0x694   : > { %8646 = vmatmul.bf16.gmra.mxu2 %v12460_v58  ;;  %8710 = vmatmul.bf16.gmra.mxu3 %v11960_v37  ;;  %v8499_v28 = vpop.f32.mrf.mxu1  ;;  %v11996_v37 = vor.u32 %v13249_v47, %v11995_v49  ;;  %v13138_v47 = vld [vmem:[#allocation2 + $0x5c] sm:$0xf] }
 0x695   : > { %v8792_v55 = vpop.f32.mrf.mxu0  ;;  %8828 = vmatmul.bf16.gmra.mxu0 %v11928_v51  ;;  %v13142_v51 = vld [vmem:[#allocation2 + $0x78] sm:$0xf0]  ;;  %v11576_v49 = vor.u32 %v13138_v47, %v11573_v45 }
 0x696   : > { %v11964_v55 = vor.u32 %v13236_v39, %v11961_v38  ;;  %v12031_v38 = vld [vmem:[#allocation2 + $0x3f8] sm:$0xf] }
 0x697   : > { %v8677_v18 = vpop.f32.mrf.mxu3 }
 0x698   : > { %v8620_v22 = vpop.f32.mrf.mxu2  ;;  %v11571_v18 = vld [vmem:[#allocation2 + $0x58] sm:$0xf] }
 0x699   : > { %v11572_v14 = vor.u32 %v13142_v51, %v11571_v18  ;;  %v11607_v18 = vld [vmem:[#allocation2 + $0xa0] sm:$0xf] }
 0x69c   : > { %8902 = vmatmul.bf16.vlgmr.msrb.gmra.mxu1 %v11536_v57  ;;  %v8502_v23 = vpop.f32.mrf.mxu1 }
 0x69d   : > { %v8794_v6 = vpop.f32.mrf.mxu0 }
 0x69e   : > { %v16947_v5 = vadd.f32 %v8794_v6, %v8673_v1 }
 0x69f   : > { %v8678_v40 = vpop.f32.mrf.mxu3 }
 0x6a0   : > { %v8621_v58 = vpop.f32.mrf.mxu2 }
 0x6a1   : > { %v16949_v0 = vadd.f32 %v8621_v58, %v8499_v28  ;;  %v13258_v58 = vld [vmem:[#allocation2 + $0x418] sm:$0xf0] }
 0x6a2   : > { %v12032_v39 = vor.u32 %v13258_v58, %v12031_v38  ;;  %v13267_v38 = vld [vmem:[#allocation2 + $0x460] sm:$0xf0] }
 0x6a4   : > { %9024 = vmatmul.bf16.vlgmr.msrb.gmra.mxu2 %v11540_v35  ;;  %8715 = vmatmul.bf16.gmra.mxu3 %v11996_v37  ;;  %v8504_v1 = vpop.f32.mrf.mxu1  ;;  %v8557_v37 = vadd.f32 %v16288_v36, %v16245_v53 }
 0x6a5   : > { %v8796_v9 = vpop.f32.mrf.mxu0  ;;  %8832 = vmatmul.bf16.gmra.mxu0 %v11964_v55 }
 0x6a6   : > { %v16953_v57 = vadd.f32 %v8796_v9, %v8675_v60  ;;  %v8679_v51 = vadd.f32 %v8678_v40, %v8557_v37  ;;  %v13147_v40 = vld [vmem:[#allocation2 + $0xa4] sm:$0xf]  ;;  %v13424_v37 = vld [vmem:[#allocation5 + $0x1b0] sm:$0xff] }
 0x6a7   : > { %v8681_v22 = vpop.f32.mrf.mxu3  ;;  %9139 = vmatpush.bf16.msra.mxu3 %v13424_v37 }
 0x6a8   : > { %v8682_v28 = vadd.f32 %v8681_v22, %v16338_v46  ;;  %v13245_v46 = vld [vmem:[#allocation2 + $0x3b4] sm:$0xf] }
 0x6a9   : > { %v12000_v55 = vor.u32 %v13245_v46, %v11997_v20  ;;  %v12033_v46 = vld [vmem:[#allocation2 + $0x41c] sm:$0xf0] }
 0x6ab   : > { %v8624_v6 = vpop.f32.mrf.mxu2 }
 0x6ac   : > { %8907 = vmatmul.bf16.gmra.mxu1 %v11572_v14  ;;  %v16956_v41 = vadd.f32 %v8624_v6, %v8502_v23  ;;  %v13151_v23 = vld [vmem:[#allocation2 + $0xc0] sm:$0xf0] }
 0x6ad   : > { %v8506_v61 = vpop.f32.mrf.mxu1  ;;  %v8799_v7 = vpop.f32.mrf.mxu0  ;;  %v11608_v6 = vor.u32 %v13151_v23, %v11607_v18  ;;  %v11643_v18 = vld [vmem:[#allocation2 + $0xe8] sm:$0xf] }
 0x6ae   : > { %v11609_v7 = vld [vmem:[#allocation2 + $0xc4] sm:$0xf0] }
 0x6af   : > { %v8683_v35 = vpop.f32.mrf.mxu3  ;;  %v11612_v20 = vor.u32 %v13147_v40, %v11609_v7  ;;  %v11645_v40 = vld [vmem:[#allocation2 + $0x10c] sm:$0xf0] }
 0x6b3   : > { %v8626_v60 = vpop.f32.mrf.mxu2 }
 0x6b4   : > { %9029 = vmatmul.bf16.gmra.mxu2 %v11576_v49  ;;  %8719 = vmatmul.bf16.gmra.mxu3 %v12032_v39  ;;  %v13448_v39 = vld [vmem:[#allocation7 + $0x30] sm:$0xff]  ;;  %v12067_v60 = vld [vmem:[#allocation2 + $0x440] sm:$0xf] }
 0x6b5   : > { %v8508_v1 = vpop.f32.mrf.mxu1  ;;  %v8800_v9 = vpop.f32.mrf.mxu0  ;;  %8837 = vmatmul.bf16.gmra.mxu0 %v12000_v55  ;;  %9803 = vmatpush.bf16.msra.mxu2 %v13448_v39 }
 0x6b6   : > { %v16960_v22 = vadd.f32 %v8800_v9, %v8679_v51  ;;  %v13254_v51 = vld [vmem:[#allocation2 + $0x3fc] sm:$0xf] }
 0x6b7   : > { %v8685_v14 = vpop.f32.mrf.mxu3  ;;  %v12036_v55 = vor.u32 %v13254_v51, %v12033_v46 }
 0x6b8   : > { %v8686_v45 = vadd.f32 %v8685_v14, %v16398_v16  ;;  %v12068_v16 = vor.u32 %v13267_v38, %v12067_v60  ;;  %v8570_v38 = vadd.f32 %v16501_v56, %v16443_v34  ;;  %v13276_v60 = vld [vmem:[#allocation2 + $0x4a8] sm:$0xf0]  ;;  %v13169_v34 = vld [vmem:[#allocation2 + $0x150] sm:$0xf0] }
 0x6bc   : > { %8911 = vmatmul.bf16.gmra.mxu1 %v11608_v6 }
 0x6bd   : > { %v8803_v47 = vpop.f32.mrf.mxu0 }
 0x6be   : > { %v16965_v58 = vadd.f32 %v8803_v47, %v8682_v28  ;;  %v13440_v47 = vld [vmem:[#allocation5 + $0x230] sm:$0xff] }
 0x6bf   : > { %v8628_v53 = vpop.f32.mrf.mxu2  ;;  %v8687_v49 = vpop.f32.mrf.mxu3  ;;  %9383 = vmatpush.bf16.msra.mxu1 %v13440_v47 }
 0x6c0   : > { %v16963_v36 = vadd.f32 %v8628_v53, %v8506_v61  ;;  %v13160_v61 = vld [vmem:[#allocation2 + $0x108] sm:$0xf0] }
 0x6c1   : > { %v8511_v35 = vpop.f32.mrf.mxu1  ;;  %v11644_v7 = vor.u32 %v13160_v61, %v11643_v18  ;;  %v13432_v53 = vld [vmem:[#allocation5 + $0x1f0] sm:$0xff]  ;;  %v13263_v18 = vld [vmem:[#allocation2 + $0x444] sm:$0xf] }
 0x6c2   : > { %9261 = vmatpush.bf16.msra.mxu0 %v13432_v53  ;;  %v12103_v61 = vld [vmem:[#allocation2 + $0x488] sm:$0xf] }
 0x6c4   : > { %9033 = vmatmul.bf16.gmra.mxu2 %v11612_v20  ;;  %8723 = vmatmul.bf16.gmra.mxu3 %v12068_v16  ;;  %v13156_v20 = vld [vmem:[#allocation2 + $0xec] sm:$0xf] }
 0x6c5   : > { %v8805_v28 = vpop.f32.mrf.mxu0  ;;  %8841 = vmatmul.bf16.gmra.mxu0 %v12036_v55  ;;  %v11648_v46 = vor.u32 %v13156_v20, %v11645_v40  ;;  %v8566_v55 = vadd.f32 %v16447_v42, %v16370_v2  ;;  %v11681_v2 = vld [vmem:[#allocation2 + $0x154] sm:$0xf0] }
 0x6c6   : > { %v12104_v28 = vor.u32 %v13276_v60, %v12103_v61  ;;  %v13285_v60 = vld [vmem:[#allocation2 + $0x4f0] sm:$0xf0] }
 0x6c7   : > { %v8630_v23 = vpop.f32.mrf.mxu2  ;;  %v8690_v6 = vpop.f32.mrf.mxu3 }
 0x6c8   : > { %v16967_v9 = vadd.f32 %v8630_v23, %v8508_v1  ;;  %v12069_v23 = vld [vmem:[#allocation2 + $0x464] sm:$0xf0]  ;;  %v8688_v6 = vadd.f32 %v8687_v49, %v8566_v55  ;;  %v13165_v49 = vld [vmem:[#allocation2 + $0x134] sm:$0xf] }
 0x6c9   : > { %v8512_v14 = vpop.f32.mrf.mxu1  ;;  %v12072_v56 = vor.u32 %v13263_v18, %v12069_v23  ;;  %v12139_v23 = vld [vmem:[#allocation2 + $0x4d0] sm:$0xf] }
 0x6ca   : > { %v12140_v18 = vor.u32 %v13285_v60, %v12139_v23  ;;  %v12175_v23 = vld [vmem:[#allocation2 + $0x518] sm:$0xf] }
 0x6cc   : > { %8915 = vmatmul.bf16.gmra.mxu1 %v11644_v7 }
 0x6cd   : > { %v8807_v35 = vpop.f32.mrf.mxu0 }
 0x6ce   : > { %v16971_v1 = vadd.f32 %v8807_v35, %v8686_v45  ;;  %v11679_v45 = vld [vmem:[#allocation2 + $0x130] sm:$0xf] }
 0x6cf   : > { %v8691_v39 = vpop.f32.mrf.mxu3  ;;  %v11680_v35 = vor.u32 %v13169_v34, %v11679_v45  ;;  %v13178_v34 = vld [vmem:[#allocation2 + $0x198] sm:$0xf0] }
 0x6d0   : > { %v8692_v16 = vadd.f32 %v8691_v39, %v8570_v38 }
 0x6d1   : > { %v8633_v37 = vpop.f32.mrf.mxu2 }
 0x6d3   : > { %v8515_v51 = vpop.f32.mrf.mxu1 }
 0x6d4   : > { %9037 = vmatmul.bf16.gmra.mxu2 %v11648_v46  ;;  %8728 = vmatmul.bf16.gmra.mxu3 %v12104_v28  ;;  %v11684_v46 = vor.u32 %v13165_v49, %v11681_v2  ;;  %v12105_v28 = vld [vmem:[#allocation2 + $0x4ac] sm:$0xf0]  ;;  %v11717_v2 = vld [vmem:[#allocation2 + $0x19c] sm:$0xf0]  ;;  %v13174_v49 = vld [vmem:[#allocation2 + $0x17c] sm:$0xf] }
 0x6d5   : > { %v8809_v7 = vpop.f32.mrf.mxu0  ;;  %8845 = vmatmul.bf16.gmra.mxu0 %v12072_v56 }
 0x6d6   : > { %v16975_v47 = vadd.f32 %v8809_v7, %v8688_v6  ;;  %v11715_v7 = vld [vmem:[#allocation2 + $0x178] sm:$0xf] }
 0x6d7   : > { %v8694_v40 = vpop.f32.mrf.mxu3 }
 0x6d8   : > { %v8695_v20 = vadd.f32 %v8694_v40, %v16516_v33  ;;  %v11716_v40 = vor.u32 %v13178_v34, %v11715_v7 }
 0x6d9   : > { %v8634_v53 = vpop.f32.mrf.mxu2 }
 0x6da   : > { %v16977_v38 = vadd.f32 %v8634_v53, %v8512_v14  ;;  %v13272_v14 = vld [vmem:[#allocation2 + $0x48c] sm:$0xf] }
 0x6db   : > { %v8517_v37 = vpop.f32.mrf.mxu1  ;;  %v12108_v33 = vor.u32 %v13272_v14, %v12105_v28 }
 0x6dc   : > { %8920 = vmatmul.bf16.gmra.mxu1 %v11680_v35 }
 0x6dd   : > { %v8812_v42 = vpop.f32.mrf.mxu0 }
 0x6df   : > { %v8696_v39 = vpop.f32.mrf.mxu3 }
 0x6e3   : > { %v8637_v61 = vpop.f32.mrf.mxu2 }
 0x6e4   : > { %9042 = vmatmul.bf16.gmra.mxu2 %v11684_v46  ;;  %v16980_v55 = vadd.f32 %v8637_v61, %v8515_v51  ;;  %8732 = vmatmul.bf16.gmra.mxu3 %v12140_v18  ;;  %v13294_v46 = vld [vmem:[#allocation2 + $0x538] sm:$0xf0]  ;;  %v11720_v61 = vor.u32 %v13174_v49, %v11717_v2  ;;  %v13281_v18 = vld [vmem:[#allocation2 + $0x4d4] sm:$0xf]  ;;  %v11753_v49 = vld [vmem:[#allocation2 + $0x1e4] sm:$0xf0] }
 0x6e5   : > { %v8519_v6 = vpop.f32.mrf.mxu1  ;;  %v8813_v56 = vpop.f32.mrf.mxu0  ;;  %8850 = vmatmul.bf16.gmra.mxu0 %v12108_v33  ;;  %v12176_v28 = vor.u32 %v13294_v46, %v12175_v23 }
 0x6e6   : > { %v16982_v45 = vadd.f32 %v8813_v56, %v8692_v16  ;;  %v12141_v16 = vld [vmem:[#allocation2 + $0x4f4] sm:$0xf0]  ;;  %v11751_v56 = vld [vmem:[#allocation2 + $0x1c0] sm:$0xf] }
 0x6e7   : > { %v8698_v53 = vpop.f32.mrf.mxu3  ;;  %v12144_v34 = vor.u32 %v13281_v18, %v12141_v16 }
 0x6e8   : > { %v8699_v35 = vadd.f32 %v8698_v53, %v16556_v54  ;;  %v13187_v54 = vld [vmem:[#allocation2 + $0x1e0] sm:$0xf0] }
 0x6e9   : > { %v11752_v53 = vor.u32 %v13187_v54, %v11751_v56  ;;  %v8579_v54 = vadd.f32 %v16572_v4, %v16541_v21  ;;  %v11789_v21 = vld [vmem:[#allocation2 + $0x22c] sm:$0xf0] }
 0x6eb   : > { %v8639_v37 = vpop.f32.mrf.mxu2 }
 0x6ec   : > { %8924 = vmatmul.bf16.gmra.mxu1 %v11716_v40  ;;  %v13447_v40 = vld [vmem:[#allocation7 + $0x28] sm:$0xff] }
 0x6ed   : > { %v8520_v51 = vpop.f32.mrf.mxu1  ;;  %v8816_v42 = vpop.f32.mrf.mxu0  ;;  %v13431_v37 = vld [vmem:[#allocation5 + $0x1e8] sm:$0xff]  ;;  %9804 = vmatpush.bf16.msra.mxu2 %v13447_v40 }
 0x6ee   : > { %v16985_v39 = vadd.f32 %v8816_v42, %v8695_v20  ;;  %v13423_v20 = vld [vmem:[#allocation5 + $0x1a8] sm:$0xff]  ;;  %9262 = vmatpush.bf16.msra.mxu0 %v13431_v37 }
 0x6ef   : > { %v8700_v60 = vpop.f32.mrf.mxu3  ;;  %v13439_v51 = vld [vmem:[#allocation5 + $0x228] sm:$0xff]  ;;  %9140 = vmatpush.bf16.msra.mxu3 %v13423_v20 }
 0x6f0   : > { %9384 = vmatpush.bf16.msra.mxu1 %v13439_v51  ;;  %v8701_v56 = vadd.f32 %v8700_v60, %v8579_v54  ;;  %v13192_v60 = vld [vmem:[#allocation2 + $0x20c] sm:$0xf]  ;;  %v12213_v54 = vld [vmem:[#allocation2 + $0x584] sm:$0xf0] }
 0x6f4   : > { %9046 = vmatmul.bf16.gmra.mxu2 %v11720_v61  ;;  %8736 = vmatmul.bf16.gmra.mxu3 %v12176_v28  ;;  %v13183_v61 = vld [vmem:[#allocation2 + $0x1c4] sm:$0xf] }
 0x6f5   : > { %v8641_v14 = vpop.f32.mrf.mxu2  ;;  %v8818_v33 = vpop.f32.mrf.mxu0  ;;  %8854 = vmatmul.bf16.gmra.mxu0 %v12144_v34  ;;  %v13303_v28 = vld [vmem:[#allocation2 + $0x580] sm:$0xf0]  ;;  %v11756_v18 = vor.u32 %v13183_v61, %v11753_v49 }
 0x6f6   : > { %v12177_v14 = vld [vmem:[#allocation2 + $0x53c] sm:$0xf0]  ;;  %v13290_v33 = vld [vmem:[#allocation2 + $0x51c] sm:$0xf] }
 0x6f7   : > { %v8522_v6 = vpop.f32.mrf.mxu1  ;;  %v8703_v7 = vpop.f32.mrf.mxu3  ;;  %v12180_v20 = vor.u32 %v13290_v33, %v12177_v14  ;;  %v12247_v14 = vld [vmem:[#allocation2 + $0x5a8] sm:$0xf] }
 0x6f8   : > { %v12211_v6 = vld [vmem:[#allocation2 + $0x560] sm:$0xf] }
 0x6f9   : > { %v12212_v34 = vor.u32 %v13303_v28, %v12211_v6  ;;  %v11792_v6 = vor.u32 %v13192_v60, %v11789_v21 }
 0x6fc   : > { %8928 = vmatmul.bf16.gmra.mxu1 %v11752_v53  ;;  %v13196_v53 = vld [vmem:[#allocation2 + $0x228] sm:$0xf0] }
 0x6fd   : > { %v8642_v42 = vpop.f32.mrf.mxu2  ;;  %v8820_v46 = vpop.f32.mrf.mxu0 }
 0x6fe   : > { %v16987_v23 = vadd.f32 %v8820_v46, %v8699_v35  ;;  %v11787_v35 = vld [vmem:[#allocation2 + $0x208] sm:$0xf] }
 0x6ff   : > { %v8523_v2 = vpop.f32.mrf.mxu1  ;;  %v8704_v16 = vpop.f32.mrf.mxu3  ;;  %v11788_v42 = vor.u32 %v13196_v53, %v11787_v35  ;;  %v13205_v53 = vld [vmem:[#allocation2 + $0x270] sm:$0xf0]  ;;  %v11823_v35 = vld [vmem:[#allocation2 + $0x250] sm:$0xf] }
 0x700   : > { %v11824_v21 = vor.u32 %v13205_v53, %v11823_v35  ;;  %v13422_v35 = vld [vmem:[#allocation5 + $0x1a0] sm:$0xff] }
 0x701   : > { %9141 = vmatpush.bf16.msra.mxu3 %v13422_v35 }
 0x704   : > { %9050 = vmatmul.bf16.gmra.mxu2 %v11756_v18  ;;  %8741 = vmatmul.bf16.gmra.mxu3 %v12212_v34  ;;  %v13312_v18 = vld [vmem:[#allocation2 + $0x5c8] sm:$0xf0]  ;;  %v8583_v34 = vadd.f32 %v16606_v15, %v16568_v44  ;;  %v8540_v44 = vadd.f32 %v16111_v30, %v16078_v10 }
 0x705   : > { %v8822_v40 = vpop.f32.mrf.mxu0  ;;  %8858 = vmatmul.bf16.gmra.mxu0 %v12180_v20  ;;  %v12248_v33 = vor.u32 %v13312_v18, %v12247_v14  ;;  %v13308_v30 = vld [vmem:[#allocation2 + $0x5ac] sm:$0xf] }
 0x706   : > { %v16991_v51 = vadd.f32 %v8822_v40, %v8701_v56  ;;  %v13299_v56 = vld [vmem:[#allocation2 + $0x564] sm:$0xf]  ;;  %v8662_v15 = vadd.f32 %v16806_v62, %v8540_v44 }
 0x707   : > { %v8644_v7 = vpop.f32.mrf.mxu2  ;;  %v8707_v2 = vpop.f32.mrf.mxu3  ;;  %v12216_v20 = vor.u32 %v13299_v56, %v12213_v54  ;;  %v12249_v56 = vld [vmem:[#allocation2 + $0x5cc] sm:$0xf0] }
 0x708   : > { %v8708_v49 = vadd.f32 %v8707_v2, %v16635_v19  ;;  %v8705_v7 = vadd.f32 %v8704_v16, %v8583_v34  ;;  %v8784_v60 = vadd.f32 %v16918_v52, %v8662_v15 }
 0x709   : > { %v8525_v37 = vpop.f32.mrf.mxu1 }
 0x70c   : > { %8933 = vmatmul.bf16.gmra.mxu1 %v11788_v42 }
 0x70d   : > { %v8825_v4 = vpop.f32.mrf.mxu0 }
 0x70f   : > { %v8645_v46 = vpop.f32.mrf.mxu2  ;;  %v8709_v28 = vpop.f32.mrf.mxu3 }
 0x711   : > { %v8526_v61 = vpop.f32.mrf.mxu1 }
 0x712   : > { %v11825_v61 = vld [vmem:[#allocation2 + $0x274] sm:$0xf0] }
 0x714   : > { %9055 = vmatmul.bf16.gmra.mxu2 %v11792_v6  ;;  %8745 = vmatmul.bf16.gmra.mxu3 %v12248_v33  ;;  %v13201_v6 = vld [vmem:[#allocation2 + $0x254] sm:$0xf] }
 0x715   : > { %v8826_v40 = vpop.f32.mrf.mxu0  ;;  %8863 = vmatmul.bf16.gmra.mxu0 %v12216_v20  ;;  %v11828_v33 = vor.u32 %v13201_v6, %v11825_v61 }
 0x716   : > { %v16996_v2 = vadd.f32 %v8826_v40, %v8705_v7  ;;  %v13214_v7 = vld [vmem:[#allocation2 + $0x2b8] sm:$0xf0]  ;;  %v11859_v40 = vld [vmem:[#allocation2 + $0x298] sm:$0xf] }
 0x717   : > { %v8647_v19 = vpop.f32.mrf.mxu2  ;;  %v8711_v42 = vpop.f32.mrf.mxu3 }
 0x718   : > { %v8712_v4 = vadd.f32 %v8711_v42, %v16692_v25  ;;  %v12283_v25 = vld [vmem:[#allocation2 + $0x5f0] sm:$0xf]  ;;  %v12252_v19 = vor.u32 %v13308_v30, %v12249_v56  ;;  %v13446_v42 = vld [vmem:[#allocation7 + $0x20] sm:$0xff] }
 0x719   : > { %v8903_v37 = vpop.f32.mrf.mxu1  ;;  %9805 = vmatpush.bf16.msra.mxu2 %v13446_v42  ;;  %v12285_v56 = vld [vmem:[#allocation2 + $0x614] sm:$0xf0] }
 0x71a   : > { %v8904_v46 = vadd.f32 %v8903_v37, %v16914_v12  ;;  %v13321_v12 = vld [vmem:[#allocation2 + $0x610] sm:$0xf0]  ;;  %v11860_v37 = vor.u32 %v13214_v7, %v11859_v40 }
 0x71b   : > { %v12284_v10 = vor.u32 %v13321_v12, %v12283_v25  ;;  %v13317_v7 = vld [vmem:[#allocation2 + $0x5f4] sm:$0xf] }
 0x71c   : > { %8937 = vmatmul.bf16.gmra.mxu1 %v11824_v21  ;;  %v8544_v21 = vadd.f32 %v16139_v32, %v16105_v63  ;;  %v12319_v32 = vld [vmem:[#allocation2 + $0x638] sm:$0xf] }
 0x71d   : > { %v8829_v28 = vpop.f32.mrf.mxu0 }
 0x71e   : > { %v17004_v14 = vadd.f32 %v8829_v28, %v8708_v49  ;;  %v8666_v44 = vadd.f32 %v16905_v29, %v8544_v21  ;;  %v17996_v29 = vld [vmem:[#allocation114_spill] sm:$0xff] }
 0x71f   : > { %v8648_v16 = vpop.f32.mrf.mxu2  ;;  %v8713_v54 = vpop.f32.mrf.mxu3 }
 0x720   : > { %v11861_v16 = vld [vmem:[#allocation2 + $0x2bc] sm:$0xf0] }
 0x721   : > { %v8905_v18 = vpop.f32.mrf.mxu1 }
 0x722   : > { %v8906_v34 = vadd.f32 %v8905_v18, %v8784_v60  ;;  %v13210_v18 = vld [vmem:[#allocation2 + $0x29c] sm:$0xf] }
 0x723   : > { %v11864_v63 = vor.u32 %v13210_v18, %v11861_v16  ;;  %v11897_v16 = vld [vmem:[#allocation2 + $0x304] sm:$0xf0]  ;;  %v13219_v18 = vld [vmem:[#allocation2 + $0x2e4] sm:$0xf] }
 0x724   : > { %9059 = vmatmul.bf16.gmra.mxu2 %v11828_v33  ;;  %8749 = vmatmul.bf16.gmra.mxu3 %v12284_v10  ;;  %v13330_v33 = vld [vmem:[#allocation2 + $0x658] sm:$0xf0]  ;;  %v17995_v10 = vld [vmem:[#allocation35_spill] sm:$0xff] }
 0x725   : > { %v8831_v52 = vpop.f32.mrf.mxu0  ;;  %8867 = vmatmul.bf16.gmra.mxu0 %v12252_v19  ;;  %v8592_v30 = vadd.f32 %v17996_v29, %v17995_v10  ;;  %v13223_v19 = vld [vmem:[#allocation2 + $0x300] sm:$0xf0]  ;;  %v12321_v10 = vld [vmem:[#allocation2 + $0x65c] sm:$0xf0]  ;;  %v17997_v29 = vld [vmem:[#allocation70_spill] sm:$0xff] }
 0x726   : > { %v12288_v52 = vor.u32 %v13317_v7, %v12285_v56  ;;  %v12355_v56 = vld [vmem:[#allocation2 + $0x680] sm:$0xf] }
 0x727   : > { %v9025_v62 = vpop.f32.mrf.mxu2  ;;  %v8716_v49 = vpop.f32.mrf.mxu3 }
 0x728   : > { %v17006_v53 = vadd.f32 %v9025_v62, %v8904_v46  ;;  %v8788_v46 = vadd.f32 %v16937_v11, %v8666_v44  ;;  %v12320_v62 = vor.u32 %v13330_v33, %v12319_v32  ;;  %v8714_v11 = vadd.f32 %v8713_v54, %v8592_v30 }
 0x729   : > { %v8908_v20 = vpop.f32.mrf.mxu1  ;;  %v11900_v32 = vor.u32 %v13219_v18, %v11897_v16  ;;  %v13228_v16 = vld [vmem:[#allocation2 + $0x32c] sm:$0xf] }
 0x72a   : > { %v13430_v20 = vld [vmem:[#allocation5 + $0x1e0] sm:$0xff] }
 0x72b   : > { %9263 = vmatpush.bf16.msra.mxu0 %v13430_v20  ;;  %v11931_v20 = vld [vmem:[#allocation2 + $0x328] sm:$0xf] }
 0x72c   : > { %8941 = vmatmul.bf16.gmra.mxu1 %v11860_v37  ;;  %v11895_v37 = vld [vmem:[#allocation2 + $0x2e0] sm:$0xf] }
 0x72d   : > { %v8833_v60 = vpop.f32.mrf.mxu0  ;;  %v11896_v44 = vor.u32 %v13223_v19, %v11895_v37 }
 0x72e   : > { %v17014_v6 = vadd.f32 %v8833_v60, %v8712_v4  ;;  %v13438_v4 = vld [vmem:[#allocation5 + $0x220] sm:$0xff] }
 0x72f   : > { %v9027_v15 = vpop.f32.mrf.mxu2  ;;  %v8717_v12 = vpop.f32.mrf.mxu3  ;;  %9385 = vmatpush.bf16.msra.mxu1 %v13438_v4 }
 0x730   : > { %v17012_v61 = vadd.f32 %v9027_v15, %v8906_v34 }
 0x731   : > { %v8909_v28 = vpop.f32.mrf.mxu1 }
 0x732   : > { %v8910_v25 = vadd.f32 %v8909_v28, %v8788_v46 }
 0x734   : > { %9063 = vmatmul.bf16.gmra.mxu2 %v11864_v63  ;;  %8754 = vmatmul.bf16.gmra.mxu3 %v12320_v62  ;;  %v13339_v63 = vld [vmem:[#allocation2 + $0x6a0] sm:$0xf0]  ;;  %v13326_v62 = vld [vmem:[#allocation2 + $0x63c] sm:$0xf] }
 0x735   : > { %v8835_v40 = vpop.f32.mrf.mxu0  ;;  %8871 = vmatmul.bf16.gmra.mxu0 %v12288_v52  ;;  %v12356_v30 = vor.u32 %v13339_v63, %v12355_v56  ;;  %v12391_v63 = vld [vmem:[#allocation2 + $0x6c8] sm:$0xf]  ;;  %v13335_v56 = vld [vmem:[#allocation2 + $0x684] sm:$0xf] }
 0x736   : > { %v17018_v35 = vadd.f32 %v8835_v40, %v8714_v11  ;;  %v13232_v11 = vld [vmem:[#allocation2 + $0x348] sm:$0xf0] }
 0x737   : > { %v9030_v34 = vpop.f32.mrf.mxu2  ;;  %v8720_v42 = vpop.f32.mrf.mxu3  ;;  %v11932_v37 = vor.u32 %v13232_v11, %v11931_v20  ;;  %v13420_v11 = vld [vmem:[#allocation5 + $0x190] sm:$0xff] }
 0x738   : > { %v8721_v54 = vadd.f32 %v8720_v42, %v16804_v43  ;;  %v11933_v42 = vld [vmem:[#allocation2 + $0x34c] sm:$0xf0] }
 0x739   : > { %v8912_v49 = vpop.f32.mrf.mxu1 }
 0x73a   : > { %v8913_v21 = vadd.f32 %v8912_v49, %v16943_v26  ;;  %v8596_v26 = vadd.f32 %v16774_v13, %v17997_v29 }
 0x73c   : > { %8946 = vmatmul.bf16.gmra.mxu1 %v11896_v44  ;;  %v8718_v43 = vadd.f32 %v8717_v12, %v8596_v26  ;;  %v13421_v26 = vld [vmem:[#allocation5 + $0x198] sm:$0xff] }
 0x73d   : > { %v8838_v60 = vpop.f32.mrf.mxu0  ;;  %9142 = vmatpush.bf16.msra.mxu3 %v13421_v26 }
 0x73f   : > { %v9031_v15 = vpop.f32.mrf.mxu2  ;;  %v8722_v33 = vpop.f32.mrf.mxu3 }
 0x740   : > { %v17022_v46 = vadd.f32 %v9031_v15, %v8910_v25  ;;  %v12324_v25 = vor.u32 %v13326_v62, %v12321_v10  ;;  %v11936_v33 = vor.u32 %v13228_v16, %v11933_v42  ;;  %v13241_v10 = vld [vmem:[#allocation2 + $0x390] sm:$0xf0] }
 0x741   : > { %v8914_v28 = vpop.f32.mrf.mxu1  ;;  %9143 = vmatpush.bf16.msra.mxu3 %v13420_v11 }
 0x742   : > { %v13348_v28 = vld [vmem:[#allocation2 + $0x6e8] sm:$0xf0] }
 0x744   : > { %9068 = vmatmul.bf16.gmra.mxu2 %v11900_v32  ;;  %8758 = vmatmul.bf16.gmra.mxu3 %v12356_v30  ;;  %v12357_v32 = vld [vmem:[#allocation2 + $0x6a4] sm:$0xf0] }
 0x745   : > { %v8839_v19 = vpop.f32.mrf.mxu0  ;;  %8876 = vmatmul.bf16.gmra.mxu0 %v12324_v25  ;;  %v12360_v29 = vor.u32 %v13335_v56, %v12357_v32  ;;  %v13419_v25 = vld [vmem:[#allocation5 + $0x188] sm:$0xff]  ;;  %v12427_v32 = vld [vmem:[#allocation2 + $0x710] sm:$0xf] }
 0x746   : > { %v17028_v4 = vadd.f32 %v8839_v19, %v8718_v43  ;;  %v11967_v43 = vld [vmem:[#allocation2 + $0x370] sm:$0xf]  ;;  %9144 = vmatpush.bf16.msra.mxu3 %v13419_v25  ;;  %v12005_v25 = vld [vmem:[#allocation2 + $0x3dc] sm:$0xf0] }
 0x747   : > { %v9034_v7 = vpop.f32.mrf.mxu2  ;;  %v8724_v40 = vpop.f32.mrf.mxu3 }
 0x748   : > { %v17026_v34 = vadd.f32 %v9034_v7, %v8913_v21  ;;  %v8725_v13 = vadd.f32 %v8724_v40, %v16857_v48 }
 0x749   : > { %v8916_v52 = vpop.f32.mrf.mxu1 }
 0x74a   : > { %v8917_v49 = vadd.f32 %v8916_v52, %v16947_v5  ;;  %v12392_v5 = vor.u32 %v13348_v28, %v12391_v63  ;;  %v11969_v52 = vld [vmem:[#allocation2 + $0x394] sm:$0xf0] }
 0x74b   : > { %v13418_v63 = vld [vmem:[#allocation5 + $0x180] sm:$0xff] }
 0x74c   : > { %8950 = vmatmul.bf16.gmra.mxu1 %v11932_v37  ;;  %9145 = vmatpush.bf16.msra.mxu3 %v13418_v63  ;;  %v12429_v63 = vld [vmem:[#allocation2 + $0x734] sm:$0xf0] }
 0x74d   : > { %v8842_v44 = vpop.f32.mrf.mxu0 }
 0x74e   : > { %v17032_v21 = vadd.f32 %v8842_v44, %v8721_v54 }
 0x74f   : > { %v9036_v12 = vpop.f32.mrf.mxu2  ;;  %v8726_v60 = vpop.f32.mrf.mxu3 }
 0x750   : > { %v13237_v12 = vld [vmem:[#allocation2 + $0x374] sm:$0xf] }
 0x751   : > { %v8918_v15 = vpop.f32.mrf.mxu1  ;;  %v11972_v28 = vor.u32 %v13237_v12, %v11969_v52  ;;  %v12463_v12 = vld [vmem:[#allocation2 + $0x758] sm:$0xf] }
 0x752   : > { %v8919_v18 = vadd.f32 %v8918_v15, %v16953_v57  ;;  %v11968_v57 = vor.u32 %v13241_v10, %v11967_v43  ;;  %v13357_v15 = vld [vmem:[#allocation2 + $0x730] sm:$0xf0] }
 0x753   : > { %v12428_v56 = vor.u32 %v13357_v15, %v12427_v32  ;;  %v13259_v32 = vld [vmem:[#allocation2 + $0x420] sm:$0xf0] }
 0x754   : > { %9072 = vmatmul.bf16.gmra.mxu2 %v11936_v33  ;;  %8762 = vmatmul.bf16.gmra.mxu3 %v12392_v5  ;;  %v8605_v5 = vadd.f32 %v16879_v27, %v16832_v24  ;;  %v13429_v27 = vld [vmem:[#allocation5 + $0x1d8] sm:$0xff] }
 0x755   : > { %v8844_v62 = vpop.f32.mrf.mxu0  ;;  %8880 = vmatmul.bf16.gmra.mxu0 %v12360_v29  ;;  %v13445_v29 = vld [vmem:[#allocation7 + $0x18] sm:$0xff] }
 0x756   : > { %v12003_v62 = vld [vmem:[#allocation2 + $0x3b8] sm:$0xf]  ;;  %9806 = vmatpush.bf16.msra.mxu2 %v13445_v29  ;;  %9264 = vmatpush.bf16.msra.mxu0 %v13429_v27 }
 0x757   : > { %v9038_v48 = vpop.f32.mrf.mxu2  ;;  %v8729_v7 = vpop.f32.mrf.mxu3 }
 0x758   : > { %v17035_v30 = vadd.f32 %v9038_v48, %v8917_v49  ;;  %v8609_v49 = vadd.f32 %v16911_v8, %v16892_v31  ;;  %v13344_v31 = vld [vmem:[#allocation2 + $0x6cc] sm:$0xf]  ;;  %v8727_v8 = vadd.f32 %v8726_v60, %v8605_v5  ;;  %v13250_v48 = vld [vmem:[#allocation2 + $0x3d8] sm:$0xf0] }
 0x759   : > { %v8921_v54 = vpop.f32.mrf.mxu1  ;;  %v12004_v24 = vor.u32 %v13250_v48, %v12003_v62 }
 0x75c   : > { %8954 = vmatmul.bf16.gmra.mxu1 %v11968_v57  ;;  %v13437_v57 = vld [vmem:[#allocation5 + $0x218] sm:$0xff] }
 0x75d   : > { %v8846_v40 = vpop.f32.mrf.mxu0  ;;  %9386 = vmatpush.bf16.msra.mxu1 %v13437_v57  ;;  %v13134_v57 = vld [vmem:[#allocation2 + $0x38] sm:$0xf0] }
 0x75e   : > { %v17041_v42 = vadd.f32 %v8846_v40, %v8725_v13 }
 0x75f   : > { %v9040_v19 = vpop.f32.mrf.mxu2  ;;  %v8730_v44 = vpop.f32.mrf.mxu3 }
 0x760   : > { %v17037_v20 = vadd.f32 %v9040_v19, %v8919_v18  ;;  %v8731_v33 = vadd.f32 %v8730_v44, %v8609_v49  ;;  %v12393_v18 = vld [vmem:[#allocation2 + $0x6ec] sm:$0xf0]  ;;  %v13246_v49 = vld [vmem:[#allocation2 + $0x3bc] sm:$0xf] }
 0x761   : > { %v8922_v37 = vpop.f32.mrf.mxu1  ;;  %v12396_v10 = vor.u32 %v13344_v31, %v12393_v18  ;;  %v13366_v44 = vld [vmem:[#allocation2 + $0x778] sm:$0xf0]  ;;  %v12008_v15 = vor.u32 %v13246_v49, %v12005_v25  ;;  %v12039_v31 = vld [vmem:[#allocation2 + $0x400] sm:$0xf] }
 0x762   : > { %v8923_v16 = vadd.f32 %v8922_v37, %v16960_v22  ;;  %v13362_v49 = vld [vmem:[#allocation2 + $0x75c] sm:$0xf] }
 0x764   : > { %9076 = vmatmul.bf16.gmra.mxu2 %v11972_v28  ;;  %8765 = vmatmul.bf16.gmra.mxu3 %v12428_v56  ;;  %v12464_v28 = vor.u32 %v13366_v44, %v12463_v12  ;;  %v13268_v12 = vld [vmem:[#allocation2 + $0x468] sm:$0xf0] }
 0x765   : > { %v8848_v26 = vpop.f32.mrf.mxu0  ;;  %8884 = vmatmul.bf16.gmra.mxu0 %v12396_v10  ;;  %v12040_v10 = vor.u32 %v13259_v32, %v12039_v31  ;;  %v12077_v32 = vld [vmem:[#allocation2 + $0x46c] sm:$0xf0]  ;;  %v13264_v31 = vld [vmem:[#allocation2 + $0x44c] sm:$0xf] }
 0x766   : > { %v17046_v54 = vadd.f32 %v8848_v26, %v8727_v8 }
 0x767   : > { %v9043_v13 = vpop.f32.mrf.mxu2  ;;  %v8733_v43 = vpop.f32.mrf.mxu3 }
 0x768   : > { %v8734_v60 = vadd.f32 %v8733_v43, %v16920_v17  ;;  %v8618_v43 = vadd.f32 %v16945_v50, %v16935_v3 }
 0x769   : > { %v8925_v22 = vpop.f32.mrf.mxu1 }
 0x76a   : > { %v8926_v7 = vadd.f32 %v8925_v22, %v16965_v58  ;;  %v13353_v58 = vld [vmem:[#allocation2 + $0x714] sm:$0xf]  ;;  %v12041_v22 = vld [vmem:[#allocation2 + $0x424] sm:$0xf0] }
 0x76b   : > { %v12432_v18 = vor.u32 %v13353_v58, %v12429_v63  ;;  %v13427_v63 = vld [vmem:[#allocation5 + $0x1c8] sm:$0xff] }
 0x76c   : > { %8959 = vmatmul.bf16.gmra.mxu1 %v12004_v24  ;;  %v13255_v24 = vld [vmem:[#allocation2 + $0x404] sm:$0xf] }
 0x76d   : > { %v8851_v52 = vpop.f32.mrf.mxu0  ;;  %v12044_v25 = vor.u32 %v13255_v24, %v12041_v22  ;;  %v12080_v22 = vor.u32 %v13264_v31, %v12077_v32  ;;  %v11545_v24 = vld [vmem:[#allocation2 + $0x3c] sm:$0xf0]  ;;  %v13436_v32 = vld [vmem:[#allocation5 + $0x210] sm:$0xff]  ;;  %v13139_v31 = vld [vmem:[#allocation2 + $0x64] sm:$0xf] }
 0x76e   : > { %v11543_v52 = vld [vmem:[#allocation2 + $0x18] sm:$0xf]  ;;  %9387 = vmatpush.bf16.msra.mxu1 %v13436_v32 }
 0x76f   : > { %v9044_v11 = vpop.f32.mrf.mxu2  ;;  %v8735_v37 = vpop.f32.mrf.mxu3 }
 0x770   : > { %v17050_v19 = vadd.f32 %v9044_v11, %v8923_v16 }
 0x771   : > { %v8927_v40 = vpop.f32.mrf.mxu1 }
 0x772   : > { %v11544_v40 = vor.u32 %v13134_v57, %v11543_v52  ;;  %v13130_v57 = vld [vmem:[#allocation2 + $0x1c] sm:$0xf] }
 0x774   : > { %9081 = vmatmul.bf16.gmra.mxu2 %v12008_v15  ;;  %8768 = vmatmul.bf16.gmra.mxu3 %v12464_v28  ;;  %v12075_v15 = vld [vmem:[#allocation2 + $0x448] sm:$0xf] }
 0x775   : > { %v8852_v56 = vpop.f32.mrf.mxu0  ;;  %8887 = vmatmul.bf16.gmra.mxu0 %v12432_v18  ;;  %v12076_v28 = vor.u32 %v13268_v12, %v12075_v15  ;;  %v13444_v12 = vld [vmem:[#allocation7 + $0x10] sm:$0xff] }
 0x776   : > { %v17054_v8 = vadd.f32 %v8852_v56, %v8731_v33  ;;  %9807 = vmatpush.bf16.msra.mxu2 %v13444_v12  ;;  %v13161_v12 = vld [vmem:[#allocation2 + $0x110] sm:$0xf0] }
 0x777   : > { %v9047_v17 = vpop.f32.mrf.mxu2  ;;  %v8737_v13 = vpop.f32.mrf.mxu3 }
 0x778   : > { %v17052_v5 = vadd.f32 %v9047_v17, %v8926_v7  ;;  %v8738_v29 = vadd.f32 %v8737_v13, %v16939_v59  ;;  %v12465_v59 = vld [vmem:[#allocation2 + $0x77c] sm:$0xf0] }
 0x779   : > { %v8929_v16 = vpop.f32.mrf.mxu1  ;;  %v12468_v44 = vor.u32 %v13362_v49, %v12465_v59 }
 0x77a   : > { %v8930_v48 = vadd.f32 %v8929_v16, %v16971_v1 }
 0x77c   : > { %8963 = vmatmul.bf16.gmra.mxu1 %v12040_v10  ;;  %v13143_v10 = vld [vmem:[#allocation2 + $0x80] sm:$0xf0] }
 0x77d   : > { %v8855_v62 = vpop.f32.mrf.mxu0 }
 0x77e   : > { %v17060_v27 = vadd.f32 %v8855_v62, %v8734_v60 }
 0x77f   : > { %v9049_v26 = vpop.f32.mrf.mxu2  ;;  %v8739_v33 = vpop.f32.mrf.mxu3 }
 0x780   : > { %v8740_v1 = vadd.f32 %v8739_v33, %v8618_v43  ;;  %v13426_v43 = vld [vmem:[#allocation5 + $0x1c0] sm:$0xff] }
 0x781   : > { %v8931_v7 = vpop.f32.mrf.mxu1 }
 0x782   : > { %v8932_v11 = vadd.f32 %v8931_v7, %v16975_v47  ;;  %v13428_v47 = vld [vmem:[#allocation5 + $0x1d0] sm:$0xff]  ;;  %v11579_v7 = vld [vmem:[#allocation2 + $0x60] sm:$0xf] }
 0x783   : > { %9265 = vmatpush.bf16.msra.mxu0 %v13428_v47  ;;  %v11580_v33 = vor.u32 %v13143_v10, %v11579_v7  ;;  %v13273_v47 = vld [vmem:[#allocation2 + $0x494] sm:$0xf]  ;;  %v12147_v7 = vld [vmem:[#allocation2 + $0x4d8] sm:$0xf] }
 0x784   : > { %9085 = vmatmul.bf16.gmra.mxu2 %v12044_v25  ;;  %9146 = vmatmul.bf16.vlgmr.msra.gmra.mxu3 %v11544_v40  ;;  %v13277_v25 = vld [vmem:[#allocation2 + $0x4b0] sm:$0xf0]  ;;  %v12111_v40 = vld [vmem:[#allocation2 + $0x490] sm:$0xf] }
 0x785   : > { %v8857_v50 = vpop.f32.mrf.mxu0  ;;  %8890 = vmatmul.bf16.gmra.mxu0 %v12468_v44 }
 0x787   : > { %v9051_v37 = vpop.f32.mrf.mxu2  ;;  %v8742_v58 = vpop.f32.mrf.mxu3  ;;  %9266 = vmatpush.bf16.msra.mxu0 %v13427_v63 }
 0x788   : > { %v17063_v3 = vadd.f32 %v9051_v37, %v8930_v48  ;;  %v12112_v37 = vor.u32 %v13277_v25, %v12111_v40 }
 0x789   : > { %v8934_v60 = vpop.f32.mrf.mxu1 }
 0x78a   : > { %v12113_v60 = vld [vmem:[#allocation2 + $0x4b4] sm:$0xf0] }
 0x78b   : > { %9267 = vmatpush.bf16.msra.mxu0 %v13426_v43 }
 0x78c   : > { %8967 = vmatmul.bf16.gmra.mxu1 %v12076_v28 }
 0x78d   : > { %v8859_v56 = vpop.f32.mrf.mxu0 }
 0x78e   : > { %v17067_v13 = vadd.f32 %v8859_v56, %v8738_v29  ;;  %v11548_v29 = vor.u32 %v13130_v57, %v11545_v24  ;;  %v11615_v56 = vld [vmem:[#allocation2 + $0xa8] sm:$0xf] }
 0x78f   : > { %v9053_v17 = vpop.f32.mrf.mxu2  ;;  %v8743_v48 = vpop.f32.mrf.mxu3 }
 0x790   : > { %v17065_v18 = vadd.f32 %v9053_v17, %v8932_v11  ;;  %v8744_v62 = vadd.f32 %v8743_v48, %v16949_v0  ;;  %v12116_v17 = vor.u32 %v13273_v47, %v12113_v60  ;;  %v13286_v48 = vld [vmem:[#allocation2 + $0x4f8] sm:$0xf0] }
 0x791   : > { %v8935_v16 = vpop.f32.mrf.mxu1 }
 0x792   : > { %v8936_v26 = vadd.f32 %v8935_v16, %v16982_v45 }
 0x794   : > { %9089 = vmatmul.bf16.gmra.mxu2 %v12080_v22  ;;  %9151 = vmatmul.bf16.gmra.mxu3 %v11580_v33 }
 0x795   : > { %v8861_v52 = vpop.f32.mrf.mxu0  ;;  %9268 = vmatmul.bf16.vlgmr.msra.gmra.mxu0 %v11548_v29 }
 0x796   : > { %v17071_v49 = vadd.f32 %v8861_v52, %v8740_v1  ;;  %v13152_v1 = vld [vmem:[#allocation2 + $0xc8] sm:$0xf0]  ;;  %v12149_v52 = vld [vmem:[#allocation2 + $0x4fc] sm:$0xf0] }
 0x797   : > { %v9056_v11 = vpop.f32.mrf.mxu2  ;;  %v8746_v45 = vpop.f32.mrf.mxu3  ;;  %v11616_v16 = vor.u32 %v13152_v1, %v11615_v56  ;;  %v12183_v56 = vld [vmem:[#allocation2 + $0x520] sm:$0xf] }
 0x798   : > { %v8747_v44 = vadd.f32 %v8746_v45, %v16956_v41  ;;  %v12148_v11 = vor.u32 %v13286_v48, %v12147_v7  ;;  %v13282_v45 = vld [vmem:[#allocation2 + $0x4dc] sm:$0xf] }
 0x799   : > { %v8938_v59 = vpop.f32.mrf.mxu1  ;;  %v13170_v7 = vld [vmem:[#allocation2 + $0x158] sm:$0xf0] }
 0x79a   : > { %v8939_v0 = vadd.f32 %v8938_v59, %v16985_v39  ;;  %v11581_v39 = vld [vmem:[#allocation2 + $0x84] sm:$0xf0] }
 0x79b   : > { %v11584_v10 = vor.u32 %v13139_v31, %v11581_v39 }
 0x79c   : > { %8972 = vmatmul.bf16.gmra.mxu1 %v12112_v37 }
 0x79d   : > { %v8864_v58 = vpop.f32.mrf.mxu0 }
 0x79e   : > { %v11651_v58 = vld [vmem:[#allocation2 + $0xf0] sm:$0xf] }
 0x79f   : > { %v9057_v50 = vpop.f32.mrf.mxu2  ;;  %v8748_v63 = vpop.f32.mrf.mxu3 }
 0x7a0   : > { %v17075_v15 = vadd.f32 %v9057_v50, %v8936_v26  ;;  %v12152_v50 = vor.u32 %v13282_v45, %v12149_v52  ;;  %v13295_v63 = vld [vmem:[#allocation2 + $0x540] sm:$0xf0]  ;;  %v11653_v52 = vld [vmem:[#allocation2 + $0x114] sm:$0xf0] }
 0x7a1   : > { %v8940_v28 = vpop.f32.mrf.mxu1 }
 0x7a2   : > { %v11652_v28 = vor.u32 %v13161_v12, %v11651_v58 }
 0x7a4   : > { %9094 = vmatmul.bf16.gmra.mxu2 %v12116_v17  ;;  %9155 = vmatmul.bf16.gmra.mxu3 %v11616_v16 }
 0x7a5   : > { %v8865_v26 = vpop.f32.mrf.mxu0  ;;  %9273 = vmatmul.bf16.gmra.mxu0 %v11584_v10  ;;  %v13291_v10 = vld [vmem:[#allocation2 + $0x524] sm:$0xf] }
 0x7a6   : > { %v17079_v24 = vadd.f32 %v8865_v26, %v8744_v62 }
 0x7a7   : > { %v9060_v41 = vpop.f32.mrf.mxu2  ;;  %v8750_v33 = vpop.f32.mrf.mxu3 }
 0x7a8   : > { %v17077_v22 = vadd.f32 %v9060_v41, %v8939_v0  ;;  %v8751_v25 = vadd.f32 %v8750_v33, %v16963_v36  ;;  %v13148_v36 = vld [vmem:[#allocation2 + $0xac] sm:$0xf] }
 0x7a9   : > { %v8942_v43 = vpop.f32.mrf.mxu1 }
 0x7aa   : > { %v8943_v57 = vadd.f32 %v8942_v43, %v16987_v23  ;;  %v11617_v23 = vld [vmem:[#allocation2 + $0xcc] sm:$0xf0] }
 0x7ab   : > { %v11620_v1 = vor.u32 %v13148_v36, %v11617_v23 }
 0x7ac   : > { %8976 = vmatmul.bf16.gmra.mxu1 %v12148_v11 }
 0x7ad   : > { %v8868_v59 = vpop.f32.mrf.mxu0 }
 0x7ae   : > { %v17083_v0 = vadd.f32 %v8868_v59, %v8747_v44 }
 0x7af   : > { %v9062_v29 = vpop.f32.mrf.mxu2  ;;  %v8752_v37 = vpop.f32.mrf.mxu3 }
 0x7b0   : > { %v8753_v60 = vadd.f32 %v8752_v37, %v16967_v9  ;;  %v12185_v9 = vld [vmem:[#allocation2 + $0x544] sm:$0xf0]  ;;  %v11687_v29 = vld [vmem:[#allocation2 + $0x138] sm:$0xf]  ;;  %v13304_v37 = vld [vmem:[#allocation2 + $0x588] sm:$0xf0] }
 0x7b1   : > { %v8944_v40 = vpop.f32.mrf.mxu1  ;;  %v11688_v59 = vor.u32 %v13170_v7, %v11687_v29  ;;  %v12255_v29 = vld [vmem:[#allocation2 + $0x5b0] sm:$0xf] }
 0x7b2   : > { %v8945_v62 = vadd.f32 %v8944_v40, %v16991_v51  ;;  %v12184_v51 = vor.u32 %v13295_v63, %v12183_v56  ;;  %v13157_v40 = vld [vmem:[#allocation2 + $0xf4] sm:$0xf] }
 0x7b3   : > { %v11656_v12 = vor.u32 %v13157_v40, %v11653_v52 }
 0x7b4   : > { %9098 = vmatmul.bf16.gmra.mxu2 %v12152_v50  ;;  %9159 = vmatmul.bf16.gmra.mxu3 %v11652_v28 }
 0x7b5   : > { %v8870_v44 = vpop.f32.mrf.mxu0  ;;  %9277 = vmatmul.bf16.gmra.mxu0 %v11620_v1 }
 0x7b7   : > { %v9064_v47 = vpop.f32.mrf.mxu2  ;;  %v8755_v39 = vpop.f32.mrf.mxu3 }
 0x7b8   : > { %v17087_v17 = vadd.f32 %v9064_v47, %v8943_v57  ;;  %v12188_v57 = vor.u32 %v13291_v10, %v12185_v9  ;;  %v12221_v47 = vld [vmem:[#allocation2 + $0x58c] sm:$0xf0]  ;;  %v13179_v39 = vld [vmem:[#allocation2 + $0x1a0] sm:$0xf0]  ;;  %v11689_v9 = vld [vmem:[#allocation2 + $0x15c] sm:$0xf0] }
 0x7b9   : > { %v8947_v32 = vpop.f32.mrf.mxu1 }
 0x7ba   : > { %v13300_v32 = vld [vmem:[#allocation2 + $0x56c] sm:$0xf] }
 0x7bc   : > { %8980 = vmatmul.bf16.gmra.mxu1 %v12184_v51  ;;  %v12224_v51 = vor.u32 %v13300_v32, %v12221_v47  ;;  %v11759_v47 = vld [vmem:[#allocation2 + $0x1c8] sm:$0xf]  ;;  %v13175_v32 = vld [vmem:[#allocation2 + $0x184] sm:$0xf] }
 0x7bd   : > { %v8872_v41 = vpop.f32.mrf.mxu0 }
 0x7be   : > { %v17091_v26 = vadd.f32 %v8872_v41, %v8751_v25  ;;  %v12219_v25 = vld [vmem:[#allocation2 + $0x568] sm:$0xf] }
 0x7bf   : > { %v9066_v16 = vpop.f32.mrf.mxu2  ;;  %v8756_v43 = vpop.f32.mrf.mxu3  ;;  %v12220_v28 = vor.u32 %v13304_v37, %v12219_v25  ;;  %v13309_v25 = vld [vmem:[#allocation2 + $0x5b4] sm:$0xf] }
 0x7c0   : > { %v17089_v31 = vadd.f32 %v9066_v16, %v8945_v62  ;;  %v8757_v11 = vadd.f32 %v8756_v43, %v16977_v38  ;;  %v11723_v16 = vld [vmem:[#allocation2 + $0x180] sm:$0xf] }
 0x7c1   : > { %v8948_v48 = vpop.f32.mrf.mxu1  ;;  %v11724_v41 = vor.u32 %v13179_v39, %v11723_v16  ;;  %v13435_v43 = vld [vmem:[#allocation5 + $0x208] sm:$0xff] }
 0x7c2   : > { %v8949_v33 = vadd.f32 %v8948_v48, %v16996_v2  ;;  %v13313_v48 = vld [vmem:[#allocation2 + $0x5d0] sm:$0xf0]  ;;  %9388 = vmatpush.bf16.msra.mxu1 %v13435_v43  ;;  %v13318_v43 = vld [vmem:[#allocation2 + $0x5fc] sm:$0xf] }
 0x7c4   : > { %9102 = vmatmul.bf16.gmra.mxu2 %v12188_v57  ;;  %9164 = vmatmul.bf16.gmra.mxu3 %v11688_v59 }
 0x7c5   : > { %v8874_v62 = vpop.f32.mrf.mxu0  ;;  %9281 = vmatmul.bf16.gmra.mxu0 %v11656_v12  ;;  %v12257_v12 = vld [vmem:[#allocation2 + $0x5d4] sm:$0xf0] }
 0x7c6   : > { %v17095_v58 = vadd.f32 %v8874_v62, %v8753_v60  ;;  %v13443_v60 = vld [vmem:[#allocation7 + $0x8] sm:$0xff] }
 0x7c7   : > { %v9069_v45 = vpop.f32.mrf.mxu2  ;;  %v8759_v23 = vpop.f32.mrf.mxu3  ;;  %9808 = vmatpush.bf16.msra.mxu2 %v13443_v60 }
 0x7c8   : > { %v8760_v38 = vadd.f32 %v8759_v23, %v16980_v55  ;;  %v12256_v45 = vor.u32 %v13313_v48, %v12255_v29 }
 0x7c9   : > { %v8951_v50 = vpop.f32.mrf.mxu1 }
 0x7ca   : > { %v8952_v2 = vadd.f32 %v8951_v50, %v17004_v14  ;;  %v13166_v14 = vld [vmem:[#allocation2 + $0x13c] sm:$0xf] }
 0x7cb   : > { %v11692_v10 = vor.u32 %v13166_v14, %v11689_v9  ;;  %v12293_v14 = vld [vmem:[#allocation2 + $0x61c] sm:$0xf0] }
 0x7cc   : > { %8985 = vmatmul.bf16.gmra.mxu1 %v12220_v28  ;;  %v13188_v28 = vld [vmem:[#allocation2 + $0x1e8] sm:$0xf0] }
 0x7cd   : > { %v8877_v1 = vpop.f32.mrf.mxu0 }
 0x7ce   : > { %v11725_v1 = vld [vmem:[#allocation2 + $0x1a4] sm:$0xf0] }
 0x7cf   : > { %v9070_v36 = vpop.f32.mrf.mxu2  ;;  %v8761_v56 = vpop.f32.mrf.mxu3  ;;  %v11728_v39 = vor.u32 %v13175_v32, %v11725_v1 }
 0x7d0   : > { %v17099_v63 = vadd.f32 %v9070_v36, %v8949_v33  ;;  %v13322_v56 = vld [vmem:[#allocation2 + $0x618] sm:$0xf0] }
 0x7d1   : > { %v8953_v44 = vpop.f32.mrf.mxu1 }
 0x7d2   : > { %v11760_v44 = vor.u32 %v13188_v28, %v11759_v47 }
 0x7d4   : > { %9107 = vmatmul.bf16.gmra.mxu2 %v12224_v51  ;;  %9168 = vmatmul.bf16.gmra.mxu3 %v11724_v41 }
 0x7d5   : > { %v8878_v33 = vpop.f32.mrf.mxu0  ;;  %9286 = vmatmul.bf16.gmra.mxu0 %v11692_v10 }
 0x7d6   : > { %v17103_v52 = vadd.f32 %v8878_v33, %v8757_v11  ;;  %v12260_v11 = vor.u32 %v13309_v25, %v12257_v12  ;;  %v13184_v12 = vld [vmem:[#allocation2 + $0x1cc] sm:$0xf] }
 0x7d7   : > { %v9073_v55 = vpop.f32.mrf.mxu2  ;;  %v8763_v59 = vpop.f32.mrf.mxu3 }
 0x7d8   : > { %v17101_v7 = vadd.f32 %v9073_v55, %v8952_v2  ;;  %v12296_v59 = vor.u32 %v13318_v43, %v12293_v14  ;;  %v13193_v14 = vld [vmem:[#allocation2 + $0x214] sm:$0xf]  ;;  %v13442_v43 = vld [vmem:[#allocation7] sm:$0xff] }
 0x7d9   : > { %v8955_v57 = vpop.f32.mrf.mxu1  ;;  %9809 = vmatpush.bf16.msra.mxu2 %v13442_v43 }
 0x7da   : > { %v8956_v40 = vadd.f32 %v8955_v57, %v17014_v6  ;;  %v13197_v57 = vld [vmem:[#allocation2 + $0x230] sm:$0xf0] }
 0x7dc   : > { %8989 = vmatmul.bf16.gmra.mxu1 %v12256_v45  ;;  %v11761_v45 = vld [vmem:[#allocation2 + $0x1ec] sm:$0xf0] }
 0x7dd   : > { %v8881_v62 = vpop.f32.mrf.mxu0  ;;  %v11764_v25 = vor.u32 %v13184_v12, %v11761_v45 }
 0x7de   : > { %v17106_v23 = vadd.f32 %v8881_v62, %v8760_v38  ;;  %v12291_v38 = vld [vmem:[#allocation2 + $0x5f8] sm:$0xf] }
 0x7df   : > { %v9075_v37 = vpop.f32.mrf.mxu2  ;;  %v8764_v2 = vpop.f32.mrf.mxu3  ;;  %v12292_v41 = vor.u32 %v13322_v56, %v12291_v38 }
 0x7e1   : > { %v8957_v50 = vpop.f32.mrf.mxu1 }
 0x7e2   : > { %v8958_v36 = vadd.f32 %v8957_v50, %v17018_v35  ;;  %v13331_v50 = vld [vmem:[#allocation2 + $0x660] sm:$0xf0] }
 0x7e4   : > { %9111 = vmatmul.bf16.gmra.mxu2 %v12260_v11  ;;  %9172 = vmatmul.bf16.gmra.mxu3 %v11760_v44  ;;  %v12329_v44 = vld [vmem:[#allocation2 + $0x664] sm:$0xf0] }
 0x7e5   : > { %v8883_v60 = vpop.f32.mrf.mxu0  ;;  %9290 = vmatmul.bf16.gmra.mxu0 %v11728_v39  ;;  %v13327_v39 = vld [vmem:[#allocation2 + $0x644] sm:$0xf] }
 0x7e6   : > { %v12332_v38 = vor.u32 %v13327_v39, %v12329_v44 }
 0x7e7   : > { %v9077_v6 = vpop.f32.mrf.mxu2  ;;  %v8766_v9 = vpop.f32.mrf.mxu3 }
 0x7e8   : > { %v17109_v51 = vadd.f32 %v9077_v6, %v8956_v40  ;;  %v11795_v40 = vld [vmem:[#allocation2 + $0x210] sm:$0xf]  ;;  %v11831_v9 = vld [vmem:[#allocation2 + $0x258] sm:$0xf] }
 0x7e9   : > { %v8960_v16 = vpop.f32.mrf.mxu1  ;;  %v11796_v37 = vor.u32 %v13197_v57, %v11795_v40 }
 0x7ea   : > { %v13206_v16 = vld [vmem:[#allocation2 + $0x278] sm:$0xf0] }
 0x7ec   : > { %8993 = vmatmul.bf16.gmra.mxu1 %v12292_v41  ;;  %v11797_v41 = vld [vmem:[#allocation2 + $0x234] sm:$0xf0] }
 0x7ed   : > { %v8885_v48 = vpop.f32.mrf.mxu0 }
 0x7ef   : > { %v9079_v35 = vpop.f32.mrf.mxu2  ;;  %v8767_v33 = vpop.f32.mrf.mxu3 }
 0x7f0   : > { %v17111_v55 = vadd.f32 %v9079_v35, %v8958_v36  ;;  %v12327_v36 = vld [vmem:[#allocation2 + $0x640] sm:$0xf]  ;;  %v11832_v35 = vor.u32 %v13206_v16, %v11831_v9 }
 0x7f1   : > { %v8961_v10 = vpop.f32.mrf.mxu1  ;;  %v12328_v1 = vor.u32 %v13331_v50, %v12327_v36  ;;  %v13336_v36 = vld [vmem:[#allocation2 + $0x68c] sm:$0xf] }
 0x7f2   : > { %v8962_v29 = vadd.f32 %v8961_v10, %v17028_v4  ;;  %v11800_v10 = vor.u32 %v13193_v14, %v11797_v41 }
 0x7f4   : > { %9115 = vmatmul.bf16.gmra.mxu2 %v12296_v59  ;;  %9177 = vmatmul.bf16.gmra.mxu3 %v11796_v37  ;;  %v12363_v59 = vld [vmem:[#allocation2 + $0x688] sm:$0xf] }
 0x7f5   : > { %v8886_v2 = vpop.f32.mrf.mxu0  ;;  %9294 = vmatmul.bf16.gmra.mxu0 %v11764_v25  ;;  %v12365_v25 = vld [vmem:[#allocation2 + $0x6ac] sm:$0xf0] }
 0x7f7   : > { %v9082_v62 = vpop.f32.mrf.mxu2  ;;  %v8769_v11 = vpop.f32.mrf.mxu3 }
 0x7f8   : > { %v13434_v62 = vld [vmem:[#allocation5 + $0x200] sm:$0xff] }
 0x7f9   : > { %v8964_v28 = vpop.f32.mrf.mxu1  ;;  %9389 = vmatpush.bf16.msra.mxu1 %v13434_v62 }
 0x7fa   : > { %v8965_v47 = vadd.f32 %v8964_v28, %v17032_v21  ;;  %v13340_v21 = vld [vmem:[#allocation2 + $0x6a8] sm:$0xf0] }
 0x7fb   : > { %v12364_v37 = vor.u32 %v13340_v21, %v12363_v59 }
 0x7fc   : > { %8998 = vmatmul.bf16.gmra.mxu1 %v12328_v1 }
 0x7fd   : > { %v8888_v6 = vpop.f32.mrf.mxu0 }
 0x7fe   : > { %v11867_v6 = vld [vmem:[#allocation2 + $0x2a0] sm:$0xf] }
 0x7ff   : > { %v9083_v4 = vpop.f32.mrf.mxu2  ;;  %v8770_v60 = vpop.f32.mrf.mxu3 }
 0x800   : > { %v17115_v32 = vadd.f32 %v9083_v4, %v8962_v29  ;;  %v12368_v4 = vor.u32 %v13336_v36, %v12365_v25  ;;  %v13349_v60 = vld [vmem:[#allocation2 + $0x6f0] sm:$0xf0]  ;;  %v11869_v25 = vld [vmem:[#allocation2 + $0x2c4] sm:$0xf0] }
 0x801   : > { %v8966_v56 = vpop.f32.mrf.mxu1 }
 0x804   : > { %9120 = vmatmul.bf16.gmra.mxu2 %v12332_v38  ;;  %9181 = vmatmul.bf16.gmra.mxu3 %v11832_v35  ;;  %v12399_v35 = vld [vmem:[#allocation2 + $0x6d0] sm:$0xf] }
 0x805   : > { %v8889_v57 = vpop.f32.mrf.mxu0  ;;  %9299 = vmatmul.bf16.gmra.mxu0 %v11800_v10 }
 0x806   : > { %v13345_v57 = vld [vmem:[#allocation2 + $0x6d4] sm:$0xf] }
 0x807   : > { %v9086_v48 = vpop.f32.mrf.mxu2  ;;  %v9147_v40 = vpop.f32.mrf.mxu3 }
 0x808   : > { %v17117_v33 = vadd.f32 %v9086_v48, %v8965_v47  ;;  %v9148_v12 = vadd.f32 %v9147_v40, %v17006_v53  ;;  %v13215_v47 = vld [vmem:[#allocation2 + $0x2c0] sm:$0xf0]  ;;  %v13202_v53 = vld [vmem:[#allocation2 + $0x25c] sm:$0xf]  ;;  %v13224_v40 = vld [vmem:[#allocation2 + $0x308] sm:$0xf0] }
 0x809   : > { %v8968_v29 = vpop.f32.mrf.mxu1  ;;  %v11868_v56 = vor.u32 %v13215_v47, %v11867_v6 }
 0x80a   : > { %v8969_v45 = vadd.f32 %v8968_v29, %v17041_v42  ;;  %v11833_v42 = vld [vmem:[#allocation2 + $0x27c] sm:$0xf0] }
 0x80b   : > { %v11836_v16 = vor.u32 %v13202_v53, %v11833_v42 }
 0x80c   : > { %9002 = vmatmul.bf16.gmra.mxu1 %v12364_v37 }
 0x80d   : > { %v8891_v2 = vpop.f32.mrf.mxu0 }
 0x80f   : > { %v9088_v50 = vpop.f32.mrf.mxu2  ;;  %v9149_v11 = vpop.f32.mrf.mxu3 }
 0x810   : > { %v9150_v44 = vadd.f32 %v9149_v11, %v17012_v61  ;;  %v12401_v61 = vld [vmem:[#allocation2 + $0x6f4] sm:$0xf0]  ;;  %v11903_v50 = vld [vmem:[#allocation2 + $0x2e8] sm:$0xf] }
 0x811   : > { %v8970_v28 = vpop.f32.mrf.mxu1  ;;  %v12404_v37 = vor.u32 %v13345_v57, %v12401_v61  ;;  %v11904_v2 = vor.u32 %v13224_v40, %v11903_v50  ;;  %v12435_v11 = vld [vmem:[#allocation2 + $0x718] sm:$0xf] }
 0x812   : > { %v8971_v1 = vadd.f32 %v8970_v28, %v17046_v54  ;;  %v12400_v54 = vor.u32 %v13349_v60, %v12399_v35  ;;  %v13211_v28 = vld [vmem:[#allocation2 + $0x2a4] sm:$0xf] }
 0x813   : > { %v11872_v47 = vor.u32 %v13211_v28, %v11869_v25 }
 0x814   : > { %9124 = vmatmul.bf16.gmra.mxu2 %v12368_v4  ;;  %9185 = vmatmul.bf16.gmra.mxu3 %v11868_v56 }
 0x815   : > { %v8892_v9 = vpop.f32.mrf.mxu0  ;;  %9303 = vmatmul.bf16.gmra.mxu0 %v11836_v16 }
 0x817   : > { %v9090_v39 = vpop.f32.mrf.mxu2  ;;  %v9152_v14 = vpop.f32.mrf.mxu3 }
 0x818   : > { %v17123_v38 = vadd.f32 %v9090_v39, %v8969_v45  ;;  %v13354_v39 = vld [vmem:[#allocation2 + $0x71c] sm:$0xf]  ;;  %v13233_v14 = vld [vmem:[#allocation2 + $0x350] sm:$0xf0] }
 0x819   : > { %v8973_v41 = vpop.f32.mrf.mxu1 }
 0x81a   : > { %v12437_v41 = vld [vmem:[#allocation2 + $0x73c] sm:$0xf0] }
 0x81c   : > { %9006 = vmatmul.bf16.gmra.mxu1 %v12400_v54  ;;  %v12440_v54 = vor.u32 %v13354_v39, %v12437_v41  ;;  %v11975_v39 = vld [vmem:[#allocation2 + $0x378] sm:$0xf]  ;;  %v13135_v41 = vld [vmem:[#allocation2 + $0x40] sm:$0xf0] }
 0x81d   : > { %v9269_v10 = vpop.f32.mrf.mxu0 }
 0x81e   : > { %v17127_v29 = vadd.f32 %v9269_v10, %v9148_v12  ;;  %v13358_v12 = vld [vmem:[#allocation2 + $0x738] sm:$0xf0]  ;;  %v13220_v10 = vld [vmem:[#allocation2 + $0x2ec] sm:$0xf] }
 0x81f   : > { %v9092_v48 = vpop.f32.mrf.mxu2  ;;  %v9153_v59 = vpop.f32.mrf.mxu3  ;;  %v12436_v56 = vor.u32 %v13358_v12, %v12435_v11  ;;  %v12473_v11 = vld [vmem:[#allocation2 + $0x784] sm:$0xf0] }
 0x820   : > { %v17125_v21 = vadd.f32 %v9092_v48, %v8971_v1  ;;  %v9154_v62 = vadd.f32 %v9153_v59, %v17022_v46  ;;  %v11905_v48 = vld [vmem:[#allocation2 + $0x30c] sm:$0xf0] }
 0x821   : > { %v8974_v43 = vpop.f32.mrf.mxu1 }
 0x822   : > { %v8975_v45 = vadd.f32 %v8974_v43, %v17054_v8  ;;  %v13367_v43 = vld [vmem:[#allocation2 + $0x780] sm:$0xf0] }
 0x824   : > { %9128 = vmatmul.bf16.gmra.mxu2 %v12404_v37  ;;  %9190 = vmatmul.bf16.gmra.mxu3 %v11904_v2 }
 0x825   : > { %v9271_v1 = vpop.f32.mrf.mxu0  ;;  %9307 = vmatmul.bf16.gmra.mxu0 %v11872_v47 }
 0x826   : > { %v17131_v6 = vadd.f32 %v9271_v1, %v9150_v44  ;;  %v11939_v44 = vld [vmem:[#allocation2 + $0x330] sm:$0xf] }
 0x827   : > { %v9095_v36 = vpop.f32.mrf.mxu2  ;;  %v9156_v42 = vpop.f32.mrf.mxu3  ;;  %v11940_v61 = vor.u32 %v13233_v14, %v11939_v44  ;;  %v11551_v44 = vld [vmem:[#allocation2 + $0x20] sm:$0xf] }
 0x828   : > { %v9157_v46 = vadd.f32 %v9156_v42, %v17026_v34  ;;  %v11908_v34 = vor.u32 %v13220_v10, %v11905_v48  ;;  %v17999_v10 = vld [vmem:[#allocation18_spill] sm:$0xff] }
 0x829   : > { %v8977_v4 = vpop.f32.mrf.mxu1 }
 0x82a   : > { %v8978_v8 = vadd.f32 %v8977_v4, %v17060_v27  ;;  %v13363_v4 = vld [vmem:[#allocation2 + $0x764] sm:$0xf] }
 0x82c   : > { %9009 = vmatmul.bf16.gmra.mxu1 %v12436_v56  ;;  %v12476_v56 = vor.u32 %v13363_v4, %v12473_v11 }
 0x82d   : > { %v9274_v16 = vpop.f32.mrf.mxu0 }
 0x82f   : > { %v9096_v53 = vpop.f32.mrf.mxu2  ;;  %v9158_v35 = vpop.f32.mrf.mxu3 }
 0x830   : > { %v17135_v60 = vadd.f32 %v9096_v53, %v8975_v45  ;;  %v12471_v45 = vld [vmem:[#allocation2 + $0x760] sm:$0xf] }
 0x831   : > { %v8979_v9 = vpop.f32.mrf.mxu1  ;;  %v12472_v2 = vor.u32 %v13367_v43, %v12471_v45 }
 0x834   : > { %9131 = vmatmul.bf16.gmra.mxu2 %v12440_v54  ;;  %9194 = vmatmul.bf16.gmra.mxu3 %v11940_v61  ;;  %v17998_v61 = vld [vmem:[#allocation17_spill] sm:$0xff] }
 0x835   : > { %v9275_v59 = vpop.f32.mrf.mxu0  ;;  %9312 = vmatmul.bf16.gmra.mxu0 %v11908_v34 }
 0x836   : > { %v17139_v37 = vadd.f32 %v9275_v59, %v9154_v62 }
 0x837   : > { %v9099_v27 = vpop.f32.mrf.mxu2  ;;  %v9160_v50 = vpop.f32.mrf.mxu3 }
 0x838   : > { %v17137_v57 = vadd.f32 %v9099_v27, %v8978_v8  ;;  %v9161_v28 = vadd.f32 %v9160_v50, %v17035_v30  ;;  %v13242_v8 = vld [vmem:[#allocation2 + $0x398] sm:$0xf0]  ;;  %v13229_v30 = vld [vmem:[#allocation2 + $0x334] sm:$0xf]  ;;  %v9647_v27 = vunpack.c.l.b16 %v17999_v10  ;;  %v13260_v10 = vld [vmem:[#allocation2 + $0x428] sm:$0xf0] }
 0x839   : > { %v8981_v40 = vpop.f32.mrf.mxu1  ;;  %v11976_v16 = vor.u32 %v13242_v8, %v11975_v39 }
 0x83a   : > { %v8982_v25 = vadd.f32 %v8981_v40, %v17067_v13  ;;  %v11941_v13 = vld [vmem:[#allocation2 + $0x354] sm:$0xf0] }
 0x83b   : > { %v11944_v35 = vor.u32 %v13229_v30, %v11941_v13 }
 0x83c   : > { %9012 = vmatmul.bf16.gmra.mxu1 %v12472_v2  ;;  %v13251_v2 = vld [vmem:[#allocation2 + $0x3e0] sm:$0xf0] }
 0x83d   : > { %v9278_v47 = vpop.f32.mrf.mxu0 }
 0x83e   : > { %v17143_v12 = vadd.f32 %v9278_v47, %v9157_v46  ;;  %v12011_v47 = vld [vmem:[#allocation2 + $0x3c0] sm:$0xf] }
 0x83f   : > { %v9101_v36 = vpop.f32.mrf.mxu2  ;;  %v9162_v42 = vpop.f32.mrf.mxu3  ;;  %v12012_v4 = vor.u32 %v13251_v2, %v12011_v47 }
 0x840   : > { %v9163_v53 = vadd.f32 %v9162_v42, %v17037_v20  ;;  %v9646_v20 = vunpack.c.l.b16 %v17998_v61  ;;  %v13238_v42 = vld [vmem:[#allocation2 + $0x37c] sm:$0xf] }
 0x841   : > { %v8983_v1 = vpop.f32.mrf.mxu1 }
 0x842   : > { %v8984_v62 = vadd.f32 %v8983_v1, %v17071_v49  ;;  %v11552_v49 = vor.u32 %v13135_v41, %v11551_v44  ;;  %v9700_v59 = vpack.c.b16 %v9647_v27, %v9646_v20  ;;  %v11977_v1 = vld [vmem:[#allocation2 + $0x39c] sm:$0xf0]  ;;  %v12047_v27 = vld [vmem:[#allocation2 + $0x408] sm:$0xf] }
 0x843   : > { %v18000_v41 = vld [vmem:[#allocation19_spill] sm:$0xff] }
 0x844   : > { %9134 = vmatmul.bf16.gmra.mxu2 %v12476_v56  ;;  %9198 = vmatmul.bf16.gmra.mxu3 %v11976_v16  ;;  %v11980_v56 = vor.u32 %v13238_v42, %v11977_v1  ;;  %v11587_v16 = vld [vmem:[#allocation2 + $0x68] sm:$0xf] }
 0x845   : > { %v9280_v46 = vpop.f32.mrf.mxu0  ;;  %9316 = vmatmul.bf16.gmra.mxu0 %v11944_v35  ;;  %v9648_v35 = vunpack.c.l.b16 %v18000_v41 }
 0x846   : > { %v18001_v46 = vld [vmem:[#allocation20_spill] sm:$0xff] }
 0x847   : > { %v9103_v9 = vpop.f32.mrf.mxu2  ;;  %v9165_v48 = vpop.f32.mrf.mxu3 }
 0x848   : > { %v17147_v14 = vadd.f32 %v9103_v9, %v8982_v25 }
 0x849   : > { %v8986_v54 = vpop.f32.mrf.mxu1 }
 0x84a   : > { %v9649_v54 = vunpack.c.l.b16 %v18001_v46  ;;  %v13269_v46 = vld [vmem:[#allocation2 + $0x470] sm:$0xf0] }
 0x84c   : > { %9390 = vmatmul.bf16.vlgmr.msra.gmra.mxu1 %v11552_v49  ;;  %v9701_v49 = vpack.c.b16 %v9649_v54, %v9648_v35 }
 0x84d   : > { %v9282_v40 = vpop.f32.mrf.mxu0 }
 0x84e   : > { %v17153_v50 = vadd.f32 %v9282_v40, %v9161_v28  ;;  %v13153_v40 = vld [vmem:[#allocation2 + $0xd0] sm:$0xf0] }
 0x84f   : > { %v9105_v43 = vpop.f32.mrf.mxu2  ;;  %v9166_v25 = vpop.f32.mrf.mxu3 }
 0x850   : > { %v17151_v34 = vadd.f32 %v9105_v43, %v8984_v62  ;;  %v9167_v11 = vadd.f32 %v9166_v25, %v17050_v19  ;;  %v13144_v62 = vld [vmem:[#allocation2 + $0x88] sm:$0xf0]  ;;  %v12013_v43 = vld [vmem:[#allocation2 + $0x3e4] sm:$0xf0] }
 0x851   : > { %v8987_v45 = vpop.f32.mrf.mxu1  ;;  %v11588_v9 = vor.u32 %v13144_v62, %v11587_v16 }
 0x852   : > { %v8988_v36 = vadd.f32 %v8987_v45, %v17079_v24 }
 0x854   : > { %9810 = vmatmul.bf16.vlgmr.msra.gmra.mxu2 %v9700_v59  ;;  %9203 = vmatmul.bf16.gmra.mxu3 %v12012_v4  ;;  %v13247_v59 = vld [vmem:[#allocation2 + $0x3c4] sm:$0xf] }
 0x855   : > { %v9284_v39 = vpop.f32.mrf.mxu0  ;;  %9320 = vmatmul.bf16.gmra.mxu0 %v11980_v56  ;;  %v12016_v45 = vor.u32 %v13247_v59, %v12013_v43  ;;  %v18002_v56 = vld [vmem:[#allocation21_spill] sm:$0xff] }
 0x856   : > { %v17157_v28 = vadd.f32 %v9284_v39, %v9163_v53  ;;  %v9650_v39 = vunpack.c.l.b16 %v18002_v56 }
 0x857   : > { %v9108_v8 = vpop.f32.mrf.mxu2  ;;  %v9169_v30 = vpop.f32.mrf.mxu3 }
 0x858   : > { %v9170_v19 = vadd.f32 %v9169_v30, %v17052_v5 }
 0x859   : > { %v8990_v13 = vpop.f32.mrf.mxu1 }
 0x85a   : > { %v8991_v24 = vadd.f32 %v8990_v13, %v17083_v0  ;;  %v12048_v0 = vor.u32 %v13260_v10, %v12047_v27  ;;  %v18003_v13 = vld [vmem:[#allocation22_spill] sm:$0xff] }
 0x85b   : > { %v9651_v16 = vunpack.c.l.b16 %v18003_v13 }
 0x85c   : > { %9395 = vmatmul.bf16.gmra.mxu1 %v11588_v9 }
 0x85d   : > { %v9287_v61 = vpop.f32.mrf.mxu0 }
 0x85e   : > { %v13256_v61 = vld [vmem:[#allocation2 + $0x40c] sm:$0xf] }
 0x85f   : > { %v9109_v44 = vpop.f32.mrf.mxu2  ;;  %v9171_v53 = vpop.f32.mrf.mxu3 }
 0x860   : > { %v17163_v48 = vadd.f32 %v9109_v44, %v8988_v36  ;;  %v11623_v36 = vld [vmem:[#allocation2 + $0xb0] sm:$0xf]  ;;  %v13162_v53 = vld [vmem:[#allocation2 + $0x118] sm:$0xf0] }
 0x861   : > { %v8992_v20 = vpop.f32.mrf.mxu1  ;;  %v11624_v8 = vor.u32 %v13153_v40, %v11623_v36  ;;  %v12083_v44 = vld [vmem:[#allocation2 + $0x450] sm:$0xf]  ;;  %v18005_v40 = vld [vmem:[#allocation24_spill] sm:$0xff] }
 0x864   : > { %9815 = vmatmul.bf16.gmra.mxu2 %v9701_v49  ;;  %9207 = vmatmul.bf16.gmra.mxu3 %v12048_v0  ;;  %v12084_v49 = vor.u32 %v13269_v46, %v12083_v44  ;;  %v11659_v0 = vld [vmem:[#allocation2 + $0xf8] sm:$0xf]  ;;  %v13171_v46 = vld [vmem:[#allocation2 + $0x160] sm:$0xf0] }
 0x865   : > { %v9288_v2 = vpop.f32.mrf.mxu0  ;;  %9325 = vmatmul.bf16.gmra.mxu0 %v12016_v45  ;;  %v9653_v45 = vunpack.c.l.b16 %v18005_v40  ;;  %v13287_v40 = vld [vmem:[#allocation2 + $0x500] sm:$0xf0] }
 0x866   : > { %v17167_v1 = vadd.f32 %v9288_v2, %v9167_v11 }
 0x867   : > { %v9112_v5 = vpop.f32.mrf.mxu2  ;;  %v9173_v4 = vpop.f32.mrf.mxu3 }
 0x868   : > { %v17165_v25 = vadd.f32 %v9112_v5, %v8991_v24  ;;  %v9174_v62 = vadd.f32 %v9173_v4, %v17063_v3  ;;  %v9702_v24 = vpack.c.b16 %v9651_v16, %v9650_v39  ;;  %v12049_v3 = vld [vmem:[#allocation2 + $0x42c] sm:$0xf0]  ;;  %v11660_v5 = vor.u32 %v13162_v53, %v11659_v0  ;;  %v13278_v39 = vld [vmem:[#allocation2 + $0x4b8] sm:$0xf0] }
 0x869   : > { %v8994_v47 = vpop.f32.mrf.mxu1  ;;  %v12052_v10 = vor.u32 %v13256_v61, %v12049_v3  ;;  %v18006_v53 = vld [vmem:[#allocation25_spill] sm:$0xff] }
 0x86a   : > { %v8995_v42 = vadd.f32 %v8994_v47, %v17091_v26 }
 0x86c   : > { %9399 = vmatmul.bf16.gmra.mxu1 %v11624_v8 }
 0x86d   : > { %v9291_v9 = vpop.f32.mrf.mxu0 }
 0x86e   : > { %v17173_v35 = vadd.f32 %v9291_v9, %v9170_v19 }
 0x86f   : > { %v9114_v30 = vpop.f32.mrf.mxu2  ;;  %v9175_v11 = vpop.f32.mrf.mxu3 }
 0x870   : > { %v9176_v26 = vadd.f32 %v9175_v11, %v17065_v18  ;;  %v12119_v30 = vld [vmem:[#allocation2 + $0x498] sm:$0xf] }
 0x871   : > { %v8996_v41 = vpop.f32.mrf.mxu1  ;;  %v12120_v9 = vor.u32 %v13278_v39, %v12119_v30 }
 0x872   : > { %v8997_v54 = vadd.f32 %v8996_v41, %v17095_v58  ;;  %v18004_v58 = vld [vmem:[#allocation23_spill] sm:$0xff]  ;;  %v13265_v41 = vld [vmem:[#allocation2 + $0x454] sm:$0xf] }
 0x873   : > { %v9652_v18 = vunpack.c.l.b16 %v18004_v58 }
 0x874   : > { %9819 = vmatmul.bf16.gmra.mxu2 %v9702_v24  ;;  %9211 = vmatmul.bf16.gmra.mxu3 %v12084_v49  ;;  %v12085_v24 = vld [vmem:[#allocation2 + $0x474] sm:$0xf0]  ;;  %v11695_v49 = vld [vmem:[#allocation2 + $0x140] sm:$0xf] }
 0x875   : > { %v9293_v43 = vpop.f32.mrf.mxu0  ;;  %9329 = vmatmul.bf16.gmra.mxu0 %v12052_v10  ;;  %v9703_v36 = vpack.c.b16 %v9653_v45, %v9652_v18  ;;  %v9654_v10 = vunpack.c.l.b16 %v18006_v53  ;;  %v12155_v45 = vld [vmem:[#allocation2 + $0x4e0] sm:$0xf] }
 0x876   : > { %v18007_v43 = vld [vmem:[#allocation26_spill] sm:$0xff] }
 0x877   : > { %v9116_v20 = vpop.f32.mrf.mxu2  ;;  %v9178_v59 = vpop.f32.mrf.mxu3 }
 0x878   : > { %v17177_v27 = vadd.f32 %v9116_v20, %v8995_v42  ;;  %v11696_v20 = vor.u32 %v13171_v46, %v11695_v49  ;;  %v18008_v46 = vld [vmem:[#allocation27_spill] sm:$0xff] }
 0x879   : > { %v8999_v19 = vpop.f32.mrf.mxu1 }
 0x87a   : > { %v9655_v19 = vunpack.c.l.b16 %v18007_v43  ;;  %v13296_v43 = vld [vmem:[#allocation2 + $0x548] sm:$0xf0] }
 0x87c   : > { %9403 = vmatmul.bf16.gmra.mxu1 %v11660_v5  ;;  %v9704_v5 = vpack.c.b16 %v9655_v19, %v9654_v10  ;;  %v12191_v19 = vld [vmem:[#allocation2 + $0x528] sm:$0xf] }
 0x87d   : > { %v9295_v4 = vpop.f32.mrf.mxu0 }
 0x87e   : > { %v17183_v56 = vadd.f32 %v9295_v4, %v9174_v62  ;;  %v13180_v4 = vld [vmem:[#allocation2 + $0x1a8] sm:$0xf0] }
 0x87f   : > { %v9118_v2 = vpop.f32.mrf.mxu2  ;;  %v9179_v42 = vpop.f32.mrf.mxu3 }
 0x880   : > { %v17181_v47 = vadd.f32 %v9118_v2, %v8997_v54  ;;  %v9180_v16 = vadd.f32 %v9179_v42, %v17075_v15  ;;  %v12088_v54 = vor.u32 %v13265_v41, %v12085_v24  ;;  %v12121_v2 = vld [vmem:[#allocation2 + $0x4bc] sm:$0xf0] }
 0x881   : > { %v9000_v8 = vpop.f32.mrf.mxu1 }
 0x882   : > { %v9001_v13 = vadd.f32 %v9000_v8, %v17103_v52 }
 0x884   : > { %9823 = vmatmul.bf16.gmra.mxu2 %v9703_v36  ;;  %9216 = vmatmul.bf16.gmra.mxu3 %v12120_v9  ;;  %v13274_v36 = vld [vmem:[#allocation2 + $0x49c] sm:$0xf] }
 0x885   : > { %v9297_v44 = vpop.f32.mrf.mxu0  ;;  %9333 = vmatmul.bf16.gmra.mxu0 %v12088_v54  ;;  %v12124_v8 = vor.u32 %v13274_v36, %v12121_v2  ;;  %v9656_v54 = vunpack.c.l.b16 %v18008_v46  ;;  %v11767_v2 = vld [vmem:[#allocation2 + $0x1d0] sm:$0xf]  ;;  %v13305_v46 = vld [vmem:[#allocation2 + $0x590] sm:$0xf0] }
 0x886   : > { %v17187_v62 = vadd.f32 %v9297_v44, %v9176_v26  ;;  %v18009_v44 = vld [vmem:[#allocation28_spill] sm:$0xff]  ;;  %v18010_v36 = vld [vmem:[#allocation29_spill] sm:$0xff] }
 0x887   : > { %v9121_v11 = vpop.f32.mrf.mxu2  ;;  %v9182_v61 = vpop.f32.mrf.mxu3 }
 0x888   : > { %v9183_v15 = vadd.f32 %v9182_v61, %v17077_v22 }
 0x889   : > { %v9003_v3 = vpop.f32.mrf.mxu1 }
 0x88a   : > { %v9004_v52 = vadd.f32 %v9003_v3, %v17106_v23  ;;  %v12156_v23 = vor.u32 %v13287_v40, %v12155_v45  ;;  %v9657_v3 = vunpack.c.l.b16 %v18009_v44  ;;  %v12227_v44 = vld [vmem:[#allocation2 + $0x570] sm:$0xf] }
 0x88c   : > { %9408 = vmatmul.bf16.gmra.mxu1 %v11696_v20  ;;  %v9705_v61 = vpack.c.b16 %v9657_v3, %v9656_v54  ;;  %v12193_v3 = vld [vmem:[#allocation2 + $0x54c] sm:$0xf0] }
 0x88d   : > { %v9300_v58 = vpop.f32.mrf.mxu0 }
 0x88f   : > { %v9122_v0 = vpop.f32.mrf.mxu2  ;;  %v9184_v26 = vpop.f32.mrf.mxu3 }
 0x890   : > { %v17193_v59 = vadd.f32 %v9122_v0, %v9001_v13  ;;  %v11731_v13 = vld [vmem:[#allocation2 + $0x188] sm:$0xf] }
 0x891   : > { %v9005_v18 = vpop.f32.mrf.mxu1  ;;  %v11732_v41 = vor.u32 %v13180_v4, %v11731_v13  ;;  %v12157_v0 = vld [vmem:[#allocation2 + $0x504] sm:$0xf0]  ;;  %v18011_v4 = vld [vmem:[#allocation30_spill] sm:$0xff] }
 0x892   : > { %v13189_v18 = vld [vmem:[#allocation2 + $0x1f0] sm:$0xf0] }
 0x894   : > { %9828 = vmatmul.bf16.gmra.mxu2 %v9704_v5  ;;  %9220 = vmatmul.bf16.gmra.mxu3 %v12156_v23  ;;  %v12192_v5 = vor.u32 %v13296_v43, %v12191_v19 }
 0x895   : > { %v9301_v39 = vpop.f32.mrf.mxu0  ;;  %9338 = vmatmul.bf16.gmra.mxu0 %v12124_v8 }
 0x896   : > { %v17197_v24 = vadd.f32 %v9301_v39, %v9180_v16 }
 0x897   : > { %v9125_v22 = vpop.f32.mrf.mxu2  ;;  %v9186_v9 = vpop.f32.mrf.mxu3 }
 0x898   : > { %v17195_v42 = vadd.f32 %v9125_v22, %v9004_v52  ;;  %v9187_v11 = vadd.f32 %v9186_v9, %v17087_v17  ;;  %v13283_v17 = vld [vmem:[#allocation2 + $0x4e4] sm:$0xf]  ;;  %v9658_v22 = vunpack.c.l.b16 %v18010_v36 }
 0x899   : > { %v9007_v30 = vpop.f32.mrf.mxu1  ;;  %v12160_v26 = vor.u32 %v13283_v17, %v12157_v0  ;;  %v11803_v0 = vld [vmem:[#allocation2 + $0x218] sm:$0xf] }
 0x89c   : > { %9412 = vmatmul.bf16.gmra.mxu1 %v11732_v41 }
 0x89d   : > { %v9304_v20 = vpop.f32.mrf.mxu0 }
 0x89e   : > { %v17202_v53 = vadd.f32 %v9304_v20, %v9183_v15  ;;  %v11768_v15 = vor.u32 %v13189_v18, %v11767_v2 }
 0x89f   : > { %v9127_v49 = vpop.f32.mrf.mxu2  ;;  %v9188_v10 = vpop.f32.mrf.mxu3 }
 0x8a0   : > { %v9189_v16 = vadd.f32 %v9188_v10, %v17089_v31  ;;  %v9659_v31 = vunpack.c.l.b16 %v18011_v4  ;;  %v12228_v49 = vor.u32 %v13305_v46, %v12227_v44  ;;  %v12263_v4 = vld [vmem:[#allocation2 + $0x5b8] sm:$0xf]  ;;  %v11839_v46 = vld [vmem:[#allocation2 + $0x260] sm:$0xf] }
 0x8a1   : > { %v9008_v52 = vpop.f32.mrf.mxu1 }
 0x8a2   : > { %v9706_v39 = vpack.c.b16 %v9659_v31, %v9658_v22  ;;  %v13198_v52 = vld [vmem:[#allocation2 + $0x238] sm:$0xf0] }
 0x8a3   : > { %v11804_v17 = vor.u32 %v13198_v52, %v11803_v0  ;;  %v13314_v22 = vld [vmem:[#allocation2 + $0x5d8] sm:$0xf0] }
 0x8a4   : > { %9832 = vmatmul.bf16.gmra.mxu2 %v9705_v61  ;;  %9224 = vmatmul.bf16.gmra.mxu3 %v12192_v5  ;;  %v13292_v61 = vld [vmem:[#allocation2 + $0x52c] sm:$0xf]  ;;  %v12264_v31 = vor.u32 %v13314_v22, %v12263_v4 }
 0x8a5   : > { %v9306_v40 = vpop.f32.mrf.mxu0  ;;  %9342 = vmatmul.bf16.gmra.mxu0 %v12160_v26  ;;  %v12196_v10 = vor.u32 %v13292_v61, %v12193_v3  ;;  %v18013_v26 = vld [vmem:[#allocation34_spill] sm:$0xff]  ;;  %v13216_v4 = vld [vmem:[#allocation2 + $0x2c8] sm:$0xf0] }
 0x8a6   : > { %v9661_v40 = vunpack.c.l.b16 %v18013_v26 }
 0x8a7   : > { %v9129_v58 = vpop.f32.mrf.mxu2  ;;  %v9191_v23 = vpop.f32.mrf.mxu3 }
 0x8a9   : > { %v9010_v45 = vpop.f32.mrf.mxu1 }
 0x8ac   : > { %9416 = vmatmul.bf16.gmra.mxu1 %v11768_v15 }
 0x8ad   : > { %v9308_v30 = vpop.f32.mrf.mxu0 }
 0x8ae   : > { %v17207_v9 = vadd.f32 %v9308_v30, %v9187_v11  ;;  %v13207_v30 = vld [vmem:[#allocation2 + $0x280] sm:$0xf0] }
 0x8af   : > { %v9130_v8 = vpop.f32.mrf.mxu2  ;;  %v9192_v41 = vpop.f32.mrf.mxu3 }
 0x8b0   : > { %v9193_v54 = vadd.f32 %v9192_v41, %v17099_v63  ;;  %v18012_v63 = vld [vmem:[#allocation33_spill] sm:$0xff] }
 0x8b1   : > { %v9011_v13 = vpop.f32.mrf.mxu1  ;;  %v9660_v18 = vunpack.c.l.b16 %v18012_v63  ;;  %v13301_v8 = vld [vmem:[#allocation2 + $0x574] sm:$0xf] }
 0x8b3   : > { %v9707_v2 = vpack.c.b16 %v9661_v40, %v9660_v18 }
 0x8b4   : > { %9836 = vmatmul.bf16.gmra.mxu2 %v9706_v39  ;;  %9229 = vmatmul.bf16.gmra.mxu3 %v12228_v49  ;;  %v11840_v49 = vor.u32 %v13207_v30, %v11839_v46  ;;  %v11875_v30 = vld [vmem:[#allocation2 + $0x2a8] sm:$0xf] }
 0x8b5   : > { %v9310_v43 = vpop.f32.mrf.mxu0  ;;  %9346 = vmatmul.bf16.gmra.mxu0 %v12196_v10  ;;  %v18015_v10 = vld [vmem:[#allocation37_spill] sm:$0xff] }
 0x8b6   : > { %v17210_v5 = vadd.f32 %v9310_v43, %v9189_v16  ;;  %v12229_v16 = vld [vmem:[#allocation2 + $0x594] sm:$0xf0]  ;;  %v9663_v43 = vunpack.c.l.b16 %v18015_v10  ;;  %v18017_v10 = vld [vmem:[#allocation40_spill] sm:$0xff] }
 0x8b7   : > { %v9132_v20 = vpop.f32.mrf.mxu2  ;;  %v9195_v11 = vpop.f32.mrf.mxu3 }
 0x8b8   : > { %v9196_v58 = vadd.f32 %v9195_v11, %v17101_v7  ;;  %v12232_v7 = vor.u32 %v13301_v8, %v12229_v16  ;;  %v18014_v20 = vld [vmem:[#allocation36_spill] sm:$0xff] }
 0x8b9   : > { %v9013_v19 = vpop.f32.mrf.mxu1  ;;  %v9662_v52 = vunpack.c.l.b16 %v18014_v20  ;;  %v18016_v20 = vld [vmem:[#allocation39_spill] sm:$0xff] }
 0x8bb   : > { %v9708_v0 = vpack.c.b16 %v9663_v43, %v9662_v52  ;;  %v9664_v52 = vunpack.c.l.b16 %v18016_v20  ;;  %v9665_v43 = vunpack.c.l.b16 %v18017_v10 }
 0x8bc   : > { %9421 = vmatmul.bf16.gmra.mxu1 %v11804_v17 }
 0x8bd   : > { %v9313_v23 = vpop.f32.mrf.mxu0 }
 0x8bf   : > { %v9133_v45 = vpop.f32.mrf.mxu2  ;;  %v9197_v36 = vpop.f32.mrf.mxu3 }
 0x8c0   : > { %v12299_v45 = vld [vmem:[#allocation2 + $0x600] sm:$0xf]  ;;  %v13310_v36 = vld [vmem:[#allocation2 + $0x5bc] sm:$0xf] }
 0x8c1   : > { %v9014_v15 = vpop.f32.mrf.mxu1 }
 0x8c2   : > { %v17240_v15 = vld [vmem:[%s17588_s7] ss:$0 sm:$0xff] }
 0x8c4   : > { %9841 = vmatmul.bf16.gmra.mxu2 %v9707_v2  ;;  %9233 = vmatmul.bf16.gmra.mxu3 %v12264_v31  ;;  %v17234_v2 = vld [vmem:[%s17590_s9] ss:$0 sm:$0xff] }
 0x8c5   : > { %v9314_v13 = vpop.f32.mrf.mxu0  ;;  %9351 = vmatmul.bf16.gmra.mxu0 %v12232_v7 }
 0x8c6   : > { %v17215_v44 = vadd.f32 %v9314_v13, %v9193_v54  ;;  %v17226_v54 = vld [vmem:[%s17587_s6] ss:$0 sm:$0xff] }
 0x8c7   : > { %v9135_v39 = vpop.f32.mrf.mxu2  ;;  %v9199_v3 = vpop.f32.mrf.mxu3 }
 0x8c8   : > { %v9200_v61 = vadd.f32 %v9199_v3, %v17109_v51  ;;  %v13323_v51 = vld [vmem:[#allocation2 + $0x620] sm:$0xf0]  ;;  %v11876_v3 = vor.u32 %v13216_v4, %v11875_v30  ;;  %v12335_v4 = vld [vmem:[#allocation2 + $0x648] sm:$0xf] }
 0x8c9   : > { %v9391_v41 = vpop.f32.mrf.mxu1  ;;  %v12300_v23 = vor.u32 %v13323_v51, %v12299_v45  ;;  %v13319_v30 = vld [vmem:[#allocation2 + $0x604] sm:$0xf] }
 0x8ca   : > { %v9392_v18 = vadd.f32 %v9391_v41, %v17127_v29 }
 0x8cc   : > { %9425 = vmatmul.bf16.gmra.mxu1 %v11840_v49  ;;  %v9508_v29 = vmul.f32 %v17226_v54, %v9392_v18  ;;  %v9709_v18 = vpack.c.b16 %v9665_v43, %v9664_v52 }
 0x8cd   : > { %v9317_v11 = vpop.f32.mrf.mxu0 }
 0x8ce   : > { %v17220_v63 = vadd.f32 %v9317_v11, %v9196_v58  ;;  %v12265_v58 = vld [vmem:[#allocation2 + $0x5dc] sm:$0xf0]  ;;  %v9544_v7 = vadd.f32 %v17240_v15, %v9508_v29  ;;  %v13332_v29 = vld [vmem:[#allocation2 + $0x668] sm:$0xf0] }
 0x8cf   : > { %v9136_v19 = vpop.f32.mrf.mxu2  ;;  %v9201_v26 = vpop.f32.mrf.mxu3  ;;  %v12268_v16 = vor.u32 %v13310_v36, %v12265_v58 }
 0x8d0   : > { %v17229_v40 = vadd.f32 %v9201_v26, %v17111_v55  ;;  %v17245_v55 = vld [vmem:[%s17591_s10] ss:$0 sm:$0xff] }
 0x8d1   : > { %v9393_v17 = vpop.f32.mrf.mxu1 }
 0x8d2   : > { %v9394_v13 = vadd.f32 %v9393_v17, %v17131_v6 }
 0x8d4   : > { %9845 = vmatmul.bf16.gmra.mxu2 %v9708_v0  ;;  %9237 = vmatmul.bf16.gmra.mxu3 %v12300_v23  ;;  %v9509_v19 = vmul.f32 %v17226_v54, %v9394_v13 }
 0x8d5   : > { %v9319_v8 = vpop.f32.mrf.mxu0  ;;  %9355 = vmatmul.bf16.gmra.mxu0 %v12268_v16 }
 0x8d6   : > { %v9545_v58 = vadd.f32 %v17240_v15, %v9509_v19  ;;  %v12336_v8 = vor.u32 %v13332_v29, %v12335_v4  ;;  %v18018_v19 = vld [vmem:[#allocation44_spill] sm:$0xff]  ;;  %v12371_v4 = vld [vmem:[#allocation2 + $0x690] sm:$0xf] }
 0x8d7   : > { %v9811_v22 = vpop.f32.mrf.mxu2  ;;  %v9204_v41 = vpop.f32.mrf.mxu3 }
 0x8d8   : > { %v9928_v31 = vmul.f32 %v17234_v2, %v9811_v22 }
 0x8d9   : > { %v9396_v39 = vpop.f32.mrf.mxu1 }
 0x8da   : > { %v9964_v46 = vadd.f32 %v17245_v55, %v9928_v31  ;;  %v12301_v31 = vld [vmem:[#allocation2 + $0x624] sm:$0xf0] }
 0x8db   : > { %v12304_v13 = vor.u32 %v13319_v30, %v12301_v31  ;;  %v12337_v31 = vld [vmem:[#allocation2 + $0x66c] sm:$0xf0] }
 0x8dc   : > { %v9996_v49 = vadd.f32 %v9964_v46, %v9544_v7  ;;  %9429 = vmatmul.bf16.gmra.mxu1 %v11876_v3  ;;  %v13225_v7 = vld [vmem:[#allocation2 + $0x310] sm:$0xf0] }
 0x8dd   : > { %v9321_v26 = vpop.f32.mrf.mxu0 }
 0x8de   : > { %vm10028_vm1 = vcmp.ge.f32.partialorder %v9996_v49, 0.0  ;;  %v10060_v6 = vmul.f32 0.01, %v9996_v49  ;;  %v17263_v45 = vadd.f32 %v9321_v26, %v9200_v61 }
 0x8df   : > { %v9813_v0 = vpop.f32.mrf.mxu2  ;;  %v9205_v23 = vpop.f32.mrf.mxu3 }
 0x8e0   : > { %v10092_v11 = vsel %vm10028_vm1, %v9996_v49, %v10060_v6  ;;  %v9929_v17 = vmul.f32 %v17234_v2, %v9813_v0  ;;  %v9206_v22 = vadd.f32 %v9205_v23, %v17115_v32  ;;  %v11911_v49 = vld [vmem:[#allocation2 + $0x2f0] sm:$0xf]  ;;  %v9666_v6 = vunpack.c.l.b16 %v18018_v19 }
 0x8e1   : > { %10125 = vst.msk [vmem:[%s17258_s23] sm:$0xff] %vm10124_vm4, %v10092_v11  ;;  %v9397_v51 = vpop.f32.mrf.mxu1  ;;  %v11912_v10 = vor.u32 %v13225_v7, %v11911_v49  ;;  %v18019_v0 = vld [vmem:[#allocation45_spill] sm:$0xff] }
 0x8e2   : > { %v9965_v36 = vadd.f32 %v17245_v55, %v9929_v17  ;;  %v9398_v20 = vadd.f32 %v9397_v51, %v17139_v37  ;;  %v9667_v11 = vunpack.c.l.b16 %v18019_v0 }
 0x8e4   : > { %v9997_v16 = vadd.f32 %v9965_v36, %v9545_v58  ;;  %9849 = vmatmul.bf16.gmra.mxu2 %v9709_v18  ;;  %9242 = vmatmul.bf16.gmra.mxu3 %v12336_v8  ;;  %v9510_v17 = vmul.f32 %v17226_v54, %v9398_v20  ;;  %v9710_v58 = vpack.c.b16 %v9667_v11, %v9666_v6  ;;  %v13341_v36 = vld [vmem:[#allocation2 + $0x6b0] sm:$0xf0]  ;;  %v11947_v20 = vld [vmem:[#allocation2 + $0x338] sm:$0xf] }
 0x8e5   : > { %v9323_v46 = vpop.f32.mrf.mxu0  ;;  %9359 = vmatmul.bf16.gmra.mxu0 %v12304_v13  ;;  %v12372_v8 = vor.u32 %v13341_v36, %v12371_v4  ;;  %v13234_v13 = vld [vmem:[#allocation2 + $0x358] sm:$0xf0] }
 0x8e6   : > { %vm10029_vm15 = vcmp.ge.f32.partialorder %v9997_v16, 0.0  ;;  %v10061_v39 = vmul.f32 0.01, %v9997_v16  ;;  %v17271_v32 = vadd.f32 %v9323_v46, %v17229_v40  ;;  %v9546_v29 = vadd.f32 %v17240_v15, %v9510_v17 }
 0x8e7   : > { %v9816_v61 = vpop.f32.mrf.mxu2  ;;  %v9208_v52 = vpop.f32.mrf.mxu3  ;;  %v11948_v0 = vor.u32 %v13234_v13, %v11947_v20 }
 0x8e8   : > { %v10093_v41 = vsel %vm10029_vm15, %v9997_v16, %v10061_v39  ;;  %v9209_v43 = vadd.f32 %v9208_v52, %v17117_v33  ;;  %v13328_v61 = vld [vmem:[#allocation2 + $0x64c] sm:$0xf] }
 0x8e9   : > { %10126 = vst.msk [vmem:[%s17258_s23 + $0x8] sm:$0xff] %vm10124_vm4, %v10093_v41  ;;  %v9400_v3 = vpop.f32.mrf.mxu1  ;;  %v12340_v41 = vor.u32 %v13328_v61, %v12337_v31 }
 0x8ea   : > { %v9401_v37 = vadd.f32 %v9400_v3, %v17143_v12 }
 0x8ec   : > { %9434 = vmatmul.bf16.gmra.mxu1 %v11912_v10  ;;  %v9511_v39 = vmul.f32 %v17226_v54, %v9401_v37 }
 0x8ed   : > { %v9326_v40 = vpop.f32.mrf.mxu0 }
 0x8ee   : > { %v9547_v10 = vadd.f32 %v17240_v15, %v9511_v39  ;;  %v13337_v39 = vld [vmem:[#allocation2 + $0x694] sm:$0xf] }
 0x8ef   : > { %v9817_v18 = vpop.f32.mrf.mxu2  ;;  %v9210_v51 = vpop.f32.mrf.mxu3 }
 0x8f0   : > { %v9930_v26 = vmul.f32 %v17234_v2, %v9817_v18  ;;  %v18020_v18 = vld [vmem:[#allocation51_spill] sm:$0xff] }
 0x8f1   : > { %v9402_v23 = vpop.f32.mrf.mxu1 }
 0x8f2   : > { %v9966_v33 = vadd.f32 %v17245_v55, %v9930_v26  ;;  %v9668_v26 = vunpack.c.l.b16 %v18020_v18  ;;  %v18023_v18 = vld [vmem:[#allocation60_spill] sm:$0xff] }
 0x8f4   : > { %v9998_v16 = vadd.f32 %v9966_v33, %v9546_v29  ;;  %9854 = vmatmul.bf16.gmra.mxu2 %v9710_v58  ;;  %9246 = vmatmul.bf16.gmra.mxu3 %v12372_v8  ;;  %v18021_v58 = vld [vmem:[#allocation52_spill] sm:$0xff]  ;;  %v12407_v8 = vld [vmem:[#allocation2 + $0x6d8] sm:$0xf] }
 0x8f5   : > { %v9327_v3 = vpop.f32.mrf.mxu0  ;;  %9364 = vmatmul.bf16.gmra.mxu0 %v12340_v41  ;;  %v9669_v40 = vunpack.c.l.b16 %v18021_v58  ;;  %v13243_v41 = vld [vmem:[#allocation2 + $0x3a0] sm:$0xf0] }
 0x8f6   : > { %vm10030_vm0 = vcmp.ge.f32.partialorder %v9998_v16, 0.0  ;;  %v10062_v30 = vmul.f32 0.01, %v9998_v16  ;;  %v17286_v52 = vadd.f32 %v9327_v3, %v9206_v22 }
 0x8f7   : > { %v9820_v7 = vpop.f32.mrf.mxu2  ;;  %v9212_v19 = vpop.f32.mrf.mxu3  ;;  %v9711_v37 = vpack.c.b16 %v9669_v40, %v9668_v26  ;;  %v9671_v26 = vunpack.c.l.b16 %v18023_v18  ;;  %v18025_v18 = vld [vmem:[#allocation69_spill] sm:$0xff] }
 0x8f8   : > { %v10094_v12 = vsel %vm10030_vm0, %v9998_v16, %v10062_v30  ;;  %v9931_v46 = vmul.f32 %v17234_v2, %v9820_v7  ;;  %v9213_v11 = vadd.f32 %v9212_v19, %v17123_v38  ;;  %v13350_v16 = vld [vmem:[#allocation2 + $0x6f8] sm:$0xf0]  ;;  %v12373_v30 = vld [vmem:[#allocation2 + $0x6b4] sm:$0xf0] }
 0x8f9   : > { %10127 = vst.msk [vmem:[%s17258_s23 + $0x10] sm:$0xff] %vm10124_vm4, %v10094_v12  ;;  %v9404_v49 = vpop.f32.mrf.mxu1  ;;  %v12408_v61 = vor.u32 %v13350_v16, %v12407_v8  ;;  %v12376_v12 = vor.u32 %v13337_v39, %v12373_v30  ;;  %v13359_v16 = vld [vmem:[#allocation2 + $0x740] sm:$0xf0]  ;;  %v12443_v30 = vld [vmem:[#allocation2 + $0x720] sm:$0xf] }
 0x8fa   : > { %v9967_v6 = vadd.f32 %v17245_v55, %v9931_v46  ;;  %v9405_v4 = vadd.f32 %v9404_v49, %v17153_v50  ;;  %v11983_v50 = vld [vmem:[#allocation2 + $0x380] sm:$0xf] }
 0x8fb   : > { %v11984_v19 = vor.u32 %v13243_v41, %v11983_v50 }
 0x8fc   : > { %v9999_v17 = vadd.f32 %v9967_v6, %v9547_v10  ;;  %9438 = vmatmul.bf16.gmra.mxu1 %v11948_v0  ;;  %v9512_v7 = vmul.f32 %v17226_v54, %v9405_v4  ;;  %v18022_v0 = vld [vmem:[#allocation59_spill] sm:$0xff] }
 0x8fd   : > { %v9330_v51 = vpop.f32.mrf.mxu0 }
 0x8fe   : > { %vm10031_vm2 = vcmp.ge.f32.partialorder %v9999_v17, 0.0  ;;  %v10063_v23 = vmul.f32 0.01, %v9999_v17  ;;  %v17295_v33 = vadd.f32 %v9330_v51, %v9209_v43  ;;  %v9548_v49 = vadd.f32 %v17240_v15, %v9512_v7  ;;  %v12409_v7 = vld [vmem:[#allocation2 + $0x6fc] sm:$0xf0] }
 0x8ff   : > { %v9822_v22 = vpop.f32.mrf.mxu2  ;;  %v9214_v38 = vpop.f32.mrf.mxu3 }
 0x900   : > { %v10095_v29 = vsel %vm10031_vm2, %v9999_v17, %v10063_v23  ;;  %v9215_v31 = vadd.f32 %v9214_v38, %v17125_v21  ;;  %v9670_v17 = vunpack.c.l.b16 %v18022_v0  ;;  %v18024_v0 = vld [vmem:[#allocation68_spill] sm:$0xff] }
 0x901   : > { %10128 = vst.msk [vmem:[%s17258_s23 + $0x18] sm:$0xff] %vm10124_vm4, %v10095_v29  ;;  %v9406_v36 = vpop.f32.mrf.mxu1 }
 0x902   : > { %v9407_v21 = vadd.f32 %v9406_v36, %v17157_v28  ;;  %v9712_v28 = vpack.c.b16 %v9671_v26, %v9670_v17  ;;  %v9672_v17 = vunpack.c.l.b16 %v18024_v0  ;;  %v9673_v26 = vunpack.c.l.b16 %v18025_v18 }
 0x904   : > { %9858 = vmatmul.bf16.gmra.mxu2 %v9711_v37  ;;  %9250 = vmatmul.bf16.gmra.mxu3 %v12408_v61  ;;  %v9513_v58 = vmul.f32 %v17226_v54, %v9407_v21  ;;  %v12019_v21 = vld [vmem:[#allocation2 + $0x3c8] sm:$0xf] }
 0x905   : > { %v9332_v46 = vpop.f32.mrf.mxu0  ;;  %9368 = vmatmul.bf16.gmra.mxu0 %v12376_v12  ;;  %v13346_v12 = vld [vmem:[#allocation2 + $0x6dc] sm:$0xf] }
 0x906   : > { %v9549_v4 = vadd.f32 %v17240_v15, %v9513_v58  ;;  %v12412_v46 = vor.u32 %v13346_v12, %v12409_v7  ;;  %v13355_v7 = vld [vmem:[#allocation2 + $0x724] sm:$0xf] }
 0x907   : > { %v9824_v13 = vpop.f32.mrf.mxu2  ;;  %v9217_v20 = vpop.f32.mrf.mxu3 }
 0x908   : > { %v9932_v43 = vmul.f32 %v17234_v2, %v9824_v13  ;;  %v12444_v13 = vor.u32 %v13359_v16, %v12443_v30  ;;  %v12445_v16 = vld [vmem:[#allocation2 + $0x744] sm:$0xf0] }
 0x909   : > { %v9409_v3 = vpop.f32.mrf.mxu1  ;;  %v12448_v12 = vor.u32 %v13355_v7, %v12445_v16  ;;  %v13270_v16 = vld [vmem:[#allocation2 + $0x478] sm:$0xf0] }
 0x90a   : > { %v9968_v10 = vadd.f32 %v17245_v55, %v9932_v43  ;;  %v13252_v43 = vld [vmem:[#allocation2 + $0x3e8] sm:$0xf0] }
 0x90c   : > { %v10000_v6 = vadd.f32 %v9968_v10, %v9548_v49  ;;  %9442 = vmatmul.bf16.gmra.mxu1 %v11984_v19  ;;  %v12020_v19 = vor.u32 %v13252_v43, %v12019_v21 }
 0x90d   : > { %v9334_v37 = vpop.f32.mrf.mxu0 }
 0x90e   : > { %vm10032_vm3 = vcmp.ge.f32.partialorder %v10000_v6, 0.0  ;;  %v10064_v40 = vmul.f32 0.01, %v10000_v6  ;;  %v17310_v36 = vadd.f32 %v9334_v37, %v9213_v11 }
 0x90f   : > { %v9826_v23 = vpop.f32.mrf.mxu2  ;;  %v9218_v38 = vpop.f32.mrf.mxu3 }
 0x910   : > { %v10096_v22 = vsel %vm10032_vm3, %v10000_v6, %v10064_v40  ;;  %v9933_v29 = vmul.f32 %v17234_v2, %v9826_v23  ;;  %v9219_v39 = vadd.f32 %v9218_v38, %v17135_v60 }
 0x911   : > { %10129 = vst.msk [vmem:[%s17258_s23 + $0x20] sm:$0xff] %vm10124_vm4, %v10096_v22  ;;  %v9410_v51 = vpop.f32.mrf.mxu1  ;;  %v9713_v22 = vpack.c.b16 %v9673_v26, %v9672_v17  ;;  %v18026_v17 = vld [vmem:[#allocation79_spill] sm:$0xff]  ;;  %v18027_v26 = vld [vmem:[#allocation80_spill] sm:$0xff] }
 0x912   : > { %v9969_v8 = vadd.f32 %v17245_v55, %v9933_v29  ;;  %v9411_v60 = vadd.f32 %v9410_v51, %v17167_v1  ;;  %v13368_v51 = vld [vmem:[#allocation2 + $0x788] sm:$0xf0]  ;;  %v9674_v18 = vunpack.c.l.b16 %v18026_v17 }
 0x914   : > { %v10001_v61 = vadd.f32 %v9969_v8, %v9549_v4  ;;  %9862 = vmatmul.bf16.gmra.mxu2 %v9712_v28  ;;  %9253 = vmatmul.bf16.gmra.mxu3 %v12444_v13  ;;  %v9514_v58 = vmul.f32 %v17226_v54, %v9411_v60  ;;  %v12479_v4 = vld [vmem:[#allocation2 + $0x768] sm:$0xf] }
 0x915   : > { %v9336_v50 = vpop.f32.mrf.mxu0  ;;  %9372 = vmatmul.bf16.gmra.mxu0 %v12412_v46  ;;  %v12480_v8 = vor.u32 %v13368_v51, %v12479_v4  ;;  %v12481_v51 = vld [vmem:[#allocation2 + $0x78c] sm:$0xf0]  ;;  %v13364_v4 = vld [vmem:[#allocation2 + $0x76c] sm:$0xf] }
 0x916   : > { %vm10033_vm5 = vcmp.ge.f32.partialorder %v10001_v61, 0.0  ;;  %v10065_v41 = vmul.f32 0.01, %v10001_v61  ;;  %v17317_v20 = vadd.f32 %v9336_v50, %v9215_v31  ;;  %v9550_v28 = vadd.f32 %v17240_v15, %v9514_v58 }
 0x917   : > { %v9829_v11 = vpop.f32.mrf.mxu2  ;;  %v9221_v10 = vpop.f32.mrf.mxu3  ;;  %v9675_v58 = vunpack.c.l.b16 %v18027_v26 }
 0x918   : > { %v10097_v3 = vsel %vm10033_vm5, %v10001_v61, %v10065_v41  ;;  %v9222_v6 = vadd.f32 %v9221_v10, %v17137_v57  ;;  %v13261_v41 = vld [vmem:[#allocation2 + $0x430] sm:$0xf0] }
 0x919   : > { %10130 = vst.msk [vmem:[%s17258_s23 + $0x28] sm:$0xff] %vm10124_vm4, %v10097_v3  ;;  %v9413_v49 = vpop.f32.mrf.mxu1  ;;  %v12055_v3 = vld [vmem:[#allocation2 + $0x410] sm:$0xf] }
 0x91a   : > { %v9414_v1 = vadd.f32 %v9413_v49, %v17173_v35  ;;  %v12056_v10 = vor.u32 %v13261_v41, %v12055_v3 }
 0x91c   : > { %9447 = vmatmul.bf16.gmra.mxu1 %v12020_v19  ;;  %v9515_v30 = vmul.f32 %v17226_v54, %v9414_v1 }
 0x91d   : > { %v9339_v31 = vpop.f32.mrf.mxu0 }
 0x91e   : > { %v9551_v49 = vadd.f32 %v17240_v15, %v9515_v30 }
 0x91f   : > { %v9830_v40 = vpop.f32.mrf.mxu2  ;;  %v9223_v37 = vpop.f32.mrf.mxu3 }
 0x920   : > { %v9934_v23 = vmul.f32 %v17234_v2, %v9830_v40 }
 0x921   : > { %v9415_v29 = vpop.f32.mrf.mxu1 }
 0x922   : > { %v9970_v57 = vadd.f32 %v17245_v55, %v9934_v23 }
 0x924   : > { %v10002_v38 = vadd.f32 %v9970_v57, %v9550_v28  ;;  %9867 = vmatmul.bf16.gmra.mxu2 %v9713_v22  ;;  %9256 = vmatmul.bf16.gmra.mxu3 %v12480_v8  ;;  %v9714_v22 = vpack.c.b16 %v9675_v58, %v9674_v18  ;;  %v12484_v8 = vor.u32 %v13364_v4, %v12481_v51 }
 0x925   : > { %v9340_v43 = vpop.f32.mrf.mxu0  ;;  %9375 = vmatmul.bf16.gmra.mxu0 %v12448_v12 }
 0x926   : > { %vm10034_vm6 = vcmp.ge.f32.partialorder %v10002_v38, 0.0  ;;  %v10066_v61 = vmul.f32 0.01, %v10002_v38  ;;  %v17332_v50 = vadd.f32 %v9340_v43, %v9219_v39 }
 0x927   : > { %v9833_v13 = vpop.f32.mrf.mxu2  ;;  %v9225_v21 = vpop.f32.mrf.mxu3 }
 0x928   : > { %v10098_v35 = vsel %vm10034_vm6, %v10002_v38, %v10066_v61  ;;  %v9935_v11 = vmul.f32 %v17234_v2, %v9833_v13  ;;  %v9226_v19 = vadd.f32 %v9225_v21, %v17147_v14  ;;  %v12091_v13 = vld [vmem:[#allocation2 + $0x458] sm:$0xf] }
 0x929   : > { %10131 = vst.msk [vmem:[%s17258_s23 + $0x30] sm:$0xff] %vm10124_vm4, %v10098_v35  ;;  %v9417_v46 = vpop.f32.mrf.mxu1  ;;  %v12092_v12 = vor.u32 %v13270_v16, %v12091_v13 }
 0x92a   : > { %v9971_v60 = vadd.f32 %v17245_v55, %v9935_v11  ;;  %v9418_v1 = vadd.f32 %v9417_v46, %v17183_v56  ;;  %v18028_v11 = vld [vmem:[#allocation88_spill] sm:$0xff]  ;;  %v18029_v46 = vld [vmem:[#allocation89_spill] sm:$0xff] }
 0x92b   : > { %v9676_v43 = vunpack.c.l.b16 %v18028_v11  ;;  %v9677_v3 = vunpack.c.l.b16 %v18029_v46 }
 0x92c   : > { %v10003_v0 = vadd.f32 %v9971_v60, %v9551_v49  ;;  %9451 = vmatmul.bf16.gmra.mxu1 %v12056_v10  ;;  %v9516_v57 = vmul.f32 %v17226_v54, %v9418_v1  ;;  %v13279_v1 = vld [vmem:[#allocation2 + $0x4c0] sm:$0xf0] }
 0x92d   : > { %v9343_v31 = vpop.f32.mrf.mxu0 }
 0x92e   : > { %vm10035_vm7 = vcmp.ge.f32.partialorder %v10003_v0, 0.0  ;;  %v10067_v40 = vmul.f32 0.01, %v10003_v0  ;;  %v17341_v28 = vadd.f32 %v9343_v31, %v9222_v6  ;;  %v9552_v6 = vadd.f32 %v17240_v15, %v9516_v57 }
 0x92f   : > { %v9835_v39 = vpop.f32.mrf.mxu2  ;;  %v9227_v14 = vpop.f32.mrf.mxu3 }
 0x930   : > { %v10099_v23 = vsel %vm10035_vm7, %v10003_v0, %v10067_v40  ;;  %v9228_v37 = vadd.f32 %v9227_v14, %v17151_v34 }
 0x931   : > { %10132 = vst.msk [vmem:[%s17258_s23 + $0x38] sm:$0xff] %vm10124_vm4, %v10099_v23  ;;  %v9419_v29 = vpop.f32.mrf.mxu1 }
 0x932   : > { %v9420_v56 = vadd.f32 %v9419_v29, %v17187_v62  ;;  %v9715_v62 = vpack.c.b16 %v9677_v3, %v9676_v43 }
 0x934   : > { %9871 = vmatmul.bf16.gmra.mxu2 %v9714_v22  ;;  %v9517_v49 = vmul.f32 %v17226_v54, %v9420_v56 }
 0x935   : > { %v9345_v61 = vpop.f32.mrf.mxu0  ;;  %9378 = vmatmul.bf16.gmra.mxu0 %v12484_v8 }
 0x936   : > { %v9553_v58 = vadd.f32 %v17240_v15, %v9517_v49 }
 0x937   : > { %v9837_v38 = vpop.f32.mrf.mxu2  ;;  %v9230_v34 = vpop.f32.mrf.mxu3 }
 0x938   : > { %v9936_v30 = vmul.f32 %v17234_v2, %v9837_v38 }
 0x939   : > { %v9422_v7 = vpop.f32.mrf.mxu1 }
 0x93a   : > { %v9972_v41 = vadd.f32 %v17245_v55, %v9936_v30  ;;  %v18030_v30 = vld [vmem:[#allocation95_spill] sm:$0xff]  ;;  %v18031_v7 = vld [vmem:[#allocation96_spill] sm:$0xff] }
 0x93b   : > { %v9678_v61 = vunpack.c.l.b16 %v18030_v30  ;;  %v9679_v13 = vunpack.c.l.b16 %v18031_v7 }
 0x93c   : > { %v10004_v35 = vadd.f32 %v9972_v41, %v9552_v6  ;;  %9455 = vmatmul.bf16.gmra.mxu1 %v12092_v12 }
 0x93d   : > { %v9347_v17 = vpop.f32.mrf.mxu0  ;;  %v9716_v41 = vpack.c.b16 %v9679_v13, %v9678_v61 }
 0x93e   : > { %vm10036_vm8 = vcmp.ge.f32.partialorder %v10004_v35, 0.0  ;;  %v10068_v21 = vmul.f32 0.01, %v10004_v35  ;;  %v17356_v26 = vadd.f32 %v9347_v17, %v9226_v19  ;;  %v12127_v19 = vld [vmem:[#allocation2 + $0x4a0] sm:$0xf] }
 0x93f   : > { %v9839_v60 = vpop.f32.mrf.mxu2  ;;  %v9231_v40 = vpop.f32.mrf.mxu3  ;;  %v12128_v8 = vor.u32 %v13279_v1, %v12127_v19  ;;  %v12163_v17 = vld [vmem:[#allocation2 + $0x4e8] sm:$0xf] }
 0x940   : > { %v10100_v10 = vsel %vm10036_vm8, %v10004_v35, %v10068_v21  ;;  %v9937_v0 = vmul.f32 %v17234_v2, %v9839_v60  ;;  %v9232_v23 = vadd.f32 %v9231_v40, %v17163_v48  ;;  %v13288_v21 = vld [vmem:[#allocation2 + $0x508] sm:$0xf0] }
 0x941   : > { %10133 = vst.msk [vmem:[%s17258_s23 + $0x40] sm:$0xff] %vm10124_vm4, %v10100_v10  ;;  %v9423_v18 = vpop.f32.mrf.mxu1 }
 0x942   : > { %v9973_v39 = vadd.f32 %v17245_v55, %v9937_v0  ;;  %v9424_v38 = vadd.f32 %v9423_v18, %v17197_v24 }
 0x944   : > { %v10005_v22 = vadd.f32 %v9973_v39, %v9553_v58  ;;  %9875 = vmatmul.bf16.gmra.mxu2 %v9715_v62  ;;  %v9518_v6 = vmul.f32 %v17226_v54, %v9424_v38  ;;  %v12164_v39 = vor.u32 %v13288_v21, %v12163_v17 }
 0x945   : > { %v9349_v51 = vpop.f32.mrf.mxu0 }
 0x946   : > { %vm10037_vm9 = vcmp.ge.f32.partialorder %v10005_v22, 0.0  ;;  %v10069_v31 = vmul.f32 0.01, %v10005_v22  ;;  %v17363_v4 = vadd.f32 %v9349_v51, %v9228_v37  ;;  %v9554_v24 = vadd.f32 %v17240_v15, %v9518_v6 }
 0x947   : > { %v9842_v29 = vpop.f32.mrf.mxu2  ;;  %v9234_v16 = vpop.f32.mrf.mxu3 }
 0x948   : > { %v10101_v14 = vsel %vm10037_vm9, %v10005_v22, %v10069_v31  ;;  %v9235_v48 = vadd.f32 %v9234_v16, %v17165_v25  ;;  %v18032_v29 = vld [vmem:[#allocation99_spill] sm:$0xff] }
 0x949   : > { %10134 = vst.msk [vmem:[%s17258_s23 + $0x48] sm:$0xff] %vm10124_vm4, %v10101_v14  ;;  %v9426_v57 = vpop.f32.mrf.mxu1  ;;  %v9680_v1 = vunpack.c.l.b16 %v18032_v29  ;;  %v18033_v14 = vld [vmem:[#allocation101_spill] sm:$0xff] }
 0x94a   : > { %v9427_v35 = vadd.f32 %v9426_v57, %v17202_v53  ;;  %v9681_v51 = vunpack.c.l.b16 %v18033_v14 }
 0x94c   : > { %9460 = vmatmul.bf16.gmra.mxu1 %v12128_v8  ;;  %v9519_v46 = vmul.f32 %v17226_v54, %v9427_v35  ;;  %v9717_v38 = vpack.c.b16 %v9681_v51, %v9680_v1  ;;  %v13306_v51 = vld [vmem:[#allocation2 + $0x598] sm:$0xf0] }
 0x94d   : > { %v9352_v12 = vpop.f32.mrf.mxu0 }
 0x94e   : > { %v9555_v18 = vadd.f32 %v17240_v15, %v9519_v46  ;;  %v18035_v46 = vld [vmem:[#allocation42_spill] sm:$0xff] }
 0x94f   : > { %v9843_v56 = vpop.f32.mrf.mxu2  ;;  %v9236_v11 = vpop.f32.mrf.mxu3 }
 0x950   : > { %v9938_v34 = vmul.f32 %v17234_v2, %v9843_v56  ;;  %v13297_v56 = vld [vmem:[#allocation2 + $0x550] sm:$0xf0] }
 0x951   : > { %v9428_v37 = vpop.f32.mrf.mxu1 }
 0x952   : > { %v9974_v25 = vadd.f32 %v17245_v55, %v9938_v34  ;;  %v12199_v37 = vld [vmem:[#allocation2 + $0x530] sm:$0xf] }
 0x953   : > { %v12200_v11 = vor.u32 %v13297_v56, %v12199_v37 }
 0x954   : > { %v10006_v43 = vadd.f32 %v9974_v25, %v9554_v24  ;;  %9880 = vmatmul.bf16.gmra.mxu2 %v9716_v41  ;;  %v18034_v25 = vld [vmem:[#allocation41_spill] sm:$0xff] }
 0x955   : > { %v9353_v0 = vpop.f32.mrf.mxu0 }
 0x956   : > { %vm10038_vm10 = vcmp.ge.f32.partialorder %v10006_v43, 0.0  ;;  %v10070_v3 = vmul.f32 0.01, %v10006_v43  ;;  %v17378_v53 = vadd.f32 %v9353_v0, %v9232_v23 }
 0x957   : > { %v9846_v49 = vpop.f32.mrf.mxu2  ;;  %v9238_v58 = vpop.f32.mrf.mxu3 }
 0x958   : > { %v10102_v60 = vsel %vm10038_vm10, %v10006_v43, %v10070_v3  ;;  %v9939_v10 = vmul.f32 %v17234_v2, %v9846_v49  ;;  %v9239_v22 = vadd.f32 %v9238_v58, %v17177_v27  ;;  %v9682_v43 = vunpack.c.l.b16 %v18034_v25 }
 0x959   : > { %10135 = vst.msk [vmem:[%s17258_s23 + $0x50] sm:$0xff] %vm10124_vm4, %v10102_v60  ;;  %v9430_v62 = vpop.f32.mrf.mxu1  ;;  %v9683_v3 = vunpack.c.l.b16 %v18035_v46 }
 0x95a   : > { %v9975_v40 = vadd.f32 %v17245_v55, %v9939_v10  ;;  %v9431_v61 = vadd.f32 %v9430_v62, %v17207_v9 }
 0x95c   : > { %v10007_v31 = vadd.f32 %v9975_v40, %v9555_v18  ;;  %9464 = vmatmul.bf16.gmra.mxu1 %v12164_v39  ;;  %v9520_v13 = vmul.f32 %v17226_v54, %v9431_v61 }
 0x95d   : > { %v9356_v16 = vpop.f32.mrf.mxu0 }
 0x95e   : > { %vm10039_vm11 = vcmp.ge.f32.partialorder %v10007_v31, 0.0  ;;  %v10071_v57 = vmul.f32 0.01, %v10007_v31  ;;  %v17387_v30 = vadd.f32 %v9356_v16, %v9235_v48  ;;  %v9556_v24 = vadd.f32 %v17240_v15, %v9520_v13 }
 0x95f   : > { %v9848_v19 = vpop.f32.mrf.mxu2  ;;  %v9240_v27 = vpop.f32.mrf.mxu3 }
 0x960   : > { %v10103_v23 = vsel %vm10039_vm11, %v10007_v31, %v10071_v57  ;;  %v9241_v7 = vadd.f32 %v9240_v27, %v17181_v47  ;;  %v18036_v27 = vld [vmem:[#allocation46_spill] sm:$0xff] }
 0x961   : > { %10136 = vst.msk [vmem:[%s17258_s23 + $0x58] sm:$0xff] %vm10124_vm4, %v10103_v23  ;;  %v9432_v8 = vpop.f32.mrf.mxu1  ;;  %v9684_v13 = vunpack.c.l.b16 %v18036_v27  ;;  %v13324_v27 = vld [vmem:[#allocation2 + $0x628] sm:$0xf0] }
 0x962   : > { %v9433_v48 = vadd.f32 %v9432_v8, %v17210_v5  ;;  %v9718_v5 = vpack.c.b16 %v9683_v3, %v9682_v43  ;;  %v13315_v43 = vld [vmem:[#allocation2 + $0x5e0] sm:$0xf0] }
 0x964   : > { %9884 = vmatmul.bf16.gmra.mxu2 %v9717_v38  ;;  %v9521_v49 = vmul.f32 %v17226_v54, %v9433_v48 }
 0x965   : > { %v9358_v41 = vpop.f32.mrf.mxu0 }
 0x966   : > { %v9557_v58 = vadd.f32 %v17240_v15, %v9521_v49 }
 0x967   : > { %v9850_v6 = vpop.f32.mrf.mxu2  ;;  %v9243_v35 = vpop.f32.mrf.mxu3 }
 0x968   : > { %v9940_v34 = vmul.f32 %v17234_v2, %v9850_v6  ;;  %v18037_v6 = vld [vmem:[#allocation47_spill] sm:$0xff] }
 0x969   : > { %v9435_v12 = vpop.f32.mrf.mxu1  ;;  %v9685_v56 = vunpack.c.l.b16 %v18037_v6 }
 0x96a   : > { %v9976_v9 = vadd.f32 %v17245_v55, %v9940_v34 }
 0x96b   : > { %v9719_v37 = vpack.c.b16 %v9685_v56, %v9684_v13 }
 0x96c   : > { %v10008_v47 = vadd.f32 %v9976_v9, %v9556_v24  ;;  %9468 = vmatmul.bf16.gmra.mxu1 %v12200_v11 }
 0x96d   : > { %v9360_v62 = vpop.f32.mrf.mxu0 }
 0x96e   : > { %vm10040_vm12 = vcmp.ge.f32.partialorder %v10008_v47, 0.0  ;;  %v10072_v21 = vmul.f32 0.01, %v10008_v47  ;;  %v17402_v18 = vadd.f32 %v9360_v62, %v9239_v22  ;;  %v12235_v22 = vld [vmem:[#allocation2 + $0x578] sm:$0xf] }
 0x96f   : > { %v9852_v60 = vpop.f32.mrf.mxu2  ;;  %v9244_v40 = vpop.f32.mrf.mxu3  ;;  %v12236_v61 = vor.u32 %v13306_v51, %v12235_v22 }
 0x970   : > { %v10104_v10 = vsel %vm10040_vm12, %v10008_v47, %v10072_v21  ;;  %v9941_v0 = vmul.f32 %v17234_v2, %v9852_v60  ;;  %v9245_v31 = vadd.f32 %v9244_v40, %v17193_v59  ;;  %v12271_v60 = vld [vmem:[#allocation2 + $0x5c0] sm:$0xf] }
 0x971   : > { %10137 = vst.msk [vmem:[%s17258_s23 + $0x60] sm:$0xff] %vm10124_vm4, %v10104_v10  ;;  %v9436_v17 = vpop.f32.mrf.mxu1  ;;  %v12272_v62 = vor.u32 %v13315_v43, %v12271_v60 }
 0x972   : > { %v9977_v39 = vadd.f32 %v17245_v55, %v9941_v0  ;;  %v9437_v16 = vadd.f32 %v9436_v17, %v17215_v44 }
 0x974   : > { %v10009_v29 = vadd.f32 %v9977_v39, %v9557_v58  ;;  %9888 = vmatmul.bf16.gmra.mxu2 %v9718_v5  ;;  %v9522_v34 = vmul.f32 %v17226_v54, %v9437_v16  ;;  %v18038_v58 = vld [vmem:[#allocation54_spill] sm:$0xff]  ;;  %v18039_v39 = vld [vmem:[#allocation55_spill] sm:$0xff] }
 0x975   : > { %v9362_v19 = vpop.f32.mrf.mxu0  ;;  %v9686_v40 = vunpack.c.l.b16 %v18038_v58 }
 0x976   : > { %vm10041_vm13 = vcmp.ge.f32.partialorder %v10009_v29, 0.0  ;;  %v10073_v1 = vmul.f32 0.01, %v10009_v29  ;;  %v17409_v38 = vadd.f32 %v9362_v19, %v9241_v7  ;;  %v9558_v44 = vadd.f32 %v17240_v15, %v9522_v34  ;;  %v12307_v34 = vld [vmem:[#allocation2 + $0x608] sm:$0xf] }
 0x977   : > { %v9855_v14 = vpop.f32.mrf.mxu2  ;;  %v9247_v8 = vpop.f32.mrf.mxu3 }
 0x978   : > { %v10105_v57 = vsel %vm10041_vm13, %v10009_v29, %v10073_v1  ;;  %v9248_v59 = vadd.f32 %v9247_v8, %v17195_v42  ;;  %v9687_v29 = vunpack.c.l.b16 %v18039_v39 }
 0x979   : > { %10138 = vst.msk [vmem:[%s17258_s23 + $0x68] sm:$0xff] %vm10124_vm4, %v10105_v57  ;;  %v9439_v23 = vpop.f32.mrf.mxu1 }
 0x97a   : > { %v9440_v48 = vadd.f32 %v9439_v23, %v17220_v63  ;;  %v9720_v57 = vpack.c.b16 %v9687_v29, %v9686_v40  ;;  %v12343_v40 = vld [vmem:[#allocation2 + $0x650] sm:$0xf] }
 0x97c   : > { %9473 = vmatmul.bf16.gmra.mxu1 %v12236_v61  ;;  %v9523_v11 = vmul.f32 %v17226_v54, %v9440_v48  ;;  %v18041_v48 = vld [vmem:[#allocation63_spill] sm:$0xff] }
 0x97d   : > { %v9365_v24 = vpop.f32.mrf.mxu0 }
 0x97e   : > { %v9559_v10 = vadd.f32 %v17240_v15, %v9523_v11 }
 0x97f   : > { %v9856_v41 = vpop.f32.mrf.mxu2  ;;  %v9249_v35 = vpop.f32.mrf.mxu3 }
 0x980   : > { %v9942_v12 = vmul.f32 %v17234_v2, %v9856_v41  ;;  %v9689_v35 = vunpack.c.l.b16 %v18041_v48 }
 0x981   : > { %v9441_v7 = vpop.f32.mrf.mxu1 }
 0x982   : > { %v9978_v42 = vadd.f32 %v17245_v55, %v9942_v12  ;;  %v18040_v7 = vld [vmem:[#allocation62_spill] sm:$0xff] }
 0x984   : > { %v10010_v9 = vadd.f32 %v9978_v42, %v9558_v44  ;;  %9893 = vmatmul.bf16.gmra.mxu2 %v9719_v37  ;;  %v9688_v44 = vunpack.c.l.b16 %v18040_v7 }
 0x985   : > { %v9366_v49 = vpop.f32.mrf.mxu0 }
 0x986   : > { %vm10042_vm14 = vcmp.ge.f32.partialorder %v10010_v9, 0.0  ;;  %v10074_v47 = vmul.f32 0.01, %v10010_v9  ;;  %v17424_v63 = vadd.f32 %v9366_v49, %v9245_v31 }
 0x987   : > { %v9859_v25 = vpop.f32.mrf.mxu2  ;;  %v9251_v0 = vpop.f32.mrf.mxu3 }
 0x988   : > { %v10106_v46 = vsel %vm10042_vm14, %v10010_v9, %v10074_v47  ;;  %v9943_v3 = vmul.f32 %v17234_v2, %v9859_v25 }
 0x989   : > { %10139 = vst.msk [vmem:[%s17258_s23 + $0x70] sm:$0xff] %vm10124_vm4, %v10106_v46  ;;  %v9443_v21 = vpop.f32.mrf.mxu1 }
 0x98a   : > { %v9979_v5 = vadd.f32 %v17245_v55, %v9943_v3  ;;  %v9444_v22 = vadd.f32 %v9443_v21, %v17263_v45  ;;  %v12308_v45 = vor.u32 %v13324_v27, %v12307_v34 }
 0x98c   : > { %v10011_v17 = vadd.f32 %v9979_v5, %v9559_v10  ;;  %9477 = vmatmul.bf16.gmra.mxu1 %v12272_v62  ;;  %v9524_v8 = vmul.f32 %v17226_v54, %v9444_v22  ;;  %v13333_v5 = vld [vmem:[#allocation2 + $0x670] sm:$0xf0] }
 0x98d   : > { %v9369_v19 = vpop.f32.mrf.mxu0 }
 0x98e   : > { %vm10043_vm1 = vcmp.ge.f32.partialorder %v10011_v17, 0.0  ;;  %v10075_v1 = vmul.f32 0.01, %v10011_v17  ;;  %v17432_v23 = vadd.f32 %v9369_v19, %v9248_v59  ;;  %v9560_v41 = vadd.f32 %v17240_v15, %v9524_v8 }
 0x98f   : > { %v9861_v14 = vpop.f32.mrf.mxu2  ;;  %v9252_v16 = vpop.f32.mrf.mxu3 }
 0x990   : > { %v10107_v51 = vsel %vm10043_vm1, %v10011_v17, %v10075_v1  ;;  %v12344_v1 = vor.u32 %v13333_v5, %v12343_v40  ;;  %v18042_v14 = vld [vmem:[#allocation72_spill] sm:$0xff] }
 0x991   : > { %10140 = vst.msk [vmem:[%s17258_s23 + $0x78] sm:$0xff] %vm10124_vm4, %v10107_v51  ;;  %v9445_v31 = vpop.f32.mrf.mxu1  ;;  %v9690_v51 = vunpack.c.l.b16 %v18042_v14 }
 0x992   : > { %v9446_v12 = vadd.f32 %v9445_v31, %v17271_v32  ;;  %v9721_v32 = vpack.c.b16 %v9689_v35, %v9688_v44 }
 0x994   : > { %9897 = vmatmul.bf16.gmra.mxu2 %v9720_v57  ;;  %v9525_v42 = vmul.f32 %v17226_v54, %v9446_v12  ;;  %v18043_v57 = vld [vmem:[#allocation73_spill] sm:$0xff] }
 0x995   : > { %v9371_v6 = vpop.f32.mrf.mxu0  ;;  %v9691_v19 = vunpack.c.l.b16 %v18043_v57  ;;  %v18046_v57 = vld [vmem:[#allocation11_spill] sm:$0xff] }
 0x996   : > { %v9561_v3 = vadd.f32 %v17240_v15, %v9525_v42 }
 0x997   : > { %v9863_v61 = vpop.f32.mrf.mxu2  ;;  %v9254_v59 = vpop.f32.mrf.mxu3  ;;  %v9722_v8 = vpack.c.b16 %v9691_v19, %v9690_v51  ;;  %v9694_v19 = vunpack.c.l.b16 %v18046_v57 }
 0x998   : > { %v9944_v13 = vmul.f32 %v17234_v2, %v9863_v61 }
 0x999   : > { %v9448_v56 = vpop.f32.mrf.mxu1 }
 0x99a   : > { %v9980_v37 = vadd.f32 %v17245_v55, %v9944_v13 }
 0x99c   : > { %v10012_v24 = vadd.f32 %v9980_v37, %v9560_v41  ;;  %9481 = vmatmul.bf16.gmra.mxu1 %v12308_v45  ;;  %v12379_v37 = vld [vmem:[#allocation2 + $0x698] sm:$0xf]  ;;  %v13342_v45 = vld [vmem:[#allocation2 + $0x6b8] sm:$0xf0] }
 0x99d   : > { %v9373_v43 = vpop.f32.mrf.mxu0  ;;  %v12380_v42 = vor.u32 %v13342_v45, %v12379_v37 }
 0x99e   : > { %vm10044_vm15 = vcmp.ge.f32.partialorder %v10012_v24, 0.0  ;;  %v10076_v9 = vmul.f32 0.01, %v10012_v24 }
 0x99f   : > { %v9865_v11 = vpop.f32.mrf.mxu2  ;;  %v9255_v49 = vpop.f32.mrf.mxu3 }
 0x9a0   : > { %v10108_v47 = vsel %vm10044_vm15, %v10012_v24, %v10076_v9  ;;  %v9945_v25 = vmul.f32 %v17234_v2, %v9865_v11 }
 0x9a1   : > { %10141 = vst.msk [vmem:[%s17258_s23 + $0x80] sm:$0xff] %vm10124_vm4, %v10108_v47  ;;  %v9449_v46 = vpop.f32.mrf.mxu1  ;;  %v18045_v47 = vld [vmem:[#allocation82_spill] sm:$0xff] }
 0x9a2   : > { %v9981_v21 = vadd.f32 %v17245_v55, %v9945_v25  ;;  %v9450_v39 = vadd.f32 %v9449_v46, %v17286_v52  ;;  %v9693_v25 = vunpack.c.l.b16 %v18045_v47 }
 0x9a4   : > { %v10013_v60 = vadd.f32 %v9981_v21, %v9561_v3  ;;  %9901 = vmatmul.bf16.gmra.mxu2 %v9721_v32  ;;  %v9526_v31 = vmul.f32 %v17226_v54, %v9450_v39 }
 0x9a5   : > { %v9374_v17 = vpop.f32.mrf.mxu0 }
 0x9a6   : > { %vm10045_vm0 = vcmp.ge.f32.partialorder %v10013_v60, 0.0  ;;  %v10077_v10 = vmul.f32 0.01, %v10013_v60  ;;  %v9562_v13 = vadd.f32 %v17240_v15, %v9526_v31  ;;  %v18047_v31 = vld [vmem:[#allocation12_spill] sm:$0xff] }
 0x9a7   : > { %v9868_v0 = vpop.f32.mrf.mxu2  ;;  %v9257_v29 = vpop.f32.mrf.mxu3 }
 0x9a8   : > { %v10109_v62 = vsel %vm10045_vm0, %v10013_v60, %v10077_v10  ;;  %v13351_v10 = vld [vmem:[#allocation2 + $0x700] sm:$0xf0]  ;;  %v17478_v0 = vld [vmem:[%s17590_s9] ss:$0 sm:$0xff] }
 0x9a9   : > { %10142 = vst.msk [vmem:[%s17258_s23 + $0x88] sm:$0xff] %vm10124_vm4, %v10109_v62  ;;  %v9452_v58 = vpop.f32.mrf.mxu1  ;;  %v17491_v29 = vld [vmem:[%s17591_s10] ss:$0 sm:$0xff] }
 0x9aa   : > { %v9453_v52 = vadd.f32 %v9452_v58, %v17295_v33  ;;  %v17484_v58 = vld [vmem:[%s17588_s7] ss:$0 sm:$0xff] }
 0x9ac   : > { %9486 = vmatmul.bf16.gmra.mxu1 %v12344_v1  ;;  %v9527_v41 = vmul.f32 %v17226_v54, %v9453_v52  ;;  %v18044_v54 = vld [vmem:[#allocation81_spill] sm:$0xff] }
 0x9ad   : > { %v9376_v61 = vpop.f32.mrf.mxu0  ;;  %v9692_v11 = vunpack.c.l.b16 %v18044_v54 }
 0x9ae   : > { %v9563_v48 = vadd.f32 %v17240_v15, %v9527_v41 }
 0x9af   : > { %v9869_v22 = vpop.f32.mrf.mxu2  ;;  %v9258_v6 = vpop.f32.mrf.mxu3  ;;  %v9723_v46 = vpack.c.b16 %v9693_v25, %v9692_v11 }
 0x9b0   : > { %v9946_v16 = vmul.f32 %v17234_v2, %v9869_v22  ;;  %v9695_v22 = vunpack.c.l.b16 %v18047_v31 }
 0x9b1   : > { %v9454_v27 = vpop.f32.mrf.mxu1 }
 0x9b2   : > { %v9982_v56 = vadd.f32 %v17245_v55, %v9946_v16 }
 0x9b4   : > { %v10014_v34 = vadd.f32 %v9982_v56, %v9562_v13  ;;  %9906 = vmatmul.bf16.gmra.mxu2 %v9722_v8  ;;  %v9724_v13 = vpack.c.b16 %v9695_v22, %v9694_v19 }
 0x9b5   : > { %v9377_v44 = vpop.f32.mrf.mxu0 }
 0x9b6   : > { %vm10046_vm2 = vcmp.ge.f32.partialorder %v10014_v34, 0.0  ;;  %v10078_v12 = vmul.f32 0.01, %v10014_v34 }
 0x9b7   : > { %v9872_v59 = vpop.f32.mrf.mxu2 }
 0x9b8   : > { %v10110_v24 = vsel %vm10046_vm2, %v10014_v34, %v10078_v12  ;;  %v9947_v7 = vmul.f32 %v17234_v2, %v9872_v59  ;;  %v13360_v59 = vld [vmem:[#allocation2 + $0x748] sm:$0xf0] }
 0x9b9   : > { %10143 = vst.msk [vmem:[%s17258_s23 + $0x90] sm:$0xff] %vm10124_vm4, %v10110_v24  ;;  %v9456_v33 = vpop.f32.mrf.mxu1  ;;  %v12451_v24 = vld [vmem:[#allocation2 + $0x728] sm:$0xf] }
 0x9ba   : > { %v9983_v35 = vadd.f32 %v17245_v55, %v9947_v7  ;;  %v9457_v15 = vadd.f32 %v9456_v33, %v17310_v36  ;;  %v17472_v55 = vld [vmem:[%s17587_s6] ss:$0 sm:$0xff]  ;;  %v12452_v44 = vor.u32 %v13360_v59, %v12451_v24  ;;  %v18048_v33 = vld [vmem:[#allocation13_spill] sm:$0xff] }
 0x9bb   : > { %v12415_v36 = vld [vmem:[#allocation2 + $0x6e0] sm:$0xf] }
 0x9bc   : > { %v10015_v9 = vadd.f32 %v9983_v35, %v9563_v48  ;;  %9490 = vmatmul.bf16.gmra.mxu1 %v12380_v42  ;;  %v9528_v21 = vmul.f32 %v17472_v55, %v9457_v15  ;;  %v12416_v14 = vor.u32 %v13351_v10, %v12415_v36  ;;  %v9696_v48 = vunpack.c.l.b16 %v18048_v33  ;;  %v18049_v35 = vld [vmem:[#allocation14_spill] sm:$0xff]  ;;  %v13369_v15 = vld [vmem:[#allocation2 + $0x790] sm:$0xf0] }
 0x9bd   : > { %v9379_v3 = vpop.f32.mrf.mxu0  ;;  %v9697_v42 = vunpack.c.l.b16 %v18049_v35 }
 0x9be   : > { %vm10047_vm3 = vcmp.ge.f32.partialorder %v10015_v9, 0.0  ;;  %v10079_v32 = vmul.f32 0.01, %v10015_v9  ;;  %v9564_v40 = vadd.f32 %v17484_v58, %v9528_v21 }
 0x9bf   : > { %v9874_v43 = vpop.f32.mrf.mxu2  ;;  %v9725_v47 = vpack.c.b16 %v9697_v42, %v9696_v48 }
 0x9c0   : > { %v10111_v2 = vsel %vm10047_vm3, %v10015_v9, %v10079_v32 }
 0x9c1   : > { %10144 = vst.msk [vmem:[%s17258_s23 + $0x98] sm:$0xff] %vm10124_vm4, %v10111_v2  ;;  %v9458_v49 = vpop.f32.mrf.mxu1 }
 0x9c2   : > { %v9459_v39 = vadd.f32 %v9458_v49, %v17317_v20 }
 0x9c4   : > { %9910 = vmatmul.bf16.gmra.mxu2 %v9723_v46  ;;  %v9529_v16 = vmul.f32 %v17472_v55, %v9459_v39 }
 0x9c5   : > { %v9380_v62 = vpop.f32.mrf.mxu0 }
 0x9c6   : > { %v9565_v6 = vadd.f32 %v17484_v58, %v9529_v16 }
 0x9c7   : > { %v9876_v60 = vpop.f32.mrf.mxu2 }
 0x9c8   : > { %v9948_v5 = vmul.f32 %v17478_v0, %v9876_v60 }
 0x9c9   : > { %v9461_v17 = vpop.f32.mrf.mxu1 }
 0x9ca   : > { %v9984_v1 = vadd.f32 %v17491_v29, %v9948_v5  ;;  %v12487_v5 = vld [vmem:[#allocation2 + $0x770] sm:$0xf] }
 0x9cb   : > { %v12488_v17 = vor.u32 %v13369_v15, %v12487_v5 }
 0x9cc   : > { %v10016_v51 = vadd.f32 %v9984_v1, %v9564_v40  ;;  %9494 = vmatmul.bf16.gmra.mxu1 %v12416_v14  ;;  %v18050_v40 = vld [vmem:[#allocation15_spill] sm:$0xff]  ;;  %v18051_v1 = vld [vmem:[#allocation16_spill] sm:$0xff] }
 0x9cd   : > { %v9698_v39 = vunpack.c.l.b16 %v18050_v40  ;;  %v9699_v14 = vunpack.c.l.b16 %v18051_v1 }
 0x9ce   : > { %vm10048_vm5 = vcmp.ge.f32.partialorder %v10016_v51, 0.0  ;;  %v10080_v8 = vmul.f32 0.01, %v10016_v51 }
 0x9cf   : > { %v9878_v20 = vpop.f32.mrf.mxu2  ;;  %v9726_v31 = vpack.c.b16 %v9699_v14, %v9698_v39 }
 0x9d0   : > { %v10112_v61 = vsel %vm10048_vm5, %v10016_v51, %v10080_v8  ;;  %v9949_v27 = vmul.f32 %v17478_v0, %v9878_v20 }
 0x9d1   : > { %10145 = vst.msk [vmem:[%s17258_s23 + $0xa0] sm:$0xff] %vm10124_vm4, %v10112_v61  ;;  %v9462_v52 = vpop.f32.mrf.mxu1 }
 0x9d2   : > { %v9985_v56 = vadd.f32 %v17491_v29, %v9949_v27  ;;  %v9463_v7 = vadd.f32 %v9462_v52, %v17332_v50 }
 0x9d4   : > { %v10017_v34 = vadd.f32 %v9985_v56, %v9565_v6  ;;  %9914 = vmatmul.bf16.gmra.mxu2 %v9724_v13  ;;  %v9530_v9 = vmul.f32 %v17472_v55, %v9463_v7 }
 0x9d6   : > { %vm10049_vm6 = vcmp.ge.f32.partialorder %v10017_v34, 0.0  ;;  %v10081_v41 = vmul.f32 0.01, %v10017_v34  ;;  %v9566_v32 = vadd.f32 %v17484_v58, %v9530_v9 }
 0x9d7   : > { %v9881_v12 = vpop.f32.mrf.mxu2 }
 0x9d8   : > { %v10113_v37 = vsel %vm10049_vm6, %v10017_v34, %v10081_v41 }
 0x9d9   : > { %10146 = vst.msk [vmem:[%s17258_s23 + $0xa8] sm:$0xff] %vm10124_vm4, %v10113_v37  ;;  %v9465_v45 = vpop.f32.mrf.mxu1 }
 0x9da   : > { %v9466_v43 = vadd.f32 %v9465_v45, %v17341_v28 }
 0x9dc   : > { %9497 = vmatmul.bf16.gmra.mxu1 %v12452_v44  ;;  %v9531_v46 = vmul.f32 %v17472_v55, %v9466_v43 }
 0x9de   : > { %v9567_v28 = vadd.f32 %v17484_v58, %v9531_v46 }
 0x9df   : > { %v9882_v54 = vpop.f32.mrf.mxu2 }
 0x9e0   : > { %v9950_v11 = vmul.f32 %v17478_v0, %v9882_v54 }
 0x9e1   : > { %v9467_v25 = vpop.f32.mrf.mxu1 }
 0x9e2   : > { %v9986_v50 = vadd.f32 %v17491_v29, %v9950_v11 }
 0x9e4   : > { %v10018_v2 = vadd.f32 %v9986_v50, %v9566_v32  ;;  %9917 = vmatmul.bf16.gmra.mxu2 %v9725_v47 }
 0x9e6   : > { %vm10050_vm7 = vcmp.ge.f32.partialorder %v10018_v2, 0.0  ;;  %v10082_v3 = vmul.f32 0.01, %v10018_v2 }
 0x9e7   : > { %v9885_v49 = vpop.f32.mrf.mxu2 }
 0x9e8   : > { %v10114_v21 = vsel %vm10050_vm7, %v10018_v2, %v10082_v3  ;;  %v9951_v60 = vmul.f32 %v17478_v0, %v9885_v49 }
 0x9e9   : > { %10147 = vst.msk [vmem:[%s17258_s23 + $0xb0] sm:$0xff] %vm10124_vm4, %v10114_v21  ;;  %v9469_v10 = vpop.f32.mrf.mxu1 }
 0x9ea   : > { %v9987_v62 = vadd.f32 %v17491_v29, %v9951_v60  ;;  %v9470_v16 = vadd.f32 %v9469_v10, %v17356_v26 }
 0x9ec   : > { %v10019_v36 = vadd.f32 %v9987_v62, %v9567_v28  ;;  %9500 = vmatmul.bf16.gmra.mxu1 %v12488_v17  ;;  %v9532_v8 = vmul.f32 %v17472_v55, %v9470_v16 }
 0x9ee   : > { %vm10051_vm8 = vcmp.ge.f32.partialorder %v10019_v36, 0.0  ;;  %v10083_v51 = vmul.f32 0.01, %v10019_v36  ;;  %v9568_v13 = vadd.f32 %v17484_v58, %v9532_v8 }
 0x9ef   : > { %v9887_v57 = vpop.f32.mrf.mxu2 }
 0x9f0   : > { %v10115_v19 = vsel %vm10051_vm8, %v10019_v36, %v10083_v51 }
 0x9f1   : > { %10148 = vst.msk [vmem:[%s17258_s23 + $0xb8] sm:$0xff] %vm10124_vm4, %v10115_v19  ;;  %v9471_v22 = vpop.f32.mrf.mxu1 }
 0x9f2   : > { %v9472_v52 = vadd.f32 %v9471_v22, %v17363_v4 }
 0x9f4   : > { %9920 = vmatmul.bf16.gmra.mxu2 %v9726_v31  ;;  %v9533_v34 = vmul.f32 %v17472_v55, %v9472_v52 }
 0x9f6   : > { %v9569_v45 = vadd.f32 %v17484_v58, %v9533_v34 }
 0x9f7   : > { %v9889_v20 = vpop.f32.mrf.mxu2 }
 0x9f8   : > { %v9952_v61 = vmul.f32 %v17478_v0, %v9889_v20 }
 0x9f9   : > { %v9474_v27 = vpop.f32.mrf.mxu1 }
 0x9fa   : > { %v9988_v6 = vadd.f32 %v17491_v29, %v9952_v61 }
 0x9fc   : > { %v10020_v56 = vadd.f32 %v9988_v6, %v9568_v13 }
 0x9fe   : > { %vm10052_vm9 = vcmp.ge.f32.partialorder %v10020_v56, 0.0  ;;  %v10084_v26 = vmul.f32 0.01, %v10020_v56 }
 0x9ff   : > { %v9891_v41 = vpop.f32.mrf.mxu2 }
 0xa00   : > { %v10116_v12 = vsel %vm10052_vm9, %v10020_v56, %v10084_v26  ;;  %v9953_v59 = vmul.f32 %v17478_v0, %v9891_v41 }
 0xa01   : > { %10149 = vst.msk [vmem:[%s17258_s23 + $0xc0] sm:$0xff] %vm10124_vm4, %v10116_v12  ;;  %v9475_v37 = vpop.f32.mrf.mxu1 }
 0xa02   : > { %v9989_v24 = vadd.f32 %v17491_v29, %v9953_v59  ;;  %v9476_v35 = vadd.f32 %v9475_v37, %v17378_v53 }
 0xa04   : > { %v10021_v4 = vadd.f32 %v9989_v24, %v9569_v45  ;;  %v9534_v42 = vmul.f32 %v17472_v55, %v9476_v35 }
 0xa06   : > { %vm10053_vm10 = vcmp.ge.f32.partialorder %v10021_v4, 0.0  ;;  %v10085_v7 = vmul.f32 0.01, %v10021_v4  ;;  %v9570_v47 = vadd.f32 %v17484_v58, %v9534_v42 }
 0xa07   : > { %v9894_v44 = vpop.f32.mrf.mxu2 }
 0xa08   : > { %v10117_v33 = vsel %vm10053_vm10, %v10021_v4, %v10085_v7 }
 0xa09   : > { %10150 = vst.msk [vmem:[%s17258_s23 + $0xc8] sm:$0xff] %vm10124_vm4, %v10117_v33  ;;  %v9478_v48 = vpop.f32.mrf.mxu1 }
 0xa0a   : > { %v9479_v25 = vadd.f32 %v9478_v48, %v17387_v30 }
 0xa0c   : > { %v9535_v50 = vmul.f32 %v17472_v55, %v9479_v25 }
 0xa0e   : > { %v9571_v15 = vadd.f32 %v17484_v58, %v9535_v50 }
 0xa0f   : > { %v9895_v9 = vpop.f32.mrf.mxu2 }
 0xa10   : > { %v9954_v54 = vmul.f32 %v17478_v0, %v9895_v9 }
 0xa11   : > { %v9480_v11 = vpop.f32.mrf.mxu1 }
 0xa12   : > { %v9990_v32 = vadd.f32 %v17491_v29, %v9954_v54 }
 0xa14   : > { %v10022_v43 = vadd.f32 %v9990_v32, %v9570_v47 }
 0xa16   : > { %vm10054_vm11 = vcmp.ge.f32.partialorder %v10022_v43, 0.0  ;;  %v10086_v2 = vmul.f32 0.01, %v10022_v43 }
 0xa17   : > { %v9898_v46 = vpop.f32.mrf.mxu2 }
 0xa18   : > { %v10118_v53 = vsel %vm10054_vm11, %v10022_v43, %v10086_v2  ;;  %v9955_v3 = vmul.f32 %v17478_v0, %v9898_v46 }
 0xa19   : > { %10151 = vst.msk [vmem:[%s17258_s23 + $0xd0] sm:$0xff] %vm10124_vm4, %v10118_v53  ;;  %v9482_v49 = vpop.f32.mrf.mxu1 }
 0xa1a   : > { %v9991_v21 = vadd.f32 %v17491_v29, %v9955_v3  ;;  %v9483_v62 = vadd.f32 %v9482_v49, %v17402_v18 }
 0xa1c   : > { %v10023_v30 = vadd.f32 %v9991_v21, %v9571_v15  ;;  %v9536_v17 = vmul.f32 %v17472_v55, %v9483_v62 }
 0xa1e   : > { %vm10055_vm12 = vcmp.ge.f32.partialorder %v10023_v30, 0.0  ;;  %v10087_v60 = vmul.f32 0.01, %v10023_v30  ;;  %v9572_v1 = vadd.f32 %v17484_v58, %v9536_v17 }
 0xa1f   : > { %v9900_v10 = vpop.f32.mrf.mxu2 }
 0xa20   : > { %v10119_v5 = vsel %vm10055_vm12, %v10023_v30, %v10087_v60 }
 0xa21   : > { %10152 = vst.msk [vmem:[%s17258_s23 + $0xd8] sm:$0xff] %vm10124_vm4, %v10119_v5  ;;  %v9484_v28 = vpop.f32.mrf.mxu1 }
 0xa22   : > { %v9485_v14 = vadd.f32 %v9484_v28, %v17409_v38 }
 0xa24   : > { %v9537_v19 = vmul.f32 %v17472_v55, %v9485_v14 }
 0xa26   : > { %v9573_v20 = vadd.f32 %v17484_v58, %v9537_v19 }
 0xa27   : > { %v9902_v36 = vpop.f32.mrf.mxu2 }
 0xa28   : > { %v9956_v40 = vmul.f32 %v17478_v0, %v9902_v36 }
 0xa29   : > { %v9487_v39 = vpop.f32.mrf.mxu1 }
 0xa2a   : > { %v9992_v51 = vadd.f32 %v17491_v29, %v9956_v40 }
 0xa2c   : > { %v10024_v57 = vadd.f32 %v9992_v51, %v9572_v1 }
 0xa2e   : > { %vm10056_vm13 = vcmp.ge.f32.partialorder %v10024_v57, 0.0  ;;  %v10088_v31 = vmul.f32 0.01, %v10024_v57 }
 0xa2f   : > { %v9904_v22 = vpop.f32.mrf.mxu2 }
 0xa30   : > { %v10120_v18 = vsel %vm10056_vm13, %v10024_v57, %v10088_v31  ;;  %v9957_v16 = vmul.f32 %v17478_v0, %v9904_v22 }
 0xa31   : > { %10153 = vst.msk [vmem:[%s17258_s23 + $0xe0] sm:$0xff] %vm10124_vm4, %v10120_v18  ;;  %v9488_v8 = vpop.f32.mrf.mxu1 }
 0xa32   : > { %v9993_v61 = vadd.f32 %v17491_v29, %v9957_v16  ;;  %v9489_v56 = vadd.f32 %v9488_v8, %v17424_v63 }
 0xa34   : > { %v10025_v38 = vadd.f32 %v9993_v61, %v9573_v20  ;;  %v9538_v34 = vmul.f32 %v17472_v55, %v9489_v56 }
 0xa36   : > { %vm10057_vm14 = vcmp.ge.f32.partialorder %v10025_v38, 0.0  ;;  %v10089_v27 = vmul.f32 0.01, %v10025_v38  ;;  %v9574_v59 = vadd.f32 %v17484_v58, %v9538_v34 }
 0xa37   : > { %v9907_v13 = vpop.f32.mrf.mxu2 }
 0xa38   : > { %v10121_v52 = vsel %vm10057_vm14, %v10025_v38, %v10089_v27 }
 0xa39   : > { %10154 = vst.msk [vmem:[%s17258_s23 + $0xe8] sm:$0xff] %vm10124_vm4, %v10121_v52  ;;  %v9491_v6 = vpop.f32.mrf.mxu1 }
 0xa3a   : > { %v9492_v37 = vadd.f32 %v9491_v6, %v17432_v23 }
 0xa3c   : > { %v9539_v4 = vmul.f32 %v17472_v55, %v9492_v37 }
 0xa3e   : > { %v9575_v35 = vadd.f32 %v17484_v58, %v9539_v4 }
 0xa3f   : > { %v9908_v26 = vpop.f32.mrf.mxu2 }
 0xa40   : > { %v9958_v41 = vmul.f32 %v17478_v0, %v9908_v26 }
 0xa41   : > { %v9493_v12 = vpop.f32.mrf.mxu1 }
 0xa42   : > { %v9994_v45 = vadd.f32 %v17491_v29, %v9958_v41 }
 0xa44   : > { %v10026_v24 = vadd.f32 %v9994_v45, %v9574_v59 }
 0xa46   : > { %vm10058_vm1 = vcmp.ge.f32.partialorder %v10026_v24, 0.0  ;;  %v10090_v7 = vmul.f32 0.01, %v10026_v24 }
 0xa47   : > { %v9911_v44 = vpop.f32.mrf.mxu2 }
 0xa48   : > { %v10122_v63 = vsel %vm10058_vm1, %v10026_v24, %v10090_v7  ;;  %v9959_v33 = vmul.f32 %v17478_v0, %v9911_v44 }
 0xa49   : > { %10155 = vst.msk [vmem:[%s17258_s23 + $0xf0] sm:$0xff] %vm10124_vm4, %v10122_v63  ;;  %v9495_v48 = vpop.f32.mrf.mxu1 }
 0xa4a   : > { %v9995_v42 = vadd.f32 %v17491_v29, %v9959_v33 }
 0xa4c   : > { %v10027_v23 = vadd.f32 %v9995_v42, %v9575_v35 }
 0xa4e   : > { %vm10059_vm15 = vcmp.ge.f32.partialorder %v10027_v23, 0.0  ;;  %v10091_v9 = vmul.f32 0.01, %v10027_v23 }
 0xa4f   : > { %v9913_v54 = vpop.f32.mrf.mxu2 }
 0xa50   : > { %v10123_v11 = vsel %vm10059_vm15, %v10027_v23, %v10091_v9 }
 0xa51   : > { %10156 = vst.msk [vmem:[%s17258_s23 + $0xf8] sm:$0xff] %vm10124_vm4, %v10123_v11  ;;  %v9496_v55 = vpop.f32.mrf.mxu1 }
 0xa57   : > { %v9915_v47 = vpop.f32.mrf.mxu2 }
 0xa59   : > { %v9498_v25 = vpop.f32.mrf.mxu1 }
 0xa5f   : > { %v9916_v32 = vpop.f32.mrf.mxu2 }
 0xa61   : > { %v9499_v43 = vpop.f32.mrf.mxu1 }
 0xa67   : > { %v9918_v0 = vpop.f32.mrf.mxu2 }
 0xa69   : > { %v9501_v50 = vpop.f32.mrf.mxu1 }
 0xa6f   : > { %v9919_v2 = vpop.f32.mrf.mxu2 }
 0xa71   : > { %v9502_v46 = vpop.f32.mrf.mxu1 }
 0xa77   : > { %v9921_v53 = vpop.f32.mrf.mxu2 }
 0xa7f   : > { %v9922_v58 = vpop.f32.mrf.mxu2 }
 0xa80 PF: > { %s23_s17 = sadd.s32 1, %s13640_s17  }
 0xa81   : > { %p20_p7 = scmp.ge.s32.totalorder %s23_s17, 4  }
 0xa83   :  { %22 = sbr.rel (!%p20_p7) target bundleno = 2 (0x2), region = 107 }
 0xa88   :  { %10178 = vsyncpa [#allocation4], 1 }
 0xa89   :  { %10180 = vsyncpa [#allocation4 + $0x1], 1 }
 0xa8a   :  { %10181 = vsyncpa [#allocation6], 1 }

</bundles_post_ra>
